<compile_context>
chip_gen: v5e
topology: v5e:2x2
jax: 0.10.0
libtpu: 0.0.40
codegen_flags: <defaults>
</compile_context>

<pallas_src>
import functools

import jax
import jax.numpy as jnp
from jax import lax
from jax.experimental import pallas as pl
from jax.experimental.pallas import tpu as pltpu


# ------------------------------ small helpers --------------------------------


def _round_up(v, m):
    return ((v + m - 1) // m) * m


def _padded_tile_bytes(rows, cols, itemsize=4):
    """VMEM footprint of a (rows, cols) f32 tile incl. (8,128) layout padding."""
    return _round_up(max(rows, 1), 8) * _round_up(max(cols, 1), 128) * itemsize


def _vmem_limit_bytes(need_bytes):
    """Per-call scoped-VMEM limit: >= 32 MiB default, <= ~3/4 of physical VMEM.

    v5e/v6e have 128 MiB VMEM (the limit may be raised well past the 32 MiB scoped
    default); v7x only 64 MiB, so query the chip and never carry the big limit there.
    """
    cap = 128 * 1024 * 1024
    try:
        cap = int(pltpu.get_tpu_info().vmem_capacity_bytes)
    except Exception:
        pass
    return int(min(max(2 * need_bytes, 32 * 1024 * 1024), (cap * 3) // 4))


# ------------------------------ Pallas kernels --------------------------------


def _conv3d_tap_kernel(x_ref, w_ref, y_ref, sum_ref, sq_ref, *,
                       kh, kw, wp, wo, hw_t, hw_pad):
    """One (sample, output frame, temporal tap) step of the direct 3-D conv.

    x_ref:   (HpWp_pad, Cin)     channels-last padded input slice t = to*st + kd
    w_ref:   (kh*kw, Cin, cpad)  weights of temporal tap kd
    y_ref:   (hw_pad, cpad)      pre-BN conv output tile (accumulated over kd)
    sum_ref: (1, cpad)           per-sample running channel sum   of final y
    sq_ref:  (1, cpad)           per-sample running channel sumsq of final y
    """
    to = pl.program_id(1)
    kd = pl.program_id(2)

    @pl.when(jnp.logical_and(to == 0, kd == 0))
    def _init_stats():
        sum_ref[...] = jnp.zeros_like(sum_ref)
        sq_ref[...] = jnp.zeros_like(sq_ref)

    # kh*kw spatial taps of this temporal slice as small MXU matmuls (f32 acc).
    # Row r of the tile is output position (ho, w') = (r // wp, r % wp); columns
    # w' >= wo are junk (windows straddling a row boundary) - they are masked out of
    # the stats below and sliced off in the wrapper.
    acc = None
    for ki in range(kh):
        for kj in range(kw):
            base = ki * wp + kj
            a = x_ref[base:base + hw_t, :]                        # (hw_t, Cin)
            if hw_pad != hw_t:
                a = jnp.pad(a, ((0, hw_pad - hw_t), (0, 0)))
            part = jnp.dot(a, w_ref[ki * kw + kj],
                           preferred_element_type=jnp.float32)    # (hw_pad, cpad)
            acc = part if acc is None else acc + part

    @pl.when(kd == 0)
    def _first_tap():
        y_ref[...] = acc

    @pl.when(kd != 0)
    def _other_taps():
        y_ref[...] += acc

    # After the last temporal tap the tile holds the final conv output: fold it into
    # the per-sample batch statistics (zero-padded Cout lanes stay exactly 0).
    @pl.when(kd == pl.num_programs(2) - 1)
    def _stats():
        y = y_ref[...]
        r = lax.broadcasted_iota(jnp.int32, (hw_pad, 1), 0)
        valid = (r % wp) < wo
        if hw_pad != hw_t:
            valid = jnp.logical_and(valid, r < hw_t)
        ym = jnp.where(valid, y, 0.0)
        # TODO(synk): on v5e a ones-row matmul on the MXU would offload these VPU
        # reductions if the VALU/store slots ever become the binding unit.
        sum_ref[...] += jnp.sum(ym, axis=0, keepdims=True)
        sq_ref[...] += jnp.sum(ym * ym, axis=0, keepdims=True)


def _bn_relu_kernel(y_ref, scale_ref, shift_ref, o_ref):
    """Elementwise BN affine + ReLU over a lane-dense (tm2, cpad) tile."""
    o_ref[...] = jnp.maximum(y_ref[...] * scale_ref[...] + shift_ref[...], 0.0)


# --------------------------------- wrapper ------------------------------------


@functools.partial(jax.jit, static_argnames=("kernel_size", "stride", "padding"))
def basic_conv3d(x, conv_weight, bn_gamma, bn_beta, *, kernel_size, stride,
                 padding, eps=1e-5):
    """Forward of BasicConv3d.  x: (N, Cin, T, H, W) f32 -> (N, Cout, To, Ho, Wo)."""
    n, cin, t, h, w = x.shape
    cout = conv_weight.shape[0]
    kt = kh = kw = int(kernel_size)
    st = int(stride)
    p = int(padding)
    if st != 1:
        # TODO(synk): spatial stride > 1 needs strided in-kernel tap slices
        # (pl.ds(..., stride=s)); not required for this BasicConv3d instance.
        raise NotImplementedError("Pallas basic_conv3d currently supports stride=1")

    tp, hp, wp = t + 2 * p, h + 2 * p, w + 2 * p
    t_out = tp - kt + 1
    h_out = hp - kh + 1
    w_out = wp - kw + 1

    # Channels-last, spatially flattened, zero-padded input: (N, Tp, HpWp_pad, Cin).
    # This relayout touches x exactly once (vs the old im2col's ~27x blow-up).
    x_cl = jnp.pad(x, ((0, 0), (0, 0), (p, p), (p, p), (p, p)))
    x_cl = x_cl.transpose(0, 2, 3, 4, 1).reshape(n, tp, hp * wp, cin)
    hw_t = h_out * wp                           # rows per (n, to) tile incl. junk cols
    hw_pad = _round_up(hw_t, 8)
    hwp_pad = _round_up(hp * wp + (kw - 1), 8)  # slab rows + last-tap slice overhang
    x_cl = jnp.pad(x_cl, ((0, 0), (0, 0), (0, hwp_pad - hp * wp), (0, 0)))

    # Lane-dense Cout padding: 128 for small layers; a 256 multiple once Cout > 128 so
    # v6e/v7x's 2x256x256 MXUs see full-width tiles (v5e's 4x128^2 is indifferent).
    cpad = 128 if cout <= 128 else _round_up(cout, 256)

    wk = conv_weight.transpose(2, 3, 4, 1, 0).reshape(kt, kh * kw, cin, cout)
    wk = jnp.pad(wk, ((0, 0), (0, 0), (0, 0), (0, cpad - cout)))
    gamma = jnp.pad(bn_gamma, (0, cpad - cout)).reshape(1, cpad)
    beta = jnp.pad(bn_beta, (0, cpad - cout)).reshape(1, cpad)

    # ---- Pass 1: direct conv + per-sample partial stats, y streamed to HBM --------
    conv_need = 2 * (_padded_tile_bytes(hwp_pad, cin)
                     + kh * kw * _padded_tile_bytes(cin, cpad)
                     + _padded_tile_bytes(hw_pad, cpad)
                     + 2 * _padded_tile_bytes(1, cpad))
    conv_kernel = functools.partial(_conv3d_tap_kernel, kh=kh, kw=kw, wp=wp,
                                    wo=w_out, hw_t=hw_t, hw_pad=hw_pad)
    y4, psum, psq = pl.pallas_call(
        conv_kernel,
        out_shape=(jax.ShapeDtypeStruct((n, t_out, hw_pad, cpad), jnp.float32),
                   jax.ShapeDtypeStruct((n, 1, cpad), jnp.float32),
                   jax.ShapeDtypeStruct((n, 1, cpad), jnp.float32)),
        grid_spec=pltpu.PrefetchScalarGridSpec(
            num_scalar_prefetch=0,
            grid=(n, t_out, kt),            # (sample, output frame, temporal tap)
            in_specs=[
                pl.BlockSpec((None, None, hwp_pad, cin),
                             lambda ni, ti, ki: (ni, ti * st + ki, 0, 0)),
                # TODO(synk): pipeline_mode=pl.Buffered(1) would single-buffer this
                # small per-kd weight block; kept at the default double buffer.
                pl.BlockSpec((None, kh * kw, cin, cpad),
                             lambda ni, ti, ki: (ki, 0, 0, 0)),
            ],
            out_specs=(
                pl.BlockSpec((None, None, hw_pad, cpad),
                             lambda ni, ti, ki: (ni, ti, 0, 0)),
                pl.BlockSpec((None, 1, cpad), lambda ni, ti, ki: (ni, 0, 0)),
                pl.BlockSpec((None, 1, cpad), lambda ni, ti, ki: (ni, 0, 0)),
            )),
        compiler_params=pltpu.CompilerParams(
            # Batch axis "parallel": per-sample y tiles and per-sample partial stats
            # carry no cross-sample state, so v7x can split it across both cores.
            dimension_semantics=("parallel", "arbitrary", "arbitrary"),
            vmem_limit_bytes=_vmem_limit_bytes(conv_need)),
    )(x_cl, wk)

    # ---- Fold batch stats into a per-channel affine (training-mode BatchNorm3d) ---
    m_real = n * t_out * h_out * w_out
    # TODO(synk): E[y^2]-E[y]^2 in f32 can cancel when |mean| >> std; switch to a
    # two-pass / Welford combine of the per-sample partials if tolerances tighten.
    mean = jnp.sum(psum, axis=0) / m_real                           # (1, cpad)
    var = jnp.maximum(jnp.sum(psq, axis=0) / m_real - mean * mean, 0.0)
    scale = gamma * lax.rsqrt(var + eps)
    shift = beta - mean * scale

    # ---- Pass 2: BN affine + ReLU, fully parallel, y overwritten in place ---------
    m2 = n * t_out * hw_pad
    y2 = y4.reshape(m2, cpad)
    g = 1                                  # largest whole-(n,to) group tile <= ~4K rows
    for cand in range(1, n * t_out + 1):
        if (n * t_out) % cand == 0 and cand * hw_pad <= 4096:
            g = cand
    tm2 = g * hw_pad
    bn_need = 2 * (2 * _padded_tile_bytes(tm2, cpad) + 2 * _padded_tile_bytes(1, cpad))
    out2 = pl.pallas_call(
        _bn_relu_kernel,
        out_shape=jax.ShapeDtypeStruct((m2, cpad), jnp.float32),
        grid_spec=pltpu.PrefetchScalarGridSpec(
            num_scalar_prefetch=0,
            grid=(m2 // tm2,),
            in_specs=[pl.BlockSpec((tm2, cpad), lambda i: (i, 0)),
                      pl.BlockSpec((1, cpad), lambda i: (0, 0)),
                      pl.BlockSpec((1, cpad), lambda i: (0, 0))],
            out_specs=pl.BlockSpec((tm2, cpad), lambda i: (i, 0))),
        compiler_params=pltpu.CompilerParams(
            dimension_semantics=("parallel",),
            vmem_limit_bytes=_vmem_limit_bytes(bn_need)),
        input_output_aliases={0: 0},
    )(y2, scale, shift)

    # ---- Back to PyTorch NCDHW, dropping junk width columns and Cout lane pad -----
    out = out2.reshape(n, t_out, hw_pad, cpad)[:, :, :hw_t, :]
    out = out.reshape(n, t_out, h_out, wp, cpad)[:, :, :, :w_out, :cout]
    return out.transpose(0, 4, 1, 2, 3)


# -------------------------------- reference ------------------------------------


def basic_conv3d_reference(x, conv_weight, bn_gamma, bn_beta, *, stride,
                           padding, eps=1e-5):
    dn = lax.conv_dimension_numbers(x.shape, conv_weight.shape,
                                    ("NCDHW", "OIDHW", "NCDHW"))
    y = lax.conv_general_dilated(
        x, conv_weight,
        window_strides=(stride, stride, stride),
        padding=[(padding, padding)] * 3,
        dimension_numbers=dn)
    mean = jnp.mean(y, axis=(0, 2, 3, 4), keepdims=True)
    var = jnp.mean((y - mean) ** 2, axis=(0, 2, 3, 4), keepdims=True)  # biased
    g = bn_gamma.reshape(1, -1, 1, 1, 1)
    b = bn_beta.reshape(1, -1, 1, 1, 1)
    yn = (y - mean) * lax.rsqrt(var + eps) * g + b
    return jnp.maximum(yn, 0.0)


# ----------------------------------- main ---------------------------------------


if __name__ == "__main__":
    # BasicConv3d(in_planes=4, out_planes=8, kernel_size=3, stride=1, padding=1)
    in_planes, out_planes = 4, 8
    kernel_size, stride, padding = 3, 1, 1
    N, T, H, W = 2, 8, 16, 16

    key = jax.random.PRNGKey(0)
    kx, kw_ = jax.random.split(key)
    x = jax.random.normal(kx, (N, in_planes, T, H, W), dtype=jnp.float32)

    # deterministic parameter init matching __init__:
    # conv.weight ~ N(0, 0.01), bn.weight = 1, bn.bias = 0
    conv_weight = 0.01 * jax.random.normal(
        kw_, (out_planes, in_planes, kernel_size, kernel_size, kernel_size),
        dtype=jnp.float32)
    bn_gamma = jnp.ones((out_planes,), dtype=jnp.float32)
    bn_beta = jnp.zeros((out_planes,), dtype=jnp.float32)

    out = basic_conv3d(x, conv_weight, bn_gamma, bn_beta,
                       kernel_size=kernel_size, stride=stride, padding=padding)
    out = jax.block_until_ready(out)

    ref = basic_conv3d_reference(x, conv_weight, bn_gamma, bn_beta,
                                 stride=stride, padding=padding)
    ref = jax.block_until_ready(ref)

    assert out.shape == (N, out_planes, T, H, W), out.shape
    assert jnp.allclose(out, ref, atol=1e-4, rtol=1e-4), float(
        jnp.max(jnp.abs(out - ref)))

    print("KERNEL_OK")
</pallas_src>

<mosaic_0001>
module attributes {stable_mosaic.version = 11 : i64} {
  func.func @_conv3d_tap_kernel(%arg0: i32, %arg1: i32, %arg2: i32, %arg3: memref<1x1x328x4xf32, #tpu.memory_space<vmem>>, %arg4: memref<1x9x4x128xf32, #tpu.memory_space<vmem>>, %arg5: memref<1x1x288x128xf32, #tpu.memory_space<vmem>>, %arg6: memref<1x1x128xf32, #tpu.memory_space<vmem>>, %arg7: memref<1x1x128xf32, #tpu.memory_space<vmem>>) attributes {dimension_semantics = [#tpu.dimension_semantics<parallel>, #tpu.dimension_semantics<arbitrary>, #tpu.dimension_semantics<arbitrary>], iteration_bounds = array<i64: 2, 8, 3>, scalar_prefetch = 0 : i64, scratch_operands = 0 : i64, tpu.core_type = #tpu.core_type<tc>, window_params = [{transform_indices = @transform_0, window_bounds = array<i64: 1, 1, 328, 4>}, {transform_indices = @transform_1, window_bounds = array<i64: 1, 9, 4, 128>}, {transform_indices = @transform_2, window_bounds = array<i64: 1, 1, 288, 128>}, {transform_indices = @transform_3, window_bounds = array<i64: 1, 1, 128>}, {transform_indices = @transform_4, window_bounds = array<i64: 1, 1, 128>}]} {
    %c0_i32 = arith.constant 0 : i32
    %0 = arith.cmpi eq, %arg1, %c0_i32 : i32
    %c0_i32_0 = arith.constant 0 : i32
    %1 = arith.cmpi eq, %arg2, %c0_i32_0 : i32
    %2 = arith.andi %0, %1 : i1
    %3 = arith.extui %2 : i1 to i32
    %c0_i32_1 = arith.constant 0 : i32
    %4 = arith.cmpi ne, %3, %c0_i32_1 : i32
    scf.if %4 {
      %cst_72 = arith.constant 0.000000e+00 : f32
      %67 = vector.broadcast %cst_72 : f32 to vector<1x128xf32>
      %c0_73 = arith.constant 0 : index
      %c0_74 = arith.constant 0 : index
      %c0_75 = arith.constant 0 : index
      %68 = vector.load %arg6[%c0_73, %c0_74, %c0_75] : memref<1x1x128xf32, #tpu.memory_space<vmem>>, vector<1x1x128xf32>
      %69 = vector.shape_cast %68 : vector<1x1x128xf32> to vector<1x128xf32>
      %70 = vector.shape_cast %67 : vector<1x128xf32> to vector<1x1x128xf32>
      tpu.vector_store %arg6[%c0_73, %c0_74, %c0_75], %70 {strides = array<i32>} : memref<1x1x128xf32, #tpu.memory_space<vmem>>, vector<1x1x128xf32>,
      %cst_76 = arith.constant 0.000000e+00 : f32
      %71 = vector.broadcast %cst_76 : f32 to vector<1x128xf32>
      %c0_77 = arith.constant 0 : index
      %c0_78 = arith.constant 0 : index
      %c0_79 = arith.constant 0 : index
      %72 = vector.load %arg7[%c0_77, %c0_78, %c0_79] : memref<1x1x128xf32, #tpu.memory_space<vmem>>, vector<1x1x128xf32>
      %73 = vector.shape_cast %72 : vector<1x1x128xf32> to vector<1x128xf32>
      %74 = vector.shape_cast %71 : vector<1x128xf32> to vector<1x1x128xf32>
      tpu.vector_store %arg7[%c0_77, %c0_78, %c0_79], %74 {strides = array<i32>} : memref<1x1x128xf32, #tpu.memory_space<vmem>>, vector<1x1x128xf32>,
    } else {
    }
    %c0 = arith.constant 0 : index
    %c0_2 = arith.constant 0 : index
    %c0_3 = arith.constant 0 : index
    %c0_4 = arith.constant 0 : index
    %5 = vector.load %arg3[%c0, %c0_2, %c0_3, %c0_4] : memref<1x1x328x4xf32, #tpu.memory_space<vmem>>, vector<1x1x288x4xf32>
    %6 = vector.shape_cast %5 : vector<1x1x288x4xf32> to vector<288x4xf32>
    %c0_5 = arith.constant 0 : index
    %c0_6 = arith.constant 0 : index
    %c0_7 = arith.constant 0 : index
    %c0_8 = arith.constant 0 : index
    %7 = vector.load %arg4[%c0_5, %c0_6, %c0_7, %c0_8] : memref<1x9x4x128xf32, #tpu.memory_space<vmem>>, vector<1x1x4x128xf32>
    %8 = vector.shape_cast %7 : vector<1x1x4x128xf32> to vector<4x128xf32>
    %cst = arith.constant dense<0.000000e+00> : vector<288x128xf32>
    %9 = tpu.matmul %6, %8, %cst {dimension_numbers = #tpu.dot_dimension_numbers<[1], [0], [0], [1], [0, 0, 1, 1], [], []>} : vector<288x4xf32>, vector<4x128xf32>, vector<288x128xf32> -> vector<288x128xf32>
    %c0_9 = arith.constant 0 : index
    %c0_10 = arith.constant 0 : index
    %c1 = arith.constant 1 : index
    %c0_11 = arith.constant 0 : index
    %10 = vector.load %arg3[%c0_9, %c0_10, %c1, %c0_11] : memref<1x1x328x4xf32, #tpu.memory_space<vmem>>, vector<1x1x288x4xf32>
    %11 = vector.shape_cast %10 : vector<1x1x288x4xf32> to vector<288x4xf32>
    %c0_12 = arith.constant 0 : index
    %c1_13 = arith.constant 1 : index
    %c0_14 = arith.constant 0 : index
    %c0_15 = arith.constant 0 : index
    %12 = vector.load %arg4[%c0_12, %c1_13, %c0_14, %c0_15] : memref<1x9x4x128xf32, #tpu.memory_space<vmem>>, vector<1x1x4x128xf32>
    %13 = vector.shape_cast %12 : vector<1x1x4x128xf32> to vector<4x128xf32>
    %cst_16 = arith.constant dense<0.000000e+00> : vector<288x128xf32>
    %14 = tpu.matmul %11, %13, %cst_16 {dimension_numbers = #tpu.dot_dimension_numbers<[1], [0], [0], [1], [0, 0, 1, 1], [], []>} : vector<288x4xf32>, vector<4x128xf32>, vector<288x128xf32> -> vector<288x128xf32>
    %15 = arith.addf %9, %14 : vector<288x128xf32>
    %c0_17 = arith.constant 0 : index
    %c0_18 = arith.constant 0 : index
    %c2 = arith.constant 2 : index
    %c0_19 = arith.constant 0 : index
    %16 = vector.load %arg3[%c0_17, %c0_18, %c2, %c0_19] : memref<1x1x328x4xf32, #tpu.memory_space<vmem>>, vector<1x1x288x4xf32>
    %17 = vector.shape_cast %16 : vector<1x1x288x4xf32> to vector<288x4xf32>
    %c0_20 = arith.constant 0 : index
    %c2_21 = arith.constant 2 : index
    %c0_22 = arith.constant 0 : index
    %c0_23 = arith.constant 0 : index
    %18 = vector.load %arg4[%c0_20, %c2_21, %c0_22, %c0_23] : memref<1x9x4x128xf32, #tpu.memory_space<vmem>>, vector<1x1x4x128xf32>
    %19 = vector.shape_cast %18 : vector<1x1x4x128xf32> to vector<4x128xf32>
    %cst_24 = arith.constant dense<0.000000e+00> : vector<288x128xf32>
    %20 = tpu.matmul %17, %19, %cst_24 {dimension_numbers = #tpu.dot_dimension_numbers<[1], [0], [0], [1], [0, 0, 1, 1], [], []>} : vector<288x4xf32>, vector<4x128xf32>, vector<288x128xf32> -> vector<288x128xf32>
    %21 = arith.addf %15, %20 : vector<288x128xf32>
    %c0_25 = arith.constant 0 : index
    %c0_26 = arith.constant 0 : index
    %c18 = arith.constant 18 : index
    %c0_27 = arith.constant 0 : index
    %22 = vector.load %arg3[%c0_25, %c0_26, %c18, %c0_27] : memref<1x1x328x4xf32, #tpu.memory_space<vmem>>, vector<1x1x288x4xf32>
    %23 = vector.shape_cast %22 : vector<1x1x288x4xf32> to vector<288x4xf32>
    %c0_28 = arith.constant 0 : index
    %c3 = arith.constant 3 : index
    %c0_29 = arith.constant 0 : index
    %c0_30 = arith.constant 0 : index
    %24 = vector.load %arg4[%c0_28, %c3, %c0_29, %c0_30] : memref<1x9x4x128xf32, #tpu.memory_space<vmem>>, vector<1x1x4x128xf32>
    %25 = vector.shape_cast %24 : vector<1x1x4x128xf32> to vector<4x128xf32>
    %cst_31 = arith.constant dense<0.000000e+00> : vector<288x128xf32>
    %26 = tpu.matmul %23, %25, %cst_31 {dimension_numbers = #tpu.dot_dimension_numbers<[1], [0], [0], [1], [0, 0, 1, 1], [], []>} : vector<288x4xf32>, vector<4x128xf32>, vector<288x128xf32> -> vector<288x128xf32>
    %27 = arith.addf %21, %26 : vector<288x128xf32>
    %c0_32 = arith.constant 0 : index
    %c0_33 = arith.constant 0 : index
    %c19 = arith.constant 19 : index
    %c0_34 = arith.constant 0 : index
    %28 = vector.load %arg3[%c0_32, %c0_33, %c19, %c0_34] : memref<1x1x328x4xf32, #tpu.memory_space<vmem>>, vector<1x1x288x4xf32>
    %29 = vector.shape_cast %28 : vector<1x1x288x4xf32> to vector<288x4xf32>
    %c0_35 = arith.constant 0 : index
    %c4 = arith.constant 4 : index
    %c0_36 = arith.constant 0 : index
    %c0_37 = arith.constant 0 : index
    %30 = vector.load %arg4[%c0_35, %c4, %c0_36, %c0_37] : memref<1x9x4x128xf32, #tpu.memory_space<vmem>>, vector<1x1x4x128xf32>
    %31 = vector.shape_cast %30 : vector<1x1x4x128xf32> to vector<4x128xf32>
    %cst_38 = arith.constant dense<0.000000e+00> : vector<288x128xf32>
    %32 = tpu.matmul %29, %31, %cst_38 {dimension_numbers = #tpu.dot_dimension_numbers<[1], [0], [0], [1], [0, 0, 1, 1], [], []>} : vector<288x4xf32>, vector<4x128xf32>, vector<288x128xf32> -> vector<288x128xf32>
    %33 = arith.addf %27, %32 : vector<288x128xf32>
    %c0_39 = arith.constant 0 : index
    %c0_40 = arith.constant 0 : index
    %c20 = arith.constant 20 : index
    %c0_41 = arith.constant 0 : index
    %34 = vector.load %arg3[%c0_39, %c0_40, %c20, %c0_41] : memref<1x1x328x4xf32, #tpu.memory_space<vmem>>, vector<1x1x288x4xf32>
    %35 = vector.shape_cast %34 : vector<1x1x288x4xf32> to vector<288x4xf32>
    %c0_42 = arith.constant 0 : index
    %c5 = arith.constant 5 : index
    %c0_43 = arith.constant 0 : index
    %c0_44 = arith.constant 0 : index
    %36 = vector.load %arg4[%c0_42, %c5, %c0_43, %c0_44] : memref<1x9x4x128xf32, #tpu.memory_space<vmem>>, vector<1x1x4x128xf32>
    %37 = vector.shape_cast %36 : vector<1x1x4x128xf32> to vector<4x128xf32>
    %cst_45 = arith.constant dense<0.000000e+00> : vector<288x128xf32>
    %38 = tpu.matmul %35, %37, %cst_45 {dimension_numbers = #tpu.dot_dimension_numbers<[1], [0], [0], [1], [0, 0, 1, 1], [], []>} : vector<288x4xf32>, vector<4x128xf32>, vector<288x128xf32> -> vector<288x128xf32>
    %39 = arith.addf %33, %38 : vector<288x128xf32>
    %c0_46 = arith.constant 0 : index
    %c0_47 = arith.constant 0 : index
    %c36 = arith.constant 36 : index
    %c0_48 = arith.constant 0 : index
    %40 = vector.load %arg3[%c0_46, %c0_47, %c36, %c0_48] : memref<1x1x328x4xf32, #tpu.memory_space<vmem>>, vector<1x1x288x4xf32>
    %41 = vector.shape_cast %40 : vector<1x1x288x4xf32> to vector<288x4xf32>
    %c0_49 = arith.constant 0 : index
    %c6 = arith.constant 6 : index
    %c0_50 = arith.constant 0 : index
    %c0_51 = arith.constant 0 : index
    %42 = vector.load %arg4[%c0_49, %c6, %c0_50, %c0_51] : memref<1x9x4x128xf32, #tpu.memory_space<vmem>>, vector<1x1x4x128xf32>
    %43 = vector.shape_cast %42 : vector<1x1x4x128xf32> to vector<4x128xf32>
    %cst_52 = arith.constant dense<0.000000e+00> : vector<288x128xf32>
    %44 = tpu.matmul %41, %43, %cst_52 {dimension_numbers = #tpu.dot_dimension_numbers<[1], [0], [0], [1], [0, 0, 1, 1], [], []>} : vector<288x4xf32>, vector<4x128xf32>, vector<288x128xf32> -> vector<288x128xf32>
    %45 = arith.addf %39, %44 : vector<288x128xf32>
    %c0_53 = arith.constant 0 : index
    %c0_54 = arith.constant 0 : index
    %c37 = arith.constant 37 : index
    %c0_55 = arith.constant 0 : index
    %46 = vector.load %arg3[%c0_53, %c0_54, %c37, %c0_55] : memref<1x1x328x4xf32, #tpu.memory_space<vmem>>, vector<1x1x288x4xf32>
    %47 = vector.shape_cast %46 : vector<1x1x288x4xf32> to vector<288x4xf32>
    %c0_56 = arith.constant 0 : index
    %c7 = arith.constant 7 : index
    %c0_57 = arith.constant 0 : index
    %c0_58 = arith.constant 0 : index
    %48 = vector.load %arg4[%c0_56, %c7, %c0_57, %c0_58] : memref<1x9x4x128xf32, #tpu.memory_space<vmem>>, vector<1x1x4x128xf32>
    %49 = vector.shape_cast %48 : vector<1x1x4x128xf32> to vector<4x128xf32>
    %cst_59 = arith.constant dense<0.000000e+00> : vector<288x128xf32>
    %50 = tpu.matmul %47, %49, %cst_59 {dimension_numbers = #tpu.dot_dimension_numbers<[1], [0], [0], [1], [0, 0, 1, 1], [], []>} : vector<288x4xf32>, vector<4x128xf32>, vector<288x128xf32> -> vector<288x128xf32>
    %51 = arith.addf %45, %50 : vector<288x128xf32>
    %c0_60 = arith.constant 0 : index
    %c0_61 = arith.constant 0 : index
    %c38 = arith.constant 38 : index
    %c0_62 = arith.constant 0 : index
    %52 = vector.load %arg3[%c0_60, %c0_61, %c38, %c0_62] : memref<1x1x328x4xf32, #tpu.memory_space<vmem>>, vector<1x1x288x4xf32>
    %53 = vector.shape_cast %52 : vector<1x1x288x4xf32> to vector<288x4xf32>
    %c0_63 = arith.constant 0 : index
    %c8 = arith.constant 8 : index
    %c0_64 = arith.constant 0 : index
    %c0_65 = arith.constant 0 : index
    %54 = vector.load %arg4[%c0_63, %c8, %c0_64, %c0_65] : memref<1x9x4x128xf32, #tpu.memory_space<vmem>>, vector<1x1x4x128xf32>
    %55 = vector.shape_cast %54 : vector<1x1x4x128xf32> to vector<4x128xf32>
    %cst_66 = arith.constant dense<0.000000e+00> : vector<288x128xf32>
    %56 = tpu.matmul %53, %55, %cst_66 {dimension_numbers = #tpu.dot_dimension_numbers<[1], [0], [0], [1], [0, 0, 1, 1], [], []>} : vector<288x4xf32>, vector<4x128xf32>, vector<288x128xf32> -> vector<288x128xf32>
    %57 = arith.addf %51, %56 : vector<288x128xf32>
    %c0_i32_67 = arith.constant 0 : i32
    %58 = arith.cmpi eq, %arg2, %c0_i32_67 : i32
    %59 = arith.extui %58 : i1 to i32
    %c0_i32_68 = arith.constant 0 : i32
    %60 = arith.cmpi ne, %59, %c0_i32_68 : i32
    scf.if %60 {
      %c0_72 = arith.constant 0 : index
      %c0_73 = arith.constant 0 : index
      %c0_74 = arith.constant 0 : index
      %c0_75 = arith.constant 0 : index
      %67 = vector.load %arg5[%c0_72, %c0_73, %c0_74, %c0_75] : memref<1x1x288x128xf32, #tpu.memory_space<vmem>>, vector<1x1x288x128xf32>
      %68 = vector.shape_cast %67 : vector<1x1x288x128xf32> to vector<288x128xf32>
      %69 = vector.shape_cast %57 : vector<288x128xf32> to vector<1x1x288x128xf32>
      tpu.vector_store %arg5[%c0_72, %c0_73, %c0_74, %c0_75], %69 {strides = array<i32>} : memref<1x1x288x128xf32, #tpu.memory_space<vmem>>, vector<1x1x288x128xf32>,
    } else {
    }
    %c0_i32_69 = arith.constant 0 : i32
    %61 = arith.cmpi ne, %arg2, %c0_i32_69 : i32
    %62 = arith.extui %61 : i1 to i32
    %c0_i32_70 = arith.constant 0 : i32
    %63 = arith.cmpi ne, %62, %c0_i32_70 : i32
    scf.if %63 {
      %c0_72 = arith.constant 0 : index
      %c0_73 = arith.constant 0 : index
      %c0_74 = arith.constant 0 : index
      %c0_75 = arith.constant 0 : index
      %67 = vector.load %arg5[%c0_72, %c0_73, %c0_74, %c0_75] : memref<1x1x288x128xf32, #tpu.memory_space<vmem>>, vector<1x1x288x128xf32>
      %68 = vector.shape_cast %67 : vector<1x1x288x128xf32> to vector<288x128xf32>
      %69 = arith.addf %68, %57 : vector<288x128xf32>
      %c0_76 = arith.constant 0 : index
      %c0_77 = arith.constant 0 : index
      %c0_78 = arith.constant 0 : index
      %c0_79 = arith.constant 0 : index
      %70 = vector.load %arg5[%c0_76, %c0_77, %c0_78, %c0_79] : memref<1x1x288x128xf32, #tpu.memory_space<vmem>>, vector<1x1x288x128xf32>
      %71 = vector.shape_cast %70 : vector<1x1x288x128xf32> to vector<288x128xf32>
      %72 = vector.shape_cast %69 : vector<288x128xf32> to vector<1x1x288x128xf32>
      tpu.vector_store %arg5[%c0_76, %c0_77, %c0_78, %c0_79], %72 {strides = array<i32>} : memref<1x1x288x128xf32, #tpu.memory_space<vmem>>, vector<1x1x288x128xf32>,
    } else {
    }
    %c2_i32 = arith.constant 2 : i32
    %64 = arith.cmpi eq, %arg2, %c2_i32 : i32
    %65 = arith.extui %64 : i1 to i32
    %c0_i32_71 = arith.constant 0 : i32
    %66 = arith.cmpi ne, %65, %c0_i32_71 : i32
    scf.if %66 {
      %c0_72 = arith.constant 0 : index
      %c0_73 = arith.constant 0 : index
      %c0_74 = arith.constant 0 : index
      %c0_75 = arith.constant 0 : index
      %67 = vector.load %arg5[%c0_72, %c0_73, %c0_74, %c0_75] : memref<1x1x288x128xf32, #tpu.memory_space<vmem>>, vector<1x1x288x128xf32>
      %68 = vector.shape_cast %67 : vector<1x1x288x128xf32> to vector<288x128xf32>
      %69 = tpu.iota {dimensions = array<i32: 0>} : vector<288x1xi32>
      %c18_i32 = arith.constant 18 : i32
      %c0_i32_76 = arith.constant 0 : i32
      %70 = arith.cmpi eq, %c18_i32, %c0_i32_76 : i32
      %c1_i32 = arith.constant 1 : i32
      %71 = arith.select %70, %c1_i32, %c18_i32 : i32
      %72 = vector.broadcast %71 : i32 to vector<288x1xi32>
      %73 = arith.remsi %69, %72 : vector<288x1xi32>
      %c0_i32_77 = arith.constant 0 : i32
      %74 = vector.broadcast %c0_i32_77 : i32 to vector<288x1xi32>
      %75 = arith.cmpi ne, %73, %74 : vector<288x1xi32>
      %c0_i32_78 = arith.constant 0 : i32
      %76 = vector.broadcast %c0_i32_78 : i32 to vector<288x1xi32>
      %77 = arith.cmpi slt, %73, %76 : vector<288x1xi32>
      %c0_i32_79 = arith.constant 0 : i32
      %78 = arith.cmpi slt, %71, %c0_i32_79 : i32
      %79 = vector.broadcast %78 : i1 to vector<288x1xi1>
      %80 = vector.broadcast %79 : vector<288x1xi1> to vector<288x1xi1>
      %81 = arith.xori %77, %80 : vector<288x1xi1>
      %82 = arith.andi %81, %75 : vector<288x1xi1>
      %83 = vector.broadcast %71 : i32 to vector<288x1xi32>
      %84 = arith.addi %73, %83 : vector<288x1xi32>
      %85 = arith.select %82, %84, %73 : vector<288x1xi1>, vector<288x1xi32>
      %c16_i32 = arith.constant 16 : i32
      %86 = vector.broadcast %c16_i32 : i32 to vector<288x1xi32>
      %87 = arith.cmpi slt, %85, %86 : vector<288x1xi32>
      %cst_80 = arith.constant 0.000000e+00 : f32
      %88 = vector.shape_cast %87 : vector<288x1xi1> to vector<288x1xi1>
      %89 = vector.broadcast %88 : vector<288x1xi1> to vector<288x128xi1>
      %90 = vector.broadcast %cst_80 : f32 to vector<288x128xf32>
      %91 = arith.select %89, %68, %90 : vector<288x128xi1>, vector<288x128xf32>
      %c0_81 = arith.constant 0 : index
      %c0_82 = arith.constant 0 : index
      %c0_83 = arith.constant 0 : index
      %92 = vector.load %arg6[%c0_81, %c0_82, %c0_83] : memref<1x1x128xf32, #tpu.memory_space<vmem>>, vector<1x1x128xf32>
      %93 = vector.shape_cast %92 : vector<1x1x128xf32> to vector<1x128xf32>
      %cst_84 = arith.constant dense<0.000000e+00> : vector<128xf32>
      %94 = vector.multi_reduction <add>, %91, %cst_84 [0] : vector<288x128xf32> to vector<128xf32>
      %95 = vector.shape_cast %94 : vector<128xf32> to vector<1x128xf32>
      %96 = arith.addf %93, %95 : vector<1x128xf32>
      %c0_85 = arith.constant 0 : index
      %c0_86 = arith.constant 0 : index
      %c0_87 = arith.constant 0 : index
      %97 = vector.load %arg6[%c0_85, %c0_86, %c0_87] : memref<1x1x128xf32, #tpu.memory_space<vmem>>, vector<1x1x128xf32>
      %98 = vector.shape_cast %97 : vector<1x1x128xf32> to vector<1x128xf32>
      %99 = vector.shape_cast %96 : vector<1x128xf32> to vector<1x1x128xf32>
      tpu.vector_store %arg6[%c0_85, %c0_86, %c0_87], %99 {strides = array<i32>} : memref<1x1x128xf32, #tpu.memory_space<vmem>>, vector<1x1x128xf32>,
      %c0_88 = arith.constant 0 : index
      %c0_89 = arith.constant 0 : index
      %c0_90 = arith.constant 0 : index
      %100 = vector.load %arg7[%c0_88, %c0_89, %c0_90] : memref<1x1x128xf32, #tpu.memory_space<vmem>>, vector<1x1x128xf32>
      %101 = vector.shape_cast %100 : vector<1x1x128xf32> to vector<1x128xf32>
      %102 = arith.mulf %91, %91 : vector<288x128xf32>
      %cst_91 = arith.constant dense<0.000000e+00> : vector<128xf32>
      %103 = vector.multi_reduction <add>, %102, %cst_91 [0] : vector<288x128xf32> to vector<128xf32>
      %104 = vector.shape_cast %103 : vector<128xf32> to vector<1x128xf32>
      %105 = arith.addf %101, %104 : vector<1x128xf32>
      %c0_92 = arith.constant 0 : index
      %c0_93 = arith.constant 0 : index
      %c0_94 = arith.constant 0 : index
      %106 = vector.load %arg7[%c0_92, %c0_93, %c0_94] : memref<1x1x128xf32, #tpu.memory_space<vmem>>, vector<1x1x128xf32>
      %107 = vector.shape_cast %106 : vector<1x1x128xf32> to vector<1x128xf32>
      %108 = vector.shape_cast %105 : vector<1x128xf32> to vector<1x1x128xf32>
      tpu.vector_store %arg7[%c0_92, %c0_93, %c0_94], %108 {strides = array<i32>} : memref<1x1x128xf32, #tpu.memory_space<vmem>>, vector<1x1x128xf32>,
    } else {
    }
    return
  }
  func.func @transform_0(%arg0: i32, %arg1: i32, %arg2: i32) -> (i32, i32, i32, i32) {
    %c1_i32 = arith.constant 1 : i32
    %0 = arith.muli %arg1, %c1_i32 : i32
    %1 = arith.addi %0, %arg2 : i32
    %c0_i32 = arith.constant 0 : i32
    %c0_i32_0 = arith.constant 0 : i32
    %c0_i32_1 = arith.constant 0 : i32
    return %arg0, %1, %c0_i32, %c0_i32_0 : i32, i32, i32, i32
  }
  func.func @transform_1(%arg0: i32, %arg1: i32, %arg2: i32) -> (i32, i32, i32, i32) {
    %c0_i32 = arith.constant 0 : i32
    %c0_i32_0 = arith.constant 0 : i32
    %c0_i32_1 = arith.constant 0 : i32
    %c0_i32_2 = arith.constant 0 : i32
    return %arg2, %c0_i32, %c0_i32_0, %c0_i32_1 : i32, i32, i32, i32
  }
  func.func @transform_2(%arg0: i32, %arg1: i32, %arg2: i32) -> (i32, i32, i32, i32) {
    %c0_i32 = arith.constant 0 : i32
    %c0_i32_0 = arith.constant 0 : i32
    %c0_i32_1 = arith.constant 0 : i32
    return %arg0, %arg1, %c0_i32, %c0_i32_0 : i32, i32, i32, i32
  }
  func.func @transform_3(%arg0: i32, %arg1: i32, %arg2: i32) -> (i32, i32, i32) {
    %c0_i32 = arith.constant 0 : i32
    %c0_i32_0 = arith.constant 0 : i32
    %c0_i32_1 = arith.constant 0 : i32
    return %arg0, %c0_i32, %c0_i32_0 : i32, i32, i32
  }
  func.func @transform_4(%arg0: i32, %arg1: i32, %arg2: i32) -> (i32, i32, i32) {
    %c0_i32 = arith.constant 0 : i32
    %c0_i32_0 = arith.constant 0 : i32
    %c0_i32_1 = arith.constant 0 : i32
    return %arg0, %c0_i32, %c0_i32_0 : i32, i32, i32
  }
}

module attributes {stable_mosaic.version = 11 : i64} {
  func.func @_bn_relu_kernel(%arg0: i32, %arg1: memref<2304x128xf32, #tpu.memory_space<vmem>>, %arg2: memref<1x128xf32, #tpu.memory_space<vmem>>, %arg3: memref<1x128xf32, #tpu.memory_space<vmem>>, %arg4: memref<2304x128xf32, #tpu.memory_space<vmem>>) attributes {dimension_semantics = [#tpu.dimension_semantics<parallel>], iteration_bounds = array<i64: 2>, scalar_prefetch = 0 : i64, scratch_operands = 0 : i64, tpu.core_type = #tpu.core_type<tc>, window_params = [{transform_indices = @transform_0, window_bounds = array<i64: 2304, 128>}, {pipeline_mode = #tpu.pipeline_mode<synchronous>, transform_indices = @transform_1, window_bounds = array<i64: 1, 128>}, {pipeline_mode = #tpu.pipeline_mode<synchronous>, transform_indices = @transform_2, window_bounds = array<i64: 1, 128>}, {transform_indices = @transform_3, window_bounds = array<i64: 2304, 128>}]} {
    %c0 = arith.constant 0 : index
    %c0_0 = arith.constant 0 : index
    %0 = vector.load %arg1[%c0, %c0_0] : memref<2304x128xf32, #tpu.memory_space<vmem>>, vector<2304x128xf32>
    %c0_1 = arith.constant 0 : index
    %c0_2 = arith.constant 0 : index
    %1 = vector.load %arg2[%c0_1, %c0_2] : memref<1x128xf32, #tpu.memory_space<vmem>>, vector<1x128xf32>
    %2 = vector.broadcast %1 : vector<1x128xf32> to vector<2304x128xf32>
    %3 = arith.mulf %0, %2 : vector<2304x128xf32>
    %c0_3 = arith.constant 0 : index
    %c0_4 = arith.constant 0 : index
    %4 = vector.load %arg3[%c0_3, %c0_4] : memref<1x128xf32, #tpu.memory_space<vmem>>, vector<1x128xf32>
    %5 = vector.broadcast %4 : vector<1x128xf32> to vector<2304x128xf32>
    %6 = arith.addf %3, %5 : vector<2304x128xf32>
    %cst = arith.constant 0.000000e+00 : f32
    %7 = vector.broadcast %cst : f32 to vector<2304x128xf32>
    %8 = arith.maximumf %6, %7 : vector<2304x128xf32>
    %c0_5 = arith.constant 0 : index
    %c0_6 = arith.constant 0 : index
    %9 = vector.load %arg4[%c0_5, %c0_6] : memref<2304x128xf32, #tpu.memory_space<vmem>>, vector<2304x128xf32>
    tpu.vector_store %arg4[%c0_5, %c0_6], %8 {strides = array<i32>} : memref<2304x128xf32, #tpu.memory_space<vmem>>, vector<2304x128xf32>,
    return
  }
  func.func @transform_0(%arg0: i32) -> (i32, i32) {
    %c0_i32 = arith.constant 0 : i32
    %c0_i32_0 = arith.constant 0 : i32
    return %arg0, %c0_i32 : i32, i32
  }
  func.func @transform_1(%arg0: i32) -> (i32, i32) {
    %c0_i32 = arith.constant 0 : i32
    %c0_i32_0 = arith.constant 0 : i32
    %c0_i32_1 = arith.constant 0 : i32
    return %c0_i32, %c0_i32_0 : i32, i32
  }
  func.func @transform_2(%arg0: i32) -> (i32, i32) {
    %c0_i32 = arith.constant 0 : i32
    %c0_i32_0 = arith.constant 0 : i32
    %c0_i32_1 = arith.constant 0 : i32
    return %c0_i32, %c0_i32_0 : i32, i32
  }
  func.func @transform_3(%arg0: i32) -> (i32, i32) {
    %c0_i32 = arith.constant 0 : i32
    %c0_i32_0 = arith.constant 0 : i32
    return %arg0, %c0_i32 : i32, i32
  }
}

</mosaic_0001>

<bundles_post_ra>
// kernel: basic_conv3d.3
= control target key start
LH: loop header
LB: loop body
LE: loop exit
PB: predicated region body
PF: predicated region fallthrough
CT: control target
= control target key end

     0   :  { %s1729_s12 = smov 0   ;;  %s3803_s0 = inlined_call_operand.vmem [shape: f32[4608,128], index: 0, kind: input, shape index: {}, may-alias: {0,3}]   ;;  %s3804_s1 = inlined_call_operand.vmem [shape: f32[1,128], index: 1, kind: input, shape index: {}]   ;;  %s3805_s2 = inlined_call_operand.vmem [shape: f32[1,128], index: 2, kind: input, shape index: {}]   ;;  %s3806_s3 = inlined_call_operand.vmem [shape: f32[4608,128], index: 3, kind: output, shape index: {}, may-alias: {0,3}]  }
   0x1 LB: > { %s1678_s13 = sadd.s32 4294967295, %s1707_s12   ;;  %p1682_p0 = scmp.ge.s32.totalorder %s1707_s12, 1  ;;  %s1707_s12 = sphi %s1729_s12, %s13_s12  }
   0x2   : > { %p138_p1 = scmp.lt.s32.totalorder %s1707_s12, 3 }
   0x4   : > { %p139_p2 = pnand %p1682_p0, %p138_p1 }
   0x6   : > { %142 = sbr.rel (%p139_p2) target bundleno = 557 (0x22d), region = 32 }
   0xb   : > { %s162_s14 = smul.u32 288, %s1678_s13  ;;  %v1758_v8 = vld [vmem:[%s3804_s1] ss:$0 sm:$0xff] }
   0xc   : > { %v1763_v9 = vld [vmem:[%s3805_s2] ss:$0 sm:$0xff] }
   0xd   : > { %p163_p3 = scmp.lt.s32.totalorder %s162_s14, 575 }
   0xf   : > { %s4274_s14 = smov (!%p163_p3, %s162_s14), 575 }
  0x10   : > { %s1683_s15 = sshll.u32 %s4274_s14, 3 }
  0x11   : > { %s1745_s18 = scalar_lea.vmem %s3803_s0, %s1683_s15  ;;  %s1819_s25 = scalar_lea.vmem %s3806_s3, %s1683_s15 }
  0x12   : > { %v174_v0 = vld [vmem:[%s1745_s18] sm:$0xff]  ;;  %v175_v1 = vld [vmem:[%s1745_s18 + $0x8] sm:$0xff]  ;;  %v176_v2 = vld [vmem:[%s1745_s18 + $0x10] sm:$0xff] }
  0x13   : > { %v177_v3 = vld [vmem:[%s1745_s18 + $0x18] sm:$0xff]  ;;  %v178_v4 = vld [vmem:[%s1745_s18 + $0x20] sm:$0xff]  ;;  %v179_v5 = vld [vmem:[%s1745_s18 + $0x28] sm:$0xff]  ;;  %v466_v10 = vmul.f32 %v1758_v8, %v174_v0  ;;  %v467_v11 = vmul.f32 %v1758_v8, %v175_v1  ;;  %v468_v12 = vmul.f32 %v1758_v8, %v176_v2 }
  0x14   : > { %v180_v6 = vld [vmem:[%s1745_s18 + $0x30] sm:$0xff]  ;;  %v181_v7 = vld [vmem:[%s1745_s18 + $0x38] sm:$0xff]  ;;  %v469_v13 = vmul.f32 %v1758_v8, %v177_v3  ;;  %v1770_v14 = vld [vmem:[%s1745_s18 + $0x40] sm:$0xff]  ;;  %v1782_v18 = vmul.f32 %v1758_v8, %v178_v4  ;;  %v1785_v19 = vmul.f32 %v1758_v8, %v179_v5 }
  0x15   : > { %v1773_v15 = vld [vmem:[%s1745_s18 + $0x48] sm:$0xff]  ;;  %v1776_v16 = vld [vmem:[%s1745_s18 + $0x50] sm:$0xff]  ;;  %v1779_v17 = vld [vmem:[%s1745_s18 + $0x58] sm:$0xff]  ;;  %v1788_v20 = vmul.f32 %v1758_v8, %v180_v6  ;;  %v1791_v21 = vmul.f32 %v1758_v8, %v181_v7  ;;  %v1803_v25 = vadd.f32 %v1763_v9, %v466_v10  ;;  %v1806_v26 = vadd.f32 %v1763_v9, %v467_v11 }
  0x16   : > { %v1794_v22 = vld [vmem:[%s1745_s18 + $0x60] sm:$0xff]  ;;  %v1797_v23 = vld [vmem:[%s1745_s18 + $0x68] sm:$0xff]  ;;  %v1800_v24 = vld [vmem:[%s1745_s18 + $0x70] sm:$0xff]  ;;  %v1809_v27 = vadd.f32 %v1763_v9, %v468_v12  ;;  %v1812_v28 = vadd.f32 %v1763_v9, %v469_v13 }
  0x17   : > { %v1822_v29 = vld [vmem:[%s1745_s18 + $0x78] sm:$0xff]  ;;  %v1825_v30 = vld [vmem:[%s1745_s18 + $0x80] sm:$0xff]  ;;  %v1828_v31 = vld [vmem:[%s1745_s18 + $0x88] sm:$0xff] }
  0x18   : > { %v1831_v32 = vld [vmem:[%s1745_s18 + $0x90] sm:$0xff]  ;;  %v1834_v33 = vld [vmem:[%s1745_s18 + $0x98] sm:$0xff]  ;;  %v1837_v34 = vld [vmem:[%s1745_s18 + $0xa0] sm:$0xff] }
  0x19   : > { %v1840_v35 = vld [vmem:[%s1745_s18 + $0xa8] sm:$0xff]  ;;  %v1843_v36 = vld [vmem:[%s1745_s18 + $0xb0] sm:$0xff]  ;;  %v1846_v37 = vld [vmem:[%s1745_s18 + $0xb8] sm:$0xff] }
  0x1a   : > { %v1849_v38 = vld [vmem:[%s1745_s18 + $0xc0] sm:$0xff]  ;;  %v1852_v39 = vld [vmem:[%s1745_s18 + $0xc8] sm:$0xff]  ;;  %v1855_v40 = vld [vmem:[%s1745_s18 + $0xd0] sm:$0xff] }
  0x1b   : > { %v1858_v41 = vld [vmem:[%s1745_s18 + $0xd8] sm:$0xff]  ;;  %v1861_v42 = vld [vmem:[%s1745_s18 + $0xe0] sm:$0xff]  ;;  %v1864_v43 = vld [vmem:[%s1745_s18 + $0xe8] sm:$0xff] }
  0x1c   : > { %v1867_v44 = vld [vmem:[%s1745_s18 + $0xf0] sm:$0xff]  ;;  %v1870_v45 = vld [vmem:[%s1745_s18 + $0xf8] sm:$0xff]  ;;  %v1873_v46 = vld [vmem:[%s1745_s18 + $0x100] sm:$0xff] }
  0x1d   : > { %v1876_v47 = vld [vmem:[%s1745_s18 + $0x108] sm:$0xff]  ;;  %v1879_v48 = vld [vmem:[%s1745_s18 + $0x110] sm:$0xff]  ;;  %v1882_v49 = vld [vmem:[%s1745_s18 + $0x118] sm:$0xff] }
  0x1e   : > { %v1885_v50 = vld [vmem:[%s1745_s18 + $0x120] sm:$0xff]  ;;  %v1888_v51 = vld [vmem:[%s1745_s18 + $0x128] sm:$0xff]  ;;  %v1891_v52 = vld [vmem:[%s1745_s18 + $0x130] sm:$0xff] }
  0x1f   : > { %v1894_v53 = vld [vmem:[%s1745_s18 + $0x138] sm:$0xff]  ;;  %v1897_v54 = vld [vmem:[%s1745_s18 + $0x140] sm:$0xff]  ;;  %v1900_v55 = vld [vmem:[%s1745_s18 + $0x148] sm:$0xff] }
  0x20   : > { %v1903_v56 = vld [vmem:[%s1745_s18 + $0x150] sm:$0xff]  ;;  %v1906_v57 = vld [vmem:[%s1745_s18 + $0x158] sm:$0xff]  ;;  %v1909_v58 = vld [vmem:[%s1745_s18 + $0x160] sm:$0xff] }
  0x21   : > { %v1912_v59 = vld [vmem:[%s1745_s18 + $0x168] sm:$0xff]  ;;  %v1915_v60 = vld [vmem:[%s1745_s18 + $0x170] sm:$0xff]  ;;  %v1918_v61 = vld [vmem:[%s1745_s18 + $0x178] sm:$0xff] }
  0x22   : > { %v1921_v62 = vld [vmem:[%s1745_s18 + $0x180] sm:$0xff]  ;;  %v1924_v63 = vld [vmem:[%s1745_s18 + $0x188] sm:$0xff]  ;;  %v1927_v0 = vld [vmem:[%s1745_s18 + $0x190] sm:$0xff] }
  0x23   : > { %v1930_v1 = vld [vmem:[%s1745_s18 + $0x198] sm:$0xff]  ;;  %v1933_v2 = vld [vmem:[%s1745_s18 + $0x1a0] sm:$0xff]  ;;  %v1936_v3 = vld [vmem:[%s1745_s18 + $0x1a8] sm:$0xff] }
  0x24   : > { %3807 = vst [vmem:[#allocation2_spill] sm:$0xff] %v1936_v3  ;;  %v1939_v4 = vld [vmem:[%s1745_s18 + $0x1b0] sm:$0xff]  ;;  %v1942_v5 = vld [vmem:[%s1745_s18 + $0x1b8] sm:$0xff]  ;;  %v1945_v6 = vld [vmem:[%s1745_s18 + $0x1c0] sm:$0xff] }
  0x25   : > { %3808 = vst [vmem:[#allocation3_spill] sm:$0xff] %v1939_v4  ;;  %v1948_v7 = vld [vmem:[%s1745_s18 + $0x1c8] sm:$0xff]  ;;  %v1951_v10 = vld [vmem:[%s1745_s18 + $0x1d0] sm:$0xff]  ;;  %v1954_v11 = vld [vmem:[%s1745_s18 + $0x1d8] sm:$0xff] }
  0x26   : > { %3809 = vst [vmem:[#allocation4_spill] sm:$0xff] %v1942_v5  ;;  %v1957_v12 = vld [vmem:[%s1745_s18 + $0x1e0] sm:$0xff]  ;;  %v1960_v13 = vld [vmem:[%s1745_s18 + $0x1e8] sm:$0xff]  ;;  %v1963_v5 = vld [vmem:[%s1745_s18 + $0x1f0] sm:$0xff] }
  0x27   : > { %3810 = vst [vmem:[#allocation5_spill] sm:$0xff] %v1945_v6  ;;  %v1966_v6 = vld [vmem:[%s1745_s18 + $0x1f8] sm:$0xff]  ;;  %v2596_v3 = vld [vmem:[%s1745_s18 + $0x888] sm:$0xff] }
  0x28   : > { %3811 = vst [vmem:[#allocation6_spill] sm:$0xff] %v1948_v7  ;;  %v1969_v7 = vld [vmem:[%s1745_s18 + $0x200] sm:$0xff]  ;;  %v2578_v4 = vld [vmem:[%s1745_s18 + $0x858] sm:$0xff] }
  0x29   : > { %3812 = vst [vmem:[#allocation7_spill] sm:$0xff] %v1951_v10  ;;  %v1972_v10 = vld [vmem:[%s1745_s18 + $0x208] sm:$0xff] }
  0x2a   : > { %3813 = vst [vmem:[#allocation8_spill] sm:$0xff] %v1954_v11  ;;  %v1975_v11 = vld [vmem:[%s1745_s18 + $0x210] sm:$0xff] }
  0x2b   : > { %3814 = vst [vmem:[#allocation9_spill] sm:$0xff] %v1957_v12  ;;  %v1978_v12 = vld [vmem:[%s1745_s18 + $0x218] sm:$0xff] }
  0x2c   : > { %3815 = vst [vmem:[#allocation10_spill] sm:$0xff] %v1960_v13  ;;  %v1981_v13 = vld [vmem:[%s1745_s18 + $0x220] sm:$0xff] }
  0x2d   : > { %3816 = vst [vmem:[#allocation11_spill] sm:$0xff] %v1963_v5  ;;  %v1984_v5 = vld [vmem:[%s1745_s18 + $0x228] sm:$0xff] }
  0x2e   : > { %3817 = vst [vmem:[#allocation12_spill] sm:$0xff] %v1966_v6  ;;  %v1987_v6 = vld [vmem:[%s1745_s18 + $0x230] sm:$0xff] }
  0x2f   : > { %3818 = vst [vmem:[#allocation13_spill] sm:$0xff] %v1969_v7  ;;  %v1990_v7 = vld [vmem:[%s1745_s18 + $0x238] sm:$0xff] }
  0x30   : > { %3819 = vst [vmem:[#allocation14_spill] sm:$0xff] %v1972_v10  ;;  %v1993_v10 = vld [vmem:[%s1745_s18 + $0x240] sm:$0xff] }
  0x31   : > { %3820 = vst [vmem:[#allocation15_spill] sm:$0xff] %v1975_v11  ;;  %v1996_v11 = vld [vmem:[%s1745_s18 + $0x248] sm:$0xff] }
  0x32   : > { %3821 = vst [vmem:[#allocation16_spill] sm:$0xff] %v1978_v12  ;;  %v1999_v12 = vld [vmem:[%s1745_s18 + $0x250] sm:$0xff] }
  0x33   : > { %3822 = vst [vmem:[#allocation17_spill] sm:$0xff] %v1981_v13  ;;  %v2002_v13 = vld [vmem:[%s1745_s18 + $0x258] sm:$0xff] }
  0x34   : > { %3823 = vst [vmem:[#allocation18_spill] sm:$0xff] %v1984_v5  ;;  %v2005_v5 = vld [vmem:[%s1745_s18 + $0x260] sm:$0xff] }
  0x35   : > { %3824 = vst [vmem:[#allocation19_spill] sm:$0xff] %v1987_v6  ;;  %v2008_v6 = vld [vmem:[%s1745_s18 + $0x268] sm:$0xff] }
  0x36   : > { %3825 = vst [vmem:[#allocation20_spill] sm:$0xff] %v1990_v7  ;;  %v2011_v7 = vld [vmem:[%s1745_s18 + $0x270] sm:$0xff] }
  0x37   : > { %3826 = vst [vmem:[#allocation21_spill] sm:$0xff] %v1993_v10  ;;  %v2014_v10 = vld [vmem:[%s1745_s18 + $0x278] sm:$0xff] }
  0x38   : > { %3827 = vst [vmem:[#allocation22_spill] sm:$0xff] %v1996_v11  ;;  %v2017_v11 = vld [vmem:[%s1745_s18 + $0x280] sm:$0xff] }
  0x39   : > { %3828 = vst [vmem:[#allocation23_spill] sm:$0xff] %v1999_v12  ;;  %v2020_v12 = vld [vmem:[%s1745_s18 + $0x288] sm:$0xff] }
  0x3a   : > { %3829 = vst [vmem:[#allocation24_spill] sm:$0xff] %v2002_v13  ;;  %v2023_v13 = vld [vmem:[%s1745_s18 + $0x290] sm:$0xff] }
  0x3b   : > { %3830 = vst [vmem:[#allocation25_spill] sm:$0xff] %v2005_v5  ;;  %v2026_v5 = vld [vmem:[%s1745_s18 + $0x298] sm:$0xff] }
  0x3c   : > { %3831 = vst [vmem:[#allocation26_spill] sm:$0xff] %v2008_v6  ;;  %v2029_v6 = vld [vmem:[%s1745_s18 + $0x2a0] sm:$0xff] }
  0x3d   : > { %3832 = vst [vmem:[#allocation27_spill] sm:$0xff] %v2011_v7  ;;  %v2032_v7 = vld [vmem:[%s1745_s18 + $0x2a8] sm:$0xff] }
  0x3e   : > { %3833 = vst [vmem:[#allocation28_spill] sm:$0xff] %v2014_v10  ;;  %v2035_v10 = vld [vmem:[%s1745_s18 + $0x2b0] sm:$0xff] }
  0x3f   : > { %3834 = vst [vmem:[#allocation29_spill] sm:$0xff] %v2017_v11  ;;  %v2038_v11 = vld [vmem:[%s1745_s18 + $0x2b8] sm:$0xff] }
  0x40   : > { %3835 = vst [vmem:[#allocation30_spill] sm:$0xff] %v2020_v12  ;;  %v2041_v12 = vld [vmem:[%s1745_s18 + $0x2c0] sm:$0xff] }
  0x41   : > { %3836 = vst [vmem:[#allocation31_spill] sm:$0xff] %v2023_v13  ;;  %v2044_v13 = vld [vmem:[%s1745_s18 + $0x2c8] sm:$0xff] }
  0x42   : > { %3837 = vst [vmem:[#allocation32_spill] sm:$0xff] %v2026_v5  ;;  %v2047_v5 = vld [vmem:[%s1745_s18 + $0x2d0] sm:$0xff] }
  0x43   : > { %3838 = vst [vmem:[#allocation33_spill] sm:$0xff] %v2029_v6  ;;  %v2050_v6 = vld [vmem:[%s1745_s18 + $0x2d8] sm:$0xff] }
  0x44   : > { %3839 = vst [vmem:[#allocation34_spill] sm:$0xff] %v2032_v7  ;;  %v2053_v7 = vld [vmem:[%s1745_s18 + $0x2e0] sm:$0xff] }
  0x45   : > { %3840 = vst [vmem:[#allocation35_spill] sm:$0xff] %v2035_v10  ;;  %v2056_v10 = vld [vmem:[%s1745_s18 + $0x2e8] sm:$0xff] }
  0x46   : > { %3841 = vst [vmem:[#allocation36_spill] sm:$0xff] %v2038_v11  ;;  %v2059_v11 = vld [vmem:[%s1745_s18 + $0x2f0] sm:$0xff] }
  0x47   : > { %3842 = vst [vmem:[#allocation37_spill] sm:$0xff] %v2041_v12  ;;  %v2062_v12 = vld [vmem:[%s1745_s18 + $0x2f8] sm:$0xff] }
  0x48   : > { %3843 = vst [vmem:[#allocation38_spill] sm:$0xff] %v2044_v13  ;;  %v2065_v13 = vld [vmem:[%s1745_s18 + $0x300] sm:$0xff] }
  0x49   : > { %3844 = vst [vmem:[#allocation39_spill] sm:$0xff] %v2047_v5  ;;  %v2068_v5 = vld [vmem:[%s1745_s18 + $0x308] sm:$0xff] }
  0x4a   : > { %3845 = vst [vmem:[#allocation40_spill] sm:$0xff] %v2050_v6  ;;  %v2071_v6 = vld [vmem:[%s1745_s18 + $0x310] sm:$0xff] }
  0x4b   : > { %3846 = vst [vmem:[#allocation41_spill] sm:$0xff] %v2053_v7  ;;  %v2074_v7 = vld [vmem:[%s1745_s18 + $0x318] sm:$0xff] }
  0x4c   : > { %3847 = vst [vmem:[#allocation42_spill] sm:$0xff] %v2056_v10  ;;  %v2077_v10 = vld [vmem:[%s1745_s18 + $0x320] sm:$0xff] }
  0x4d   : > { %3848 = vst [vmem:[#allocation43_spill] sm:$0xff] %v2059_v11  ;;  %v2080_v11 = vld [vmem:[%s1745_s18 + $0x328] sm:$0xff] }
  0x4e   : > { %3849 = vst [vmem:[#allocation44_spill] sm:$0xff] %v2062_v12  ;;  %v2083_v12 = vld [vmem:[%s1745_s18 + $0x330] sm:$0xff] }
  0x4f   : > { %3850 = vst [vmem:[#allocation45_spill] sm:$0xff] %v2065_v13  ;;  %v2086_v13 = vld [vmem:[%s1745_s18 + $0x338] sm:$0xff] }
  0x50   : > { %3851 = vst [vmem:[#allocation46_spill] sm:$0xff] %v2068_v5  ;;  %v2089_v5 = vld [vmem:[%s1745_s18 + $0x340] sm:$0xff] }
  0x51   : > { %3852 = vst [vmem:[#allocation47_spill] sm:$0xff] %v2071_v6  ;;  %v2092_v6 = vld [vmem:[%s1745_s18 + $0x348] sm:$0xff] }
  0x52   : > { %3853 = vst [vmem:[#allocation48_spill] sm:$0xff] %v2074_v7  ;;  %v2095_v7 = vld [vmem:[%s1745_s18 + $0x350] sm:$0xff] }
  0x53   : > { %3854 = vst [vmem:[#allocation49_spill] sm:$0xff] %v2077_v10  ;;  %v2098_v10 = vld [vmem:[%s1745_s18 + $0x358] sm:$0xff] }
  0x54   : > { %3855 = vst [vmem:[#allocation50_spill] sm:$0xff] %v2080_v11  ;;  %v2101_v11 = vld [vmem:[%s1745_s18 + $0x360] sm:$0xff] }
  0x55   : > { %3856 = vst [vmem:[#allocation51_spill] sm:$0xff] %v2083_v12  ;;  %v2104_v12 = vld [vmem:[%s1745_s18 + $0x368] sm:$0xff] }
  0x56   : > { %3857 = vst [vmem:[#allocation52_spill] sm:$0xff] %v2086_v13  ;;  %v2107_v13 = vld [vmem:[%s1745_s18 + $0x370] sm:$0xff] }
  0x57   : > { %3858 = vst [vmem:[#allocation53_spill] sm:$0xff] %v2089_v5  ;;  %v2110_v5 = vld [vmem:[%s1745_s18 + $0x378] sm:$0xff] }
  0x58   : > { %3859 = vst [vmem:[#allocation54_spill] sm:$0xff] %v2092_v6  ;;  %v2113_v6 = vld [vmem:[%s1745_s18 + $0x380] sm:$0xff] }
  0x59   : > { %3860 = vst [vmem:[#allocation55_spill] sm:$0xff] %v2095_v7  ;;  %v2116_v7 = vld [vmem:[%s1745_s18 + $0x388] sm:$0xff] }
  0x5a   : > { %3861 = vst [vmem:[#allocation56_spill] sm:$0xff] %v2098_v10  ;;  %v2119_v10 = vld [vmem:[%s1745_s18 + $0x390] sm:$0xff] }
  0x5b   : > { %3862 = vst [vmem:[#allocation57_spill] sm:$0xff] %v2101_v11  ;;  %v2122_v11 = vld [vmem:[%s1745_s18 + $0x398] sm:$0xff] }
  0x5c   : > { %3863 = vst [vmem:[#allocation58_spill] sm:$0xff] %v2104_v12  ;;  %v2125_v12 = vld [vmem:[%s1745_s18 + $0x3a0] sm:$0xff] }
  0x5d   : > { %3864 = vst [vmem:[#allocation59_spill] sm:$0xff] %v2107_v13  ;;  %v2128_v13 = vld [vmem:[%s1745_s18 + $0x3a8] sm:$0xff] }
  0x5e   : > { %3865 = vst [vmem:[#allocation60_spill] sm:$0xff] %v2110_v5  ;;  %v2131_v5 = vld [vmem:[%s1745_s18 + $0x3b0] sm:$0xff] }
  0x5f   : > { %3866 = vst [vmem:[#allocation61_spill] sm:$0xff] %v2113_v6  ;;  %v2134_v6 = vld [vmem:[%s1745_s18 + $0x3b8] sm:$0xff] }
  0x60   : > { %3867 = vst [vmem:[#allocation62_spill] sm:$0xff] %v2116_v7  ;;  %v2137_v7 = vld [vmem:[%s1745_s18 + $0x3c0] sm:$0xff] }
  0x61   : > { %3868 = vst [vmem:[#allocation63_spill] sm:$0xff] %v2119_v10  ;;  %v2140_v10 = vld [vmem:[%s1745_s18 + $0x3c8] sm:$0xff] }
  0x62   : > { %3869 = vst [vmem:[#allocation64_spill] sm:$0xff] %v2122_v11  ;;  %v2143_v11 = vld [vmem:[%s1745_s18 + $0x3d0] sm:$0xff] }
  0x63   : > { %3870 = vst [vmem:[#allocation65_spill] sm:$0xff] %v2125_v12  ;;  %v2146_v12 = vld [vmem:[%s1745_s18 + $0x3d8] sm:$0xff] }
  0x64   : > { %3871 = vst [vmem:[#allocation66_spill] sm:$0xff] %v2128_v13  ;;  %v2149_v13 = vld [vmem:[%s1745_s18 + $0x3e0] sm:$0xff] }
  0x65   : > { %3872 = vst [vmem:[#allocation67_spill] sm:$0xff] %v2131_v5  ;;  %v2152_v5 = vld [vmem:[%s1745_s18 + $0x3e8] sm:$0xff] }
  0x66   : > { %3873 = vst [vmem:[#allocation68_spill] sm:$0xff] %v2134_v6  ;;  %v2155_v6 = vld [vmem:[%s1745_s18 + $0x3f0] sm:$0xff] }
  0x67   : > { %3874 = vst [vmem:[#allocation69_spill] sm:$0xff] %v2137_v7  ;;  %v2158_v7 = vld [vmem:[%s1745_s18 + $0x3f8] sm:$0xff] }
  0x68   : > { %3875 = vst [vmem:[#allocation70_spill] sm:$0xff] %v2140_v10  ;;  %v2161_v10 = vld [vmem:[%s1745_s18 + $0x400] sm:$0xff] }
  0x69   : > { %3876 = vst [vmem:[#allocation71_spill] sm:$0xff] %v2143_v11  ;;  %v2164_v11 = vld [vmem:[%s1745_s18 + $0x408] sm:$0xff] }
  0x6a   : > { %3877 = vst [vmem:[#allocation72_spill] sm:$0xff] %v2146_v12  ;;  %v2167_v12 = vld [vmem:[%s1745_s18 + $0x410] sm:$0xff] }
  0x6b   : > { %3878 = vst [vmem:[#allocation73_spill] sm:$0xff] %v2149_v13  ;;  %v2170_v13 = vld [vmem:[%s1745_s18 + $0x418] sm:$0xff] }
  0x6c   : > { %3879 = vst [vmem:[#allocation74_spill] sm:$0xff] %v2152_v5  ;;  %v2173_v5 = vld [vmem:[%s1745_s18 + $0x420] sm:$0xff] }
  0x6d   : > { %3880 = vst [vmem:[#allocation75_spill] sm:$0xff] %v2155_v6  ;;  %v2176_v6 = vld [vmem:[%s1745_s18 + $0x428] sm:$0xff] }
  0x6e   : > { %3881 = vst [vmem:[#allocation76_spill] sm:$0xff] %v2158_v7  ;;  %v2179_v7 = vld [vmem:[%s1745_s18 + $0x430] sm:$0xff] }
  0x6f   : > { %3882 = vst [vmem:[#allocation77_spill] sm:$0xff] %v2161_v10  ;;  %v2182_v10 = vld [vmem:[%s1745_s18 + $0x438] sm:$0xff] }
  0x70   : > { %3883 = vst [vmem:[#allocation78_spill] sm:$0xff] %v2164_v11  ;;  %v2185_v11 = vld [vmem:[%s1745_s18 + $0x440] sm:$0xff] }
  0x71   : > { %3884 = vst [vmem:[#allocation79_spill] sm:$0xff] %v2167_v12  ;;  %v2188_v12 = vld [vmem:[%s1745_s18 + $0x448] sm:$0xff] }
  0x72   : > { %3885 = vst [vmem:[#allocation80_spill] sm:$0xff] %v2170_v13  ;;  %v2191_v13 = vld [vmem:[%s1745_s18 + $0x450] sm:$0xff] }
  0x73   : > { %3886 = vst [vmem:[#allocation81_spill] sm:$0xff] %v2173_v5  ;;  %v2194_v5 = vld [vmem:[%s1745_s18 + $0x458] sm:$0xff] }
  0x74   : > { %3887 = vst [vmem:[#allocation82_spill] sm:$0xff] %v2176_v6  ;;  %v2197_v6 = vld [vmem:[%s1745_s18 + $0x460] sm:$0xff] }
  0x75   : > { %3888 = vst [vmem:[#allocation83_spill] sm:$0xff] %v2179_v7  ;;  %v2200_v7 = vld [vmem:[%s1745_s18 + $0x468] sm:$0xff] }
  0x76   : > { %3889 = vst [vmem:[#allocation84_spill] sm:$0xff] %v2182_v10  ;;  %v2203_v10 = vld [vmem:[%s1745_s18 + $0x470] sm:$0xff] }
  0x77   : > { %3890 = vst [vmem:[#allocation85_spill] sm:$0xff] %v2185_v11  ;;  %v2206_v11 = vld [vmem:[%s1745_s18 + $0x478] sm:$0xff] }
  0x78   : > { %3891 = vst [vmem:[#allocation86_spill] sm:$0xff] %v2188_v12  ;;  %v2209_v12 = vld [vmem:[%s1745_s18 + $0x480] sm:$0xff] }
  0x79   : > { %3892 = vst [vmem:[#allocation87_spill] sm:$0xff] %v2191_v13  ;;  %v2212_v13 = vld [vmem:[%s1745_s18 + $0x488] sm:$0xff] }
  0x7a   : > { %3893 = vst [vmem:[#allocation88_spill] sm:$0xff] %v2194_v5  ;;  %v2215_v5 = vld [vmem:[%s1745_s18 + $0x490] sm:$0xff] }
  0x7b   : > { %3894 = vst [vmem:[#allocation89_spill] sm:$0xff] %v2197_v6  ;;  %v2218_v6 = vld [vmem:[%s1745_s18 + $0x498] sm:$0xff] }
  0x7c   : > { %3895 = vst [vmem:[#allocation90_spill] sm:$0xff] %v2200_v7  ;;  %v2221_v7 = vld [vmem:[%s1745_s18 + $0x4a0] sm:$0xff] }
  0x7d   : > { %3896 = vst [vmem:[#allocation91_spill] sm:$0xff] %v2203_v10  ;;  %v2224_v10 = vld [vmem:[%s1745_s18 + $0x4a8] sm:$0xff] }
  0x7e   : > { %3897 = vst [vmem:[#allocation92_spill] sm:$0xff] %v2206_v11  ;;  %v2227_v11 = vld [vmem:[%s1745_s18 + $0x4b0] sm:$0xff] }
  0x7f   : > { %3898 = vst [vmem:[#allocation93_spill] sm:$0xff] %v2209_v12  ;;  %v2230_v12 = vld [vmem:[%s1745_s18 + $0x4b8] sm:$0xff] }
  0x80   : > { %3899 = vst [vmem:[#allocation94_spill] sm:$0xff] %v2212_v13  ;;  %v2233_v13 = vld [vmem:[%s1745_s18 + $0x4c0] sm:$0xff] }
  0x81   : > { %3900 = vst [vmem:[#allocation95_spill] sm:$0xff] %v2215_v5  ;;  %v2236_v5 = vld [vmem:[%s1745_s18 + $0x4c8] sm:$0xff] }
  0x82   : > { %3901 = vst [vmem:[#allocation96_spill] sm:$0xff] %v2218_v6  ;;  %v2239_v6 = vld [vmem:[%s1745_s18 + $0x4d0] sm:$0xff] }
  0x83   : > { %3902 = vst [vmem:[#allocation97_spill] sm:$0xff] %v2221_v7  ;;  %v2242_v7 = vld [vmem:[%s1745_s18 + $0x4d8] sm:$0xff] }
  0x84   : > { %3903 = vst [vmem:[#allocation98_spill] sm:$0xff] %v2224_v10  ;;  %v2245_v10 = vld [vmem:[%s1745_s18 + $0x4e0] sm:$0xff] }
  0x85   : > { %3904 = vst [vmem:[#allocation99_spill] sm:$0xff] %v2227_v11  ;;  %v2248_v11 = vld [vmem:[%s1745_s18 + $0x4e8] sm:$0xff] }
  0x86   : > { %3905 = vst [vmem:[#allocation100_spill] sm:$0xff] %v2230_v12  ;;  %v2251_v12 = vld [vmem:[%s1745_s18 + $0x4f0] sm:$0xff] }
  0x87   : > { %3906 = vst [vmem:[#allocation101_spill] sm:$0xff] %v2233_v13  ;;  %v2254_v13 = vld [vmem:[%s1745_s18 + $0x4f8] sm:$0xff] }
  0x88   : > { %3907 = vst [vmem:[#allocation102_spill] sm:$0xff] %v2236_v5  ;;  %v2257_v5 = vld [vmem:[%s1745_s18 + $0x500] sm:$0xff] }
  0x89   : > { %3908 = vst [vmem:[#allocation103_spill] sm:$0xff] %v2239_v6  ;;  %v2260_v6 = vld [vmem:[%s1745_s18 + $0x508] sm:$0xff] }
  0x8a   : > { %3909 = vst [vmem:[#allocation104_spill] sm:$0xff] %v2242_v7  ;;  %v2263_v7 = vld [vmem:[%s1745_s18 + $0x510] sm:$0xff] }
  0x8b   : > { %3910 = vst [vmem:[#allocation105_spill] sm:$0xff] %v2245_v10  ;;  %v2266_v10 = vld [vmem:[%s1745_s18 + $0x518] sm:$0xff] }
  0x8c   : > { %3911 = vst [vmem:[#allocation106_spill] sm:$0xff] %v2248_v11  ;;  %v2269_v11 = vld [vmem:[%s1745_s18 + $0x520] sm:$0xff] }
  0x8d   : > { %3912 = vst [vmem:[#allocation107_spill] sm:$0xff] %v2251_v12  ;;  %v2272_v12 = vld [vmem:[%s1745_s18 + $0x528] sm:$0xff] }
  0x8e   : > { %3913 = vst [vmem:[#allocation108_spill] sm:$0xff] %v2254_v13  ;;  %v2275_v13 = vld [vmem:[%s1745_s18 + $0x530] sm:$0xff] }
  0x8f   : > { %3914 = vst [vmem:[#allocation109_spill] sm:$0xff] %v2257_v5  ;;  %v2278_v5 = vld [vmem:[%s1745_s18 + $0x538] sm:$0xff] }
  0x90   : > { %3915 = vst [vmem:[#allocation110_spill] sm:$0xff] %v2260_v6  ;;  %v2281_v6 = vld [vmem:[%s1745_s18 + $0x540] sm:$0xff] }
  0x91   : > { %3916 = vst [vmem:[#allocation111_spill] sm:$0xff] %v2263_v7  ;;  %v2284_v7 = vld [vmem:[%s1745_s18 + $0x548] sm:$0xff] }
  0x92   : > { %3917 = vst [vmem:[#allocation112_spill] sm:$0xff] %v2266_v10  ;;  %v2287_v10 = vld [vmem:[%s1745_s18 + $0x550] sm:$0xff] }
  0x93   : > { %3918 = vst [vmem:[#allocation113_spill] sm:$0xff] %v2269_v11  ;;  %v2290_v11 = vld [vmem:[%s1745_s18 + $0x558] sm:$0xff] }
  0x94   : > { %3919 = vst [vmem:[#allocation114_spill] sm:$0xff] %v2272_v12  ;;  %v2293_v12 = vld [vmem:[%s1745_s18 + $0x560] sm:$0xff] }
  0x95   : > { %3920 = vst [vmem:[#allocation115_spill] sm:$0xff] %v2275_v13  ;;  %v2296_v13 = vld [vmem:[%s1745_s18 + $0x568] sm:$0xff] }
  0x96   : > { %3921 = vst [vmem:[#allocation116_spill] sm:$0xff] %v2278_v5  ;;  %v2299_v5 = vld [vmem:[%s1745_s18 + $0x570] sm:$0xff] }
  0x97   : > { %3922 = vst [vmem:[#allocation117_spill] sm:$0xff] %v2281_v6  ;;  %v2302_v6 = vld [vmem:[%s1745_s18 + $0x578] sm:$0xff] }
  0x98   : > { %3923 = vst [vmem:[#allocation118_spill] sm:$0xff] %v2284_v7  ;;  %v2305_v7 = vld [vmem:[%s1745_s18 + $0x580] sm:$0xff] }
  0x99   : > { %3924 = vst [vmem:[#allocation119_spill] sm:$0xff] %v2287_v10  ;;  %v2308_v10 = vld [vmem:[%s1745_s18 + $0x588] sm:$0xff] }
  0x9a   : > { %3925 = vst [vmem:[#allocation120_spill] sm:$0xff] %v2290_v11  ;;  %v2311_v11 = vld [vmem:[%s1745_s18 + $0x590] sm:$0xff] }
  0x9b   : > { %3926 = vst [vmem:[#allocation121_spill] sm:$0xff] %v2293_v12  ;;  %v2314_v12 = vld [vmem:[%s1745_s18 + $0x598] sm:$0xff] }
  0x9c   : > { %3927 = vst [vmem:[#allocation122_spill] sm:$0xff] %v2296_v13  ;;  %v2317_v13 = vld [vmem:[%s1745_s18 + $0x5a0] sm:$0xff] }
  0x9d   : > { %3928 = vst [vmem:[#allocation123_spill] sm:$0xff] %v2299_v5  ;;  %v2320_v5 = vld [vmem:[%s1745_s18 + $0x5a8] sm:$0xff] }
  0x9e   : > { %3929 = vst [vmem:[#allocation124_spill] sm:$0xff] %v2302_v6  ;;  %v2323_v6 = vld [vmem:[%s1745_s18 + $0x5b0] sm:$0xff] }
  0x9f   : > { %3930 = vst [vmem:[#allocation125_spill] sm:$0xff] %v2305_v7  ;;  %v2326_v7 = vld [vmem:[%s1745_s18 + $0x5b8] sm:$0xff] }
  0xa0   : > { %3931 = vst [vmem:[#allocation126_spill] sm:$0xff] %v2308_v10  ;;  %v2329_v10 = vld [vmem:[%s1745_s18 + $0x5c0] sm:$0xff] }
  0xa1   : > { %3932 = vst [vmem:[#allocation127_spill] sm:$0xff] %v2311_v11  ;;  %v2332_v11 = vld [vmem:[%s1745_s18 + $0x5c8] sm:$0xff] }
  0xa2   : > { %3933 = vst [vmem:[#allocation128_spill] sm:$0xff] %v2314_v12  ;;  %v2335_v12 = vld [vmem:[%s1745_s18 + $0x5d0] sm:$0xff] }
  0xa3   : > { %3934 = vst [vmem:[#allocation129_spill] sm:$0xff] %v2317_v13  ;;  %v2338_v13 = vld [vmem:[%s1745_s18 + $0x5d8] sm:$0xff] }
  0xa4   : > { %3935 = vst [vmem:[#allocation130_spill] sm:$0xff] %v2320_v5  ;;  %v2341_v5 = vld [vmem:[%s1745_s18 + $0x5e0] sm:$0xff] }
  0xa5   : > { %3936 = vst [vmem:[#allocation131_spill] sm:$0xff] %v2323_v6  ;;  %v2344_v6 = vld [vmem:[%s1745_s18 + $0x5e8] sm:$0xff] }
  0xa6   : > { %3937 = vst [vmem:[#allocation132_spill] sm:$0xff] %v2326_v7  ;;  %v2347_v7 = vld [vmem:[%s1745_s18 + $0x5f0] sm:$0xff] }
  0xa7   : > { %3938 = vst [vmem:[#allocation133_spill] sm:$0xff] %v2329_v10  ;;  %v2350_v10 = vld [vmem:[%s1745_s18 + $0x5f8] sm:$0xff] }
  0xa8   : > { %3939 = vst [vmem:[#allocation134_spill] sm:$0xff] %v2332_v11  ;;  %v2353_v11 = vld [vmem:[%s1745_s18 + $0x600] sm:$0xff] }
  0xa9   : > { %3940 = vst [vmem:[#allocation135_spill] sm:$0xff] %v2335_v12  ;;  %v2356_v12 = vld [vmem:[%s1745_s18 + $0x608] sm:$0xff] }
  0xaa   : > { %3941 = vst [vmem:[#allocation136_spill] sm:$0xff] %v2338_v13  ;;  %v2359_v13 = vld [vmem:[%s1745_s18 + $0x610] sm:$0xff] }
  0xab   : > { %3942 = vst [vmem:[#allocation137_spill] sm:$0xff] %v2341_v5  ;;  %v2362_v5 = vld [vmem:[%s1745_s18 + $0x618] sm:$0xff] }
  0xac   : > { %3943 = vst [vmem:[#allocation138_spill] sm:$0xff] %v2344_v6  ;;  %v2365_v6 = vld [vmem:[%s1745_s18 + $0x620] sm:$0xff] }
  0xad   : > { %3944 = vst [vmem:[#allocation139_spill] sm:$0xff] %v2347_v7  ;;  %v2368_v7 = vld [vmem:[%s1745_s18 + $0x628] sm:$0xff] }
  0xae   : > { %3945 = vst [vmem:[#allocation140_spill] sm:$0xff] %v2350_v10  ;;  %v2371_v10 = vld [vmem:[%s1745_s18 + $0x630] sm:$0xff] }
  0xaf   : > { %3946 = vst [vmem:[#allocation141_spill] sm:$0xff] %v2353_v11  ;;  %v2374_v11 = vld [vmem:[%s1745_s18 + $0x638] sm:$0xff] }
  0xb0   : > { %3947 = vst [vmem:[#allocation142_spill] sm:$0xff] %v2356_v12  ;;  %v2377_v12 = vld [vmem:[%s1745_s18 + $0x640] sm:$0xff] }
  0xb1   : > { %3948 = vst [vmem:[#allocation143_spill] sm:$0xff] %v2359_v13  ;;  %v2380_v13 = vld [vmem:[%s1745_s18 + $0x648] sm:$0xff] }
  0xb2   : > { %3949 = vst [vmem:[#allocation144_spill] sm:$0xff] %v2362_v5  ;;  %v2383_v5 = vld [vmem:[%s1745_s18 + $0x650] sm:$0xff] }
  0xb3   : > { %3950 = vst [vmem:[#allocation145_spill] sm:$0xff] %v2365_v6  ;;  %v2386_v6 = vld [vmem:[%s1745_s18 + $0x658] sm:$0xff] }
  0xb4   : > { %3951 = vst [vmem:[#allocation146_spill] sm:$0xff] %v2368_v7  ;;  %v2389_v7 = vld [vmem:[%s1745_s18 + $0x660] sm:$0xff] }
  0xb5   : > { %3952 = vst [vmem:[#allocation147_spill] sm:$0xff] %v2371_v10  ;;  %v2392_v10 = vld [vmem:[%s1745_s18 + $0x668] sm:$0xff] }
  0xb6   : > { %3953 = vst [vmem:[#allocation148_spill] sm:$0xff] %v2374_v11  ;;  %v2395_v11 = vld [vmem:[%s1745_s18 + $0x670] sm:$0xff] }
  0xb7   : > { %3954 = vst [vmem:[#allocation149_spill] sm:$0xff] %v2377_v12  ;;  %v2398_v12 = vld [vmem:[%s1745_s18 + $0x678] sm:$0xff] }
  0xb8   : > { %3955 = vst [vmem:[#allocation150_spill] sm:$0xff] %v2380_v13  ;;  %v2401_v13 = vld [vmem:[%s1745_s18 + $0x680] sm:$0xff] }
  0xb9   : > { %3956 = vst [vmem:[#allocation151_spill] sm:$0xff] %v2383_v5  ;;  %v2404_v5 = vld [vmem:[%s1745_s18 + $0x688] sm:$0xff] }
  0xba   : > { %3957 = vst [vmem:[#allocation152_spill] sm:$0xff] %v2386_v6  ;;  %v2407_v6 = vld [vmem:[%s1745_s18 + $0x690] sm:$0xff] }
  0xbb   : > { %3958 = vst [vmem:[#allocation153_spill] sm:$0xff] %v2389_v7  ;;  %v2410_v7 = vld [vmem:[%s1745_s18 + $0x698] sm:$0xff] }
  0xbc   : > { %3959 = vst [vmem:[#allocation154_spill] sm:$0xff] %v2392_v10  ;;  %v2413_v10 = vld [vmem:[%s1745_s18 + $0x6a0] sm:$0xff] }
  0xbd   : > { %3960 = vst [vmem:[#allocation155_spill] sm:$0xff] %v2395_v11  ;;  %v2416_v11 = vld [vmem:[%s1745_s18 + $0x6a8] sm:$0xff] }
  0xbe   : > { %3961 = vst [vmem:[#allocation156_spill] sm:$0xff] %v2398_v12  ;;  %v2419_v12 = vld [vmem:[%s1745_s18 + $0x6b0] sm:$0xff] }
  0xbf   : > { %3962 = vst [vmem:[#allocation157_spill] sm:$0xff] %v2401_v13  ;;  %v2422_v13 = vld [vmem:[%s1745_s18 + $0x6b8] sm:$0xff] }
  0xc0   : > { %3963 = vst [vmem:[#allocation158_spill] sm:$0xff] %v2404_v5  ;;  %v2425_v5 = vld [vmem:[%s1745_s18 + $0x6c0] sm:$0xff] }
  0xc1   : > { %3964 = vst [vmem:[#allocation159_spill] sm:$0xff] %v2407_v6  ;;  %v2428_v6 = vld [vmem:[%s1745_s18 + $0x6c8] sm:$0xff] }
  0xc2   : > { %3965 = vst [vmem:[#allocation160_spill] sm:$0xff] %v2410_v7  ;;  %v2431_v7 = vld [vmem:[%s1745_s18 + $0x6d0] sm:$0xff] }
  0xc3   : > { %3966 = vst [vmem:[#allocation161_spill] sm:$0xff] %v2413_v10  ;;  %v2434_v10 = vld [vmem:[%s1745_s18 + $0x6d8] sm:$0xff] }
  0xc4   : > { %3967 = vst [vmem:[#allocation162_spill] sm:$0xff] %v2416_v11  ;;  %v2437_v11 = vld [vmem:[%s1745_s18 + $0x6e0] sm:$0xff] }
  0xc5   : > { %3968 = vst [vmem:[#allocation163_spill] sm:$0xff] %v2419_v12  ;;  %v2440_v12 = vld [vmem:[%s1745_s18 + $0x6e8] sm:$0xff] }
  0xc6   : > { %3969 = vst [vmem:[#allocation164_spill] sm:$0xff] %v2422_v13  ;;  %v2443_v13 = vld [vmem:[%s1745_s18 + $0x6f0] sm:$0xff] }
  0xc7   : > { %3970 = vst [vmem:[#allocation165_spill] sm:$0xff] %v2425_v5  ;;  %v2446_v5 = vld [vmem:[%s1745_s18 + $0x6f8] sm:$0xff] }
  0xc8   : > { %3971 = vst [vmem:[#allocation166_spill] sm:$0xff] %v2428_v6  ;;  %v2449_v6 = vld [vmem:[%s1745_s18 + $0x700] sm:$0xff] }
  0xc9   : > { %3972 = vst [vmem:[#allocation167_spill] sm:$0xff] %v2431_v7  ;;  %v2452_v7 = vld [vmem:[%s1745_s18 + $0x708] sm:$0xff] }
  0xca   : > { %3973 = vst [vmem:[#allocation168_spill] sm:$0xff] %v2434_v10  ;;  %v2455_v10 = vld [vmem:[%s1745_s18 + $0x710] sm:$0xff] }
  0xcb   : > { %3974 = vst [vmem:[#allocation169_spill] sm:$0xff] %v2437_v11  ;;  %v2458_v11 = vld [vmem:[%s1745_s18 + $0x718] sm:$0xff] }
  0xcc   : > { %3975 = vst [vmem:[#allocation170_spill] sm:$0xff] %v2440_v12  ;;  %v2461_v12 = vld [vmem:[%s1745_s18 + $0x720] sm:$0xff] }
  0xcd   : > { %3976 = vst [vmem:[#allocation171_spill] sm:$0xff] %v2443_v13  ;;  %v2464_v13 = vld [vmem:[%s1745_s18 + $0x728] sm:$0xff] }
  0xce   : > { %3977 = vst [vmem:[#allocation172_spill] sm:$0xff] %v2446_v5  ;;  %v2467_v5 = vld [vmem:[%s1745_s18 + $0x730] sm:$0xff] }
  0xcf   : > { %3978 = vst [vmem:[#allocation173_spill] sm:$0xff] %v2449_v6  ;;  %v2470_v6 = vld [vmem:[%s1745_s18 + $0x738] sm:$0xff] }
  0xd0   : > { %3979 = vst [vmem:[#allocation174_spill] sm:$0xff] %v2452_v7  ;;  %v2473_v7 = vld [vmem:[%s1745_s18 + $0x740] sm:$0xff] }
  0xd1   : > { %3980 = vst [vmem:[#allocation175_spill] sm:$0xff] %v2455_v10  ;;  %v2476_v10 = vld [vmem:[%s1745_s18 + $0x748] sm:$0xff] }
  0xd2   : > { %3981 = vst [vmem:[#allocation176_spill] sm:$0xff] %v2458_v11  ;;  %v2479_v11 = vld [vmem:[%s1745_s18 + $0x750] sm:$0xff] }
  0xd3   : > { %3982 = vst [vmem:[#allocation177_spill] sm:$0xff] %v2461_v12  ;;  %v2482_v12 = vld [vmem:[%s1745_s18 + $0x758] sm:$0xff] }
  0xd4   : > { %3983 = vst [vmem:[#allocation178_spill] sm:$0xff] %v2464_v13  ;;  %v2485_v13 = vld [vmem:[%s1745_s18 + $0x760] sm:$0xff] }
  0xd5   : > { %3984 = vst [vmem:[#allocation179_spill] sm:$0xff] %v2467_v5  ;;  %v2488_v5 = vld [vmem:[%s1745_s18 + $0x768] sm:$0xff] }
  0xd6   : > { %3985 = vst [vmem:[#allocation180_spill] sm:$0xff] %v2470_v6  ;;  %v2491_v6 = vld [vmem:[%s1745_s18 + $0x770] sm:$0xff] }
  0xd7   : > { %3986 = vst [vmem:[#allocation181_spill] sm:$0xff] %v2473_v7  ;;  %v2494_v7 = vld [vmem:[%s1745_s18 + $0x778] sm:$0xff] }
  0xd8   : > { %3987 = vst [vmem:[#allocation182_spill] sm:$0xff] %v2476_v10  ;;  %v2497_v10 = vld [vmem:[%s1745_s18 + $0x780] sm:$0xff] }
  0xd9   : > { %3988 = vst [vmem:[#allocation183_spill] sm:$0xff] %v2479_v11  ;;  %v2500_v11 = vld [vmem:[%s1745_s18 + $0x788] sm:$0xff] }
  0xda   : > { %3989 = vst [vmem:[#allocation184_spill] sm:$0xff] %v2482_v12  ;;  %v2503_v12 = vld [vmem:[%s1745_s18 + $0x790] sm:$0xff] }
  0xdb   : > { %3990 = vst [vmem:[#allocation185_spill] sm:$0xff] %v2485_v13  ;;  %v2506_v13 = vld [vmem:[%s1745_s18 + $0x798] sm:$0xff] }
  0xdc   : > { %3991 = vst [vmem:[#allocation186_spill] sm:$0xff] %v2488_v5  ;;  %v2509_v5 = vld [vmem:[%s1745_s18 + $0x7a0] sm:$0xff] }
  0xdd   : > { %3992 = vst [vmem:[#allocation187_spill] sm:$0xff] %v2491_v6  ;;  %v2512_v6 = vld [vmem:[%s1745_s18 + $0x7a8] sm:$0xff] }
  0xde   : > { %3993 = vst [vmem:[#allocation188_spill] sm:$0xff] %v2494_v7  ;;  %v2515_v7 = vld [vmem:[%s1745_s18 + $0x7b0] sm:$0xff] }
  0xdf   : > { %3994 = vst [vmem:[#allocation189_spill] sm:$0xff] %v2497_v10  ;;  %v2518_v10 = vld [vmem:[%s1745_s18 + $0x7b8] sm:$0xff] }
  0xe0   : > { %3995 = vst [vmem:[#allocation190_spill] sm:$0xff] %v2500_v11  ;;  %v2521_v11 = vld [vmem:[%s1745_s18 + $0x7c0] sm:$0xff] }
  0xe1   : > { %3996 = vst [vmem:[#allocation191_spill] sm:$0xff] %v2503_v12  ;;  %v2524_v12 = vld [vmem:[%s1745_s18 + $0x7c8] sm:$0xff] }
  0xe2   : > { %3997 = vst [vmem:[#allocation192_spill] sm:$0xff] %v2506_v13  ;;  %v2527_v13 = vld [vmem:[%s1745_s18 + $0x7d0] sm:$0xff] }
  0xe3   : > { %3998 = vst [vmem:[#allocation193_spill] sm:$0xff] %v2509_v5  ;;  %v2530_v5 = vld [vmem:[%s1745_s18 + $0x7d8] sm:$0xff] }
  0xe4   : > { %3999 = vst [vmem:[#allocation194_spill] sm:$0xff] %v2512_v6  ;;  %v2533_v6 = vld [vmem:[%s1745_s18 + $0x7e0] sm:$0xff] }
  0xe5   : > { %4000 = vst [vmem:[#allocation195_spill] sm:$0xff] %v2515_v7  ;;  %v2536_v7 = vld [vmem:[%s1745_s18 + $0x7e8] sm:$0xff] }
  0xe6   : > { %4001 = vst [vmem:[#allocation196_spill] sm:$0xff] %v2518_v10  ;;  %v2539_v10 = vld [vmem:[%s1745_s18 + $0x7f0] sm:$0xff] }
  0xe7   : > { %4002 = vst [vmem:[#allocation197_spill] sm:$0xff] %v2521_v11  ;;  %v2542_v11 = vld [vmem:[%s1745_s18 + $0x7f8] sm:$0xff] }
  0xe8   : > { %4003 = vst [vmem:[#allocation198_spill] sm:$0xff] %v2524_v12  ;;  %v2545_v12 = vld [vmem:[%s1745_s18 + $0x800] sm:$0xff] }
  0xe9   : > { %4004 = vst [vmem:[#allocation199_spill] sm:$0xff] %v2527_v13  ;;  %v2548_v13 = vld [vmem:[%s1745_s18 + $0x808] sm:$0xff] }
  0xea   : > { %4005 = vst [vmem:[#allocation200_spill] sm:$0xff] %v2530_v5  ;;  %v2551_v5 = vld [vmem:[%s1745_s18 + $0x810] sm:$0xff] }
  0xeb   : > { %4006 = vst [vmem:[#allocation201_spill] sm:$0xff] %v2533_v6  ;;  %v2554_v6 = vld [vmem:[%s1745_s18 + $0x818] sm:$0xff] }
  0xec   : > { %4007 = vst [vmem:[#allocation202_spill] sm:$0xff] %v2536_v7  ;;  %v2557_v7 = vld [vmem:[%s1745_s18 + $0x820] sm:$0xff] }
  0xed   : > { %4008 = vst [vmem:[#allocation203_spill] sm:$0xff] %v2539_v10  ;;  %v2560_v10 = vld [vmem:[%s1745_s18 + $0x828] sm:$0xff] }
  0xee   : > { %4009 = vst [vmem:[#allocation204_spill] sm:$0xff] %v2542_v11  ;;  %v2563_v11 = vld [vmem:[%s1745_s18 + $0x830] sm:$0xff] }
  0xef   : > { %4010 = vst [vmem:[#allocation205_spill] sm:$0xff] %v2545_v12  ;;  %v2566_v12 = vld [vmem:[%s1745_s18 + $0x838] sm:$0xff] }
  0xf0   : > { %4011 = vst [vmem:[#allocation206_spill] sm:$0xff] %v2548_v13  ;;  %v2569_v13 = vld [vmem:[%s1745_s18 + $0x840] sm:$0xff] }
  0xf1   : > { %4012 = vst [vmem:[#allocation207_spill] sm:$0xff] %v2551_v5  ;;  %v2572_v5 = vld [vmem:[%s1745_s18 + $0x848] sm:$0xff] }
  0xf2   : > { %4013 = vst [vmem:[#allocation208_spill] sm:$0xff] %v2554_v6  ;;  %v2575_v6 = vld [vmem:[%s1745_s18 + $0x850] sm:$0xff] }
  0xf3   : > { %4014 = vst [vmem:[#allocation209_spill] sm:$0xff] %v2557_v7  ;;  %v2581_v7 = vld [vmem:[%s1745_s18 + $0x860] sm:$0xff] }
  0xf4   : > { %4015 = vst [vmem:[#allocation210_spill] sm:$0xff] %v2560_v10  ;;  %v2584_v10 = vld [vmem:[%s1745_s18 + $0x868] sm:$0xff] }
  0xf5   : > { %4016 = vst [vmem:[#allocation211_spill] sm:$0xff] %v2563_v11  ;;  %v2587_v11 = vld [vmem:[%s1745_s18 + $0x870] sm:$0xff] }
  0xf6   : > { %4017 = vst [vmem:[#allocation212_spill] sm:$0xff] %v2566_v12  ;;  %v2590_v12 = vld [vmem:[%s1745_s18 + $0x878] sm:$0xff] }
  0xf7   : > { %4018 = vst [vmem:[#allocation213_spill] sm:$0xff] %v2569_v13  ;;  %v2593_v13 = vld [vmem:[%s1745_s18 + $0x880] sm:$0xff] }
  0xf8   : > { %4019 = vst [vmem:[#allocation214_spill] sm:$0xff] %v2572_v5  ;;  %v2599_v5 = vld [vmem:[%s1745_s18 + $0x890] sm:$0xff] }
  0xf9   : > { %4020 = vst [vmem:[#allocation215_spill] sm:$0xff] %v2575_v6  ;;  %v2602_v6 = vld [vmem:[%s1745_s18 + $0x898] sm:$0xff] }
  0xfa   : > { %4021 = vst [vmem:[#allocation216_spill] sm:$0xff] %v2578_v4  ;;  %v2605_v4 = vld [vmem:[%s1745_s18 + $0x8a0] sm:$0xff] }
  0xfb   : > { %4022 = vst [vmem:[#allocation217_spill] sm:$0xff] %v2581_v7  ;;  %v2608_v7 = vld [vmem:[%s1745_s18 + $0x8a8] sm:$0xff] }
  0xfc   : > { %4023 = vst [vmem:[#allocation218_spill] sm:$0xff] %v2584_v10  ;;  %v2611_v10 = vld [vmem:[%s1745_s18 + $0x8b0] sm:$0xff] }
  0xfd   : > { %4024 = vst [vmem:[#allocation219_spill] sm:$0xff] %v2587_v11  ;;  %v2614_v11 = vld [vmem:[%s1745_s18 + $0x8b8] sm:$0xff] }
  0xfe   : > { %4025 = vst [vmem:[#allocation220_spill] sm:$0xff] %v2590_v12  ;;  %v2617_v12 = vld [vmem:[%s1745_s18 + $0x8c0] sm:$0xff] }
  0xff   : > { %4026 = vst [vmem:[#allocation221_spill] sm:$0xff] %v2593_v13  ;;  %v2620_v13 = vld [vmem:[%s1745_s18 + $0x8c8] sm:$0xff] }
 0x100   : > { %4027 = vst [vmem:[#allocation222_spill] sm:$0xff] %v2596_v3  ;;  %v2630_v3 = vld [vmem:[%s1745_s18 + $0x8d8] sm:$0xff] }
 0x101   : > { %4028 = vst [vmem:[#allocation223_spill] sm:$0xff] %v2599_v5  ;;  %v762_v5 = vadd.f32 %v1763_v9, %v1782_v18  ;;  %v2641_v18 = vld [vmem:[%s1745_s18 + $0x8e8] sm:$0xff] }
 0x102   : > { %4029 = vst [vmem:[#allocation224_spill] sm:$0xff] %v2602_v6  ;;  %v763_v6 = vadd.f32 %v1763_v9, %v1785_v19  ;;  %v2644_v19 = vld [vmem:[%s1745_s18 + $0x8f0] sm:$0xff] }
 0x103   : > { %4030 = vst [vmem:[#allocation225_spill] sm:$0xff] %v2605_v4  ;;  %v2627_v4 = vld [vmem:[%s1745_s18 + $0x8d0] sm:$0xff] }
 0x104   : > { %4031 = vst [vmem:[#allocation226_spill] sm:$0xff] %v2608_v7  ;;  %v2633_v7 = vld [vmem:[%s1745_s18 + $0x8e0] sm:$0xff] }
 0x105   : > { %4032 = vst [vmem:[#allocation227_spill] sm:$0xff] %v2611_v10  ;;  %v764_v10 = vadd.f32 %v1763_v9, %v1788_v20  ;;  %v475_v20 = vmul.f32 %v1758_v8, %v1773_v15 }
 0x106   : > { %4033 = vst [vmem:[#allocation228_spill] sm:$0xff] %v2614_v11  ;;  %v1046_v11 = vmax.f32 %v1803_v25, 0.0  ;;  %v765_v25 = vadd.f32 %v1763_v9, %v1791_v21  ;;  %v478_v21 = vmul.f32 %v1758_v8, %v1794_v22 }
 0x107   : > { %4034 = vst [vmem:[#allocation229_spill] sm:$0xff] %v2617_v12  ;;  %v1047_v12 = vmax.f32 %v1806_v26, 0.0  ;;  %v474_v26 = vmul.f32 %v1758_v8, %v1770_v14  ;;  %v480_v14 = vmul.f32 %v1758_v8, %v1800_v24  ;;  %v1052_v15 = vmax.f32 %v764_v10, 0.0 }
 0x108   : > { %4035 = vst [vmem:[#allocation230_spill] sm:$0xff] %v2620_v13  ;;  %v1048_v13 = vmax.f32 %v1809_v27, 0.0  ;;  %v476_v27 = vmul.f32 %v1758_v8, %v1776_v16 }
 0x109   : > { %4036 = vst [vmem:[#allocation231_spill] sm:$0xff] %v2627_v4  ;;  %v2647_v4 = vld [vmem:[%s1745_s18 + $0x8f8] sm:$0xff]  ;;  %v766_v16 = vadd.f32 %v1763_v9, %v474_v26  ;;  %v772_v26 = vadd.f32 %v1763_v9, %v480_v14 }
 0x10a   : > { %4037 = vst [vmem:[#allocation232_spill] sm:$0xff] %v2630_v3  ;;  %v1049_v3 = vmax.f32 %v1812_v28, 0.0  ;;  %v1051_v28 = vmax.f32 %v763_v6, 0.0  ;;  %v1053_v6 = vmax.f32 %v765_v25, 0.0 }
 0x10b   : > { %4038 = vst [vmem:[#allocation233_spill] sm:$0xff] %v2633_v7  ;;  %v1050_v7 = vmax.f32 %v762_v5, 0.0  ;;  %v479_v5 = vmul.f32 %v1758_v8, %v1797_v23  ;;  %v481_v23 = vmul.f32 %v1758_v8, %v1822_v29  ;;  %v1054_v24 = vmax.f32 %v766_v16, 0.0 }
 0x10c   : > { %4039 = vst [vmem:[#allocation234_spill] sm:$0xff] %v2647_v4  ;;  %v477_v4 = vmul.f32 %v1758_v8, %v1779_v17  ;;  %v768_v17 = vadd.f32 %v1763_v9, %v476_v27  ;;  %v483_v29 = vmul.f32 %v1758_v8, %v1828_v31  ;;  %v485_v27 = vmul.f32 %v1758_v8, %v1834_v33 }
 0x10d   : > { %1334 = vst [vmem:[%s1819_s25] sm:$0xff] %v1046_v11  ;;  %v767_v11 = vadd.f32 %v1763_v9, %v475_v20  ;;  %v773_v20 = vadd.f32 %v1763_v9, %v481_v23  ;;  %v1060_v14 = vmax.f32 %v772_v26, 0.0  ;;  %v491_v23 = vmul.f32 %v1758_v8, %v1852_v39 }
 0x10e   : > { %1335 = vst [vmem:[%s1819_s25 + $0x8] sm:$0xff] %v1047_v12  ;;  %v769_v22 = vadd.f32 %v1763_v9, %v477_v4  ;;  %v770_v12 = vadd.f32 %v1763_v9, %v478_v21  ;;  %v482_v4 = vmul.f32 %v1758_v8, %v1825_v30  ;;  %v486_v30 = vmul.f32 %v1758_v8, %v1837_v34 }
 0x10f   : > { %1336 = vst [vmem:[%s1819_s25 + $0x10] sm:$0xff] %v1048_v13  ;;  %v1055_v10 = vmax.f32 %v767_v11, 0.0  ;;  %v771_v13 = vadd.f32 %v1763_v9, %v479_v5  ;;  %v487_v5 = vmul.f32 %v1758_v8, %v1840_v35  ;;  %v1061_v16 = vmax.f32 %v773_v20, 0.0 }
 0x110   : > { %1337 = vst [vmem:[%s1819_s25 + $0x18] sm:$0xff] %v1049_v3  ;;  %v1056_v3 = vmax.f32 %v768_v17, 0.0  ;;  %v1057_v25 = vmax.f32 %v769_v22, 0.0  ;;  %v774_v21 = vadd.f32 %v1763_v9, %v482_v4  ;;  %v777_v34 = vadd.f32 %v1763_v9, %v485_v27 }
 0x111   : > { %1338 = vst [vmem:[%s1819_s25 + $0x20] sm:$0xff] %v1050_v7  ;;  %v484_v7 = vmul.f32 %v1758_v8, %v1831_v32  ;;  %v1059_v31 = vmax.f32 %v771_v13, 0.0  ;;  %v775_v32 = vadd.f32 %v1763_v9, %v483_v29  ;;  %v489_v11 = vmul.f32 %v1758_v8, %v1846_v37 }
 0x112   : > { %1339 = vst [vmem:[%s1819_s25 + $0x28] sm:$0xff] %v1051_v28  ;;  %v1058_v28 = vmax.f32 %v770_v12, 0.0  ;;  %v1062_v17 = vmax.f32 %v774_v21, 0.0  ;;  %v778_v35 = vadd.f32 %v1763_v9, %v486_v30  ;;  %v492_v12 = vmul.f32 %v1758_v8, %v1855_v40 }
 0x113   : > { %1340 = vst [vmem:[%s1819_s25 + $0x30] sm:$0xff] %v1052_v15  ;;  %v776_v33 = vadd.f32 %v1763_v9, %v484_v7  ;;  %v488_v15 = vmul.f32 %v1758_v8, %v1843_v36  ;;  %v1063_v22 = vmax.f32 %v775_v32, 0.0  ;;  %v779_v36 = vadd.f32 %v1763_v9, %v487_v5 }
 0x114   : > { %1341 = vst [vmem:[%s1819_s25 + $0x38] sm:$0xff] %v1053_v6  ;;  %v490_v6 = vmul.f32 %v1758_v8, %v1849_v38  ;;  %v781_v38 = vadd.f32 %v1763_v9, %v489_v11  ;;  %v493_v13 = vmul.f32 %v1758_v8, %v1858_v41  ;;  %v1066_v26 = vmax.f32 %v778_v35, 0.0 }
 0x115   : > { %1342 = vst [vmem:[%s1819_s25 + $0x40] sm:$0xff] %v1054_v24  ;;  %v1064_v24 = vmax.f32 %v776_v33, 0.0  ;;  %v780_v37 = vadd.f32 %v1763_v9, %v488_v15  ;;  %v1067_v4 = vmax.f32 %v779_v36, 0.0  ;;  %v783_v40 = vadd.f32 %v1763_v9, %v491_v23 }
 0x116   : > { %1343 = vst [vmem:[%s1819_s25 + $0x48] sm:$0xff] %v1055_v10  ;;  %v1065_v10 = vmax.f32 %v777_v34, 0.0  ;;  %v782_v39 = vadd.f32 %v1763_v9, %v490_v6  ;;  %v495_v29 = vmul.f32 %v1758_v8, %v1864_v43  ;;  %v784_v41 = vadd.f32 %v1763_v9, %v492_v12 }
 0x117   : > { %1344 = vst [vmem:[%s1819_s25 + $0x50] sm:$0xff] %v1056_v3  ;;  %v494_v3 = vmul.f32 %v1758_v8, %v1861_v42  ;;  %v1068_v7 = vmax.f32 %v780_v37, 0.0  ;;  %v1069_v20 = vmax.f32 %v781_v38, 0.0  ;;  %v785_v42 = vadd.f32 %v1763_v9, %v493_v13 }
 0x118   : > { %1345 = vst [vmem:[%s1819_s25 + $0x58] sm:$0xff] %v1057_v25  ;;  %v496_v25 = vmul.f32 %v1758_v8, %v1867_v44  ;;  %v497_v27 = vmul.f32 %v1758_v8, %v1870_v45  ;;  %v498_v21 = vmul.f32 %v1758_v8, %v1873_v46  ;;  %v1071_v30 = vmax.f32 %v783_v40, 0.0 }
 0x119   : > { %1346 = vst [vmem:[%s1819_s25 + $0x60] sm:$0xff] %v1058_v28  ;;  %v1070_v28 = vmax.f32 %v782_v39, 0.0  ;;  %v786_v43 = vadd.f32 %v1763_v9, %v494_v3  ;;  %v787_v44 = vadd.f32 %v1763_v9, %v495_v29  ;;  %v1072_v32 = vmax.f32 %v784_v41, 0.0 }
 0x11a   : > { %1347 = vst [vmem:[%s1819_s25 + $0x68] sm:$0xff] %v1059_v31  ;;  %v499_v31 = vmul.f32 %v1758_v8, %v1876_v47  ;;  %v788_v45 = vadd.f32 %v1763_v9, %v496_v25  ;;  %v500_v5 = vmul.f32 %v1758_v8, %v1879_v48  ;;  %v789_v46 = vadd.f32 %v1763_v9, %v497_v27 }
 0x11b   : > { %1348 = vst [vmem:[%s1819_s25 + $0x70] sm:$0xff] %v1060_v14  ;;  %v1073_v14 = vmax.f32 %v785_v42, 0.0  ;;  %v501_v33 = vmul.f32 %v1758_v8, %v1882_v49  ;;  %v1074_v15 = vmax.f32 %v786_v43, 0.0  ;;  %v790_v47 = vadd.f32 %v1763_v9, %v498_v21 }
 0x11c   : > { %1349 = vst [vmem:[%s1819_s25 + $0x78] sm:$0xff] %v1061_v16  ;;  %v502_v16 = vmul.f32 %v1758_v8, %v1885_v50  ;;  %v1075_v34 = vmax.f32 %v787_v44, 0.0  ;;  %v791_v48 = vadd.f32 %v1763_v9, %v499_v31  ;;  %v503_v11 = vmul.f32 %v1758_v8, %v1888_v51 }
 0x11d   : > { %1350 = vst [vmem:[%s1819_s25 + $0x80] sm:$0xff] %v1062_v17  ;;  %v1076_v17 = vmax.f32 %v788_v45, 0.0  ;;  %v792_v49 = vadd.f32 %v1763_v9, %v500_v5  ;;  %v504_v35 = vmul.f32 %v1758_v8, %v1891_v52  ;;  %v1077_v6 = vmax.f32 %v789_v46, 0.0  ;;  %v4040_v45 = vld [vmem:[#allocation2_spill] sm:$0xff]  ;;  %v4041_v46 = vld [vmem:[#allocation3_spill] sm:$0xff] }
 0x11e   : > { %1351 = vst [vmem:[%s1819_s25 + $0x88] sm:$0xff] %v1063_v22  ;;  %v793_v50 = vadd.f32 %v1763_v9, %v501_v33  ;;  %v505_v22 = vmul.f32 %v1758_v8, %v1894_v53  ;;  %v1078_v36 = vmax.f32 %v790_v47, 0.0  ;;  %v794_v51 = vadd.f32 %v1763_v9, %v502_v16  ;;  %v4042_v47 = vld [vmem:[#allocation4_spill] sm:$0xff] }
 0x11f   : > { %1352 = vst [vmem:[%s1819_s25 + $0x90] sm:$0xff] %v1064_v24  ;;  %v506_v23 = vmul.f32 %v1758_v8, %v1897_v54  ;;  %v1079_v24 = vmax.f32 %v791_v48, 0.0  ;;  %v795_v52 = vadd.f32 %v1763_v9, %v503_v11  ;;  %v507_v37 = vmul.f32 %v1758_v8, %v1900_v55  ;;  %v4043_v11 = vld [vmem:[#allocation5_spill] sm:$0xff] }
 0x120   : > { %1353 = vst [vmem:[%s1819_s25 + $0x98] sm:$0xff] %v1065_v10  ;;  %v1080_v12 = vmax.f32 %v792_v49, 0.0  ;;  %v796_v53 = vadd.f32 %v1763_v9, %v504_v35  ;;  %v508_v10 = vmul.f32 %v1758_v8, %v1903_v56  ;;  %v1081_v38 = vmax.f32 %v793_v50, 0.0 }
 0x121   : > { %1354 = vst [vmem:[%s1819_s25 + $0xa0] sm:$0xff] %v1066_v26  ;;  %v797_v54 = vadd.f32 %v1763_v9, %v505_v22  ;;  %v509_v13 = vmul.f32 %v1758_v8, %v1906_v57  ;;  %v1082_v26 = vmax.f32 %v794_v51, 0.0  ;;  %v798_v55 = vadd.f32 %v1763_v9, %v506_v23  ;;  %v4045_v51 = vld [vmem:[#allocation7_spill] sm:$0xff] }
 0x122   : > { %1355 = vst [vmem:[%s1819_s25 + $0xa8] sm:$0xff] %v1067_v4  ;;  %v510_v39 = vmul.f32 %v1758_v8, %v1909_v58  ;;  %v1083_v3 = vmax.f32 %v795_v52, 0.0  ;;  %v799_v56 = vadd.f32 %v1763_v9, %v507_v37  ;;  %v511_v4 = vmul.f32 %v1758_v8, %v1912_v59  ;;  %v4046_v37 = vld [vmem:[#allocation8_spill] sm:$0xff] }
 0x123   : > { %1356 = vst [vmem:[%s1819_s25 + $0xb0] sm:$0xff] %v1068_v7  ;;  %v1084_v40 = vmax.f32 %v796_v53, 0.0  ;;  %v800_v57 = vadd.f32 %v1763_v9, %v508_v10  ;;  %v512_v29 = vmul.f32 %v1758_v8, %v1915_v60  ;;  %v1085_v7 = vmax.f32 %v797_v54, 0.0 }
 0x124   : > { %1357 = vst [vmem:[%s1819_s25 + $0xb8] sm:$0xff] %v1069_v20  ;;  %v801_v58 = vadd.f32 %v1763_v9, %v509_v13  ;;  %v513_v41 = vmul.f32 %v1758_v8, %v1918_v61  ;;  %v1086_v25 = vmax.f32 %v798_v55, 0.0  ;;  %v802_v59 = vadd.f32 %v1763_v9, %v510_v39  ;;  %v4048_v55 = vld [vmem:[#allocation10_spill] sm:$0xff] }
 0x125   : > { %1358 = vst [vmem:[%s1819_s25 + $0xc0] sm:$0xff] %v1070_v28  ;;  %v514_v20 = vmul.f32 %v1758_v8, %v1921_v62  ;;  %v1087_v42 = vmax.f32 %v799_v56, 0.0  ;;  %v803_v60 = vadd.f32 %v1763_v9, %v511_v4  ;;  %v515_v27 = vmul.f32 %v1758_v8, %v1924_v63  ;;  %v4049_v4 = vld [vmem:[#allocation11_spill] sm:$0xff] }
 0x126   : > { %1359 = vst [vmem:[%s1819_s25 + $0xc8] sm:$0xff] %v1071_v30  ;;  %v1088_v28 = vmax.f32 %v800_v57, 0.0  ;;  %v804_v61 = vadd.f32 %v1763_v9, %v512_v29  ;;  %v516_v43 = vmul.f32 %v1758_v8, %v1927_v0  ;;  %v1089_v21 = vmax.f32 %v801_v58, 0.0  ;;  %v2868_v29 = vld [vmem:[%s3805_s2] ss:$0 sm:$0xff] }
 0x127   : > { %1360 = vst [vmem:[%s1819_s25 + $0xd0] sm:$0xff] %v1072_v32  ;;  %v805_v62 = vadd.f32 %v1763_v9, %v513_v41  ;;  %v517_v30 = vmul.f32 %v1758_v8, %v1930_v1  ;;  %v1090_v44 = vmax.f32 %v802_v59, 0.0  ;;  %v806_v63 = vadd.f32 %v1763_v9, %v514_v20  ;;  %v2874_v58 = vld [vmem:[%s3804_s1] ss:$0 sm:$0xff]  ;;  %v4051_v59 = vld [vmem:[#allocation13_spill] sm:$0xff] }
 0x128   : > { %1361 = vst [vmem:[%s1819_s25 + $0xd8] sm:$0xff] %v1073_v14  ;;  %v518_v31 = vmul.f32 %v1758_v8, %v1933_v2  ;;  %v1091_v32 = vmax.f32 %v803_v60, 0.0  ;;  %v807_v0 = vadd.f32 %v1763_v9, %v515_v27  ;;  %v519_v5 = vmul.f32 %v1758_v8, %v4040_v45  ;;  %v4052_v27 = vld [vmem:[#allocation14_spill] sm:$0xff]  ;;  %v4055_v45 = vld [vmem:[#allocation17_spill] sm:$0xff] }
 0x129   : > { %1362 = vst [vmem:[%s1819_s25 + $0xe0] sm:$0xff] %v1074_v15  ;;  %v1092_v14 = vmax.f32 %v804_v61, 0.0  ;;  %v808_v1 = vadd.f32 %v1763_v9, %v516_v43  ;;  %v520_v33 = vmul.f32 %v1758_v8, %v4041_v46  ;;  %v1093_v15 = vmax.f32 %v805_v62, 0.0  ;;  %v4056_v46 = vld [vmem:[#allocation18_spill] sm:$0xff] }
 0x12a   : > { %1363 = vst [vmem:[%s1819_s25 + $0xe8] sm:$0xff] %v1075_v34  ;;  %v809_v2 = vadd.f32 %v1763_v9, %v517_v30  ;;  %v521_v16 = vmul.f32 %v1758_v8, %v4042_v47  ;;  %v1094_v34 = vmax.f32 %v806_v63, 0.0  ;;  %v810_v48 = vadd.f32 %v1763_v9, %v518_v31  ;;  %v4054_v63 = vld [vmem:[#allocation16_spill] sm:$0xff]  ;;  %v4057_v47 = vld [vmem:[#allocation19_spill] sm:$0xff] }
 0x12b   : > { %1364 = vst [vmem:[%s1819_s25 + $0xf0] sm:$0xff] %v1076_v17  ;;  %v522_v17 = vmul.f32 %v1758_v8, %v4043_v11  ;;  %v1095_v49 = vmax.f32 %v807_v0, 0.0  ;;  %v811_v35 = vadd.f32 %v1763_v9, %v519_v5  ;;  %v1096_v22 = vmax.f32 %v808_v1, 0.0  ;;  %v4058_v11 = vld [vmem:[#allocation20_spill] sm:$0xff] }
 0x12c   : > { %1365 = vst [vmem:[%s1819_s25 + $0xf8] sm:$0xff] %v1077_v6  ;;  %v4044_v6 = vld [vmem:[#allocation6_spill] sm:$0xff]  ;;  %v524_v23 = vmul.f32 %v1758_v8, %v4045_v51  ;;  %v813_v52 = vadd.f32 %v1763_v9, %v521_v16  ;;  %v1098_v53 = vmax.f32 %v810_v48, 0.0  ;;  %v527_v39 = vmul.f32 %v1758_v8, %v4048_v55  ;;  %v4063_v55 = vld [vmem:[#allocation25_spill] sm:$0xff] }
 0x12d   : > { %1366 = vst [vmem:[%s1819_s25 + $0x100] sm:$0xff] %v1078_v36  ;;  %v523_v50 = vmul.f32 %v1758_v8, %v4044_v6  ;;  %v812_v36 = vadd.f32 %v1763_v9, %v520_v33  ;;  %v814_v10 = vadd.f32 %v1763_v9, %v522_v17  ;;  %v1099_v13 = vmax.f32 %v811_v35, 0.0  ;;  %v4059_v6 = vld [vmem:[#allocation21_spill] sm:$0xff]  ;;  %v4060_v51 = vld [vmem:[#allocation22_spill] sm:$0xff] }
 0x12e   : > { %1367 = vst [vmem:[%s1819_s25 + $0x108] sm:$0xff] %v1079_v24  ;;  %v1097_v24 = vmax.f32 %v809_v2, 0.0  ;;  %v816_v56 = vadd.f32 %v1763_v9, %v524_v23  ;;  %v1101_v57 = vmax.f32 %v813_v52, 0.0  ;;  %v530_v20 = vmul.f32 %v2874_v58, %v4051_v59  ;;  %v4066_v59 = vld [vmem:[#allocation28_spill] sm:$0xff] }
 0x12f   : > { %1368 = vst [vmem:[%s1819_s25 + $0x110] sm:$0xff] %v1080_v12  ;;  %v525_v12 = vmul.f32 %v1758_v8, %v4046_v37  ;;  %v819_v60 = vadd.f32 %v2868_v29, %v527_v39  ;;  %v533_v31 = vmul.f32 %v2874_v58, %v4054_v63  ;;  %v534_v5 = vmul.f32 %v2874_v58, %v4055_v45  ;;  %v4061_v37 = vld [vmem:[#allocation23_spill] sm:$0xff]  ;;  %v4070_v45 = vld [vmem:[#allocation32_spill] sm:$0xff] }
 0x130   : > { %1369 = vst [vmem:[%s1819_s25 + $0x118] sm:$0xff] %v1081_v38  ;;  %v4047_v38 = vld [vmem:[#allocation9_spill] sm:$0xff]  ;;  %v1104_v61 = vmax.f32 %v816_v56, 0.0  ;;  %v822_v0 = vadd.f32 %v2868_v29, %v530_v20  ;;  %v535_v33 = vmul.f32 %v2874_v58, %v4056_v46  ;;  %v536_v16 = vmul.f32 %v2874_v58, %v4057_v47  ;;  %v4069_v63 = vld [vmem:[#allocation31_spill] sm:$0xff]  ;;  %v4072_v47 = vld [vmem:[#allocation34_spill] sm:$0xff] }
 0x131   : > { %1370 = vst [vmem:[%s1819_s25 + $0x120] sm:$0xff] %v1082_v26  ;;  %v526_v54 = vmul.f32 %v1758_v8, %v4047_v38  ;;  %v815_v26 = vadd.f32 %v1763_v9, %v523_v50  ;;  %v4050_v9 = vld [vmem:[#allocation12_spill] sm:$0xff]  ;;  %v825_v48 = vadd.f32 %v2868_v29, %v533_v31  ;;  %v537_v17 = vmul.f32 %v2874_v58, %v4058_v11  ;;  %v4071_v46 = vld [vmem:[#allocation33_spill] sm:$0xff]  ;;  %v4073_v11 = vld [vmem:[#allocation35_spill] sm:$0xff] }
 0x132   : > { %1371 = vst [vmem:[%s1819_s25 + $0x128] sm:$0xff] %v1083_v3  ;;  %v1100_v3 = vmax.f32 %v812_v36, 0.0  ;;  %v529_v41 = vmul.f32 %v2874_v58, %v4050_v9  ;;  %v826_v35 = vadd.f32 %v2868_v29, %v534_v5  ;;  %v538_v50 = vmul.f32 %v2874_v58, %v4059_v6  ;;  %v4062_v38 = vld [vmem:[#allocation24_spill] sm:$0xff]  ;;  %v4065_v9 = vld [vmem:[#allocation27_spill] sm:$0xff] }
 0x133   : > { %1372 = vst [vmem:[%s1819_s25 + $0x130] sm:$0xff] %v1084_v40  ;;  %v528_v40 = vmul.f32 %v1758_v8, %v4049_v4  ;;  %v1102_v8 = vmax.f32 %v814_v10, 0.0  ;;  %v827_v36 = vadd.f32 %v2868_v29, %v535_v33  ;;  %v539_v23 = vmul.f32 %v2874_v58, %v4060_v51  ;;  %v4064_v4 = vld [vmem:[#allocation26_spill] sm:$0xff]  ;;  %v4074_v6 = vld [vmem:[#allocation36_spill] sm:$0xff]  ;;  %v4075_v51 = vld [vmem:[#allocation37_spill] sm:$0xff] }
 0x134   : > { %1373 = vst [vmem:[%s1819_s25 + $0x138] sm:$0xff] %v1085_v7  ;;  %v817_v7 = vadd.f32 %v2868_v29, %v525_v12  ;;  %v828_v52 = vadd.f32 %v2868_v29, %v536_v16  ;;  %v540_v12 = vmul.f32 %v2874_v58, %v4061_v37  ;;  %v829_v10 = vadd.f32 %v2868_v29, %v537_v17  ;;  %v4076_v37 = vld [vmem:[#allocation38_spill] sm:$0xff] }
 0x135   : > { %1374 = vst [vmem:[%s1819_s25 + $0x140] sm:$0xff] %v1086_v25  ;;  %v818_v25 = vadd.f32 %v2868_v29, %v526_v54  ;;  %v820_v43 = vadd.f32 %v2868_v29, %v528_v40  ;;  %v541_v54 = vmul.f32 %v2874_v58, %v4062_v38  ;;  %v542_v39 = vmul.f32 %v2874_v58, %v4063_v55  ;;  %v4077_v38 = vld [vmem:[#allocation39_spill] sm:$0xff]  ;;  %v4078_v55 = vld [vmem:[#allocation40_spill] sm:$0xff] }
 0x136   : > { %1375 = vst [vmem:[%s1819_s25 + $0x148] sm:$0xff] %v1087_v42  ;;  %v1103_v42 = vmax.f32 %v815_v26, 0.0  ;;  %v1105_v30 = vmax.f32 %v817_v7, 0.0  ;;  %v830_v26 = vadd.f32 %v2868_v29, %v538_v50  ;;  %v831_v56 = vadd.f32 %v2868_v29, %v539_v23 }
 0x137   : > { %1376 = vst [vmem:[%s1819_s25 + $0x150] sm:$0xff] %v1088_v28  ;;  %v531_v28 = vmul.f32 %v2874_v58, %v4052_v27  ;;  %v543_v40 = vmul.f32 %v2874_v58, %v4064_v4  ;;  %v832_v7 = vadd.f32 %v2868_v29, %v540_v12  ;;  %v545_v20 = vmul.f32 %v2874_v58, %v4066_v59  ;;  %v4067_v27 = vld [vmem:[#allocation29_spill] sm:$0xff]  ;;  %v4081_v59 = vld [vmem:[#allocation43_spill] sm:$0xff] }
 0x138   : > { %1377 = vst [vmem:[%s1819_s25 + $0x158] sm:$0xff] %v1089_v21  ;;  %v4053_v21 = vld [vmem:[#allocation15_spill] sm:$0xff]  ;;  %v548_v31 = vmul.f32 %v2874_v58, %v4069_v63  ;;  %v549_v5 = vmul.f32 %v2874_v58, %v4070_v45  ;;  %v550_v33 = vmul.f32 %v2874_v58, %v4071_v46  ;;  %v551_v16 = vmul.f32 %v2874_v58, %v4072_v47  ;;  %v4079_v4 = vld [vmem:[#allocation41_spill] sm:$0xff]  ;;  %v4084_v63 = vld [vmem:[#allocation46_spill] sm:$0xff] }
 0x139   : > { %1378 = vst [vmem:[%s1819_s25 + $0x160] sm:$0xff] %v1090_v44  ;;  %v532_v62 = vmul.f32 %v2874_v58, %v4053_v21  ;;  %v821_v44 = vadd.f32 %v2868_v29, %v529_v41  ;;  %v823_v1 = vadd.f32 %v2868_v29, %v531_v28  ;;  %v544_v41 = vmul.f32 %v2874_v58, %v4065_v9  ;;  %v4068_v21 = vld [vmem:[#allocation30_spill] sm:$0xff]  ;;  %v4085_v45 = vld [vmem:[#allocation47_spill] sm:$0xff]  ;;  %v4086_v46 = vld [vmem:[#allocation48_spill] sm:$0xff] }
 0x13a   : > { %1379 = vst [vmem:[%s1819_s25 + $0x168] sm:$0xff] %v1091_v32  ;;  %v1106_v32 = vmax.f32 %v818_v25, 0.0  ;;  %v833_v25 = vadd.f32 %v2868_v29, %v541_v54  ;;  %v546_v28 = vmul.f32 %v2874_v58, %v4067_v27  ;;  %v552_v17 = vmul.f32 %v2874_v58, %v4073_v11  ;;  %v4080_v9 = vld [vmem:[#allocation42_spill] sm:$0xff]  ;;  %v4082_v27 = vld [vmem:[#allocation44_spill] sm:$0xff]  ;;  %v4087_v47 = vld [vmem:[#allocation49_spill] sm:$0xff] }
 0x13b   : > { %1380 = vst [vmem:[%s1819_s25 + $0x170] sm:$0xff] %v1092_v14  ;;  %v1107_v14 = vmax.f32 %v819_v60, 0.0  ;;  %v824_v2 = vadd.f32 %v2868_v29, %v532_v62  ;;  %v834_v60 = vadd.f32 %v2868_v29, %v542_v39  ;;  %v547_v62 = vmul.f32 %v2874_v58, %v4068_v21  ;;  %v4083_v21 = vld [vmem:[#allocation45_spill] sm:$0xff]  ;;  %v4088_v11 = vld [vmem:[#allocation50_spill] sm:$0xff] }
 0x13c   : > { %1381 = vst [vmem:[%s1819_s25 + $0x178] sm:$0xff] %v1093_v15  ;;  %v1108_v15 = vmax.f32 %v820_v43, 0.0  ;;  %v835_v43 = vadd.f32 %v2868_v29, %v543_v40  ;;  %v553_v50 = vmul.f32 %v2874_v58, %v4074_v6  ;;  %v554_v23 = vmul.f32 %v2874_v58, %v4075_v51  ;;  %v4089_v6 = vld [vmem:[#allocation51_spill] sm:$0xff]  ;;  %v4090_v51 = vld [vmem:[#allocation52_spill] sm:$0xff] }
 0x13d   : > { %1382 = vst [vmem:[%s1819_s25 + $0x180] sm:$0xff] %v1094_v34  ;;  %v1109_v34 = vmax.f32 %v821_v44, 0.0  ;;  %v836_v44 = vadd.f32 %v2868_v29, %v544_v41  ;;  %v555_v12 = vmul.f32 %v2874_v58, %v4076_v37  ;;  %v556_v54 = vmul.f32 %v2874_v58, %v4077_v38  ;;  %v4091_v37 = vld [vmem:[#allocation53_spill] sm:$0xff]  ;;  %v4092_v38 = vld [vmem:[#allocation54_spill] sm:$0xff] }
 0x13e   : > { %1383 = vst [vmem:[%s1819_s25 + $0x188] sm:$0xff] %v1095_v49  ;;  %v1110_v49 = vmax.f32 %v822_v0, 0.0  ;;  %v837_v0 = vadd.f32 %v2868_v29, %v545_v20  ;;  %v557_v39 = vmul.f32 %v2874_v58, %v4078_v55  ;;  %v558_v40 = vmul.f32 %v2874_v58, %v4079_v4  ;;  %v4093_v55 = vld [vmem:[#allocation55_spill] sm:$0xff]  ;;  %v4094_v4 = vld [vmem:[#allocation56_spill] sm:$0xff] }
 0x13f   : > { %1384 = vst [vmem:[%s1819_s25 + $0x190] sm:$0xff] %v1096_v22  ;;  %v1111_v22 = vmax.f32 %v823_v1, 0.0  ;;  %v838_v1 = vadd.f32 %v2868_v29, %v546_v28  ;;  %v559_v41 = vmul.f32 %v2874_v58, %v4080_v9  ;;  %v560_v20 = vmul.f32 %v2874_v58, %v4081_v59  ;;  %v4095_v9 = vld [vmem:[#allocation57_spill] sm:$0xff]  ;;  %v4096_v59 = vld [vmem:[#allocation58_spill] sm:$0xff] }
 0x140   : > { %1385 = vst [vmem:[%s1819_s25 + $0x198] sm:$0xff] %v1097_v24  ;;  %v1112_v24 = vmax.f32 %v824_v2, 0.0  ;;  %v839_v2 = vadd.f32 %v2868_v29, %v547_v62  ;;  %v561_v28 = vmul.f32 %v2874_v58, %v4082_v27  ;;  %v562_v62 = vmul.f32 %v2874_v58, %v4083_v21  ;;  %v4097_v27 = vld [vmem:[#allocation59_spill] sm:$0xff]  ;;  %v4098_v21 = vld [vmem:[#allocation60_spill] sm:$0xff] }
 0x141   : > { %1386 = vst [vmem:[%s1819_s25 + $0x1a0] sm:$0xff] %v1098_v53  ;;  %v1113_v53 = vmax.f32 %v825_v48, 0.0  ;;  %v840_v48 = vadd.f32 %v2868_v29, %v548_v31  ;;  %v563_v31 = vmul.f32 %v2874_v58, %v4084_v63  ;;  %v4099_v63 = vld [vmem:[#allocation61_spill] sm:$0xff] }
 0x142   : > { %1387 = vst [vmem:[%s1819_s25 + $0x1a8] sm:$0xff] %v1099_v13  ;;  %v1114_v13 = vmax.f32 %v826_v35, 0.0  ;;  %v841_v35 = vadd.f32 %v2868_v29, %v549_v5  ;;  %v564_v5 = vmul.f32 %v2874_v58, %v4085_v45  ;;  %v4100_v45 = vld [vmem:[#allocation62_spill] sm:$0xff] }
 0x143   : > { %1388 = vst [vmem:[%s1819_s25 + $0x1b0] sm:$0xff] %v1100_v3  ;;  %v1115_v3 = vmax.f32 %v827_v36, 0.0  ;;  %v842_v36 = vadd.f32 %v2868_v29, %v550_v33  ;;  %v565_v33 = vmul.f32 %v2874_v58, %v4086_v46  ;;  %v4101_v46 = vld [vmem:[#allocation63_spill] sm:$0xff] }
 0x144   : > { %1389 = vst [vmem:[%s1819_s25 + $0x1b8] sm:$0xff] %v1101_v57  ;;  %v1116_v57 = vmax.f32 %v828_v52, 0.0  ;;  %v843_v52 = vadd.f32 %v2868_v29, %v551_v16  ;;  %v566_v16 = vmul.f32 %v2874_v58, %v4087_v47  ;;  %v4102_v47 = vld [vmem:[#allocation64_spill] sm:$0xff] }
 0x145   : > { %1390 = vst [vmem:[%s1819_s25 + $0x1c0] sm:$0xff] %v1102_v8  ;;  %v1117_v8 = vmax.f32 %v829_v10, 0.0  ;;  %v844_v10 = vadd.f32 %v2868_v29, %v552_v17  ;;  %v567_v17 = vmul.f32 %v2874_v58, %v4088_v11  ;;  %v4103_v11 = vld [vmem:[#allocation65_spill] sm:$0xff] }
 0x146   : > { %1391 = vst [vmem:[%s1819_s25 + $0x1c8] sm:$0xff] %v1103_v42  ;;  %v1118_v42 = vmax.f32 %v830_v26, 0.0  ;;  %v845_v26 = vadd.f32 %v2868_v29, %v553_v50  ;;  %v568_v50 = vmul.f32 %v2874_v58, %v4089_v6  ;;  %v4104_v6 = vld [vmem:[#allocation66_spill] sm:$0xff] }
 0x147   : > { %1392 = vst [vmem:[%s1819_s25 + $0x1d0] sm:$0xff] %v1104_v61  ;;  %v1119_v61 = vmax.f32 %v831_v56, 0.0  ;;  %v846_v56 = vadd.f32 %v2868_v29, %v554_v23  ;;  %v569_v23 = vmul.f32 %v2874_v58, %v4090_v51  ;;  %v4105_v51 = vld [vmem:[#allocation67_spill] sm:$0xff] }
 0x148   : > { %1393 = vst [vmem:[%s1819_s25 + $0x1d8] sm:$0xff] %v1105_v30  ;;  %v1120_v30 = vmax.f32 %v832_v7, 0.0  ;;  %v847_v7 = vadd.f32 %v2868_v29, %v555_v12  ;;  %v570_v12 = vmul.f32 %v2874_v58, %v4091_v37  ;;  %v4106_v37 = vld [vmem:[#allocation68_spill] sm:$0xff] }
 0x149   : > { %1394 = vst [vmem:[%s1819_s25 + $0x1e0] sm:$0xff] %v1106_v32  ;;  %v1121_v32 = vmax.f32 %v833_v25, 0.0  ;;  %v848_v25 = vadd.f32 %v2868_v29, %v556_v54  ;;  %v571_v54 = vmul.f32 %v2874_v58, %v4092_v38  ;;  %v4107_v38 = vld [vmem:[#allocation69_spill] sm:$0xff] }
 0x14a   : > { %1395 = vst [vmem:[%s1819_s25 + $0x1e8] sm:$0xff] %v1107_v14  ;;  %v1122_v14 = vmax.f32 %v834_v60, 0.0  ;;  %v849_v60 = vadd.f32 %v2868_v29, %v557_v39  ;;  %v572_v39 = vmul.f32 %v2874_v58, %v4093_v55  ;;  %v4108_v55 = vld [vmem:[#allocation70_spill] sm:$0xff] }
 0x14b   : > { %1396 = vst [vmem:[%s1819_s25 + $0x1f0] sm:$0xff] %v1108_v15  ;;  %v1123_v15 = vmax.f32 %v835_v43, 0.0  ;;  %v850_v43 = vadd.f32 %v2868_v29, %v558_v40  ;;  %v573_v40 = vmul.f32 %v2874_v58, %v4094_v4  ;;  %v4109_v4 = vld [vmem:[#allocation71_spill] sm:$0xff] }
 0x14c   : > { %1397 = vst [vmem:[%s1819_s25 + $0x1f8] sm:$0xff] %v1109_v34  ;;  %v1124_v34 = vmax.f32 %v836_v44, 0.0  ;;  %v851_v44 = vadd.f32 %v2868_v29, %v559_v41  ;;  %v574_v41 = vmul.f32 %v2874_v58, %v4095_v9  ;;  %v4110_v9 = vld [vmem:[#allocation72_spill] sm:$0xff] }
 0x14d   : > { %1398 = vst [vmem:[%s1819_s25 + $0x200] sm:$0xff] %v1110_v49  ;;  %v1125_v49 = vmax.f32 %v837_v0, 0.0  ;;  %v852_v0 = vadd.f32 %v2868_v29, %v560_v20  ;;  %v575_v20 = vmul.f32 %v2874_v58, %v4096_v59  ;;  %v4111_v59 = vld [vmem:[#allocation73_spill] sm:$0xff] }
 0x14e   : > { %1399 = vst [vmem:[%s1819_s25 + $0x208] sm:$0xff] %v1111_v22  ;;  %v1126_v22 = vmax.f32 %v838_v1, 0.0  ;;  %v853_v1 = vadd.f32 %v2868_v29, %v561_v28  ;;  %v576_v28 = vmul.f32 %v2874_v58, %v4097_v27  ;;  %v4112_v27 = vld [vmem:[#allocation74_spill] sm:$0xff] }
 0x14f   : > { %1400 = vst [vmem:[%s1819_s25 + $0x210] sm:$0xff] %v1112_v24  ;;  %v1127_v24 = vmax.f32 %v839_v2, 0.0  ;;  %v854_v2 = vadd.f32 %v2868_v29, %v562_v62  ;;  %v577_v62 = vmul.f32 %v2874_v58, %v4098_v21  ;;  %v4113_v21 = vld [vmem:[#allocation75_spill] sm:$0xff] }
 0x150   : > { %1401 = vst [vmem:[%s1819_s25 + $0x218] sm:$0xff] %v1113_v53  ;;  %v1128_v53 = vmax.f32 %v840_v48, 0.0  ;;  %v855_v48 = vadd.f32 %v2868_v29, %v563_v31  ;;  %v578_v31 = vmul.f32 %v2874_v58, %v4099_v63  ;;  %v4114_v63 = vld [vmem:[#allocation76_spill] sm:$0xff] }
 0x151   : > { %1402 = vst [vmem:[%s1819_s25 + $0x220] sm:$0xff] %v1114_v13  ;;  %v1129_v13 = vmax.f32 %v841_v35, 0.0  ;;  %v856_v35 = vadd.f32 %v2868_v29, %v564_v5  ;;  %v579_v5 = vmul.f32 %v2874_v58, %v4100_v45  ;;  %v4115_v45 = vld [vmem:[#allocation77_spill] sm:$0xff] }
 0x152   : > { %1403 = vst [vmem:[%s1819_s25 + $0x228] sm:$0xff] %v1115_v3  ;;  %v1130_v3 = vmax.f32 %v842_v36, 0.0  ;;  %v857_v36 = vadd.f32 %v2868_v29, %v565_v33  ;;  %v580_v33 = vmul.f32 %v2874_v58, %v4101_v46  ;;  %v4116_v46 = vld [vmem:[#allocation78_spill] sm:$0xff] }
 0x153   : > { %1404 = vst [vmem:[%s1819_s25 + $0x230] sm:$0xff] %v1116_v57  ;;  %v1131_v57 = vmax.f32 %v843_v52, 0.0  ;;  %v858_v52 = vadd.f32 %v2868_v29, %v566_v16  ;;  %v581_v16 = vmul.f32 %v2874_v58, %v4102_v47  ;;  %v4117_v47 = vld [vmem:[#allocation79_spill] sm:$0xff] }
 0x154   : > { %1405 = vst [vmem:[%s1819_s25 + $0x238] sm:$0xff] %v1117_v8  ;;  %v1132_v8 = vmax.f32 %v844_v10, 0.0  ;;  %v859_v10 = vadd.f32 %v2868_v29, %v567_v17  ;;  %v582_v17 = vmul.f32 %v2874_v58, %v4103_v11  ;;  %v4118_v11 = vld [vmem:[#allocation80_spill] sm:$0xff] }
 0x155   : > { %1406 = vst [vmem:[%s1819_s25 + $0x240] sm:$0xff] %v1118_v42  ;;  %v1133_v42 = vmax.f32 %v845_v26, 0.0  ;;  %v860_v26 = vadd.f32 %v2868_v29, %v568_v50  ;;  %v583_v50 = vmul.f32 %v2874_v58, %v4104_v6  ;;  %v4119_v6 = vld [vmem:[#allocation81_spill] sm:$0xff] }
 0x156   : > { %1407 = vst [vmem:[%s1819_s25 + $0x248] sm:$0xff] %v1119_v61  ;;  %v1134_v61 = vmax.f32 %v846_v56, 0.0  ;;  %v861_v56 = vadd.f32 %v2868_v29, %v569_v23  ;;  %v584_v23 = vmul.f32 %v2874_v58, %v4105_v51  ;;  %v4120_v51 = vld [vmem:[#allocation82_spill] sm:$0xff] }
 0x157   : > { %1408 = vst [vmem:[%s1819_s25 + $0x250] sm:$0xff] %v1120_v30  ;;  %v1135_v30 = vmax.f32 %v847_v7, 0.0  ;;  %v862_v7 = vadd.f32 %v2868_v29, %v570_v12  ;;  %v585_v12 = vmul.f32 %v2874_v58, %v4106_v37  ;;  %v4121_v37 = vld [vmem:[#allocation83_spill] sm:$0xff] }
 0x158   : > { %1409 = vst [vmem:[%s1819_s25 + $0x258] sm:$0xff] %v1121_v32  ;;  %v1136_v32 = vmax.f32 %v848_v25, 0.0  ;;  %v863_v25 = vadd.f32 %v2868_v29, %v571_v54  ;;  %v586_v54 = vmul.f32 %v2874_v58, %v4107_v38  ;;  %v4122_v38 = vld [vmem:[#allocation84_spill] sm:$0xff] }
 0x159   : > { %1410 = vst [vmem:[%s1819_s25 + $0x260] sm:$0xff] %v1122_v14  ;;  %v1137_v14 = vmax.f32 %v849_v60, 0.0  ;;  %v864_v60 = vadd.f32 %v2868_v29, %v572_v39  ;;  %v587_v39 = vmul.f32 %v2874_v58, %v4108_v55  ;;  %v4123_v55 = vld [vmem:[#allocation85_spill] sm:$0xff] }
 0x15a   : > { %1411 = vst [vmem:[%s1819_s25 + $0x268] sm:$0xff] %v1123_v15  ;;  %v1138_v15 = vmax.f32 %v850_v43, 0.0  ;;  %v865_v43 = vadd.f32 %v2868_v29, %v573_v40  ;;  %v588_v40 = vmul.f32 %v2874_v58, %v4109_v4  ;;  %v4124_v4 = vld [vmem:[#allocation86_spill] sm:$0xff] }
 0x15b   : > { %1412 = vst [vmem:[%s1819_s25 + $0x270] sm:$0xff] %v1124_v34  ;;  %v1139_v34 = vmax.f32 %v851_v44, 0.0  ;;  %v866_v44 = vadd.f32 %v2868_v29, %v574_v41  ;;  %v589_v41 = vmul.f32 %v2874_v58, %v4110_v9  ;;  %v4125_v9 = vld [vmem:[#allocation87_spill] sm:$0xff] }
 0x15c   : > { %1413 = vst [vmem:[%s1819_s25 + $0x278] sm:$0xff] %v1125_v49  ;;  %v1140_v49 = vmax.f32 %v852_v0, 0.0  ;;  %v867_v0 = vadd.f32 %v2868_v29, %v575_v20  ;;  %v590_v20 = vmul.f32 %v2874_v58, %v4111_v59  ;;  %v4126_v59 = vld [vmem:[#allocation88_spill] sm:$0xff] }
 0x15d   : > { %1414 = vst [vmem:[%s1819_s25 + $0x280] sm:$0xff] %v1126_v22  ;;  %v1141_v22 = vmax.f32 %v853_v1, 0.0  ;;  %v868_v1 = vadd.f32 %v2868_v29, %v576_v28  ;;  %v591_v28 = vmul.f32 %v2874_v58, %v4112_v27  ;;  %v4127_v27 = vld [vmem:[#allocation89_spill] sm:$0xff] }
 0x15e   : > { %1415 = vst [vmem:[%s1819_s25 + $0x288] sm:$0xff] %v1127_v24  ;;  %v1142_v24 = vmax.f32 %v854_v2, 0.0  ;;  %v869_v2 = vadd.f32 %v2868_v29, %v577_v62  ;;  %v592_v62 = vmul.f32 %v2874_v58, %v4113_v21  ;;  %v4128_v21 = vld [vmem:[#allocation90_spill] sm:$0xff] }
 0x15f   : > { %1416 = vst [vmem:[%s1819_s25 + $0x290] sm:$0xff] %v1128_v53  ;;  %v1143_v53 = vmax.f32 %v855_v48, 0.0  ;;  %v870_v48 = vadd.f32 %v2868_v29, %v578_v31  ;;  %v593_v31 = vmul.f32 %v2874_v58, %v4114_v63  ;;  %v4129_v63 = vld [vmem:[#allocation91_spill] sm:$0xff] }
 0x160   : > { %1417 = vst [vmem:[%s1819_s25 + $0x298] sm:$0xff] %v1129_v13  ;;  %v1144_v13 = vmax.f32 %v856_v35, 0.0  ;;  %v871_v35 = vadd.f32 %v2868_v29, %v579_v5  ;;  %v594_v5 = vmul.f32 %v2874_v58, %v4115_v45  ;;  %v4130_v45 = vld [vmem:[#allocation92_spill] sm:$0xff] }
 0x161   : > { %1418 = vst [vmem:[%s1819_s25 + $0x2a0] sm:$0xff] %v1130_v3  ;;  %v1145_v3 = vmax.f32 %v857_v36, 0.0  ;;  %v872_v36 = vadd.f32 %v2868_v29, %v580_v33  ;;  %v595_v33 = vmul.f32 %v2874_v58, %v4116_v46  ;;  %v4131_v46 = vld [vmem:[#allocation93_spill] sm:$0xff] }
 0x162   : > { %1419 = vst [vmem:[%s1819_s25 + $0x2a8] sm:$0xff] %v1131_v57  ;;  %v1146_v57 = vmax.f32 %v858_v52, 0.0  ;;  %v873_v52 = vadd.f32 %v2868_v29, %v581_v16  ;;  %v596_v16 = vmul.f32 %v2874_v58, %v4117_v47  ;;  %v4132_v47 = vld [vmem:[#allocation94_spill] sm:$0xff] }
 0x163   : > { %1420 = vst [vmem:[%s1819_s25 + $0x2b0] sm:$0xff] %v1132_v8  ;;  %v1147_v8 = vmax.f32 %v859_v10, 0.0  ;;  %v874_v10 = vadd.f32 %v2868_v29, %v582_v17  ;;  %v597_v17 = vmul.f32 %v2874_v58, %v4118_v11  ;;  %v4133_v11 = vld [vmem:[#allocation95_spill] sm:$0xff] }
 0x164   : > { %1421 = vst [vmem:[%s1819_s25 + $0x2b8] sm:$0xff] %v1133_v42  ;;  %v1148_v42 = vmax.f32 %v860_v26, 0.0  ;;  %v875_v26 = vadd.f32 %v2868_v29, %v583_v50  ;;  %v598_v50 = vmul.f32 %v2874_v58, %v4119_v6  ;;  %v4134_v6 = vld [vmem:[#allocation96_spill] sm:$0xff] }
 0x165   : > { %1422 = vst [vmem:[%s1819_s25 + $0x2c0] sm:$0xff] %v1134_v61  ;;  %v1149_v61 = vmax.f32 %v861_v56, 0.0  ;;  %v876_v56 = vadd.f32 %v2868_v29, %v584_v23  ;;  %v599_v23 = vmul.f32 %v2874_v58, %v4120_v51  ;;  %v4135_v51 = vld [vmem:[#allocation97_spill] sm:$0xff] }
 0x166   : > { %1423 = vst [vmem:[%s1819_s25 + $0x2c8] sm:$0xff] %v1135_v30  ;;  %v1150_v30 = vmax.f32 %v862_v7, 0.0  ;;  %v877_v7 = vadd.f32 %v2868_v29, %v585_v12  ;;  %v600_v12 = vmul.f32 %v2874_v58, %v4121_v37  ;;  %v4136_v37 = vld [vmem:[#allocation98_spill] sm:$0xff] }
 0x167   : > { %1424 = vst [vmem:[%s1819_s25 + $0x2d0] sm:$0xff] %v1136_v32  ;;  %v1151_v32 = vmax.f32 %v863_v25, 0.0  ;;  %v878_v25 = vadd.f32 %v2868_v29, %v586_v54  ;;  %v601_v54 = vmul.f32 %v2874_v58, %v4122_v38  ;;  %v4137_v38 = vld [vmem:[#allocation99_spill] sm:$0xff] }
 0x168   : > { %1425 = vst [vmem:[%s1819_s25 + $0x2d8] sm:$0xff] %v1137_v14  ;;  %v1152_v14 = vmax.f32 %v864_v60, 0.0  ;;  %v879_v60 = vadd.f32 %v2868_v29, %v587_v39  ;;  %v602_v39 = vmul.f32 %v2874_v58, %v4123_v55  ;;  %v4138_v55 = vld [vmem:[#allocation100_spill] sm:$0xff] }
 0x169   : > { %1426 = vst [vmem:[%s1819_s25 + $0x2e0] sm:$0xff] %v1138_v15  ;;  %v1153_v15 = vmax.f32 %v865_v43, 0.0  ;;  %v880_v43 = vadd.f32 %v2868_v29, %v588_v40  ;;  %v603_v40 = vmul.f32 %v2874_v58, %v4124_v4  ;;  %v4139_v4 = vld [vmem:[#allocation101_spill] sm:$0xff] }
 0x16a   : > { %1427 = vst [vmem:[%s1819_s25 + $0x2e8] sm:$0xff] %v1139_v34  ;;  %v1154_v34 = vmax.f32 %v866_v44, 0.0  ;;  %v881_v44 = vadd.f32 %v2868_v29, %v589_v41  ;;  %v604_v41 = vmul.f32 %v2874_v58, %v4125_v9  ;;  %v4140_v9 = vld [vmem:[#allocation102_spill] sm:$0xff] }
 0x16b   : > { %1428 = vst [vmem:[%s1819_s25 + $0x2f0] sm:$0xff] %v1140_v49  ;;  %v1155_v49 = vmax.f32 %v867_v0, 0.0  ;;  %v882_v0 = vadd.f32 %v2868_v29, %v590_v20  ;;  %v605_v20 = vmul.f32 %v2874_v58, %v4126_v59  ;;  %v4141_v59 = vld [vmem:[#allocation103_spill] sm:$0xff] }
 0x16c   : > { %1429 = vst [vmem:[%s1819_s25 + $0x2f8] sm:$0xff] %v1141_v22  ;;  %v1156_v22 = vmax.f32 %v868_v1, 0.0  ;;  %v883_v1 = vadd.f32 %v2868_v29, %v591_v28  ;;  %v606_v28 = vmul.f32 %v2874_v58, %v4127_v27  ;;  %v4142_v27 = vld [vmem:[#allocation104_spill] sm:$0xff] }
 0x16d   : > { %1430 = vst [vmem:[%s1819_s25 + $0x300] sm:$0xff] %v1142_v24  ;;  %v1157_v24 = vmax.f32 %v869_v2, 0.0  ;;  %v884_v2 = vadd.f32 %v2868_v29, %v592_v62  ;;  %v607_v62 = vmul.f32 %v2874_v58, %v4128_v21  ;;  %v4143_v21 = vld [vmem:[#allocation105_spill] sm:$0xff] }
 0x16e   : > { %1431 = vst [vmem:[%s1819_s25 + $0x308] sm:$0xff] %v1143_v53  ;;  %v1158_v53 = vmax.f32 %v870_v48, 0.0  ;;  %v885_v48 = vadd.f32 %v2868_v29, %v593_v31  ;;  %v608_v31 = vmul.f32 %v2874_v58, %v4129_v63  ;;  %v4144_v63 = vld [vmem:[#allocation106_spill] sm:$0xff] }
 0x16f   : > { %1432 = vst [vmem:[%s1819_s25 + $0x310] sm:$0xff] %v1144_v13  ;;  %v1159_v13 = vmax.f32 %v871_v35, 0.0  ;;  %v886_v35 = vadd.f32 %v2868_v29, %v594_v5  ;;  %v609_v5 = vmul.f32 %v2874_v58, %v4130_v45  ;;  %v4145_v45 = vld [vmem:[#allocation107_spill] sm:$0xff] }
 0x170   : > { %1433 = vst [vmem:[%s1819_s25 + $0x318] sm:$0xff] %v1145_v3  ;;  %v1160_v3 = vmax.f32 %v872_v36, 0.0  ;;  %v887_v36 = vadd.f32 %v2868_v29, %v595_v33  ;;  %v610_v33 = vmul.f32 %v2874_v58, %v4131_v46  ;;  %v4146_v46 = vld [vmem:[#allocation108_spill] sm:$0xff] }
 0x171   : > { %1434 = vst [vmem:[%s1819_s25 + $0x320] sm:$0xff] %v1146_v57  ;;  %v1161_v57 = vmax.f32 %v873_v52, 0.0  ;;  %v888_v52 = vadd.f32 %v2868_v29, %v596_v16  ;;  %v611_v16 = vmul.f32 %v2874_v58, %v4132_v47  ;;  %v4147_v47 = vld [vmem:[#allocation109_spill] sm:$0xff] }
 0x172   : > { %1435 = vst [vmem:[%s1819_s25 + $0x328] sm:$0xff] %v1147_v8  ;;  %v1162_v8 = vmax.f32 %v874_v10, 0.0  ;;  %v889_v10 = vadd.f32 %v2868_v29, %v597_v17  ;;  %v612_v17 = vmul.f32 %v2874_v58, %v4133_v11  ;;  %v4148_v11 = vld [vmem:[#allocation110_spill] sm:$0xff] }
 0x173   : > { %1436 = vst [vmem:[%s1819_s25 + $0x330] sm:$0xff] %v1148_v42  ;;  %v1163_v42 = vmax.f32 %v875_v26, 0.0  ;;  %v890_v26 = vadd.f32 %v2868_v29, %v598_v50  ;;  %v613_v50 = vmul.f32 %v2874_v58, %v4134_v6  ;;  %v4149_v6 = vld [vmem:[#allocation111_spill] sm:$0xff] }
 0x174   : > { %1437 = vst [vmem:[%s1819_s25 + $0x338] sm:$0xff] %v1149_v61  ;;  %v1164_v61 = vmax.f32 %v876_v56, 0.0  ;;  %v891_v56 = vadd.f32 %v2868_v29, %v599_v23  ;;  %v614_v23 = vmul.f32 %v2874_v58, %v4135_v51  ;;  %v4150_v51 = vld [vmem:[#allocation112_spill] sm:$0xff] }
 0x175   : > { %1438 = vst [vmem:[%s1819_s25 + $0x340] sm:$0xff] %v1150_v30  ;;  %v1165_v30 = vmax.f32 %v877_v7, 0.0  ;;  %v892_v7 = vadd.f32 %v2868_v29, %v600_v12  ;;  %v615_v12 = vmul.f32 %v2874_v58, %v4136_v37  ;;  %v4151_v37 = vld [vmem:[#allocation113_spill] sm:$0xff] }
 0x176   : > { %1439 = vst [vmem:[%s1819_s25 + $0x348] sm:$0xff] %v1151_v32  ;;  %v1166_v32 = vmax.f32 %v878_v25, 0.0  ;;  %v893_v25 = vadd.f32 %v2868_v29, %v601_v54  ;;  %v616_v54 = vmul.f32 %v2874_v58, %v4137_v38  ;;  %v4152_v38 = vld [vmem:[#allocation114_spill] sm:$0xff] }
 0x177   : > { %1440 = vst [vmem:[%s1819_s25 + $0x350] sm:$0xff] %v1152_v14  ;;  %v1167_v14 = vmax.f32 %v879_v60, 0.0  ;;  %v894_v60 = vadd.f32 %v2868_v29, %v602_v39  ;;  %v617_v39 = vmul.f32 %v2874_v58, %v4138_v55  ;;  %v4153_v55 = vld [vmem:[#allocation115_spill] sm:$0xff] }
 0x178   : > { %1441 = vst [vmem:[%s1819_s25 + $0x358] sm:$0xff] %v1153_v15  ;;  %v1168_v15 = vmax.f32 %v880_v43, 0.0  ;;  %v895_v43 = vadd.f32 %v2868_v29, %v603_v40  ;;  %v618_v40 = vmul.f32 %v2874_v58, %v4139_v4  ;;  %v4154_v4 = vld [vmem:[#allocation116_spill] sm:$0xff] }
 0x179   : > { %1442 = vst [vmem:[%s1819_s25 + $0x360] sm:$0xff] %v1154_v34  ;;  %v1169_v34 = vmax.f32 %v881_v44, 0.0  ;;  %v896_v44 = vadd.f32 %v2868_v29, %v604_v41  ;;  %v619_v41 = vmul.f32 %v2874_v58, %v4140_v9  ;;  %v4155_v9 = vld [vmem:[#allocation117_spill] sm:$0xff] }
 0x17a   : > { %1443 = vst [vmem:[%s1819_s25 + $0x368] sm:$0xff] %v1155_v49  ;;  %v1170_v49 = vmax.f32 %v882_v0, 0.0  ;;  %v897_v0 = vadd.f32 %v2868_v29, %v605_v20  ;;  %v620_v20 = vmul.f32 %v2874_v58, %v4141_v59  ;;  %v4156_v59 = vld [vmem:[#allocation118_spill] sm:$0xff] }
 0x17b   : > { %1444 = vst [vmem:[%s1819_s25 + $0x370] sm:$0xff] %v1156_v22  ;;  %v1171_v22 = vmax.f32 %v883_v1, 0.0  ;;  %v898_v1 = vadd.f32 %v2868_v29, %v606_v28  ;;  %v621_v28 = vmul.f32 %v2874_v58, %v4142_v27  ;;  %v4157_v27 = vld [vmem:[#allocation119_spill] sm:$0xff] }
 0x17c   : > { %1445 = vst [vmem:[%s1819_s25 + $0x378] sm:$0xff] %v1157_v24  ;;  %v1172_v24 = vmax.f32 %v884_v2, 0.0  ;;  %v899_v2 = vadd.f32 %v2868_v29, %v607_v62  ;;  %v622_v62 = vmul.f32 %v2874_v58, %v4143_v21  ;;  %v4158_v21 = vld [vmem:[#allocation120_spill] sm:$0xff] }
 0x17d   : > { %1446 = vst [vmem:[%s1819_s25 + $0x380] sm:$0xff] %v1158_v53  ;;  %v1173_v53 = vmax.f32 %v885_v48, 0.0  ;;  %v900_v48 = vadd.f32 %v2868_v29, %v608_v31  ;;  %v623_v31 = vmul.f32 %v2874_v58, %v4144_v63  ;;  %v4159_v63 = vld [vmem:[#allocation121_spill] sm:$0xff] }
 0x17e   : > { %1447 = vst [vmem:[%s1819_s25 + $0x388] sm:$0xff] %v1159_v13  ;;  %v1174_v13 = vmax.f32 %v886_v35, 0.0  ;;  %v901_v35 = vadd.f32 %v2868_v29, %v609_v5  ;;  %v624_v5 = vmul.f32 %v2874_v58, %v4145_v45  ;;  %v4160_v45 = vld [vmem:[#allocation122_spill] sm:$0xff] }
 0x17f   : > { %1448 = vst [vmem:[%s1819_s25 + $0x390] sm:$0xff] %v1160_v3  ;;  %v1175_v3 = vmax.f32 %v887_v36, 0.0  ;;  %v902_v36 = vadd.f32 %v2868_v29, %v610_v33  ;;  %v625_v33 = vmul.f32 %v2874_v58, %v4146_v46  ;;  %v4161_v46 = vld [vmem:[#allocation123_spill] sm:$0xff] }
 0x180   : > { %1449 = vst [vmem:[%s1819_s25 + $0x398] sm:$0xff] %v1161_v57  ;;  %v1176_v57 = vmax.f32 %v888_v52, 0.0  ;;  %v903_v52 = vadd.f32 %v2868_v29, %v611_v16  ;;  %v626_v16 = vmul.f32 %v2874_v58, %v4147_v47  ;;  %v4162_v47 = vld [vmem:[#allocation124_spill] sm:$0xff] }
 0x181   : > { %1450 = vst [vmem:[%s1819_s25 + $0x3a0] sm:$0xff] %v1162_v8  ;;  %v1177_v8 = vmax.f32 %v889_v10, 0.0  ;;  %v904_v10 = vadd.f32 %v2868_v29, %v612_v17  ;;  %v627_v17 = vmul.f32 %v2874_v58, %v4148_v11  ;;  %v4163_v11 = vld [vmem:[#allocation125_spill] sm:$0xff] }
 0x182   : > { %1451 = vst [vmem:[%s1819_s25 + $0x3a8] sm:$0xff] %v1163_v42  ;;  %v1178_v42 = vmax.f32 %v890_v26, 0.0  ;;  %v905_v26 = vadd.f32 %v2868_v29, %v613_v50  ;;  %v628_v50 = vmul.f32 %v2874_v58, %v4149_v6  ;;  %v4164_v6 = vld [vmem:[#allocation126_spill] sm:$0xff] }
 0x183   : > { %1452 = vst [vmem:[%s1819_s25 + $0x3b0] sm:$0xff] %v1164_v61  ;;  %v1179_v61 = vmax.f32 %v891_v56, 0.0  ;;  %v906_v56 = vadd.f32 %v2868_v29, %v614_v23  ;;  %v629_v23 = vmul.f32 %v2874_v58, %v4150_v51  ;;  %v4165_v51 = vld [vmem:[#allocation127_spill] sm:$0xff] }
 0x184   : > { %1453 = vst [vmem:[%s1819_s25 + $0x3b8] sm:$0xff] %v1165_v30  ;;  %v1180_v30 = vmax.f32 %v892_v7, 0.0  ;;  %v907_v7 = vadd.f32 %v2868_v29, %v615_v12  ;;  %v630_v12 = vmul.f32 %v2874_v58, %v4151_v37  ;;  %v4166_v37 = vld [vmem:[#allocation128_spill] sm:$0xff] }
 0x185   : > { %1454 = vst [vmem:[%s1819_s25 + $0x3c0] sm:$0xff] %v1166_v32  ;;  %v1181_v32 = vmax.f32 %v893_v25, 0.0  ;;  %v908_v25 = vadd.f32 %v2868_v29, %v616_v54  ;;  %v631_v54 = vmul.f32 %v2874_v58, %v4152_v38  ;;  %v4167_v38 = vld [vmem:[#allocation129_spill] sm:$0xff] }
 0x186   : > { %1455 = vst [vmem:[%s1819_s25 + $0x3c8] sm:$0xff] %v1167_v14  ;;  %v1182_v14 = vmax.f32 %v894_v60, 0.0  ;;  %v909_v60 = vadd.f32 %v2868_v29, %v617_v39  ;;  %v632_v39 = vmul.f32 %v2874_v58, %v4153_v55  ;;  %v4168_v55 = vld [vmem:[#allocation130_spill] sm:$0xff] }
 0x187   : > { %1456 = vst [vmem:[%s1819_s25 + $0x3d0] sm:$0xff] %v1168_v15  ;;  %v1183_v15 = vmax.f32 %v895_v43, 0.0  ;;  %v910_v43 = vadd.f32 %v2868_v29, %v618_v40  ;;  %v633_v40 = vmul.f32 %v2874_v58, %v4154_v4  ;;  %v4169_v4 = vld [vmem:[#allocation131_spill] sm:$0xff] }
 0x188   : > { %1457 = vst [vmem:[%s1819_s25 + $0x3d8] sm:$0xff] %v1169_v34  ;;  %v1184_v34 = vmax.f32 %v896_v44, 0.0  ;;  %v911_v44 = vadd.f32 %v2868_v29, %v619_v41  ;;  %v634_v41 = vmul.f32 %v2874_v58, %v4155_v9  ;;  %v4170_v9 = vld [vmem:[#allocation132_spill] sm:$0xff] }
 0x189   : > { %1458 = vst [vmem:[%s1819_s25 + $0x3e0] sm:$0xff] %v1170_v49  ;;  %v1185_v49 = vmax.f32 %v897_v0, 0.0  ;;  %v912_v0 = vadd.f32 %v2868_v29, %v620_v20  ;;  %v635_v20 = vmul.f32 %v2874_v58, %v4156_v59  ;;  %v4171_v59 = vld [vmem:[#allocation133_spill] sm:$0xff] }
 0x18a   : > { %1459 = vst [vmem:[%s1819_s25 + $0x3e8] sm:$0xff] %v1171_v22  ;;  %v1186_v22 = vmax.f32 %v898_v1, 0.0  ;;  %v913_v1 = vadd.f32 %v2868_v29, %v621_v28  ;;  %v636_v28 = vmul.f32 %v2874_v58, %v4157_v27  ;;  %v4172_v27 = vld [vmem:[#allocation134_spill] sm:$0xff] }
 0x18b   : > { %1460 = vst [vmem:[%s1819_s25 + $0x3f0] sm:$0xff] %v1172_v24  ;;  %v1187_v24 = vmax.f32 %v899_v2, 0.0  ;;  %v914_v2 = vadd.f32 %v2868_v29, %v622_v62  ;;  %v637_v62 = vmul.f32 %v2874_v58, %v4158_v21  ;;  %v4173_v21 = vld [vmem:[#allocation135_spill] sm:$0xff] }
 0x18c   : > { %1461 = vst [vmem:[%s1819_s25 + $0x3f8] sm:$0xff] %v1173_v53  ;;  %v1188_v53 = vmax.f32 %v900_v48, 0.0  ;;  %v915_v48 = vadd.f32 %v2868_v29, %v623_v31  ;;  %v638_v31 = vmul.f32 %v2874_v58, %v4159_v63  ;;  %v4174_v63 = vld [vmem:[#allocation136_spill] sm:$0xff] }
 0x18d   : > { %1462 = vst [vmem:[%s1819_s25 + $0x400] sm:$0xff] %v1174_v13  ;;  %v1189_v13 = vmax.f32 %v901_v35, 0.0  ;;  %v916_v35 = vadd.f32 %v2868_v29, %v624_v5  ;;  %v639_v5 = vmul.f32 %v2874_v58, %v4160_v45  ;;  %v4175_v45 = vld [vmem:[#allocation137_spill] sm:$0xff] }
 0x18e   : > { %1463 = vst [vmem:[%s1819_s25 + $0x408] sm:$0xff] %v1175_v3  ;;  %v1190_v3 = vmax.f32 %v902_v36, 0.0  ;;  %v917_v36 = vadd.f32 %v2868_v29, %v625_v33  ;;  %v640_v33 = vmul.f32 %v2874_v58, %v4161_v46  ;;  %v4176_v46 = vld [vmem:[#allocation138_spill] sm:$0xff] }
 0x18f   : > { %1464 = vst [vmem:[%s1819_s25 + $0x410] sm:$0xff] %v1176_v57  ;;  %v1191_v57 = vmax.f32 %v903_v52, 0.0  ;;  %v918_v52 = vadd.f32 %v2868_v29, %v626_v16  ;;  %v641_v16 = vmul.f32 %v2874_v58, %v4162_v47  ;;  %v4177_v47 = vld [vmem:[#allocation139_spill] sm:$0xff] }
 0x190   : > { %1465 = vst [vmem:[%s1819_s25 + $0x418] sm:$0xff] %v1177_v8  ;;  %v1192_v8 = vmax.f32 %v904_v10, 0.0  ;;  %v919_v10 = vadd.f32 %v2868_v29, %v627_v17  ;;  %v642_v17 = vmul.f32 %v2874_v58, %v4163_v11 }
 0x191   : > { %1466 = vst [vmem:[%s1819_s25 + $0x420] sm:$0xff] %v1178_v42  ;;  %v1193_v42 = vmax.f32 %v905_v26, 0.0  ;;  %v920_v26 = vadd.f32 %v2868_v29, %v628_v50  ;;  %v643_v50 = vmul.f32 %v2874_v58, %v4164_v6  ;;  %v4179_v6 = vld [vmem:[#allocation141_spill] sm:$0xff] }
 0x192   : > { %1467 = vst [vmem:[%s1819_s25 + $0x428] sm:$0xff] %v1179_v61  ;;  %v1194_v61 = vmax.f32 %v906_v56, 0.0  ;;  %v921_v56 = vadd.f32 %v2868_v29, %v629_v23  ;;  %v644_v23 = vmul.f32 %v2874_v58, %v4165_v51  ;;  %v4180_v51 = vld [vmem:[#allocation142_spill] sm:$0xff] }
 0x193   : > { %1468 = vst [vmem:[%s1819_s25 + $0x430] sm:$0xff] %v1180_v30  ;;  %v1195_v30 = vmax.f32 %v907_v7, 0.0  ;;  %v922_v7 = vadd.f32 %v2868_v29, %v630_v12  ;;  %v645_v12 = vmul.f32 %v2874_v58, %v4166_v37  ;;  %v4181_v37 = vld [vmem:[#allocation143_spill] sm:$0xff] }
 0x194   : > { %1469 = vst [vmem:[%s1819_s25 + $0x438] sm:$0xff] %v1181_v32  ;;  %v1196_v32 = vmax.f32 %v908_v25, 0.0  ;;  %v923_v25 = vadd.f32 %v2868_v29, %v631_v54  ;;  %v646_v54 = vmul.f32 %v2874_v58, %v4167_v38  ;;  %v4182_v38 = vld [vmem:[#allocation144_spill] sm:$0xff] }
 0x195   : > { %1470 = vst [vmem:[%s1819_s25 + $0x440] sm:$0xff] %v1182_v14  ;;  %v1197_v14 = vmax.f32 %v909_v60, 0.0  ;;  %v924_v60 = vadd.f32 %v2868_v29, %v632_v39  ;;  %v647_v39 = vmul.f32 %v2874_v58, %v4168_v55  ;;  %v4183_v55 = vld [vmem:[#allocation145_spill] sm:$0xff] }
 0x196   : > { %1471 = vst [vmem:[%s1819_s25 + $0x448] sm:$0xff] %v1183_v15  ;;  %v1198_v15 = vmax.f32 %v910_v43, 0.0  ;;  %v925_v43 = vadd.f32 %v2868_v29, %v633_v40  ;;  %v648_v40 = vmul.f32 %v2874_v58, %v4169_v4  ;;  %v4184_v4 = vld [vmem:[#allocation146_spill] sm:$0xff] }
 0x197   : > { %1472 = vst [vmem:[%s1819_s25 + $0x450] sm:$0xff] %v1184_v34  ;;  %v1199_v34 = vmax.f32 %v911_v44, 0.0  ;;  %v926_v44 = vadd.f32 %v2868_v29, %v634_v41  ;;  %v649_v41 = vmul.f32 %v2874_v58, %v4170_v9  ;;  %v4185_v9 = vld [vmem:[#allocation147_spill] sm:$0xff] }
 0x198   : > { %1473 = vst [vmem:[%s1819_s25 + $0x458] sm:$0xff] %v1185_v49  ;;  %v1200_v49 = vmax.f32 %v912_v0, 0.0  ;;  %v927_v0 = vadd.f32 %v2868_v29, %v635_v20  ;;  %v650_v20 = vmul.f32 %v2874_v58, %v4171_v59  ;;  %v4186_v59 = vld [vmem:[#allocation148_spill] sm:$0xff] }
 0x199   : > { %1474 = vst [vmem:[%s1819_s25 + $0x460] sm:$0xff] %v1186_v22  ;;  %v1201_v22 = vmax.f32 %v913_v1, 0.0  ;;  %v928_v1 = vadd.f32 %v2868_v29, %v636_v28  ;;  %v651_v28 = vmul.f32 %v2874_v58, %v4172_v27  ;;  %v4187_v27 = vld [vmem:[#allocation149_spill] sm:$0xff] }
 0x19a   : > { %1475 = vst [vmem:[%s1819_s25 + $0x468] sm:$0xff] %v1187_v24  ;;  %v1202_v24 = vmax.f32 %v914_v2, 0.0  ;;  %v929_v2 = vadd.f32 %v2868_v29, %v637_v62  ;;  %v652_v62 = vmul.f32 %v2874_v58, %v4173_v21  ;;  %v4188_v21 = vld [vmem:[#allocation150_spill] sm:$0xff] }
 0x19b   : > { %1476 = vst [vmem:[%s1819_s25 + $0x470] sm:$0xff] %v1188_v53  ;;  %v1203_v53 = vmax.f32 %v915_v48, 0.0  ;;  %v930_v48 = vadd.f32 %v2868_v29, %v638_v31  ;;  %v653_v31 = vmul.f32 %v2874_v58, %v4174_v63  ;;  %v4189_v63 = vld [vmem:[#allocation151_spill] sm:$0xff] }
 0x19c   : > { %1477 = vst [vmem:[%s1819_s25 + $0x478] sm:$0xff] %v1189_v13  ;;  %v1204_v13 = vmax.f32 %v916_v35, 0.0  ;;  %v931_v35 = vadd.f32 %v2868_v29, %v639_v5  ;;  %v654_v5 = vmul.f32 %v2874_v58, %v4175_v45  ;;  %v4190_v45 = vld [vmem:[#allocation152_spill] sm:$0xff] }
 0x19d   : > { %1478 = vst [vmem:[%s1819_s25 + $0x480] sm:$0xff] %v1190_v3  ;;  %v1205_v3 = vmax.f32 %v917_v36, 0.0  ;;  %v932_v36 = vadd.f32 %v2868_v29, %v640_v33  ;;  %v655_v33 = vmul.f32 %v2874_v58, %v4176_v46  ;;  %v4191_v46 = vld [vmem:[#allocation153_spill] sm:$0xff] }
 0x19e   : > { %1479 = vst [vmem:[%s1819_s25 + $0x488] sm:$0xff] %v1191_v57  ;;  %v1206_v57 = vmax.f32 %v918_v52, 0.0  ;;  %v933_v52 = vadd.f32 %v2868_v29, %v641_v16  ;;  %v656_v16 = vmul.f32 %v2874_v58, %v4177_v47  ;;  %v4192_v47 = vld [vmem:[#allocation154_spill] sm:$0xff] }
 0x19f   : > { %1480 = vst [vmem:[%s1819_s25 + $0x490] sm:$0xff] %v1192_v8  ;;  %v1207_v8 = vmax.f32 %v919_v10, 0.0  ;;  %v934_v10 = vadd.f32 %v2868_v29, %v642_v17  ;;  %v3396_v17 = vld [vmem:[%s3804_s1] ss:$0 sm:$0xff] }
 0x1a0   : > { %1481 = vst [vmem:[%s1819_s25 + $0x498] sm:$0xff] %v1193_v42  ;;  %v1208_v42 = vmax.f32 %v920_v26, 0.0  ;;  %v935_v26 = vadd.f32 %v2868_v29, %v643_v50  ;;  %v658_v50 = vmul.f32 %v3396_v17, %v4179_v6  ;;  %v4194_v6 = vld [vmem:[#allocation156_spill] sm:$0xff] }
 0x1a1   : > { %1482 = vst [vmem:[%s1819_s25 + $0x4a0] sm:$0xff] %v1194_v61  ;;  %v1209_v61 = vmax.f32 %v921_v56, 0.0  ;;  %v936_v56 = vadd.f32 %v2868_v29, %v644_v23  ;;  %v659_v23 = vmul.f32 %v3396_v17, %v4180_v51  ;;  %v4195_v51 = vld [vmem:[#allocation157_spill] sm:$0xff] }
 0x1a2   : > { %1483 = vst [vmem:[%s1819_s25 + $0x4a8] sm:$0xff] %v1195_v30  ;;  %v1210_v30 = vmax.f32 %v922_v7, 0.0  ;;  %v937_v7 = vadd.f32 %v2868_v29, %v645_v12  ;;  %v660_v12 = vmul.f32 %v3396_v17, %v4181_v37  ;;  %v4196_v37 = vld [vmem:[#allocation158_spill] sm:$0xff] }
 0x1a3   : > { %1484 = vst [vmem:[%s1819_s25 + $0x4b0] sm:$0xff] %v1196_v32  ;;  %v1211_v32 = vmax.f32 %v923_v25, 0.0  ;;  %v938_v25 = vadd.f32 %v2868_v29, %v646_v54  ;;  %v661_v54 = vmul.f32 %v3396_v17, %v4182_v38  ;;  %v4197_v38 = vld [vmem:[#allocation159_spill] sm:$0xff] }
 0x1a4   : > { %1485 = vst [vmem:[%s1819_s25 + $0x4b8] sm:$0xff] %v1197_v14  ;;  %v1212_v14 = vmax.f32 %v924_v60, 0.0  ;;  %v939_v60 = vadd.f32 %v2868_v29, %v647_v39  ;;  %v662_v39 = vmul.f32 %v3396_v17, %v4183_v55  ;;  %v4198_v55 = vld [vmem:[#allocation160_spill] sm:$0xff] }
 0x1a5   : > { %1486 = vst [vmem:[%s1819_s25 + $0x4c0] sm:$0xff] %v1198_v15  ;;  %v1213_v15 = vmax.f32 %v925_v43, 0.0  ;;  %v940_v43 = vadd.f32 %v2868_v29, %v648_v40  ;;  %v663_v40 = vmul.f32 %v3396_v17, %v4184_v4  ;;  %v4199_v4 = vld [vmem:[#allocation161_spill] sm:$0xff] }
 0x1a6   : > { %1487 = vst [vmem:[%s1819_s25 + $0x4c8] sm:$0xff] %v1199_v34  ;;  %v1214_v34 = vmax.f32 %v926_v44, 0.0  ;;  %v941_v44 = vadd.f32 %v2868_v29, %v649_v41  ;;  %v664_v41 = vmul.f32 %v3396_v17, %v4185_v9  ;;  %v4200_v9 = vld [vmem:[#allocation162_spill] sm:$0xff] }
 0x1a7   : > { %1488 = vst [vmem:[%s1819_s25 + $0x4d0] sm:$0xff] %v1200_v49  ;;  %v1215_v49 = vmax.f32 %v927_v0, 0.0  ;;  %v942_v0 = vadd.f32 %v2868_v29, %v650_v20  ;;  %v665_v20 = vmul.f32 %v3396_v17, %v4186_v59  ;;  %v4201_v59 = vld [vmem:[#allocation163_spill] sm:$0xff] }
 0x1a8   : > { %1489 = vst [vmem:[%s1819_s25 + $0x4d8] sm:$0xff] %v1201_v22  ;;  %v1216_v22 = vmax.f32 %v928_v1, 0.0  ;;  %v943_v1 = vadd.f32 %v2868_v29, %v651_v28  ;;  %v666_v28 = vmul.f32 %v3396_v17, %v4187_v27  ;;  %v4202_v27 = vld [vmem:[#allocation164_spill] sm:$0xff] }
 0x1a9   : > { %1490 = vst [vmem:[%s1819_s25 + $0x4e0] sm:$0xff] %v1202_v24  ;;  %v1217_v24 = vmax.f32 %v929_v2, 0.0  ;;  %v944_v2 = vadd.f32 %v2868_v29, %v652_v62  ;;  %v4178_v29 = vld [vmem:[#allocation140_spill] sm:$0xff]  ;;  %v1230_v58 = vmax.f32 %v942_v0, 0.0  ;;  %v667_v62 = vmul.f32 %v3396_v17, %v4188_v21  ;;  %v4203_v21 = vld [vmem:[#allocation165_spill] sm:$0xff] }
 0x1aa   : > { %1491 = vst [vmem:[%s1819_s25 + $0x4e8] sm:$0xff] %v1203_v53  ;;  %v1218_v53 = vmax.f32 %v930_v48, 0.0  ;;  %v3390_v48 = vld [vmem:[%s3805_s2] ss:$0 sm:$0xff] }
 0x1ab   : > { %1492 = vst [vmem:[%s1819_s25 + $0x4f0] sm:$0xff] %v1204_v13  ;;  %v1219_v13 = vmax.f32 %v931_v35, 0.0  ;;  %v945_v11 = vadd.f32 %v3390_v48, %v653_v31  ;;  %v946_v35 = vadd.f32 %v3390_v48, %v654_v5  ;;  %v668_v31 = vmul.f32 %v3396_v17, %v4189_v63  ;;  %v4204_v63 = vld [vmem:[#allocation166_spill] sm:$0xff] }
 0x1ac   : > { %1493 = vst [vmem:[%s1819_s25 + $0x4f8] sm:$0xff] %v1205_v3  ;;  %v1220_v3 = vmax.f32 %v932_v36, 0.0  ;;  %v947_v36 = vadd.f32 %v3390_v48, %v655_v33  ;;  %v957_v0 = vadd.f32 %v3390_v48, %v665_v20  ;;  %v669_v5 = vmul.f32 %v3396_v17, %v4190_v45  ;;  %v4205_v45 = vld [vmem:[#allocation167_spill] sm:$0xff] }
 0x1ad   : > { %1494 = vst [vmem:[%s1819_s25 + $0x500] sm:$0xff] %v1206_v57  ;;  %v1221_v57 = vmax.f32 %v933_v52, 0.0  ;;  %v948_v52 = vadd.f32 %v3390_v48, %v656_v16  ;;  %v670_v33 = vmul.f32 %v3396_v17, %v4191_v46  ;;  %v671_v16 = vmul.f32 %v3396_v17, %v4192_v47  ;;  %v4206_v46 = vld [vmem:[#allocation168_spill] sm:$0xff]  ;;  %v4207_v47 = vld [vmem:[#allocation169_spill] sm:$0xff] }
 0x1ae   : > { %1495 = vst [vmem:[%s1819_s25 + $0x508] sm:$0xff] %v1207_v8  ;;  %v1222_v8 = vmax.f32 %v934_v10, 0.0  ;;  %v680_v20 = vmul.f32 %v3396_v17, %v4201_v59  ;;  %v4216_v59 = vld [vmem:[#allocation178_spill] sm:$0xff] }
 0x1af   : > { %1496 = vst [vmem:[%s1819_s25 + $0x510] sm:$0xff] %v1208_v42  ;;  %v1223_v42 = vmax.f32 %v935_v26, 0.0  ;;  %v950_v26 = vadd.f32 %v3390_v48, %v658_v50  ;;  %v673_v50 = vmul.f32 %v3396_v17, %v4194_v6  ;;  %v4209_v6 = vld [vmem:[#allocation171_spill] sm:$0xff] }
 0x1b0   : > { %1497 = vst [vmem:[%s1819_s25 + $0x518] sm:$0xff] %v1209_v61  ;;  %v1224_v61 = vmax.f32 %v936_v56, 0.0  ;;  %v951_v56 = vadd.f32 %v3390_v48, %v659_v23  ;;  %v674_v23 = vmul.f32 %v3396_v17, %v4195_v51  ;;  %v4210_v51 = vld [vmem:[#allocation172_spill] sm:$0xff] }
 0x1b1   : > { %1498 = vst [vmem:[%s1819_s25 + $0x520] sm:$0xff] %v1210_v30  ;;  %v1225_v30 = vmax.f32 %v937_v7, 0.0  ;;  %v952_v7 = vadd.f32 %v3390_v48, %v660_v12  ;;  %v675_v12 = vmul.f32 %v3396_v17, %v4196_v37  ;;  %v4211_v37 = vld [vmem:[#allocation173_spill] sm:$0xff] }
 0x1b2   : > { %1499 = vst [vmem:[%s1819_s25 + $0x528] sm:$0xff] %v1211_v32  ;;  %v1226_v32 = vmax.f32 %v938_v25, 0.0  ;;  %v953_v25 = vadd.f32 %v3390_v48, %v661_v54  ;;  %v676_v54 = vmul.f32 %v3396_v17, %v4197_v38  ;;  %v4212_v38 = vld [vmem:[#allocation174_spill] sm:$0xff] }
 0x1b3   : > { %1500 = vst [vmem:[%s1819_s25 + $0x530] sm:$0xff] %v1212_v14  ;;  %v1227_v14 = vmax.f32 %v939_v60, 0.0  ;;  %v954_v60 = vadd.f32 %v3390_v48, %v662_v39  ;;  %v677_v39 = vmul.f32 %v3396_v17, %v4198_v55  ;;  %v4213_v55 = vld [vmem:[#allocation175_spill] sm:$0xff] }
 0x1b4   : > { %1501 = vst [vmem:[%s1819_s25 + $0x538] sm:$0xff] %v1213_v15  ;;  %v1228_v15 = vmax.f32 %v940_v43, 0.0  ;;  %v955_v43 = vadd.f32 %v3390_v48, %v663_v40  ;;  %v678_v40 = vmul.f32 %v3396_v17, %v4199_v4  ;;  %v4214_v4 = vld [vmem:[#allocation176_spill] sm:$0xff] }
 0x1b5   : > { %1502 = vst [vmem:[%s1819_s25 + $0x540] sm:$0xff] %v1214_v34  ;;  %v1229_v34 = vmax.f32 %v941_v44, 0.0  ;;  %v956_v44 = vadd.f32 %v3390_v48, %v664_v41  ;;  %v679_v41 = vmul.f32 %v3396_v17, %v4200_v9  ;;  %v4215_v9 = vld [vmem:[#allocation177_spill] sm:$0xff] }
 0x1b6   : > { %1503 = vst [vmem:[%s1819_s25 + $0x548] sm:$0xff] %v1215_v49  ;;  %v657_v49 = vmul.f32 %v3396_v17, %v4178_v29  ;;  %v4193_v29 = vld [vmem:[#allocation155_spill] sm:$0xff] }
 0x1b7   : > { %1504 = vst [vmem:[%s1819_s25 + $0x550] sm:$0xff] %v1216_v22  ;;  %v1231_v22 = vmax.f32 %v943_v1, 0.0  ;;  %v958_v1 = vadd.f32 %v3390_v48, %v666_v28  ;;  %v681_v28 = vmul.f32 %v3396_v17, %v4202_v27  ;;  %v4217_v27 = vld [vmem:[#allocation179_spill] sm:$0xff] }
 0x1b8   : > { %1505 = vst [vmem:[%s1819_s25 + $0x558] sm:$0xff] %v1217_v24  ;;  %v1232_v24 = vmax.f32 %v944_v2, 0.0  ;;  %v949_v10 = vadd.f32 %v3390_v48, %v657_v49  ;;  %v959_v2 = vadd.f32 %v3390_v48, %v667_v62  ;;  %v672_v49 = vmul.f32 %v3396_v17, %v4193_v29  ;;  %v4208_v29 = vld [vmem:[#allocation170_spill] sm:$0xff] }
 0x1b9   : > { %1506 = vst [vmem:[%s1819_s25 + $0x560] sm:$0xff] %v1218_v53  ;;  %v1233_v53 = vmax.f32 %v945_v11, 0.0  ;;  %v960_v11 = vadd.f32 %v3390_v48, %v668_v31  ;;  %v682_v62 = vmul.f32 %v3396_v17, %v4203_v21  ;;  %v683_v31 = vmul.f32 %v3396_v17, %v4204_v63  ;;  %v4218_v21 = vld [vmem:[#allocation180_spill] sm:$0xff]  ;;  %v4219_v63 = vld [vmem:[#allocation181_spill] sm:$0xff] }
 0x1ba   : > { %1507 = vst [vmem:[%s1819_s25 + $0x568] sm:$0xff] %v1219_v13  ;;  %v1234_v13 = vmax.f32 %v946_v35, 0.0  ;;  %v961_v35 = vadd.f32 %v3390_v48, %v669_v5  ;;  %v684_v5 = vmul.f32 %v3396_v17, %v4205_v45  ;;  %v4220_v45 = vld [vmem:[#allocation182_spill] sm:$0xff] }
 0x1bb   : > { %1508 = vst [vmem:[%s1819_s25 + $0x570] sm:$0xff] %v1220_v3  ;;  %v1235_v3 = vmax.f32 %v947_v36, 0.0  ;;  %v962_v36 = vadd.f32 %v3390_v48, %v670_v33  ;;  %v685_v33 = vmul.f32 %v3396_v17, %v4206_v46  ;;  %v4221_v46 = vld [vmem:[#allocation183_spill] sm:$0xff] }
 0x1bc   : > { %1509 = vst [vmem:[%s1819_s25 + $0x578] sm:$0xff] %v1221_v57  ;;  %v1236_v57 = vmax.f32 %v948_v52, 0.0  ;;  %v963_v52 = vadd.f32 %v3390_v48, %v671_v16  ;;  %v686_v16 = vmul.f32 %v3396_v17, %v4207_v47  ;;  %v4222_v47 = vld [vmem:[#allocation184_spill] sm:$0xff] }
 0x1bd   : > { %1510 = vst [vmem:[%s1819_s25 + $0x580] sm:$0xff] %v1222_v8  ;;  %v1237_v8 = vmax.f32 %v949_v10, 0.0  ;;  %v964_v10 = vadd.f32 %v3390_v48, %v672_v49  ;;  %v687_v49 = vmul.f32 %v3396_v17, %v4208_v29  ;;  %v4223_v29 = vld [vmem:[#allocation185_spill] sm:$0xff] }
 0x1be   : > { %1511 = vst [vmem:[%s1819_s25 + $0x588] sm:$0xff] %v1223_v42  ;;  %v1238_v42 = vmax.f32 %v950_v26, 0.0  ;;  %v965_v26 = vadd.f32 %v3390_v48, %v673_v50  ;;  %v688_v50 = vmul.f32 %v3396_v17, %v4209_v6  ;;  %v4224_v6 = vld [vmem:[#allocation186_spill] sm:$0xff] }
 0x1bf   : > { %1512 = vst [vmem:[%s1819_s25 + $0x590] sm:$0xff] %v1224_v61  ;;  %v1239_v61 = vmax.f32 %v951_v56, 0.0  ;;  %v966_v56 = vadd.f32 %v3390_v48, %v674_v23  ;;  %v689_v23 = vmul.f32 %v3396_v17, %v4210_v51  ;;  %v4225_v51 = vld [vmem:[#allocation187_spill] sm:$0xff] }
 0x1c0   : > { %1513 = vst [vmem:[%s1819_s25 + $0x598] sm:$0xff] %v1225_v30  ;;  %v1240_v30 = vmax.f32 %v952_v7, 0.0  ;;  %v967_v7 = vadd.f32 %v3390_v48, %v675_v12  ;;  %v690_v12 = vmul.f32 %v3396_v17, %v4211_v37  ;;  %v4226_v37 = vld [vmem:[#allocation188_spill] sm:$0xff] }
 0x1c1   : > { %1514 = vst [vmem:[%s1819_s25 + $0x5a0] sm:$0xff] %v1226_v32  ;;  %v1241_v32 = vmax.f32 %v953_v25, 0.0  ;;  %v968_v25 = vadd.f32 %v3390_v48, %v676_v54  ;;  %v691_v54 = vmul.f32 %v3396_v17, %v4212_v38  ;;  %v4227_v38 = vld [vmem:[#allocation189_spill] sm:$0xff] }
 0x1c2   : > { %1515 = vst [vmem:[%s1819_s25 + $0x5a8] sm:$0xff] %v1227_v14  ;;  %v1242_v14 = vmax.f32 %v954_v60, 0.0  ;;  %v969_v60 = vadd.f32 %v3390_v48, %v677_v39  ;;  %v692_v39 = vmul.f32 %v3396_v17, %v4213_v55  ;;  %v4228_v55 = vld [vmem:[#allocation190_spill] sm:$0xff] }
 0x1c3   : > { %1516 = vst [vmem:[%s1819_s25 + $0x5b0] sm:$0xff] %v1228_v15  ;;  %v1243_v15 = vmax.f32 %v955_v43, 0.0  ;;  %v970_v43 = vadd.f32 %v3390_v48, %v678_v40  ;;  %v693_v40 = vmul.f32 %v3396_v17, %v4214_v4  ;;  %v4229_v4 = vld [vmem:[#allocation191_spill] sm:$0xff] }
 0x1c4   : > { %1517 = vst [vmem:[%s1819_s25 + $0x5b8] sm:$0xff] %v1229_v34  ;;  %v1244_v34 = vmax.f32 %v956_v44, 0.0  ;;  %v971_v44 = vadd.f32 %v3390_v48, %v679_v41  ;;  %v694_v41 = vmul.f32 %v3396_v17, %v4215_v9  ;;  %v4230_v9 = vld [vmem:[#allocation192_spill] sm:$0xff] }
 0x1c5   : > { %1518 = vst [vmem:[%s1819_s25 + $0x5c0] sm:$0xff] %v1230_v58  ;;  %v1245_v58 = vmax.f32 %v957_v0, 0.0  ;;  %v972_v0 = vadd.f32 %v3390_v48, %v680_v20  ;;  %v695_v20 = vmul.f32 %v3396_v17, %v4216_v59  ;;  %v4231_v59 = vld [vmem:[#allocation193_spill] sm:$0xff] }
 0x1c6   : > { %1519 = vst [vmem:[%s1819_s25 + $0x5c8] sm:$0xff] %v1231_v22  ;;  %v1246_v22 = vmax.f32 %v958_v1, 0.0  ;;  %v973_v1 = vadd.f32 %v3390_v48, %v681_v28  ;;  %v696_v28 = vmul.f32 %v3396_v17, %v4217_v27  ;;  %v4232_v27 = vld [vmem:[#allocation194_spill] sm:$0xff] }
 0x1c7   : > { %1520 = vst [vmem:[%s1819_s25 + $0x5d0] sm:$0xff] %v1232_v24  ;;  %v1247_v24 = vmax.f32 %v959_v2, 0.0  ;;  %v974_v2 = vadd.f32 %v3390_v48, %v682_v62  ;;  %v697_v62 = vmul.f32 %v3396_v17, %v4218_v21  ;;  %v4233_v21 = vld [vmem:[#allocation195_spill] sm:$0xff] }
 0x1c8   : > { %1521 = vst [vmem:[%s1819_s25 + $0x5d8] sm:$0xff] %v1233_v53  ;;  %v1248_v53 = vmax.f32 %v960_v11, 0.0  ;;  %v975_v11 = vadd.f32 %v3390_v48, %v683_v31  ;;  %v698_v31 = vmul.f32 %v3396_v17, %v4219_v63  ;;  %v4234_v63 = vld [vmem:[#allocation196_spill] sm:$0xff] }
 0x1c9   : > { %1522 = vst [vmem:[%s1819_s25 + $0x5e0] sm:$0xff] %v1234_v13  ;;  %v1249_v13 = vmax.f32 %v961_v35, 0.0  ;;  %v976_v35 = vadd.f32 %v3390_v48, %v684_v5  ;;  %v699_v5 = vmul.f32 %v3396_v17, %v4220_v45  ;;  %v4235_v45 = vld [vmem:[#allocation197_spill] sm:$0xff] }
 0x1ca   : > { %1523 = vst [vmem:[%s1819_s25 + $0x5e8] sm:$0xff] %v1235_v3  ;;  %v1250_v3 = vmax.f32 %v962_v36, 0.0  ;;  %v977_v36 = vadd.f32 %v3390_v48, %v685_v33  ;;  %v700_v33 = vmul.f32 %v3396_v17, %v4221_v46  ;;  %v4236_v46 = vld [vmem:[#allocation198_spill] sm:$0xff] }
 0x1cb   : > { %1524 = vst [vmem:[%s1819_s25 + $0x5f0] sm:$0xff] %v1236_v57  ;;  %v1251_v57 = vmax.f32 %v963_v52, 0.0  ;;  %v978_v52 = vadd.f32 %v3390_v48, %v686_v16  ;;  %v701_v16 = vmul.f32 %v3396_v17, %v4222_v47  ;;  %v4237_v47 = vld [vmem:[#allocation199_spill] sm:$0xff] }
 0x1cc   : > { %1525 = vst [vmem:[%s1819_s25 + $0x5f8] sm:$0xff] %v1237_v8  ;;  %v1252_v8 = vmax.f32 %v964_v10, 0.0  ;;  %v979_v10 = vadd.f32 %v3390_v48, %v687_v49  ;;  %v702_v49 = vmul.f32 %v3396_v17, %v4223_v29  ;;  %v4238_v29 = vld [vmem:[#allocation200_spill] sm:$0xff] }
 0x1cd   : > { %1526 = vst [vmem:[%s1819_s25 + $0x600] sm:$0xff] %v1238_v42  ;;  %v1253_v42 = vmax.f32 %v965_v26, 0.0  ;;  %v980_v26 = vadd.f32 %v3390_v48, %v688_v50  ;;  %v703_v50 = vmul.f32 %v3396_v17, %v4224_v6  ;;  %v4239_v6 = vld [vmem:[#allocation201_spill] sm:$0xff] }
 0x1ce   : > { %1527 = vst [vmem:[%s1819_s25 + $0x608] sm:$0xff] %v1239_v61  ;;  %v1254_v61 = vmax.f32 %v966_v56, 0.0  ;;  %v981_v56 = vadd.f32 %v3390_v48, %v689_v23  ;;  %v704_v23 = vmul.f32 %v3396_v17, %v4225_v51  ;;  %v4240_v51 = vld [vmem:[#allocation202_spill] sm:$0xff] }
 0x1cf   : > { %1528 = vst [vmem:[%s1819_s25 + $0x610] sm:$0xff] %v1240_v30  ;;  %v1255_v30 = vmax.f32 %v967_v7, 0.0  ;;  %v982_v7 = vadd.f32 %v3390_v48, %v690_v12  ;;  %v705_v12 = vmul.f32 %v3396_v17, %v4226_v37  ;;  %v4241_v37 = vld [vmem:[#allocation203_spill] sm:$0xff] }
 0x1d0   : > { %1529 = vst [vmem:[%s1819_s25 + $0x618] sm:$0xff] %v1241_v32  ;;  %v1256_v32 = vmax.f32 %v968_v25, 0.0  ;;  %v983_v25 = vadd.f32 %v3390_v48, %v691_v54  ;;  %v706_v54 = vmul.f32 %v3396_v17, %v4227_v38  ;;  %v4242_v38 = vld [vmem:[#allocation204_spill] sm:$0xff] }
 0x1d1   : > { %1530 = vst [vmem:[%s1819_s25 + $0x620] sm:$0xff] %v1242_v14  ;;  %v1257_v14 = vmax.f32 %v969_v60, 0.0  ;;  %v984_v60 = vadd.f32 %v3390_v48, %v692_v39  ;;  %v707_v39 = vmul.f32 %v3396_v17, %v4228_v55  ;;  %v4243_v55 = vld [vmem:[#allocation205_spill] sm:$0xff] }
 0x1d2   : > { %1531 = vst [vmem:[%s1819_s25 + $0x628] sm:$0xff] %v1243_v15  ;;  %v1258_v15 = vmax.f32 %v970_v43, 0.0  ;;  %v985_v43 = vadd.f32 %v3390_v48, %v693_v40  ;;  %v708_v40 = vmul.f32 %v3396_v17, %v4229_v4  ;;  %v4244_v4 = vld [vmem:[#allocation206_spill] sm:$0xff] }
 0x1d3   : > { %1532 = vst [vmem:[%s1819_s25 + $0x630] sm:$0xff] %v1244_v34  ;;  %v1259_v34 = vmax.f32 %v971_v44, 0.0  ;;  %v986_v44 = vadd.f32 %v3390_v48, %v694_v41  ;;  %v709_v41 = vmul.f32 %v3396_v17, %v4230_v9  ;;  %v4245_v9 = vld [vmem:[#allocation207_spill] sm:$0xff] }
 0x1d4   : > { %1533 = vst [vmem:[%s1819_s25 + $0x638] sm:$0xff] %v1245_v58  ;;  %v1260_v58 = vmax.f32 %v972_v0, 0.0  ;;  %v987_v0 = vadd.f32 %v3390_v48, %v695_v20  ;;  %v710_v20 = vmul.f32 %v3396_v17, %v4231_v59  ;;  %v4246_v59 = vld [vmem:[#allocation208_spill] sm:$0xff] }
 0x1d5   : > { %1534 = vst [vmem:[%s1819_s25 + $0x640] sm:$0xff] %v1246_v22  ;;  %v1261_v22 = vmax.f32 %v973_v1, 0.0  ;;  %v988_v1 = vadd.f32 %v3390_v48, %v696_v28  ;;  %v711_v28 = vmul.f32 %v3396_v17, %v4232_v27  ;;  %v4247_v27 = vld [vmem:[#allocation209_spill] sm:$0xff] }
 0x1d6   : > { %1535 = vst [vmem:[%s1819_s25 + $0x648] sm:$0xff] %v1247_v24  ;;  %v1262_v24 = vmax.f32 %v974_v2, 0.0  ;;  %v989_v2 = vadd.f32 %v3390_v48, %v697_v62  ;;  %v712_v62 = vmul.f32 %v3396_v17, %v4233_v21  ;;  %v4248_v21 = vld [vmem:[#allocation210_spill] sm:$0xff] }
 0x1d7   : > { %1536 = vst [vmem:[%s1819_s25 + $0x650] sm:$0xff] %v1248_v53  ;;  %v1263_v53 = vmax.f32 %v975_v11, 0.0  ;;  %v990_v11 = vadd.f32 %v3390_v48, %v698_v31  ;;  %v713_v31 = vmul.f32 %v3396_v17, %v4234_v63  ;;  %v4249_v63 = vld [vmem:[#allocation211_spill] sm:$0xff] }
 0x1d8   : > { %1537 = vst [vmem:[%s1819_s25 + $0x658] sm:$0xff] %v1249_v13  ;;  %v1264_v13 = vmax.f32 %v976_v35, 0.0  ;;  %v991_v35 = vadd.f32 %v3390_v48, %v699_v5  ;;  %v714_v5 = vmul.f32 %v3396_v17, %v4235_v45  ;;  %v4250_v45 = vld [vmem:[#allocation212_spill] sm:$0xff] }
 0x1d9   : > { %1538 = vst [vmem:[%s1819_s25 + $0x660] sm:$0xff] %v1250_v3  ;;  %v1265_v3 = vmax.f32 %v977_v36, 0.0  ;;  %v992_v36 = vadd.f32 %v3390_v48, %v700_v33  ;;  %v715_v33 = vmul.f32 %v3396_v17, %v4236_v46  ;;  %v4251_v46 = vld [vmem:[#allocation213_spill] sm:$0xff] }
 0x1da   : > { %1539 = vst [vmem:[%s1819_s25 + $0x668] sm:$0xff] %v1251_v57  ;;  %v1266_v57 = vmax.f32 %v978_v52, 0.0  ;;  %v993_v52 = vadd.f32 %v3390_v48, %v701_v16  ;;  %v716_v16 = vmul.f32 %v3396_v17, %v4237_v47  ;;  %v4252_v47 = vld [vmem:[#allocation214_spill] sm:$0xff] }
 0x1db   : > { %1540 = vst [vmem:[%s1819_s25 + $0x670] sm:$0xff] %v1252_v8  ;;  %v1267_v8 = vmax.f32 %v979_v10, 0.0  ;;  %v994_v10 = vadd.f32 %v3390_v48, %v702_v49  ;;  %v717_v49 = vmul.f32 %v3396_v17, %v4238_v29  ;;  %v4253_v29 = vld [vmem:[#allocation215_spill] sm:$0xff] }
 0x1dc   : > { %1541 = vst [vmem:[%s1819_s25 + $0x678] sm:$0xff] %v1253_v42  ;;  %v1268_v42 = vmax.f32 %v980_v26, 0.0  ;;  %v995_v26 = vadd.f32 %v3390_v48, %v703_v50  ;;  %v718_v50 = vmul.f32 %v3396_v17, %v4239_v6  ;;  %v4254_v6 = vld [vmem:[#allocation216_spill] sm:$0xff] }
 0x1dd   : > { %1542 = vst [vmem:[%s1819_s25 + $0x680] sm:$0xff] %v1254_v61  ;;  %v1269_v61 = vmax.f32 %v981_v56, 0.0  ;;  %v996_v56 = vadd.f32 %v3390_v48, %v704_v23  ;;  %v719_v23 = vmul.f32 %v3396_v17, %v4240_v51  ;;  %v4255_v51 = vld [vmem:[#allocation217_spill] sm:$0xff] }
 0x1de   : > { %1543 = vst [vmem:[%s1819_s25 + $0x688] sm:$0xff] %v1255_v30  ;;  %v1270_v30 = vmax.f32 %v982_v7, 0.0  ;;  %v997_v7 = vadd.f32 %v3390_v48, %v705_v12  ;;  %v720_v12 = vmul.f32 %v3396_v17, %v4241_v37  ;;  %v4256_v37 = vld [vmem:[#allocation218_spill] sm:$0xff] }
 0x1df   : > { %1544 = vst [vmem:[%s1819_s25 + $0x690] sm:$0xff] %v1256_v32  ;;  %v1271_v32 = vmax.f32 %v983_v25, 0.0  ;;  %v998_v25 = vadd.f32 %v3390_v48, %v706_v54  ;;  %v721_v54 = vmul.f32 %v3396_v17, %v4242_v38  ;;  %v4257_v38 = vld [vmem:[#allocation219_spill] sm:$0xff] }
 0x1e0   : > { %1545 = vst [vmem:[%s1819_s25 + $0x698] sm:$0xff] %v1257_v14  ;;  %v1272_v14 = vmax.f32 %v984_v60, 0.0  ;;  %v999_v60 = vadd.f32 %v3390_v48, %v707_v39  ;;  %v722_v39 = vmul.f32 %v3396_v17, %v4243_v55  ;;  %v4258_v55 = vld [vmem:[#allocation220_spill] sm:$0xff] }
 0x1e1   : > { %1546 = vst [vmem:[%s1819_s25 + $0x6a0] sm:$0xff] %v1258_v15  ;;  %v1273_v15 = vmax.f32 %v985_v43, 0.0  ;;  %v1000_v43 = vadd.f32 %v3390_v48, %v708_v40  ;;  %v723_v40 = vmul.f32 %v3396_v17, %v4244_v4  ;;  %v4259_v4 = vld [vmem:[#allocation221_spill] sm:$0xff] }
 0x1e2   : > { %1547 = vst [vmem:[%s1819_s25 + $0x6a8] sm:$0xff] %v1259_v34  ;;  %v1274_v34 = vmax.f32 %v986_v44, 0.0  ;;  %v1001_v44 = vadd.f32 %v3390_v48, %v709_v41  ;;  %v724_v41 = vmul.f32 %v3396_v17, %v4245_v9  ;;  %v4260_v9 = vld [vmem:[#allocation222_spill] sm:$0xff] }
 0x1e3   : > { %1548 = vst [vmem:[%s1819_s25 + $0x6b0] sm:$0xff] %v1260_v58  ;;  %v1275_v58 = vmax.f32 %v987_v0, 0.0  ;;  %v1002_v0 = vadd.f32 %v3390_v48, %v710_v20  ;;  %v725_v20 = vmul.f32 %v3396_v17, %v4246_v59  ;;  %v4261_v59 = vld [vmem:[#allocation223_spill] sm:$0xff] }
 0x1e4   : > { %1549 = vst [vmem:[%s1819_s25 + $0x6b8] sm:$0xff] %v1261_v22  ;;  %v1276_v22 = vmax.f32 %v988_v1, 0.0  ;;  %v1003_v1 = vadd.f32 %v3390_v48, %v711_v28  ;;  %v726_v28 = vmul.f32 %v3396_v17, %v4247_v27  ;;  %v4262_v27 = vld [vmem:[#allocation224_spill] sm:$0xff] }
 0x1e5   : > { %1550 = vst [vmem:[%s1819_s25 + $0x6c0] sm:$0xff] %v1262_v24  ;;  %v1277_v24 = vmax.f32 %v989_v2, 0.0  ;;  %v1004_v2 = vadd.f32 %v3390_v48, %v712_v62  ;;  %v727_v62 = vmul.f32 %v3396_v17, %v4248_v21  ;;  %v4263_v21 = vld [vmem:[#allocation225_spill] sm:$0xff] }
 0x1e6   : > { %1551 = vst [vmem:[%s1819_s25 + $0x6c8] sm:$0xff] %v1263_v53  ;;  %v1278_v53 = vmax.f32 %v990_v11, 0.0  ;;  %v1005_v11 = vadd.f32 %v3390_v48, %v713_v31  ;;  %v728_v31 = vmul.f32 %v3396_v17, %v4249_v63  ;;  %v4264_v63 = vld [vmem:[#allocation226_spill] sm:$0xff] }
 0x1e7   : > { %1552 = vst [vmem:[%s1819_s25 + $0x6d0] sm:$0xff] %v1264_v13  ;;  %v1279_v13 = vmax.f32 %v991_v35, 0.0  ;;  %v1006_v35 = vadd.f32 %v3390_v48, %v714_v5  ;;  %v729_v5 = vmul.f32 %v3396_v17, %v4250_v45  ;;  %v4265_v45 = vld [vmem:[#allocation227_spill] sm:$0xff] }
 0x1e8   : > { %1553 = vst [vmem:[%s1819_s25 + $0x6d8] sm:$0xff] %v1265_v3  ;;  %v1280_v3 = vmax.f32 %v992_v36, 0.0  ;;  %v1007_v36 = vadd.f32 %v3390_v48, %v715_v33  ;;  %v730_v33 = vmul.f32 %v3396_v17, %v4251_v46  ;;  %v4266_v46 = vld [vmem:[#allocation228_spill] sm:$0xff] }
 0x1e9   : > { %1554 = vst [vmem:[%s1819_s25 + $0x6e0] sm:$0xff] %v1266_v57  ;;  %v1281_v57 = vmax.f32 %v993_v52, 0.0  ;;  %v1008_v52 = vadd.f32 %v3390_v48, %v716_v16  ;;  %v731_v16 = vmul.f32 %v3396_v17, %v4252_v47  ;;  %v4267_v47 = vld [vmem:[#allocation229_spill] sm:$0xff] }
 0x1ea   : > { %1555 = vst [vmem:[%s1819_s25 + $0x6e8] sm:$0xff] %v1267_v8  ;;  %v1282_v8 = vmax.f32 %v994_v10, 0.0  ;;  %v1009_v10 = vadd.f32 %v3390_v48, %v717_v49  ;;  %v732_v49 = vmul.f32 %v3396_v17, %v4253_v29  ;;  %v4268_v29 = vld [vmem:[#allocation230_spill] sm:$0xff] }
 0x1eb   : > { %1556 = vst [vmem:[%s1819_s25 + $0x6f0] sm:$0xff] %v1268_v42  ;;  %v1283_v42 = vmax.f32 %v995_v26, 0.0  ;;  %v1010_v26 = vadd.f32 %v3390_v48, %v718_v50  ;;  %v733_v50 = vmul.f32 %v3396_v17, %v4254_v6  ;;  %v4269_v6 = vld [vmem:[#allocation231_spill] sm:$0xff] }
 0x1ec   : > { %1557 = vst [vmem:[%s1819_s25 + $0x6f8] sm:$0xff] %v1269_v61  ;;  %v1284_v61 = vmax.f32 %v996_v56, 0.0  ;;  %v1011_v56 = vadd.f32 %v3390_v48, %v719_v23  ;;  %v734_v23 = vmul.f32 %v3396_v17, %v4255_v51  ;;  %v4270_v51 = vld [vmem:[#allocation232_spill] sm:$0xff] }
 0x1ed   : > { %1558 = vst [vmem:[%s1819_s25 + $0x700] sm:$0xff] %v1270_v30  ;;  %v1285_v30 = vmax.f32 %v997_v7, 0.0  ;;  %v1012_v7 = vadd.f32 %v3390_v48, %v720_v12  ;;  %v735_v12 = vmul.f32 %v3396_v17, %v4256_v37  ;;  %v4271_v37 = vld [vmem:[#allocation233_spill] sm:$0xff] }
 0x1ee   : > { %1559 = vst [vmem:[%s1819_s25 + $0x708] sm:$0xff] %v1271_v32  ;;  %v1286_v32 = vmax.f32 %v998_v25, 0.0  ;;  %v1013_v25 = vadd.f32 %v3390_v48, %v721_v54  ;;  %v736_v54 = vmul.f32 %v3396_v17, %v4257_v38  ;;  %v751_v38 = vmul.f32 %v3396_v17, %v2641_v18 }
 0x1ef   : > { %1560 = vst [vmem:[%s1819_s25 + $0x710] sm:$0xff] %v1272_v14  ;;  %v1287_v14 = vmax.f32 %v999_v60, 0.0  ;;  %v1014_v60 = vadd.f32 %v3390_v48, %v722_v39  ;;  %v737_v39 = vmul.f32 %v3396_v17, %v4258_v55 }
 0x1f0   : > { %1561 = vst [vmem:[%s1819_s25 + $0x718] sm:$0xff] %v1273_v15  ;;  %v1288_v15 = vmax.f32 %v1000_v43, 0.0  ;;  %v1015_v43 = vadd.f32 %v3390_v48, %v723_v40  ;;  %v738_v40 = vmul.f32 %v3396_v17, %v4259_v4 }
 0x1f1   : > { %1562 = vst [vmem:[%s1819_s25 + $0x720] sm:$0xff] %v1274_v34  ;;  %v1289_v34 = vmax.f32 %v1001_v44, 0.0  ;;  %v1016_v44 = vadd.f32 %v3390_v48, %v724_v41  ;;  %v739_v41 = vmul.f32 %v3396_v17, %v4260_v9 }
 0x1f2   : > { %1563 = vst [vmem:[%s1819_s25 + $0x728] sm:$0xff] %v1275_v58  ;;  %v1290_v58 = vmax.f32 %v1002_v0, 0.0  ;;  %v1017_v0 = vadd.f32 %v3390_v48, %v725_v20  ;;  %v740_v20 = vmul.f32 %v3396_v17, %v4261_v59 }
 0x1f3   : > { %1564 = vst [vmem:[%s1819_s25 + $0x730] sm:$0xff] %v1276_v22  ;;  %v1291_v22 = vmax.f32 %v1003_v1, 0.0  ;;  %v1018_v1 = vadd.f32 %v3390_v48, %v726_v28  ;;  %v741_v28 = vmul.f32 %v3396_v17, %v4262_v27 }
 0x1f4   : > { %1565 = vst [vmem:[%s1819_s25 + $0x738] sm:$0xff] %v1277_v24  ;;  %v1292_v24 = vmax.f32 %v1004_v2, 0.0  ;;  %v1019_v2 = vadd.f32 %v3390_v48, %v727_v62  ;;  %v742_v62 = vmul.f32 %v3396_v17, %v4263_v21 }
 0x1f5   : > { %1566 = vst [vmem:[%s1819_s25 + $0x740] sm:$0xff] %v1278_v53  ;;  %v1293_v53 = vmax.f32 %v1005_v11, 0.0  ;;  %v1020_v11 = vadd.f32 %v3390_v48, %v728_v31  ;;  %v743_v31 = vmul.f32 %v3396_v17, %v4264_v63 }
 0x1f6   : > { %1567 = vst [vmem:[%s1819_s25 + $0x748] sm:$0xff] %v1279_v13  ;;  %v1294_v13 = vmax.f32 %v1006_v35, 0.0  ;;  %v1021_v35 = vadd.f32 %v3390_v48, %v729_v5  ;;  %v744_v5 = vmul.f32 %v3396_v17, %v4265_v45 }
 0x1f7   : > { %1568 = vst [vmem:[%s1819_s25 + $0x750] sm:$0xff] %v1280_v3  ;;  %v1295_v3 = vmax.f32 %v1007_v36, 0.0  ;;  %v1022_v36 = vadd.f32 %v3390_v48, %v730_v33  ;;  %v745_v33 = vmul.f32 %v3396_v17, %v4266_v46 }
 0x1f8   : > { %1569 = vst [vmem:[%s1819_s25 + $0x758] sm:$0xff] %v1281_v57  ;;  %v1296_v57 = vmax.f32 %v1008_v52, 0.0  ;;  %v1023_v52 = vadd.f32 %v3390_v48, %v731_v16  ;;  %v746_v16 = vmul.f32 %v3396_v17, %v4267_v47 }
 0x1f9   : > { %1570 = vst [vmem:[%s1819_s25 + $0x760] sm:$0xff] %v1282_v8  ;;  %v1297_v8 = vmax.f32 %v1009_v10, 0.0  ;;  %v1024_v10 = vadd.f32 %v3390_v48, %v732_v49  ;;  %v747_v49 = vmul.f32 %v3396_v17, %v4268_v29 }
 0x1fa   : > { %1571 = vst [vmem:[%s1819_s25 + $0x768] sm:$0xff] %v1283_v42  ;;  %v1298_v42 = vmax.f32 %v1010_v26, 0.0  ;;  %v1025_v26 = vadd.f32 %v3390_v48, %v733_v50  ;;  %v748_v50 = vmul.f32 %v3396_v17, %v4269_v6 }
 0x1fb   : > { %1572 = vst [vmem:[%s1819_s25 + $0x770] sm:$0xff] %v1284_v61  ;;  %v1299_v61 = vmax.f32 %v1011_v56, 0.0  ;;  %v1026_v56 = vadd.f32 %v3390_v48, %v734_v23  ;;  %v749_v23 = vmul.f32 %v3396_v17, %v4270_v51 }
 0x1fc   : > { %1573 = vst [vmem:[%s1819_s25 + $0x778] sm:$0xff] %v1285_v30  ;;  %v1300_v30 = vmax.f32 %v1012_v7, 0.0  ;;  %v1027_v7 = vadd.f32 %v3390_v48, %v735_v12  ;;  %v750_v12 = vmul.f32 %v3396_v17, %v4271_v37 }
 0x1fd   : > { %1574 = vst [vmem:[%s1819_s25 + $0x780] sm:$0xff] %v1286_v32  ;;  %v1301_v32 = vmax.f32 %v1013_v25, 0.0  ;;  %v1028_v25 = vadd.f32 %v3390_v48, %v736_v54 }
 0x1fe   : > { %1575 = vst [vmem:[%s1819_s25 + $0x788] sm:$0xff] %v1287_v14  ;;  %v1302_v14 = vmax.f32 %v1014_v60, 0.0  ;;  %v1029_v60 = vadd.f32 %v3390_v48, %v737_v39  ;;  %v1041_v39 = vadd.f32 %v3390_v48, %v749_v23  ;;  %v1042_v4 = vadd.f32 %v3390_v48, %v750_v12 }
 0x1ff   : > { %1576 = vst [vmem:[%s1819_s25 + $0x790] sm:$0xff] %v1288_v15  ;;  %v1303_v15 = vmax.f32 %v1015_v43, 0.0  ;;  %v1030_v43 = vadd.f32 %v3390_v48, %v738_v40 }
 0x200   : > { %1577 = vst [vmem:[%s1819_s25 + $0x798] sm:$0xff] %v1289_v34  ;;  %v1304_v34 = vmax.f32 %v1016_v44, 0.0  ;;  %v1031_v44 = vadd.f32 %v3390_v48, %v739_v41  ;;  %v1330_v41 = vmax.f32 %v1042_v4, 0.0 }
 0x201   : > { %1578 = vst [vmem:[%s1819_s25 + $0x7a0] sm:$0xff] %v1290_v58  ;;  %v1305_v58 = vmax.f32 %v1017_v0, 0.0  ;;  %v1032_v0 = vadd.f32 %v3390_v48, %v740_v20 }
 0x202   : > { %1579 = vst [vmem:[%s1819_s25 + $0x7a8] sm:$0xff] %v1291_v22  ;;  %v1306_v22 = vmax.f32 %v1018_v1, 0.0  ;;  %v1033_v1 = vadd.f32 %v3390_v48, %v741_v28 }
 0x203   : > { %1580 = vst [vmem:[%s1819_s25 + $0x7b0] sm:$0xff] %v1292_v24  ;;  %v1307_v24 = vmax.f32 %v1019_v2, 0.0  ;;  %v1034_v2 = vadd.f32 %v3390_v48, %v742_v62 }
 0x204   : > { %1581 = vst [vmem:[%s1819_s25 + $0x7b8] sm:$0xff] %v1293_v53  ;;  %v1308_v53 = vmax.f32 %v1020_v11, 0.0  ;;  %v1035_v11 = vadd.f32 %v3390_v48, %v743_v31 }
 0x205   : > { %1582 = vst [vmem:[%s1819_s25 + $0x7c0] sm:$0xff] %v1294_v13  ;;  %v1309_v13 = vmax.f32 %v1021_v35, 0.0  ;;  %v1036_v35 = vadd.f32 %v3390_v48, %v744_v5 }
 0x206   : > { %1583 = vst [vmem:[%s1819_s25 + $0x7c8] sm:$0xff] %v1295_v3  ;;  %v1310_v3 = vmax.f32 %v1022_v36, 0.0  ;;  %v1037_v36 = vadd.f32 %v3390_v48, %v745_v33 }
 0x207   : > { %1584 = vst [vmem:[%s1819_s25 + $0x7d0] sm:$0xff] %v1296_v57  ;;  %v1311_v57 = vmax.f32 %v1023_v52, 0.0  ;;  %v1038_v52 = vadd.f32 %v3390_v48, %v746_v16  ;;  %v1324_v54 = vmax.f32 %v1036_v35, 0.0 }
 0x208   : > { %1585 = vst [vmem:[%s1819_s25 + $0x7d8] sm:$0xff] %v1297_v8  ;;  %v1312_v8 = vmax.f32 %v1024_v10, 0.0  ;;  %v1039_v10 = vadd.f32 %v3390_v48, %v747_v49  ;;  %v1325_v55 = vmax.f32 %v1037_v36, 0.0 }
 0x209   : > { %1586 = vst [vmem:[%s1819_s25 + $0x7e0] sm:$0xff] %v1298_v42  ;;  %v1313_v42 = vmax.f32 %v1025_v26, 0.0  ;;  %v752_v26 = vmul.f32 %v3396_v17, %v2644_v19  ;;  %v1326_v18 = vmax.f32 %v1038_v52, 0.0  ;;  %v1043_v19 = vadd.f32 %v3390_v48, %v751_v38 }
 0x20a   : > { %1587 = vst [vmem:[%s1819_s25 + $0x7e8] sm:$0xff] %v1299_v61  ;;  %v1314_v61 = vmax.f32 %v1026_v56, 0.0  ;;  %v1327_v40 = vmax.f32 %v1039_v10, 0.0 }
 0x20b   : > { %1588 = vst [vmem:[%s1819_s25 + $0x7f0] sm:$0xff] %v1300_v30  ;;  %v1315_v30 = vmax.f32 %v1027_v7, 0.0  ;;  %v1044_v7 = vadd.f32 %v3390_v48, %v752_v26 }
 0x20c   : > { %1589 = vst [vmem:[%s1819_s25 + $0x7f8] sm:$0xff] %v1301_v32  ;;  %v1316_v32 = vmax.f32 %v1028_v25, 0.0 }
 0x20d   : > { %1590 = vst [vmem:[%s1819_s25 + $0x800] sm:$0xff] %v1302_v14  ;;  %v1317_v14 = vmax.f32 %v1029_v60, 0.0  ;;  %v1332_v25 = vmax.f32 %v1044_v7, 0.0 }
 0x20e   : > { %1591 = vst [vmem:[%s1819_s25 + $0x808] sm:$0xff] %v1303_v15  ;;  %v1318_v15 = vmax.f32 %v1030_v43, 0.0 }
 0x20f   : > { %1592 = vst [vmem:[%s1819_s25 + $0x810] sm:$0xff] %v1304_v34  ;;  %v1319_v34 = vmax.f32 %v1031_v44, 0.0 }
 0x210   : > { %1593 = vst [vmem:[%s1819_s25 + $0x818] sm:$0xff] %v1305_v58  ;;  %v1320_v58 = vmax.f32 %v1032_v0, 0.0 }
 0x211   : > { %1594 = vst [vmem:[%s1819_s25 + $0x820] sm:$0xff] %v1306_v22  ;;  %v1321_v22 = vmax.f32 %v1033_v1, 0.0 }
 0x212   : > { %1595 = vst [vmem:[%s1819_s25 + $0x828] sm:$0xff] %v1307_v24  ;;  %v1322_v24 = vmax.f32 %v1034_v2, 0.0 }
 0x213   : > { %1596 = vst [vmem:[%s1819_s25 + $0x830] sm:$0xff] %v1308_v53  ;;  %v1323_v53 = vmax.f32 %v1035_v11, 0.0 }
 0x214   : > { %1597 = vst [vmem:[%s1819_s25 + $0x838] sm:$0xff] %v1309_v13  ;;  %v1040_v13 = vadd.f32 %v3390_v48, %v748_v50 }
 0x215   : > { %1598 = vst [vmem:[%s1819_s25 + $0x840] sm:$0xff] %v1310_v3  ;;  %v4272_v3 = vld [vmem:[#allocation234_spill] sm:$0xff] }
 0x216   : > { %1599 = vst [vmem:[%s1819_s25 + $0x848] sm:$0xff] %v1311_v57  ;;  %v753_v56 = vmul.f32 %v3396_v17, %v4272_v3  ;;  %v1328_v57 = vmax.f32 %v1040_v13, 0.0  ;;  %v1329_v17 = vmax.f32 %v1041_v39, 0.0 }
 0x217   : > { %1600 = vst [vmem:[%s1819_s25 + $0x850] sm:$0xff] %v1312_v8  ;;  %v1331_v8 = vmax.f32 %v1043_v19, 0.0 }
 0x218   : > { %1601 = vst [vmem:[%s1819_s25 + $0x858] sm:$0xff] %v1313_v42  ;;  %v1045_v9 = vadd.f32 %v3390_v48, %v753_v56 }
 0x219   : > { %1602 = vst [vmem:[%s1819_s25 + $0x860] sm:$0xff] %v1314_v61 }
 0x21a   : > { %1603 = vst [vmem:[%s1819_s25 + $0x868] sm:$0xff] %v1315_v30  ;;  %v1333_v59 = vmax.f32 %v1045_v9, 0.0 }
 0x21b   : > { %1604 = vst [vmem:[%s1819_s25 + $0x870] sm:$0xff] %v1316_v32 }
 0x21c   : > { %1605 = vst [vmem:[%s1819_s25 + $0x878] sm:$0xff] %v1317_v14 }
 0x21d   : > { %1606 = vst [vmem:[%s1819_s25 + $0x880] sm:$0xff] %v1318_v15 }
 0x21e   : > { %1607 = vst [vmem:[%s1819_s25 + $0x888] sm:$0xff] %v1319_v34 }
 0x21f   : > { %1608 = vst [vmem:[%s1819_s25 + $0x890] sm:$0xff] %v1320_v58 }
 0x220   : > { %1609 = vst [vmem:[%s1819_s25 + $0x898] sm:$0xff] %v1321_v22 }
 0x221   : > { %1610 = vst [vmem:[%s1819_s25 + $0x8a0] sm:$0xff] %v1322_v24 }
 0x222   : > { %1611 = vst [vmem:[%s1819_s25 + $0x8a8] sm:$0xff] %v1323_v53 }
 0x223   : > { %1612 = vst [vmem:[%s1819_s25 + $0x8b0] sm:$0xff] %v1324_v54 }
 0x224   : > { %1613 = vst [vmem:[%s1819_s25 + $0x8b8] sm:$0xff] %v1325_v55 }
 0x225   : > { %1614 = vst [vmem:[%s1819_s25 + $0x8c0] sm:$0xff] %v1326_v18 }
 0x226   : > { %1615 = vst [vmem:[%s1819_s25 + $0x8c8] sm:$0xff] %v1327_v40 }
 0x227   : > { %1616 = vst [vmem:[%s1819_s25 + $0x8d0] sm:$0xff] %v1328_v57 }
 0x228   : > { %1617 = vst [vmem:[%s1819_s25 + $0x8d8] sm:$0xff] %v1329_v17 }
 0x229   : > { %1618 = vst [vmem:[%s1819_s25 + $0x8e0] sm:$0xff] %v1330_v41 }
 0x22a   : > { %1619 = vst [vmem:[%s1819_s25 + $0x8e8] sm:$0xff] %v1331_v8 }
 0x22b   : > { %1620 = vst [vmem:[%s1819_s25 + $0x8f0] sm:$0xff] %v1332_v25 }
 0x22c   : > { %1621 = vst [vmem:[%s1819_s25 + $0x8f8] sm:$0xff] %v1333_v59 }
 0x22d PF: > { %s13_s12 = sadd.s32 1, %s1707_s12  }
 0x22e   : > { %p10_p4 = scmp.ge.s32.totalorder %s13_s12, 4  }
 0x230   :  { %12 = sbr.rel (!%p10_p4) target bundleno = 1 (0x1), region = 62 }

// kernel: basic_conv3d.2
= control target key start
LH: loop header
LB: loop body
LE: loop exit
PB: predicated region body
PF: predicated region fallthrough
CT: control target
= control target key end

     0   :  { %s5398_s15 = smov 0   ;;  %s5400_s16 = smov 0   ;;  %s8077_s0 = inlined_call_operand.vmem [shape: f32[2,10,328,4], index: 0, kind: input, shape index: {}]   ;;  %s8078_s1 = inlined_call_operand.vmem [shape: f32[3,9,4,128], index: 1, kind: input, shape index: {}]   ;;  %s8079_s2 = inlined_call_operand.vmem [shape: f32[2,8,288,128], index: 2, kind: output, shape index: {0}]   ;;  %s8080_s3 = inlined_call_operand.vmem [shape: f32[2,1,128], index: 3, kind: output, shape index: {1}]   ;;  %s8081_s4 = inlined_call_operand.vmem [shape: f32[2,1,128], index: 4, kind: output, shape index: {2}]  }
   0x1   :  { %s5402_s17 = smov 0   ;;  %s5404_s18 = smov 0  }
   0x2   :  { %s5406_s19 = smov 0   ;;  %s5408_s20 = smov 0  }
   0x3   :  { %s5410_s21 = smov 0  }
   0x4 LB: > { %s27_s22 = sadd.s32 1, %s5357_s18  ;;  %s30_s23 = sadd.s32 1, %s5361_s19  ;;  %s5369_s21 = sphi %s5410_s21, %s15_s21   ;;  %s5365_s20 = sphi %s5408_s20, %s8372_s20   ;;  %s5361_s19 = sphi %s5406_s19, %s8371_s19   ;;  %s5357_s18 = sphi %s5404_s18, %s8370_s18   ;;  %s5353_s17 = sphi %s5402_s17, %s8369_s17   ;;  %s5349_s16 = sphi %s5400_s16, %s8368_s16   ;;  %s5345_s15 = sphi %s5398_s15, %s8367_s15  }
   0x5   : > { %p28_p0 = scmp.ge.s32.totalorder %s27_s22, 3  ;;  %p4899_p1 = scmp.ge.s32.totalorder %s5369_s21, 1 }
   0x6   : > { %p208_p2 = scmp.lt.s32.totalorder %s5369_s21, 49  ;;  %s34_s24 = sadd.s32 1, %s5365_s20 }
   0x7   : > { %s8374_s22 = smov (%p28_p0, %s27_s22), 0  ;;  %s8376_s23 = smov (!%p28_p0, %s30_s23), %s5361_s19 }
   0x8   : > { %p209_p3 = pnand %p4899_p1, %p208_p2  ;;  %p32_p4 = scmp.ge.s32.totalorder %s8376_s23, 8 }
   0x9   : > { %s254_s25 = sadd.s32 (!%p209_p3), %s5345_s15, %s5349_s16  ;;  %p255_p6 = scmp.lt.s32.totalorder (!%p209_p3), %s5353_s17, 1 }
   0xa   : > { %s8378_s23 = smov (%p32_p4, %s8376_s23), 0  ;;  %s8380_s24 = smov (!%p32_p4, %s34_s24), %s5365_s20 }
   0xb   : > { %8121 = sst [smem:[#allocation2_spill]] %s8378_s23  ;;  %p36_p5 = scmp.ge.s32.totalorder %s8380_s24, 2 }
   0xc   : > { %212 = sbr.rel (%p209_p3) target bundleno = 1218 (0x4c2), region = 28  ;;  %p257_p7 = scmp.lt.s32.totalorder (!%p209_p3), %s254_s25, 9 }
   0xd   : > { %s8382_s24 = smov (%p36_p5, %s8380_s24), 0  ;;  %p265_p8 = scmp.lt.s32.totalorder (!%p209_p3), %s5345_s15, 2 }
   0xe   : > { %8122 = sst [smem:[#allocation3_spill]] %s8382_s24  ;;  %p272_p9 = scmp.lt.s32.totalorder (!%p209_p3), %s5349_s16, 7 }
   0xf   : > { %p285_p10 = scmp.eq.s32.totalorder (!%p209_p3), %s5349_s16, 0  ;;  %p286_p11 = scmp.eq.s32.totalorder (!%p209_p3), %s5345_s15, 0 }
  0x11   : > { %s8384_s17 = smov (!%p255_p6, %s5353_s17), 1  ;;  %s8386_s25 = smov (!%p257_p7, %s254_s25), 9 }
  0x12   : > { %s5253_s26 = smul.u32 410, %s8384_s17  ;;  %s5451_s30 = scalar_lea.vmem %s8080_s3, %s8384_s17 }
  0x13   : > { %s5252_s27 = smul.u32 41, %s8386_s25  ;;  %s5462_s24 = scalar_lea.vmem %s8081_s4, %s8384_s17 }
  0x14   : > { %s266_s5 = scalar_select %p265_p8, %s5345_s15, 2 }
  0x15   : > { %s261_s6 = sadd.s32 %s5253_s26, %s5252_s27  ;;  %s5256_s7 = smul.u32 288, %s8384_s17 }
  0x16   : > { %s4900_s8 = sshll.u32 %s261_s6, 3  ;;  %s5254_s9 = smul.u32 36, %s266_s5 }
  0x17   : > { %s5457_s12 = scalar_lea.vmem %s8077_s0, %s4900_s8  ;;  %s8388_s16 = smov (!%p272_p9, %s5349_s16), 7 }
  0x18   : > { %s5467_s28 = scalar_lea.vmem %s8078_s1, %s5254_s9  ;;  %s5255_s26 = smul.u32 36, %s8388_s16 }
  0x19   : > { %p287_p12 = pnand %p286_p11, %p285_p10 }
  0x1a   : > { %s276_s27 = sadd.s32 %s5256_s7, %s5255_s26 }
  0x1b   : > { %s4902_s29 = sshll.u32 %s276_s27, 3  ;;  %290 = sbr.rel (%p287_p12) target bundleno = 35 (0x23), region = 32 }
  0x1c   : > { %s5477_s8 = scalar_lea.vmem %s8079_s2, %s4902_s29 }
  0x20   : > { %v5371_v0 = vmov 0.0  }
  0x21   : > { %291 = vst [vmem:[%s5451_s30] sm:$0x1] %v5371_v0 }
  0x22   : > { %292 = vst [vmem:[%s5462_s24] sm:$0x1] %v5371_v0 }
  0x23 PF: > { %v4903_v1 = vld [vmem:[%s5467_s28 + $0x4] sm:$0xf]  ;;  %vm477_vm0 = vcmask 1043456   ;;  %v339_v2 = vld [vmem:[%s5457_s12 + $0x49] sm:$0xff]  ;;  %vm368_vm1 = vcmask 31744   ;;  %v348_v3 = vld [vmem:[%s5457_s12 + $0x91] sm:$0xff] }
  0x24   : > { %5249 = vmatpush.msk.msra.mxu1 %vm477_vm0, %v4903_v1  ;;  %5250 = vmatpush.msk.msra.mxu2 %vm477_vm0, %v4903_v1  ;;  %v4978_v4 = vld [vmem:[%s5467_s28 + $0x8] sm:$0xf]  ;;  %v357_v5 = vld [vmem:[%s5457_s12 + $0xd9] sm:$0xff]  ;;  %v5016_v6 = vld [vmem:[%s5467_s28 + $0xc] sm:$0xf]  ;;  %p5244_p13 = scmp.ne.s32.totalorder %s5345_s15, 0 }
  0x25   : > { %4914 = vmatmul.msk.f32.vlgmr.msra.gmra.mxu1 %vm368_vm1, %v339_v2  ;;  %4923 = vmatmul.msk.f32.vlgmr.msra.gmra.mxu2 %vm368_vm1, %v348_v3  ;;  %v329_v7 = vld [vmem:[%s5467_s28] sm:$0xf]  ;;  %v5054_v9 = vld [vmem:[%s5467_s28 + $0x10] sm:$0xf]  ;;  %v5130_v29 = vld [vmem:[%s5467_s28 + $0x18] sm:$0xf] }
  0x26   : > { %4979 = vmatpush.msk.msrb.mxu2 %vm477_vm0, %v4978_v4  ;;  %5251 = vmatpush.msk.msra.mxu3 %vm477_vm0, %v4903_v1  ;;  %v330_v8 = vld [vmem:[%s5457_s12 + $0x1] sm:$0xff]  ;;  %v340_v10 = vld [vmem:[%s5457_s12 + $0x51] sm:$0xff]  ;;  %v349_v11 = vld [vmem:[%s5457_s12 + $0x99] sm:$0xff] }
  0x27   : > { %4932 = vmatmul.msk.f32.vlgmr.msra.gmra.mxu3 %vm368_vm1, %v357_v5  ;;  %4941 = vmatpush.msk.msrb.mxu1 %vm477_vm0, %v329_v7  ;;  %v358_v12 = vld [vmem:[%s5457_s12 + $0xe1] sm:$0xff]  ;;  %v331_v13 = vld [vmem:[%s5457_s12 + $0x9] sm:$0xff]  ;;  %v341_v14 = vld [vmem:[%s5457_s12 + $0x59] sm:$0xff] }
  0x28   : > { %5017 = vmatpush.msk.msrb.mxu3 %vm477_vm0, %v5016_v6  ;;  %4904 = vmatpush.msk.msra.mxu0 %vm477_vm0, %v4903_v1  ;;  %v350_v15 = vld [vmem:[%s5457_s12 + $0xa1] sm:$0xff]  ;;  %v359_v16 = vld [vmem:[%s5457_s12 + $0xe9] sm:$0xff]  ;;  %v332_v17 = vld [vmem:[%s5457_s12 + $0x11] sm:$0xff] }
  0x29   : > { %4905 = vmatmul.msk.f32.vlgmr.msra.gmra.mxu0 %vm368_vm1, %v330_v8  ;;  %v342_v18 = vld [vmem:[%s5457_s12 + $0x61] sm:$0xff]  ;;  %v351_v19 = vld [vmem:[%s5457_s12 + $0xa9] sm:$0xff]  ;;  %v360_v20 = vld [vmem:[%s5457_s12 + $0xf1] sm:$0xff]  ;;  %5131 = vmatpush.msk.msra.mxu2 %vm477_vm0, %v5130_v29 }
  0x2a   : > { %5055 = vmatpush.msk.msrb.mxu0 %vm477_vm0, %v5054_v9  ;;  %v333_v21 = vld [vmem:[%s5457_s12 + $0x19] sm:$0xff]  ;;  %v343_v22 = vld [vmem:[%s5457_s12 + $0x69] sm:$0xff]  ;;  %v352_v23 = vld [vmem:[%s5457_s12 + $0xb1] sm:$0xff] }
  0x2b   : > { %v361_v24 = vld [vmem:[%s5457_s12 + $0xf9] sm:$0xff]  ;;  %v334_v25 = vld [vmem:[%s5457_s12 + $0x21] sm:$0xff]  ;;  %v344_v26 = vld [vmem:[%s5457_s12 + $0x71] sm:$0xff] }
  0x2c   : > { %v353_v27 = vld [vmem:[%s5457_s12 + $0xb9] sm:$0xff]  ;;  %v362_v28 = vld [vmem:[%s5457_s12 + $0x101] sm:$0xff]  ;;  %v335_v30 = vld [vmem:[%s5457_s12 + $0x29] sm:$0xff] }
  0x2d   : > { %4915 = vmatmul.msk.f32.gmra.mxu1 %vm368_vm1, %v340_v10  ;;  %4924 = vmatmul.msk.f32.gmra.mxu2 %vm368_vm1, %v349_v11  ;;  %v5168_v31 = vld [vmem:[%s5467_s28 + $0x1c] sm:$0xf]  ;;  %v5092_v32 = vld [vmem:[%s5467_s28 + $0x14] sm:$0xf]  ;;  %v354_v34 = vld [vmem:[%s5457_s12 + $0xc1] sm:$0xff] }
  0x2e   : > { %5169 = vmatpush.msk.msra.mxu3 %vm477_vm0, %v5168_v31  ;;  %5093 = vmatpush.msk.msra.mxu1 %vm477_vm0, %v5092_v32  ;;  %v345_v33 = vld [vmem:[%s5457_s12 + $0x79] sm:$0xff]  ;;  %v363_v35 = vld [vmem:[%s5457_s12 + $0x109] sm:$0xff]  ;;  %v336_v36 = vld [vmem:[%s5457_s12 + $0x31] sm:$0xff] }
  0x2f   : > { %4933 = vmatmul.msk.f32.gmra.mxu3 %vm368_vm1, %v358_v12  ;;  %v5206_v37 = vld [vmem:[%s5467_s28 + $0x20] sm:$0xf]  ;;  %v355_v39 = vld [vmem:[%s5457_s12 + $0xc9] sm:$0xff]  ;;  %v364_v40 = vld [vmem:[%s5457_s12 + $0x111] sm:$0xff] }
  0x30   : > { %5207 = vmatpush.msk.msra.mxu0 %vm477_vm0, %v5206_v37  ;;  %v346_v38 = vld [vmem:[%s5457_s12 + $0x81] sm:$0xff]  ;;  %v337_v41 = vld [vmem:[%s5457_s12 + $0x39] sm:$0xff]  ;;  %v347_v42 = vld [vmem:[%s5457_s12 + $0x89] sm:$0xff] }
  0x31   : > { %4906 = vmatmul.msk.f32.gmra.mxu0 %vm368_vm1, %v331_v13  ;;  %v356_v43 = vld [vmem:[%s5457_s12 + $0xd1] sm:$0xff]  ;;  %v365_v44 = vld [vmem:[%s5457_s12 + $0x119] sm:$0xff]  ;;  %v338_v45 = vld [vmem:[%s5457_s12 + $0x41] sm:$0xff] }
  0x32   : > { %v293_v46 = vld [vmem:[%s5457_s12] sm:$0xff]  ;;  %v1152_v48 = vld [vmem:[%s5457_s12 + $0x12] sm:$0xff]  ;;  %v294_v50 = vld [vmem:[%s5457_s12 + $0x8] sm:$0xff] }
  0x33   : > { %v842_v47 = vld [vmem:[%s5457_s12 + $0x2] sm:$0xff]  ;;  %v1462_v49 = vld [vmem:[%s5457_s12 + $0x13] sm:$0xff]  ;;  %v843_v51 = vld [vmem:[%s5457_s12 + $0xa] sm:$0xff] }
  0x34   : > { %v1153_v52 = vld [vmem:[%s5457_s12 + $0x1a] sm:$0xff]  ;;  %v295_v54 = vld [vmem:[%s5457_s12 + $0x10] sm:$0xff]  ;;  %v1154_v55 = vld [vmem:[%s5457_s12 + $0x22] sm:$0xff] }
  0x35   : > { %4916 = vmatmul.msk.f32.gmra.mxu1 %vm368_vm1, %v341_v14  ;;  %4925 = vmatmul.msk.f32.gmra.mxu2 %vm368_vm1, %v350_v15  ;;  %v1463_v53 = vld [vmem:[%s5457_s12 + $0x1b] sm:$0xff]  ;;  %v1464_v56 = vld [vmem:[%s5457_s12 + $0x23] sm:$0xff]  ;;  %v1465_v59 = vld [vmem:[%s5457_s12 + $0x2b] sm:$0xff] }
  0x36   : > { %v296_v57 = vld [vmem:[%s5457_s12 + $0x18] sm:$0xff]  ;;  %v1155_v58 = vld [vmem:[%s5457_s12 + $0x2a] sm:$0xff]  ;;  %v297_v60 = vld [vmem:[%s5457_s12 + $0x20] sm:$0xff] }
  0x37   : > { %4934 = vmatmul.msk.f32.gmra.mxu3 %vm368_vm1, %v359_v16  ;;  %v1156_v61 = vld [vmem:[%s5457_s12 + $0x32] sm:$0xff]  ;;  %v298_v63 = vld [vmem:[%s5457_s12 + $0x28] sm:$0xff]  ;;  %v1157_v0 = vld [vmem:[%s5457_s12 + $0x3a] sm:$0xff] }
  0x38   : > { %v1466_v62 = vld [vmem:[%s5457_s12 + $0x33] sm:$0xff]  ;;  %v1467_v1 = vld [vmem:[%s5457_s12 + $0x3b] sm:$0xff]  ;;  %v1468_v4 = vld [vmem:[%s5457_s12 + $0x43] sm:$0xff] }
  0x39   : > { %4907 = vmatmul.msk.f32.gmra.mxu0 %vm368_vm1, %v332_v17  ;;  %v299_v2 = vld [vmem:[%s5457_s12 + $0x30] sm:$0xff]  ;;  %v1158_v3 = vld [vmem:[%s5457_s12 + $0x42] sm:$0xff]  ;;  %v300_v6 = vld [vmem:[%s5457_s12 + $0x38] sm:$0xff] }
  0x3a   : > { %v1159_v7 = vld [vmem:[%s5457_s12 + $0x4a] sm:$0xff]  ;;  %v301_v13 = vld [vmem:[%s5457_s12 + $0x40] sm:$0xff]  ;;  %v1160_v14 = vld [vmem:[%s5457_s12 + $0x52] sm:$0xff] }
  0x3b   : > { %v1469_v9 = vld [vmem:[%s5457_s12 + $0x4b] sm:$0xff]  ;;  %v1470_v16 = vld [vmem:[%s5457_s12 + $0x53] sm:$0xff] }
  0x3c   : > { %v1473_v37 = vld [vmem:[%s5457_s12 + $0x6b] sm:$0xff] }
  0x3d   : > { %4917 = vmatmul.msk.f32.gmra.mxu1 %vm368_vm1, %v342_v18  ;;  %4926 = vmatmul.msk.f32.gmra.mxu2 %vm368_vm1, %v351_v19 }
  0x3f   : > { %4935 = vmatmul.msk.f32.gmra.mxu3 %vm368_vm1, %v360_v20  ;;  %v302_v20 = vld [vmem:[%s5457_s12 + $0x48] sm:$0xff] }
  0x41   : > { %4908 = vmatmul.msk.f32.gmra.mxu0 %vm368_vm1, %v333_v21  ;;  %v1161_v21 = vld [vmem:[%s5457_s12 + $0x5a] sm:$0xff] }
  0x45   : > { %4918 = vmatmul.msk.f32.gmra.mxu1 %vm368_vm1, %v343_v22  ;;  %4927 = vmatmul.msk.f32.gmra.mxu2 %vm368_vm1, %v352_v23  ;;  %v1471_v23 = vld [vmem:[%s5457_s12 + $0x5b] sm:$0xff] }
  0x47   : > { %4936 = vmatmul.msk.f32.gmra.mxu3 %vm368_vm1, %v361_v24 }
  0x49   : > { %4909 = vmatmul.msk.f32.gmra.mxu0 %vm368_vm1, %v334_v25 }
  0x4d   : > { %4919 = vmatmul.msk.f32.gmra.mxu1 %vm368_vm1, %v344_v26  ;;  %4928 = vmatmul.msk.f32.gmra.mxu2 %vm368_vm1, %v353_v27  ;;  %v303_v27 = vld [vmem:[%s5457_s12 + $0x50] sm:$0xff] }
  0x4f   : > { %4937 = vmatmul.msk.f32.gmra.mxu3 %vm368_vm1, %v362_v28  ;;  %v1162_v28 = vld [vmem:[%s5457_s12 + $0x62] sm:$0xff] }
  0x51   : > { %4910 = vmatmul.msk.f32.gmra.mxu0 %vm368_vm1, %v335_v30  ;;  %v1472_v30 = vld [vmem:[%s5457_s12 + $0x63] sm:$0xff] }
  0x55   : > { %4920 = vmatmul.msk.f32.gmra.mxu1 %vm368_vm1, %v345_v33  ;;  %4929 = vmatmul.msk.f32.gmra.mxu2 %vm368_vm1, %v354_v34  ;;  %v304_v34 = vld [vmem:[%s5457_s12 + $0x58] sm:$0xff] }
  0x57   : > { %4938 = vmatmul.msk.f32.gmra.mxu3 %vm368_vm1, %v363_v35  ;;  %v1163_v35 = vld [vmem:[%s5457_s12 + $0x6a] sm:$0xff] }
  0x59   : > { %4911 = vmatmul.msk.f32.gmra.mxu0 %vm368_vm1, %v336_v36 }
  0x5d   : > { %4921 = vmatmul.msk.f32.gmra.mxu1 %vm368_vm1, %v346_v38  ;;  %4930 = vmatmul.msk.f32.gmra.mxu2 %vm368_vm1, %v355_v39 }
  0x5f   : > { %4939 = vmatmul.msk.f32.gmra.mxu3 %vm368_vm1, %v364_v40 }
  0x61   : > { %4912 = vmatmul.msk.f32.gmra.mxu0 %vm368_vm1, %v337_v41  ;;  %v305_v41 = vld [vmem:[%s5457_s12 + $0x60] sm:$0xff] }
  0x65   : > { %4922 = vmatmul.msk.f32.gmra.mxu1 %vm368_vm1, %v347_v42  ;;  %4931 = vmatmul.msk.f32.gmra.mxu2 %vm368_vm1, %v356_v43  ;;  %v1164_v42 = vld [vmem:[%s5457_s12 + $0x72] sm:$0xff] }
  0x67   : > { %4940 = vmatmul.msk.f32.gmra.mxu3 %vm368_vm1, %v365_v44  ;;  %v1474_v44 = vld [vmem:[%s5457_s12 + $0x73] sm:$0xff] }
  0x69   : > { %4913 = vmatmul.msk.f32.gmra.mxu0 %vm368_vm1, %v338_v45 }
  0x6d   : > { %4942 = vmatmul.msk.f32.vlgmr.msrb.gmra.mxu1 %vm368_vm1, %v293_v46  ;;  %4980 = vmatmul.msk.f32.vlgmr.msrb.gmra.mxu2 %vm368_vm1, %v842_v47 }
  0x6f   : > { %5018 = vmatmul.msk.f32.vlgmr.msrb.gmra.mxu3 %vm368_vm1, %v1152_v48 }
  0x71   : > { %5056 = vmatmul.msk.f32.vlgmr.msrb.gmra.mxu0 %vm368_vm1, %v1462_v49  ;;  %v1165_v49 = vld [vmem:[%s5457_s12 + $0x7a] sm:$0xff] }
  0x75   : > { %4943 = vmatmul.msk.f32.gmra.mxu1 %vm368_vm1, %v294_v50  ;;  %4981 = vmatmul.msk.f32.gmra.mxu2 %vm368_vm1, %v843_v51  ;;  %v1475_v51 = vld [vmem:[%s5457_s12 + $0x7b] sm:$0xff] }
  0x77   : > { %5019 = vmatmul.msk.f32.gmra.mxu3 %vm368_vm1, %v1153_v52 }
  0x79   : > { %5057 = vmatmul.msk.f32.gmra.mxu0 %vm368_vm1, %v1463_v53 }
  0x7d   : > { %4944 = vmatmul.msk.f32.gmra.mxu1 %vm368_vm1, %v295_v54  ;;  %4982 = vmatmul.msk.f32.gmra.mxu2 %vm368_vm1, %v1152_v48  ;;  %v306_v48 = vld [vmem:[%s5457_s12 + $0x68] sm:$0xff] }
  0x7f   : > { %5020 = vmatmul.msk.f32.gmra.mxu3 %vm368_vm1, %v1154_v55 }
  0x81   : > { %5058 = vmatmul.msk.f32.gmra.mxu0 %vm368_vm1, %v1464_v56  ;;  %v1166_v56 = vld [vmem:[%s5457_s12 + $0x82] sm:$0xff] }
  0x85   : > { %4945 = vmatmul.msk.f32.gmra.mxu1 %vm368_vm1, %v296_v57  ;;  %4983 = vmatmul.msk.f32.gmra.mxu2 %vm368_vm1, %v1153_v52 }
  0x87   : > { %5021 = vmatmul.msk.f32.gmra.mxu3 %vm368_vm1, %v1155_v58 }
  0x89   : > { %5059 = vmatmul.msk.f32.gmra.mxu0 %vm368_vm1, %v1465_v59 }
  0x8d   : > { %4946 = vmatmul.msk.f32.gmra.mxu1 %vm368_vm1, %v297_v60  ;;  %4984 = vmatmul.msk.f32.gmra.mxu2 %vm368_vm1, %v1154_v55  ;;  %v307_v55 = vld [vmem:[%s5457_s12 + $0x70] sm:$0xff] }
  0x8f   : > { %5022 = vmatmul.msk.f32.gmra.mxu3 %vm368_vm1, %v1156_v61 }
  0x91   : > { %5060 = vmatmul.msk.f32.gmra.mxu0 %vm368_vm1, %v1466_v62  ;;  %v308_v62 = vld [vmem:[%s5457_s12 + $0x78] sm:$0xff] }
  0x95   : > { %4947 = vmatmul.msk.f32.gmra.mxu1 %vm368_vm1, %v298_v63  ;;  %4985 = vmatmul.msk.f32.gmra.mxu2 %vm368_vm1, %v1155_v58  ;;  %v1476_v58 = vld [vmem:[%s5457_s12 + $0x83] sm:$0xff] }
  0x96   : > { %v1167_v63 = vld [vmem:[%s5457_s12 + $0x8a] sm:$0xff] }
  0x97   : > { %5023 = vmatmul.msk.f32.gmra.mxu3 %vm368_vm1, %v1157_v0 }
  0x99   : > { %5061 = vmatmul.msk.f32.gmra.mxu0 %vm368_vm1, %v1467_v1  ;;  %v1477_v1 = vld [vmem:[%s5457_s12 + $0x8b] sm:$0xff] }
  0x9d   : > { %4948 = vmatmul.msk.f32.gmra.mxu1 %vm368_vm1, %v299_v2  ;;  %4986 = vmatmul.msk.f32.gmra.mxu2 %vm368_vm1, %v1156_v61 }
  0x9f   : > { %5024 = vmatmul.msk.f32.gmra.mxu3 %vm368_vm1, %v1158_v3 }
  0xa1   : > { %5062 = vmatmul.msk.f32.gmra.mxu0 %vm368_vm1, %v1468_v4 }
  0xa2   : > { %v5625_v5 = vpop.f32.mrf.mxu1 }
  0xa5   : > { %4949 = vmatmul.msk.f32.gmra.mxu1 %vm368_vm1, %v300_v6  ;;  %4987 = vmatmul.msk.f32.gmra.mxu2 %vm368_vm1, %v1157_v0  ;;  %v309_v6 = vld [vmem:[%s5457_s12 + $0x80] sm:$0xff] }
  0xa6   : > { %v5631_v8 = vpop.f32.mrf.mxu0 }
  0xa7   : > { %5025 = vmatmul.msk.f32.gmra.mxu3 %vm368_vm1, %v1159_v7 }
  0xa8   : > { %v5635_v10 = vpop.f32.mrf.mxu2 }
  0xa9   : > { %5063 = vmatmul.msk.f32.gmra.mxu0 %vm368_vm1, %v1469_v9 }
  0xaa   : > { %v5638_v11 = vpop.f32.mrf.mxu1  ;;  %v5640_v12 = vpop.f32.mrf.mxu3 }
  0xad   : > { %4950 = vmatmul.msk.f32.gmra.mxu1 %vm368_vm1, %v301_v13  ;;  %4988 = vmatmul.msk.f32.gmra.mxu2 %vm368_vm1, %v1158_v3  ;;  %v1478_v13 = vld [vmem:[%s5457_s12 + $0x93] sm:$0xff] }
  0xae   : > { %v5646_v15 = vpop.f32.mrf.mxu0 }
  0xaf   : > { %5026 = vmatmul.msk.f32.gmra.mxu3 %vm368_vm1, %v1160_v14 }
  0xb0   : > { %v5650_v17 = vpop.f32.mrf.mxu2 }
  0xb1   : > { %5064 = vmatmul.msk.f32.gmra.mxu0 %vm368_vm1, %v1470_v16 }
  0xb2   : > { %v5653_v18 = vpop.f32.mrf.mxu1  ;;  %v5655_v19 = vpop.f32.mrf.mxu3 }
  0xb5   : > { %4951 = vmatmul.msk.f32.gmra.mxu1 %vm368_vm1, %v302_v20  ;;  %4989 = vmatmul.msk.f32.gmra.mxu2 %vm368_vm1, %v1159_v7  ;;  %v1168_v7 = vld [vmem:[%s5457_s12 + $0x92] sm:$0xff] }
  0xb6   : > { %v5661_v22 = vpop.f32.mrf.mxu0 }
  0xb7   : > { %5027 = vmatmul.msk.f32.gmra.mxu3 %vm368_vm1, %v1161_v21 }
  0xb8   : > { %v5665_v24 = vpop.f32.mrf.mxu2 }
  0xb9   : > { %5065 = vmatmul.msk.f32.gmra.mxu0 %vm368_vm1, %v1471_v23 }
  0xba   : > { %v5668_v25 = vpop.f32.mrf.mxu1  ;;  %v5670_v26 = vpop.f32.mrf.mxu3 }
  0xbd   : > { %4952 = vmatmul.msk.f32.gmra.mxu1 %vm368_vm1, %v303_v27  ;;  %4990 = vmatmul.msk.f32.gmra.mxu2 %vm368_vm1, %v1160_v14  ;;  %v310_v27 = vld [vmem:[%s5457_s12 + $0x88] sm:$0xff] }
  0xbe   : > { %v5676_v29 = vpop.f32.mrf.mxu0 }
  0xbf   : > { %5028 = vmatmul.msk.f32.gmra.mxu3 %vm368_vm1, %v1162_v28 }
  0xc0   : > { %v5680_v31 = vpop.f32.mrf.mxu2 }
  0xc1   : > { %5066 = vmatmul.msk.f32.gmra.mxu0 %vm368_vm1, %v1472_v30  ;;  %v1169_v30 = vld [vmem:[%s5457_s12 + $0x9a] sm:$0xff] }
  0xc2   : > { %v5683_v32 = vpop.f32.mrf.mxu1  ;;  %v5685_v33 = vpop.f32.mrf.mxu3 }
  0xc5   : > { %4953 = vmatmul.msk.f32.gmra.mxu1 %vm368_vm1, %v304_v34  ;;  %4991 = vmatmul.msk.f32.gmra.mxu2 %vm368_vm1, %v1161_v21 }
  0xc6   : > { %v5691_v36 = vpop.f32.mrf.mxu0 }
  0xc7   : > { %5029 = vmatmul.msk.f32.gmra.mxu3 %vm368_vm1, %v1163_v35 }
  0xc8   : > { %v5695_v38 = vpop.f32.mrf.mxu2 }
  0xc9   : > { %5067 = vmatmul.msk.f32.gmra.mxu0 %vm368_vm1, %v1473_v37 }
  0xca   : > { %v5698_v39 = vpop.f32.mrf.mxu1  ;;  %v5700_v40 = vpop.f32.mrf.mxu3 }
  0xcd   : > { %4954 = vmatmul.msk.f32.gmra.mxu1 %vm368_vm1, %v305_v41  ;;  %4992 = vmatmul.msk.f32.gmra.mxu2 %vm368_vm1, %v1162_v28 }
  0xce   : > { %v5706_v43 = vpop.f32.mrf.mxu0 }
  0xcf   : > { %5030 = vmatmul.msk.f32.gmra.mxu3 %vm368_vm1, %v1164_v42 }
  0xd0   : > { %v5710_v45 = vpop.f32.mrf.mxu2 }
  0xd1   : > { %5068 = vmatmul.msk.f32.gmra.mxu0 %vm368_vm1, %v1474_v44 }
  0xd2   : > { %v5713_v46 = vpop.f32.mrf.mxu1  ;;  %v5715_v47 = vpop.f32.mrf.mxu3 }
  0xd5   : > { %4955 = vmatmul.msk.f32.gmra.mxu1 %vm368_vm1, %v306_v48  ;;  %4993 = vmatmul.msk.f32.gmra.mxu2 %vm368_vm1, %v1163_v35  ;;  %v1479_v35 = vld [vmem:[%s5457_s12 + $0x9b] sm:$0xff] }
  0xd6   : > { %v5721_v50 = vpop.f32.mrf.mxu0 }
  0xd7   : > { %5031 = vmatmul.msk.f32.gmra.mxu3 %vm368_vm1, %v1165_v49 }
  0xd8   : > { %v5725_v52 = vpop.f32.mrf.mxu2 }
  0xd9   : > { %5069 = vmatmul.msk.f32.gmra.mxu0 %vm368_vm1, %v1475_v51 }
  0xda   : > { %v5728_v53 = vpop.f32.mrf.mxu1  ;;  %v5730_v54 = vpop.f32.mrf.mxu3 }
  0xdd   : > { %4956 = vmatmul.msk.f32.gmra.mxu1 %vm368_vm1, %v307_v55  ;;  %4994 = vmatmul.msk.f32.gmra.mxu2 %vm368_vm1, %v1164_v42  ;;  %v1170_v55 = vld [vmem:[%s5457_s12 + $0xa2] sm:$0xff] }
  0xde   : > { %v5736_v57 = vpop.f32.mrf.mxu0 }
  0xdf   : > { %5032 = vmatmul.msk.f32.gmra.mxu3 %vm368_vm1, %v1166_v56 }
  0xe0   : > { %v5740_v59 = vpop.f32.mrf.mxu2 }
  0xe1   : > { %5070 = vmatmul.msk.f32.gmra.mxu0 %vm368_vm1, %v1476_v58  ;;  %v1480_v58 = vld [vmem:[%s5457_s12 + $0xa3] sm:$0xff] }
  0xe2   : > { %v5743_v60 = vpop.f32.mrf.mxu1  ;;  %v5745_v61 = vpop.f32.mrf.mxu3 }
  0xe5   : > { %4957 = vmatmul.msk.f32.gmra.mxu1 %vm368_vm1, %v308_v62  ;;  %4995 = vmatmul.msk.f32.gmra.mxu2 %vm368_vm1, %v1165_v49  ;;  %v311_v49 = vld [vmem:[%s5457_s12 + $0x90] sm:$0xff] }
  0xe6   : > { %v5751_v0 = vpop.f32.mrf.mxu0 }
  0xe7   : > { %5033 = vmatmul.msk.f32.gmra.mxu3 %vm368_vm1, %v1167_v63 }
  0xe8   : > { %v5755_v2 = vpop.f32.mrf.mxu2 }
  0xe9   : > { %5071 = vmatmul.msk.f32.gmra.mxu0 %vm368_vm1, %v1477_v1 }
  0xea   : > { %v5758_v3 = vpop.f32.mrf.mxu3  ;;  %v734_v4 = vpop.f32.mrf.mxu1 }
  0xeb   : > { %v735_v14 = vadd.f32 %v734_v4, %v5631_v8 }
  0xed   : > { %4958 = vmatmul.msk.f32.gmra.mxu1 %vm368_vm1, %v309_v6  ;;  %4996 = vmatmul.msk.f32.gmra.mxu2 %vm368_vm1, %v1166_v56 }
  0xee   : > { %v1628_v9 = vpop.f32.mrf.mxu0 }
  0xef   : > { %5034 = vmatmul.msk.f32.gmra.mxu3 %vm368_vm1, %v1168_v7 }
  0xf0   : > { %v1008_v16 = vpop.f32.mrf.mxu2 }
  0xf1   : > { %v1116_v20 = vadd.f32 %v1008_v16, %v735_v14  ;;  %5072 = vmatmul.msk.f32.gmra.mxu0 %vm368_vm1, %v1478_v13  ;;  %v1171_v14 = vld [vmem:[%s5457_s12 + $0xaa] sm:$0xff] }
  0xf2   : > { %v737_v21 = vpop.f32.mrf.mxu1  ;;  %v1318_v23 = vpop.f32.mrf.mxu3 }
  0xf3   : > { %v1426_v28 = vadd.f32 %v1318_v23, %v1116_v20  ;;  %v738_v37 = vadd.f32 %v737_v21, %v5646_v15 }
  0xf5   : > { %v5770_v34 = vadd.f32 %v1628_v9, %v1426_v28  ;;  %4959 = vmatmul.msk.f32.gmra.mxu1 %vm368_vm1, %v310_v27  ;;  %4997 = vmatmul.msk.f32.gmra.mxu2 %vm368_vm1, %v1167_v63  ;;  %v312_v9 = vld [vmem:[%s5457_s12 + $0x98] sm:$0xff] }
  0xf6   : > { %v1631_v8 = vpop.f32.mrf.mxu0 }
  0xf7   : > { %5035 = vmatmul.msk.f32.gmra.mxu3 %vm368_vm1, %v1169_v30 }
  0xf8   : > { %v1011_v41 = vpop.f32.mrf.mxu2 }
  0xf9   : > { %v1117_v42 = vadd.f32 %v1011_v41, %v738_v37  ;;  %5073 = vmatmul.msk.f32.gmra.mxu0 %vm368_vm1, %v1479_v35  ;;  %v1172_v37 = vld [vmem:[%s5457_s12 + $0xb2] sm:$0xff] }
  0xfa   : > { %v740_v44 = vpop.f32.mrf.mxu1  ;;  %v1321_v48 = vpop.f32.mrf.mxu3 }
  0xfb   : > { %v1427_v51 = vadd.f32 %v1321_v48, %v1117_v42  ;;  %v741_v62 = vadd.f32 %v740_v44, %v5661_v22 }
  0xfd   : > { %v5780_v56 = vadd.f32 %v1631_v8, %v1427_v51  ;;  %4960 = vmatmul.msk.f32.gmra.mxu1 %vm368_vm1, %v311_v49  ;;  %4998 = vmatmul.msk.f32.gmra.mxu2 %vm368_vm1, %v1168_v7  ;;  %v1481_v7 = vld [vmem:[%s5457_s12 + $0xab] sm:$0xff]  ;;  %v313_v8 = vld [vmem:[%s5457_s12 + $0xa0] sm:$0xff] }
  0xfe   : > { %v1634_v15 = vpop.f32.mrf.mxu0 }
  0xff   : > { %5036 = vmatmul.msk.f32.gmra.mxu3 %vm368_vm1, %v1170_v55 }
 0x100   : > { %v1014_v63 = vpop.f32.mrf.mxu2 }
 0x101   : > { %v1118_v1 = vadd.f32 %v1014_v63, %v741_v62  ;;  %5074 = vmatmul.msk.f32.gmra.mxu0 %vm368_vm1, %v1480_v58  ;;  %v1173_v62 = vld [vmem:[%s5457_s12 + $0xba] sm:$0xff] }
 0x102   : > { %v743_v4 = vpop.f32.mrf.mxu1  ;;  %v1324_v6 = vpop.f32.mrf.mxu3 }
 0x103   : > { %v1428_v13 = vadd.f32 %v1324_v6, %v1118_v1  ;;  %v744_v20 = vadd.f32 %v743_v4, %v5676_v29 }
 0x105   : > { %v5790_v16 = vadd.f32 %v1634_v15, %v1428_v13  ;;  %4961 = vmatmul.msk.f32.gmra.mxu1 %vm368_vm1, %v312_v9  ;;  %4999 = vmatmul.msk.f32.gmra.mxu2 %vm368_vm1, %v1169_v30  ;;  %v1482_v30 = vld [vmem:[%s5457_s12 + $0xb3] sm:$0xff]  ;;  %v314_v15 = vld [vmem:[%s5457_s12 + $0xa8] sm:$0xff] }
 0x106   : > { %v1637_v22 = vpop.f32.mrf.mxu0 }
 0x107   : > { %5037 = vmatmul.msk.f32.gmra.mxu3 %vm368_vm1, %v1171_v14 }
 0x108   : > { %v1017_v21 = vpop.f32.mrf.mxu2 }
 0x109   : > { %v1119_v23 = vadd.f32 %v1017_v21, %v744_v20  ;;  %5075 = vmatmul.msk.f32.gmra.mxu0 %vm368_vm1, %v1481_v7  ;;  %v1174_v20 = vld [vmem:[%s5457_s12 + $0xc2] sm:$0xff] }
 0x10a   : > { %v746_v27 = vpop.f32.mrf.mxu1  ;;  %v1327_v28 = vpop.f32.mrf.mxu3 }
 0x10b   : > { %v1429_v35 = vadd.f32 %v1327_v28, %v1119_v23  ;;  %v747_v42 = vadd.f32 %v746_v27, %v5691_v36 }
 0x10d   : > { %v5800_v41 = vadd.f32 %v1637_v22, %v1429_v35  ;;  %4962 = vmatmul.msk.f32.gmra.mxu1 %vm368_vm1, %v313_v8  ;;  %5000 = vmatmul.msk.f32.gmra.mxu2 %vm368_vm1, %v1170_v55  ;;  %v1483_v55 = vld [vmem:[%s5457_s12 + $0xbb] sm:$0xff]  ;;  %v315_v22 = vld [vmem:[%s5457_s12 + $0xb0] sm:$0xff] }
 0x10e   : > { %v1640_v29 = vpop.f32.mrf.mxu0 }
 0x10f   : > { %5038 = vmatmul.msk.f32.gmra.mxu3 %vm368_vm1, %v1172_v37 }
 0x110   : > { %v1020_v44 = vpop.f32.mrf.mxu2 }
 0x111   : > { %v1120_v48 = vadd.f32 %v1020_v44, %v747_v42  ;;  %5076 = vmatmul.msk.f32.gmra.mxu0 %vm368_vm1, %v1482_v30  ;;  %v1175_v42 = vld [vmem:[%s5457_s12 + $0xca] sm:$0xff] }
 0x112   : > { %v749_v49 = vpop.f32.mrf.mxu1  ;;  %v1330_v51 = vpop.f32.mrf.mxu3 }
 0x113   : > { %v1430_v58 = vadd.f32 %v1330_v51, %v1120_v48  ;;  %v750_v1 = vadd.f32 %v749_v49, %v5706_v43 }
 0x115   : > { %v5810_v63 = vadd.f32 %v1640_v29, %v1430_v58  ;;  %4963 = vmatmul.msk.f32.gmra.mxu1 %vm368_vm1, %v314_v15  ;;  %5001 = vmatmul.msk.f32.gmra.mxu2 %vm368_vm1, %v1171_v14  ;;  %v1484_v14 = vld [vmem:[%s5457_s12 + $0xc3] sm:$0xff]  ;;  %v316_v29 = vld [vmem:[%s5457_s12 + $0xb8] sm:$0xff] }
 0x116   : > { %v1643_v36 = vpop.f32.mrf.mxu0 }
 0x117   : > { %5039 = vmatmul.msk.f32.gmra.mxu3 %vm368_vm1, %v1173_v62 }
 0x118   : > { %v1023_v4 = vpop.f32.mrf.mxu2 }
 0x119   : > { %v1121_v6 = vadd.f32 %v1023_v4, %v750_v1  ;;  %5077 = vmatmul.msk.f32.gmra.mxu0 %vm368_vm1, %v1483_v55  ;;  %v1176_v1 = vld [vmem:[%s5457_s12 + $0xd2] sm:$0xff] }
 0x11a   : > { %v752_v9 = vpop.f32.mrf.mxu1  ;;  %v1333_v13 = vpop.f32.mrf.mxu3 }
 0x11b   : > { %v1431_v7 = vadd.f32 %v1333_v13, %v1121_v6  ;;  %v753_v23 = vadd.f32 %v752_v9, %v5721_v50 }
 0x11d   : > { %v5820_v21 = vadd.f32 %v1643_v36, %v1431_v7  ;;  %4964 = vmatmul.msk.f32.gmra.mxu1 %vm368_vm1, %v315_v22  ;;  %5002 = vmatmul.msk.f32.gmra.mxu2 %vm368_vm1, %v1172_v37  ;;  %v1485_v37 = vld [vmem:[%s5457_s12 + $0xcb] sm:$0xff]  ;;  %v317_v36 = vld [vmem:[%s5457_s12 + $0xc0] sm:$0xff] }
 0x11e   : > { %v1646_v43 = vpop.f32.mrf.mxu0 }
 0x11f   : > { %5040 = vmatmul.msk.f32.gmra.mxu3 %vm368_vm1, %v1174_v20 }
 0x120   : > { %v1026_v27 = vpop.f32.mrf.mxu2 }
 0x121   : > { %v1122_v28 = vadd.f32 %v1026_v27, %v753_v23  ;;  %5078 = vmatmul.msk.f32.gmra.mxu0 %vm368_vm1, %v1484_v14  ;;  %v1177_v23 = vld [vmem:[%s5457_s12 + $0xda] sm:$0xff] }
 0x122   : > { %v755_v8 = vpop.f32.mrf.mxu1  ;;  %v1336_v35 = vpop.f32.mrf.mxu3 }
 0x123   : > { %v1432_v30 = vadd.f32 %v1336_v35, %v1122_v28  ;;  %v756_v48 = vadd.f32 %v755_v8, %v5736_v57 }
 0x125   : > { %v5830_v44 = vadd.f32 %v1646_v43, %v1432_v30  ;;  %4965 = vmatmul.msk.f32.gmra.mxu1 %vm368_vm1, %v316_v29  ;;  %5003 = vmatmul.msk.f32.gmra.mxu2 %vm368_vm1, %v1173_v62  ;;  %v1486_v62 = vld [vmem:[%s5457_s12 + $0xd3] sm:$0xff]  ;;  %v318_v43 = vld [vmem:[%s5457_s12 + $0xc8] sm:$0xff] }
 0x126   : > { %v1649_v50 = vpop.f32.mrf.mxu0 }
 0x127   : > { %5041 = vmatmul.msk.f32.gmra.mxu3 %vm368_vm1, %v1175_v42 }
 0x128   : > { %v1029_v49 = vpop.f32.mrf.mxu2 }
 0x129   : > { %v1123_v51 = vadd.f32 %v1029_v49, %v756_v48  ;;  %5079 = vmatmul.msk.f32.gmra.mxu0 %vm368_vm1, %v1485_v37  ;;  %v1178_v48 = vld [vmem:[%s5457_s12 + $0xe2] sm:$0xff] }
 0x12a   : > { %v758_v15 = vpop.f32.mrf.mxu1  ;;  %v1339_v58 = vpop.f32.mrf.mxu3 }
 0x12b   : > { %v1433_v55 = vadd.f32 %v1339_v58, %v1123_v51  ;;  %v759_v6 = vadd.f32 %v758_v15, %v5751_v0 }
 0x12d   : > { %v5840_v4 = vadd.f32 %v1649_v50, %v1433_v55  ;;  %4966 = vmatmul.msk.f32.gmra.mxu1 %vm368_vm1, %v317_v36  ;;  %5004 = vmatmul.msk.f32.gmra.mxu2 %vm368_vm1, %v1174_v20  ;;  %v1487_v20 = vld [vmem:[%s5457_s12 + $0xdb] sm:$0xff]  ;;  %v319_v50 = vld [vmem:[%s5457_s12 + $0xd0] sm:$0xff] }
 0x12e   : > { %v1652_v57 = vpop.f32.mrf.mxu0 }
 0x12f   : > { %5042 = vmatmul.msk.f32.gmra.mxu3 %vm368_vm1, %v1176_v1 }
 0x130   : > { %v1032_v9 = vpop.f32.mrf.mxu2 }
 0x131   : > { %v1124_v13 = vadd.f32 %v1032_v9, %v759_v6  ;;  %5080 = vmatmul.msk.f32.gmra.mxu0 %vm368_vm1, %v1486_v62  ;;  %v1179_v6 = vld [vmem:[%s5457_s12 + $0xea] sm:$0xff] }
 0x132   : > { %v761_v22 = vpop.f32.mrf.mxu1  ;;  %v1342_v7 = vpop.f32.mrf.mxu3 }
 0x133   : > { %v1434_v14 = vadd.f32 %v1342_v7, %v1124_v13  ;;  %v762_v28 = vadd.f32 %v761_v22, %v5625_v5 }
 0x135   : > { %v5850_v27 = vadd.f32 %v1652_v57, %v1434_v14  ;;  %4967 = vmatmul.msk.f32.gmra.mxu1 %vm368_vm1, %v318_v43  ;;  %5005 = vmatmul.msk.f32.gmra.mxu2 %vm368_vm1, %v1175_v42  ;;  %v1488_v42 = vld [vmem:[%s5457_s12 + $0xe3] sm:$0xff]  ;;  %v320_v57 = vld [vmem:[%s5457_s12 + $0xd8] sm:$0xff] }
 0x136   : > { %v1655_v0 = vpop.f32.mrf.mxu0 }
 0x137   : > { %5043 = vmatmul.msk.f32.gmra.mxu3 %vm368_vm1, %v1177_v23 }
 0x138   : > { %v1035_v8 = vpop.f32.mrf.mxu2 }
 0x139   : > { %v1125_v35 = vadd.f32 %v1035_v8, %v762_v28  ;;  %5081 = vmatmul.msk.f32.gmra.mxu0 %vm368_vm1, %v1487_v20  ;;  %v1180_v28 = vld [vmem:[%s5457_s12 + $0xf2] sm:$0xff] }
 0x13a   : > { %v764_v29 = vpop.f32.mrf.mxu1  ;;  %v1345_v30 = vpop.f32.mrf.mxu3 }
 0x13b   : > { %v1435_v37 = vadd.f32 %v1345_v30, %v1125_v35  ;;  %v765_v51 = vadd.f32 %v764_v29, %v5638_v11 }
 0x13d   : > { %v5860_v49 = vadd.f32 %v1655_v0, %v1435_v37  ;;  %4968 = vmatmul.msk.f32.gmra.mxu1 %vm368_vm1, %v319_v50  ;;  %5006 = vmatmul.msk.f32.gmra.mxu2 %vm368_vm1, %v1176_v1  ;;  %v1489_v1 = vld [vmem:[%s5457_s12 + $0xeb] sm:$0xff]  ;;  %v321_v0 = vld [vmem:[%s5457_s12 + $0xe0] sm:$0xff] }
 0x13e   : > { %v1658_v5 = vpop.f32.mrf.mxu0 }
 0x13f   : > { %5044 = vmatmul.msk.f32.gmra.mxu3 %vm368_vm1, %v1178_v48 }
 0x140   : > { %v1038_v15 = vpop.f32.mrf.mxu2 }
 0x141   : > { %v1126_v58 = vadd.f32 %v1038_v15, %v765_v51  ;;  %5082 = vmatmul.msk.f32.gmra.mxu0 %vm368_vm1, %v1488_v42  ;;  %v1181_v51 = vld [vmem:[%s5457_s12 + $0xfa] sm:$0xff] }
 0x142   : > { %v767_v36 = vpop.f32.mrf.mxu1  ;;  %v1348_v55 = vpop.f32.mrf.mxu3 }
 0x143   : > { %v1436_v62 = vadd.f32 %v1348_v55, %v1126_v58  ;;  %v768_v13 = vadd.f32 %v767_v36, %v5653_v18 }
 0x145   : > { %v5870_v9 = vadd.f32 %v1658_v5, %v1436_v62  ;;  %4969 = vmatmul.msk.f32.gmra.mxu1 %vm368_vm1, %v320_v57  ;;  %5007 = vmatmul.msk.f32.gmra.mxu2 %vm368_vm1, %v1177_v23  ;;  %v1490_v23 = vld [vmem:[%s5457_s12 + $0xf3] sm:$0xff]  ;;  %v322_v5 = vld [vmem:[%s5457_s12 + $0xe8] sm:$0xff] }
 0x146   : > { %v1661_v11 = vpop.f32.mrf.mxu0 }
 0x147   : > { %5045 = vmatmul.msk.f32.gmra.mxu3 %vm368_vm1, %v1179_v6 }
 0x148   : > { %v1041_v22 = vpop.f32.mrf.mxu2 }
 0x149   : > { %v1127_v7 = vadd.f32 %v1041_v22, %v768_v13  ;;  %5083 = vmatmul.msk.f32.gmra.mxu0 %vm368_vm1, %v1489_v1  ;;  %v1182_v13 = vld [vmem:[%s5457_s12 + $0x102] sm:$0xff] }
 0x14a   : > { %v770_v43 = vpop.f32.mrf.mxu1  ;;  %v1351_v14 = vpop.f32.mrf.mxu3 }
 0x14b   : > { %v1437_v20 = vadd.f32 %v1351_v14, %v1127_v7  ;;  %v771_v35 = vadd.f32 %v770_v43, %v5668_v25 }
 0x14d   : > { %v5880_v8 = vadd.f32 %v1661_v11, %v1437_v20  ;;  %4970 = vmatmul.msk.f32.gmra.mxu1 %vm368_vm1, %v321_v0  ;;  %5008 = vmatmul.msk.f32.gmra.mxu2 %vm368_vm1, %v1178_v48  ;;  %v1491_v48 = vld [vmem:[%s5457_s12 + $0xfb] sm:$0xff]  ;;  %v323_v11 = vld [vmem:[%s5457_s12 + $0xf0] sm:$0xff] }
 0x14e   : > { %v1664_v18 = vpop.f32.mrf.mxu0 }
 0x14f   : > { %5046 = vmatmul.msk.f32.gmra.mxu3 %vm368_vm1, %v1180_v28 }
 0x150   : > { %v1044_v29 = vpop.f32.mrf.mxu2 }
 0x151   : > { %v1128_v30 = vadd.f32 %v1044_v29, %v771_v35  ;;  %5084 = vmatmul.msk.f32.gmra.mxu0 %vm368_vm1, %v1490_v23  ;;  %v1183_v35 = vld [vmem:[%s5457_s12 + $0x10a] sm:$0xff] }
 0x152   : > { %v773_v50 = vpop.f32.mrf.mxu1  ;;  %v1354_v37 = vpop.f32.mrf.mxu3 }
 0x153   : > { %v1438_v42 = vadd.f32 %v1354_v37, %v1128_v30  ;;  %v774_v58 = vadd.f32 %v773_v50, %v5683_v32 }
 0x155   : > { %v5890_v15 = vadd.f32 %v1664_v18, %v1438_v42  ;;  %4971 = vmatmul.msk.f32.gmra.mxu1 %vm368_vm1, %v322_v5  ;;  %5009 = vmatmul.msk.f32.gmra.mxu2 %vm368_vm1, %v1179_v6  ;;  %v1492_v6 = vld [vmem:[%s5457_s12 + $0x103] sm:$0xff]  ;;  %v324_v18 = vld [vmem:[%s5457_s12 + $0xf8] sm:$0xff] }
 0x156   : > { %v1667_v25 = vpop.f32.mrf.mxu0 }
 0x157   : > { %5047 = vmatmul.msk.f32.gmra.mxu3 %vm368_vm1, %v1181_v51 }
 0x158   : > { %v1047_v36 = vpop.f32.mrf.mxu2 }
 0x159   : > { %v1129_v55 = vadd.f32 %v1047_v36, %v774_v58  ;;  %5085 = vmatmul.msk.f32.gmra.mxu0 %vm368_vm1, %v1491_v48  ;;  %v1184_v58 = vld [vmem:[%s5457_s12 + $0x112] sm:$0xff] }
 0x15a   : > { %v776_v57 = vpop.f32.mrf.mxu1  ;;  %v1357_v62 = vpop.f32.mrf.mxu3 }
 0x15b   : > { %v1439_v1 = vadd.f32 %v1357_v62, %v1129_v55  ;;  %v777_v7 = vadd.f32 %v776_v57, %v5698_v39 }
 0x15d   : > { %v5900_v22 = vadd.f32 %v1667_v25, %v1439_v1  ;;  %4972 = vmatmul.msk.f32.gmra.mxu1 %vm368_vm1, %v323_v11  ;;  %5010 = vmatmul.msk.f32.gmra.mxu2 %vm368_vm1, %v1180_v28  ;;  %v1493_v28 = vld [vmem:[%s5457_s12 + $0x10b] sm:$0xff]  ;;  %v325_v25 = vld [vmem:[%s5457_s12 + $0x100] sm:$0xff] }
 0x15e   : > { %v1670_v32 = vpop.f32.mrf.mxu0 }
 0x15f   : > { %5048 = vmatmul.msk.f32.gmra.mxu3 %vm368_vm1, %v1182_v13 }
 0x160   : > { %v1050_v43 = vpop.f32.mrf.mxu2 }
 0x161   : > { %v1130_v14 = vadd.f32 %v1050_v43, %v777_v7  ;;  %5086 = vmatmul.msk.f32.gmra.mxu0 %vm368_vm1, %v1492_v6  ;;  %v1185_v7 = vld [vmem:[%s5457_s12 + $0x11a] sm:$0xff] }
 0x162   : > { %v779_v0 = vpop.f32.mrf.mxu1  ;;  %v1360_v20 = vpop.f32.mrf.mxu3 }
 0x163   : > { %v1440_v23 = vadd.f32 %v1360_v20, %v1130_v14  ;;  %v780_v30 = vadd.f32 %v779_v0, %v5713_v46 }
 0x165   : > { %v5910_v29 = vadd.f32 %v1670_v32, %v1440_v23  ;;  %4973 = vmatmul.msk.f32.gmra.mxu1 %vm368_vm1, %v324_v18  ;;  %5011 = vmatmul.msk.f32.gmra.mxu2 %vm368_vm1, %v1181_v51  ;;  %v1494_v51 = vld [vmem:[%s5457_s12 + $0x113] sm:$0xff]  ;;  %v326_v32 = vld [vmem:[%s5457_s12 + $0x108] sm:$0xff] }
 0x166   : > { %v1673_v39 = vpop.f32.mrf.mxu0 }
 0x167   : > { %5049 = vmatmul.msk.f32.gmra.mxu3 %vm368_vm1, %v1183_v35 }
 0x168   : > { %v1053_v50 = vpop.f32.mrf.mxu2 }
 0x169   : > { %v1131_v37 = vadd.f32 %v1053_v50, %v780_v30  ;;  %5087 = vmatmul.msk.f32.gmra.mxu0 %vm368_vm1, %v1493_v28  ;;  %v1186_v30 = vld [vmem:[%s5457_s12 + $0x122] sm:$0xff] }
 0x16a   : > { %v782_v5 = vpop.f32.mrf.mxu1  ;;  %v1363_v42 = vpop.f32.mrf.mxu3 }
 0x16b   : > { %v1441_v48 = vadd.f32 %v1363_v42, %v1131_v37  ;;  %v783_v55 = vadd.f32 %v782_v5, %v5728_v53 }
 0x16d   : > { %v5920_v36 = vadd.f32 %v1673_v39, %v1441_v48  ;;  %4974 = vmatmul.msk.f32.gmra.mxu1 %vm368_vm1, %v325_v25  ;;  %5012 = vmatmul.msk.f32.gmra.mxu2 %vm368_vm1, %v1182_v13  ;;  %v1495_v13 = vld [vmem:[%s5457_s12 + $0x11b] sm:$0xff]  ;;  %v327_v39 = vld [vmem:[%s5457_s12 + $0x110] sm:$0xff] }
 0x16e   : > { %v1676_v46 = vpop.f32.mrf.mxu0 }
 0x16f   : > { %5050 = vmatmul.msk.f32.gmra.mxu3 %vm368_vm1, %v1184_v58 }
 0x170   : > { %v1056_v57 = vpop.f32.mrf.mxu2 }
 0x171   : > { %v1132_v62 = vadd.f32 %v1056_v57, %v783_v55  ;;  %5088 = vmatmul.msk.f32.gmra.mxu0 %vm368_vm1, %v1494_v51  ;;  %v1187_v55 = vld [vmem:[%s5457_s12 + $0x12a] sm:$0xff] }
 0x172   : > { %v785_v11 = vpop.f32.mrf.mxu1  ;;  %v1366_v1 = vpop.f32.mrf.mxu3  ;;  %v1497_v57 = vld [vmem:[%s5457_s12 + $0x12b] sm:$0xff] }
 0x173   : > { %v1442_v6 = vadd.f32 %v1366_v1, %v1132_v62  ;;  %v786_v14 = vadd.f32 %v785_v11, %v5743_v60 }
 0x175   : > { %v5930_v43 = vadd.f32 %v1676_v46, %v1442_v6  ;;  %4975 = vmatmul.msk.f32.gmra.mxu1 %vm368_vm1, %v326_v32  ;;  %5013 = vmatmul.msk.f32.gmra.mxu2 %vm368_vm1, %v1183_v35  ;;  %v1496_v35 = vld [vmem:[%s5457_s12 + $0x123] sm:$0xff]  ;;  %v328_v46 = vld [vmem:[%s5457_s12 + $0x118] sm:$0xff] }
 0x176   : > { %v1679_v53 = vpop.f32.mrf.mxu0 }
 0x177   : > { %5051 = vmatmul.msk.f32.gmra.mxu3 %vm368_vm1, %v1185_v7 }
 0x178   : > { %v1059_v0 = vpop.f32.mrf.mxu2 }
 0x179   : > { %v1133_v20 = vadd.f32 %v1059_v0, %v786_v14  ;;  %5089 = vmatmul.msk.f32.gmra.mxu0 %vm368_vm1, %v1495_v13  ;;  %v2082_v13 = vld [vmem:[%s5457_s12 + $0x24] sm:$0xff] }
 0x17a   : > { %v788_v18 = vpop.f32.mrf.mxu1  ;;  %v1369_v23 = vpop.f32.mrf.mxu3  ;;  %v2392_v0 = vld [vmem:[%s5457_s12 + $0x25] sm:$0xff] }
 0x17b   : > { %v1443_v28 = vadd.f32 %v1369_v23, %v1133_v20  ;;  %v789_v37 = vadd.f32 %v788_v18, %v5635_v10  ;;  %v2702_v20 = vld [vmem:[%s5457_s12 + $0x26] sm:$0xff] }
 0x17d   : > { %v5940_v50 = vadd.f32 %v1679_v53, %v1443_v28  ;;  %4976 = vmatmul.msk.f32.gmra.mxu1 %vm368_vm1, %v327_v39  ;;  %5014 = vmatmul.msk.f32.gmra.mxu2 %vm368_vm1, %v1184_v58  ;;  %v1772_v53 = vld [vmem:[%s5457_s12 + $0x14] sm:$0xff] }
 0x17e   : > { %v1682_v60 = vpop.f32.mrf.mxu0 }
 0x17f   : > { %5052 = vmatmul.msk.f32.gmra.mxu3 %vm368_vm1, %v1186_v30 }
 0x180   : > { %v1062_v5 = vpop.f32.mrf.mxu2 }
 0x181   : > { %v1134_v42 = vadd.f32 %v1062_v5, %v789_v37  ;;  %5090 = vmatmul.msk.f32.gmra.mxu0 %vm368_vm1, %v1496_v35  ;;  %v2083_v35 = vld [vmem:[%s5457_s12 + $0x2c] sm:$0xff] }
 0x182   : > { %v791_v25 = vpop.f32.mrf.mxu1  ;;  %v1372_v48 = vpop.f32.mrf.mxu3  ;;  %v2393_v5 = vld [vmem:[%s5457_s12 + $0x2d] sm:$0xff] }
 0x183   : > { %v1444_v51 = vadd.f32 %v1372_v48, %v1134_v42  ;;  %v792_v62 = vadd.f32 %v791_v25, %v5650_v17  ;;  %v2703_v25 = vld [vmem:[%s5457_s12 + $0x2e] sm:$0xff] }
 0x185   : > { %v5950_v58 = vadd.f32 %v1682_v60, %v1444_v51  ;;  %4977 = vmatmul.msk.f32.gmra.mxu1 %vm368_vm1, %v328_v46  ;;  %5015 = vmatmul.msk.f32.gmra.mxu2 %vm368_vm1, %v1185_v7  ;;  %v1773_v60 = vld [vmem:[%s5457_s12 + $0x1c] sm:$0xff] }
 0x186   : > { %v1685_v10 = vpop.f32.mrf.mxu0 }
 0x187   : > { %5053 = vmatmul.msk.f32.gmra.mxu3 %vm368_vm1, %v1187_v55 }
 0x188   : > { %v1065_v11 = vpop.f32.mrf.mxu2 }
 0x189   : > { %v1135_v1 = vadd.f32 %v1065_v11, %v792_v62  ;;  %5091 = vmatmul.msk.f32.gmra.mxu0 %vm368_vm1, %v1497_v57  ;;  %v2084_v57 = vld [vmem:[%s5457_s12 + $0x34] sm:$0xff] }
 0x18a   : > { %v794_v32 = vpop.f32.mrf.mxu1  ;;  %v1375_v6 = vpop.f32.mrf.mxu3  ;;  %v2394_v11 = vld [vmem:[%s5457_s12 + $0x35] sm:$0xff] }
 0x18b   : > { %v1445_v14 = vadd.f32 %v1375_v6, %v1135_v1  ;;  %v795_v18 = vadd.f32 %v794_v32, %v5665_v24  ;;  %v2704_v32 = vld [vmem:[%s5457_s12 + $0x36] sm:$0xff] }
 0x18d   : > { %v5961_v7 = vadd.f32 %v1685_v10, %v1445_v14  ;;  %5094 = vmatmul.msk.f32.vlgmr.msra.gmra.mxu1 %vm368_vm1, %v1772_v53  ;;  %5132 = vmatmul.msk.f32.vlgmr.msra.gmra.mxu2 %vm368_vm1, %v2082_v13 }
 0x18e   : > { %v1688_v17 = vpop.f32.mrf.mxu0 }
 0x18f   : > { %5170 = vmatmul.msk.f32.vlgmr.msra.gmra.mxu3 %vm368_vm1, %v2392_v0 }
 0x190   : > { %v1068_v23 = vpop.f32.mrf.mxu2 }
 0x191   : > { %v1136_v39 = vadd.f32 %v1068_v23, %v795_v18  ;;  %5208 = vmatmul.msk.f32.vlgmr.msra.gmra.mxu0 %vm368_vm1, %v2702_v20  ;;  %v2085_v20 = vld [vmem:[%s5457_s12 + $0x3c] sm:$0xff] }
 0x192   : > { %v797_v28 = vpop.f32.mrf.mxu1  ;;  %v1378_v30 = vpop.f32.mrf.mxu3 }
 0x193   : > { %v1446_v37 = vadd.f32 %v1378_v30, %v1136_v39  ;;  %v798_v48 = vadd.f32 %v797_v28, %v5680_v31  ;;  %v2705_v39 = vld [vmem:[%s5457_s12 + $0x3e] sm:$0xff] }
 0x195   : > { %v5972_v42 = vadd.f32 %v1688_v17, %v1446_v37  ;;  %5095 = vmatmul.msk.f32.gmra.mxu1 %vm368_vm1, %v1773_v60  ;;  %5133 = vmatmul.msk.f32.gmra.mxu2 %vm368_vm1, %v2083_v35 }
 0x196   : > { %v1691_v24 = vpop.f32.mrf.mxu0 }
 0x197   : > { %5171 = vmatmul.msk.f32.gmra.mxu3 %vm368_vm1, %v2393_v5 }
 0x198   : > { %v1071_v46 = vpop.f32.mrf.mxu2 }
 0x199   : > { %v1137_v51 = vadd.f32 %v1071_v46, %v798_v48  ;;  %5209 = vmatmul.msk.f32.gmra.mxu0 %vm368_vm1, %v2703_v25  ;;  %v2706_v46 = vld [vmem:[%s5457_s12 + $0x46] sm:$0xff] }
 0x19a   : > { %v800_v55 = vpop.f32.mrf.mxu1  ;;  %v1381_v10 = vpop.f32.mrf.mxu3 }
 0x19b   : > { %v1447_v62 = vadd.f32 %v1381_v10, %v1137_v51  ;;  %v801_v6 = vadd.f32 %v800_v55, %v5695_v38 }
 0x19d   : > { %v5982_v1 = vadd.f32 %v1691_v24, %v1447_v62  ;;  %5096 = vmatmul.msk.f32.gmra.mxu1 %vm368_vm1, %v2082_v13  ;;  %5134 = vmatmul.msk.f32.gmra.mxu2 %vm368_vm1, %v2084_v57  ;;  %v2395_v13 = vld [vmem:[%s5457_s12 + $0x3d] sm:$0xff] }
 0x19e   : > { %v1694_v31 = vpop.f32.mrf.mxu0  ;;  %v2086_v24 = vld [vmem:[%s5457_s12 + $0x44] sm:$0xff] }
 0x19f   : > { %5172 = vmatmul.msk.f32.gmra.mxu3 %vm368_vm1, %v2394_v11 }
 0x1a0   : > { %v1074_v53 = vpop.f32.mrf.mxu2 }
 0x1a1   : > { %v1138_v14 = vadd.f32 %v1074_v53, %v801_v6  ;;  %5210 = vmatmul.msk.f32.gmra.mxu0 %vm368_vm1, %v2704_v32  ;;  %v2707_v53 = vld [vmem:[%s5457_s12 + $0x4e] sm:$0xff] }
 0x1a2   : > { %v803_v0 = vpop.f32.mrf.mxu1  ;;  %v1384_v17 = vpop.f32.mrf.mxu3 }
 0x1a3   : > { %v1448_v18 = vadd.f32 %v1384_v17, %v1138_v14  ;;  %v804_v28 = vadd.f32 %v803_v0, %v5710_v45 }
 0x1a5   : > { %v5992_v23 = vadd.f32 %v1694_v31, %v1448_v18  ;;  %5097 = vmatmul.msk.f32.gmra.mxu1 %vm368_vm1, %v2083_v35  ;;  %5135 = vmatmul.msk.f32.gmra.mxu2 %vm368_vm1, %v2085_v20  ;;  %v2396_v35 = vld [vmem:[%s5457_s12 + $0x45] sm:$0xff] }
 0x1a6   : > { %v1697_v38 = vpop.f32.mrf.mxu0  ;;  %v2087_v31 = vld [vmem:[%s5457_s12 + $0x4c] sm:$0xff] }
 0x1a7   : > { %5173 = vmatmul.msk.f32.gmra.mxu3 %vm368_vm1, %v2395_v13 }
 0x1a8   : > { %v1077_v30 = vpop.f32.mrf.mxu2 }
 0x1a9   : > { %v1139_v60 = vadd.f32 %v1077_v30, %v804_v28  ;;  %5211 = vmatmul.msk.f32.gmra.mxu0 %vm368_vm1, %v2705_v39  ;;  %v2708_v30 = vld [vmem:[%s5457_s12 + $0x56] sm:$0xff] }
 0x1aa   : > { %v806_v37 = vpop.f32.mrf.mxu1  ;;  %v1387_v5 = vpop.f32.mrf.mxu3 }
 0x1ab   : > { %v1449_v25 = vadd.f32 %v1387_v5, %v1139_v60  ;;  %v807_v51 = vadd.f32 %v806_v37, %v5725_v52 }
 0x1ad   : > { %v6002_v48 = vadd.f32 %v1697_v38, %v1449_v25  ;;  %5098 = vmatmul.msk.f32.gmra.mxu1 %vm368_vm1, %v2084_v57  ;;  %5136 = vmatmul.msk.f32.gmra.mxu2 %vm368_vm1, %v2086_v24  ;;  %v2397_v57 = vld [vmem:[%s5457_s12 + $0x4d] sm:$0xff] }
 0x1ae   : > { %v1700_v45 = vpop.f32.mrf.mxu0  ;;  %v2088_v38 = vld [vmem:[%s5457_s12 + $0x54] sm:$0xff] }
 0x1af   : > { %5174 = vmatmul.msk.f32.gmra.mxu3 %vm368_vm1, %v2396_v35 }
 0x1b0   : > { %v1080_v55 = vpop.f32.mrf.mxu2 }
 0x1b1   : > { %v1140_v10 = vadd.f32 %v1080_v55, %v807_v51  ;;  %5212 = vmatmul.msk.f32.gmra.mxu0 %vm368_vm1, %v2706_v46  ;;  %v2709_v55 = vld [vmem:[%s5457_s12 + $0x5e] sm:$0xff] }
 0x1b2   : > { %v809_v62 = vpop.f32.mrf.mxu1  ;;  %v1390_v11 = vpop.f32.mrf.mxu3 }
 0x1b3   : > { %v1450_v32 = vadd.f32 %v1390_v11, %v1140_v10  ;;  %v810_v14 = vadd.f32 %v809_v62, %v5740_v59 }
 0x1b5   : > { %v6012_v6 = vadd.f32 %v1700_v45, %v1450_v32  ;;  %5099 = vmatmul.msk.f32.gmra.mxu1 %vm368_vm1, %v2085_v20  ;;  %5137 = vmatmul.msk.f32.gmra.mxu2 %vm368_vm1, %v2087_v31  ;;  %v2398_v20 = vld [vmem:[%s5457_s12 + $0x55] sm:$0xff] }
 0x1b6   : > { %v1703_v52 = vpop.f32.mrf.mxu0  ;;  %v2089_v45 = vld [vmem:[%s5457_s12 + $0x5c] sm:$0xff] }
 0x1b7   : > { %5175 = vmatmul.msk.f32.gmra.mxu3 %vm368_vm1, %v2397_v57 }
 0x1b8   : > { %v1083_v0 = vpop.f32.mrf.mxu2 }
 0x1b9   : > { %v1141_v17 = vadd.f32 %v1083_v0, %v810_v14  ;;  %5213 = vmatmul.msk.f32.gmra.mxu0 %vm368_vm1, %v2707_v53  ;;  %v2710_v0 = vld [vmem:[%s5457_s12 + $0x66] sm:$0xff] }
 0x1ba   : > { %v812_v18 = vpop.f32.mrf.mxu1  ;;  %v1393_v13 = vpop.f32.mrf.mxu3 }
 0x1bb   : > { %v1451_v39 = vadd.f32 %v1393_v13, %v1141_v17  ;;  %v813_v60 = vadd.f32 %v812_v18, %v5755_v2 }
 0x1bd   : > { %v6022_v28 = vadd.f32 %v1703_v52, %v1451_v39  ;;  %5100 = vmatmul.msk.f32.gmra.mxu1 %vm368_vm1, %v2086_v24  ;;  %5138 = vmatmul.msk.f32.gmra.mxu2 %vm368_vm1, %v2088_v38  ;;  %v2399_v24 = vld [vmem:[%s5457_s12 + $0x5d] sm:$0xff] }
 0x1be   : > { %v1706_v59 = vpop.f32.mrf.mxu0  ;;  %v2090_v52 = vld [vmem:[%s5457_s12 + $0x64] sm:$0xff] }
 0x1bf   : > { %5176 = vmatmul.msk.f32.gmra.mxu3 %vm368_vm1, %v2398_v20 }
 0x1c0   : > { %v1086_v37 = vpop.f32.mrf.mxu2 }
 0x1c1   : > { %v1142_v5 = vadd.f32 %v1086_v37, %v813_v60  ;;  %5214 = vmatmul.msk.f32.gmra.mxu0 %vm368_vm1, %v2708_v30  ;;  %v2711_v37 = vld [vmem:[%s5457_s12 + $0x6e] sm:$0xff] }
 0x1c2   : > { %v815_v25 = vpop.f32.mrf.mxu1  ;;  %v1396_v35 = vpop.f32.mrf.mxu3 }
 0x1c3   : > { %v1452_v46 = vadd.f32 %v1396_v35, %v1142_v5  ;;  %v816_v10 = vadd.f32 %v815_v25, %v5640_v12 }
 0x1c5   : > { %v6032_v51 = vadd.f32 %v1706_v59, %v1452_v46  ;;  %5101 = vmatmul.msk.f32.gmra.mxu1 %vm368_vm1, %v2087_v31  ;;  %5139 = vmatmul.msk.f32.gmra.mxu2 %vm368_vm1, %v2089_v45  ;;  %v2400_v31 = vld [vmem:[%s5457_s12 + $0x65] sm:$0xff] }
 0x1c6   : > { %v1709_v2 = vpop.f32.mrf.mxu0  ;;  %v2091_v59 = vld [vmem:[%s5457_s12 + $0x6c] sm:$0xff] }
 0x1c7   : > { %5177 = vmatmul.msk.f32.gmra.mxu3 %vm368_vm1, %v2399_v24 }
 0x1c8   : > { %v1089_v62 = vpop.f32.mrf.mxu2 }
 0x1c9   : > { %v1143_v11 = vadd.f32 %v1089_v62, %v816_v10  ;;  %5215 = vmatmul.msk.f32.gmra.mxu0 %vm368_vm1, %v2709_v55  ;;  %v2712_v62 = vld [vmem:[%s5457_s12 + $0x76] sm:$0xff] }
 0x1ca   : > { %v818_v32 = vpop.f32.mrf.mxu1  ;;  %v1399_v57 = vpop.f32.mrf.mxu3 }
 0x1cb   : > { %v1453_v53 = vadd.f32 %v1399_v57, %v1143_v11  ;;  %v819_v17 = vadd.f32 %v818_v32, %v5655_v19 }
 0x1cd   : > { %v6042_v14 = vadd.f32 %v1709_v2, %v1453_v53  ;;  %5102 = vmatmul.msk.f32.gmra.mxu1 %vm368_vm1, %v2088_v38  ;;  %5140 = vmatmul.msk.f32.gmra.mxu2 %vm368_vm1, %v2090_v52  ;;  %v2401_v38 = vld [vmem:[%s5457_s12 + $0x6d] sm:$0xff] }
 0x1ce   : > { %v1712_v12 = vpop.f32.mrf.mxu0  ;;  %v2092_v2 = vld [vmem:[%s5457_s12 + $0x74] sm:$0xff] }
 0x1cf   : > { %5178 = vmatmul.msk.f32.gmra.mxu3 %vm368_vm1, %v2400_v31 }
 0x1d0   : > { %v1092_v18 = vpop.f32.mrf.mxu2 }
 0x1d1   : > { %v1144_v13 = vadd.f32 %v1092_v18, %v819_v17  ;;  %5216 = vmatmul.msk.f32.gmra.mxu0 %vm368_vm1, %v2710_v0  ;;  %v2713_v18 = vld [vmem:[%s5457_s12 + $0x7e] sm:$0xff] }
 0x1d2   : > { %v821_v39 = vpop.f32.mrf.mxu1  ;;  %v1402_v20 = vpop.f32.mrf.mxu3 }
 0x1d3   : > { %v1454_v30 = vadd.f32 %v1402_v20, %v1144_v13  ;;  %v822_v5 = vadd.f32 %v821_v39, %v5670_v26 }
 0x1d5   : > { %v6052_v60 = vadd.f32 %v1712_v12, %v1454_v30  ;;  %5103 = vmatmul.msk.f32.gmra.mxu1 %vm368_vm1, %v2089_v45  ;;  %5141 = vmatmul.msk.f32.gmra.mxu2 %vm368_vm1, %v2091_v59  ;;  %v2402_v45 = vld [vmem:[%s5457_s12 + $0x75] sm:$0xff] }
 0x1d6   : > { %v1715_v19 = vpop.f32.mrf.mxu0  ;;  %v2093_v12 = vld [vmem:[%s5457_s12 + $0x7c] sm:$0xff] }
 0x1d7   : > { %5179 = vmatmul.msk.f32.gmra.mxu3 %vm368_vm1, %v2401_v38 }
 0x1d8   : > { %v1095_v25 = vpop.f32.mrf.mxu2 }
 0x1d9   : > { %v1145_v35 = vadd.f32 %v1095_v25, %v822_v5  ;;  %5217 = vmatmul.msk.f32.gmra.mxu0 %vm368_vm1, %v2711_v37  ;;  %v2714_v25 = vld [vmem:[%s5457_s12 + $0x86] sm:$0xff] }
 0x1da   : > { %v824_v46 = vpop.f32.mrf.mxu1  ;;  %v1405_v24 = vpop.f32.mrf.mxu3 }
 0x1db   : > { %v1455_v55 = vadd.f32 %v1405_v24, %v1145_v35  ;;  %v825_v11 = vadd.f32 %v824_v46, %v5685_v33 }
 0x1dd   : > { %v6062_v10 = vadd.f32 %v1715_v19, %v1455_v55  ;;  %5104 = vmatmul.msk.f32.gmra.mxu1 %vm368_vm1, %v2090_v52  ;;  %5142 = vmatmul.msk.f32.gmra.mxu2 %vm368_vm1, %v2092_v2  ;;  %v2403_v52 = vld [vmem:[%s5457_s12 + $0x7d] sm:$0xff] }
 0x1de   : > { %v1718_v26 = vpop.f32.mrf.mxu0  ;;  %v2094_v19 = vld [vmem:[%s5457_s12 + $0x84] sm:$0xff] }
 0x1df   : > { %5180 = vmatmul.msk.f32.gmra.mxu3 %vm368_vm1, %v2402_v45 }
 0x1e0   : > { %v1098_v32 = vpop.f32.mrf.mxu2 }
 0x1e1   : > { %v1146_v57 = vadd.f32 %v1098_v32, %v825_v11  ;;  %5218 = vmatmul.msk.f32.gmra.mxu0 %vm368_vm1, %v2712_v62  ;;  %v2715_v32 = vld [vmem:[%s5457_s12 + $0x8e] sm:$0xff] }
 0x1e2   : > { %v827_v53 = vpop.f32.mrf.mxu1  ;;  %v1408_v31 = vpop.f32.mrf.mxu3 }
 0x1e3   : > { %v1456_v0 = vadd.f32 %v1408_v31, %v1146_v57  ;;  %v828_v13 = vadd.f32 %v827_v53, %v5700_v40 }
 0x1e5   : > { %v6072_v17 = vadd.f32 %v1718_v26, %v1456_v0  ;;  %5105 = vmatmul.msk.f32.gmra.mxu1 %vm368_vm1, %v2091_v59  ;;  %5143 = vmatmul.msk.f32.gmra.mxu2 %vm368_vm1, %v2093_v12  ;;  %v2404_v59 = vld [vmem:[%s5457_s12 + $0x85] sm:$0xff] }
 0x1e6   : > { %v1721_v33 = vpop.f32.mrf.mxu0  ;;  %v2095_v26 = vld [vmem:[%s5457_s12 + $0x8c] sm:$0xff] }
 0x1e7   : > { %5181 = vmatmul.msk.f32.gmra.mxu3 %vm368_vm1, %v2403_v52 }
 0x1e8   : > { %v1101_v39 = vpop.f32.mrf.mxu2 }
 0x1e9   : > { %v1147_v20 = vadd.f32 %v1101_v39, %v828_v13  ;;  %5219 = vmatmul.msk.f32.gmra.mxu0 %vm368_vm1, %v2713_v18  ;;  %v2716_v39 = vld [vmem:[%s5457_s12 + $0x96] sm:$0xff] }
 0x1ea   : > { %v830_v30 = vpop.f32.mrf.mxu1  ;;  %v1411_v38 = vpop.f32.mrf.mxu3 }
 0x1eb   : > { %v1457_v37 = vadd.f32 %v1411_v38, %v1147_v20  ;;  %v831_v35 = vadd.f32 %v830_v30, %v5715_v47 }
 0x1ed   : > { %v6082_v5 = vadd.f32 %v1721_v33, %v1457_v37  ;;  %5106 = vmatmul.msk.f32.gmra.mxu1 %vm368_vm1, %v2092_v2  ;;  %5144 = vmatmul.msk.f32.gmra.mxu2 %vm368_vm1, %v2094_v19  ;;  %v2405_v2 = vld [vmem:[%s5457_s12 + $0x8d] sm:$0xff] }
 0x1ee   : > { %v1724_v40 = vpop.f32.mrf.mxu0  ;;  %v2096_v33 = vld [vmem:[%s5457_s12 + $0x94] sm:$0xff] }
 0x1ef   : > { %5182 = vmatmul.msk.f32.gmra.mxu3 %vm368_vm1, %v2404_v59 }
 0x1f0   : > { %v1104_v46 = vpop.f32.mrf.mxu2 }
 0x1f1   : > { %v1148_v24 = vadd.f32 %v1104_v46, %v831_v35  ;;  %5220 = vmatmul.msk.f32.gmra.mxu0 %vm368_vm1, %v2714_v25  ;;  %v2717_v46 = vld [vmem:[%s5457_s12 + $0x9e] sm:$0xff] }
 0x1f2   : > { %v833_v55 = vpop.f32.mrf.mxu1  ;;  %v1414_v45 = vpop.f32.mrf.mxu3 }
 0x1f3   : > { %v1458_v62 = vadd.f32 %v1414_v45, %v1148_v24  ;;  %v834_v57 = vadd.f32 %v833_v55, %v5730_v54 }
 0x1f5   : > { %v6092_v11 = vadd.f32 %v1724_v40, %v1458_v62  ;;  %5107 = vmatmul.msk.f32.gmra.mxu1 %vm368_vm1, %v2093_v12  ;;  %5145 = vmatmul.msk.f32.gmra.mxu2 %vm368_vm1, %v2095_v26  ;;  %v2406_v12 = vld [vmem:[%s5457_s12 + $0x95] sm:$0xff] }
 0x1f6   : > { %v1727_v47 = vpop.f32.mrf.mxu0  ;;  %v2097_v40 = vld [vmem:[%s5457_s12 + $0x9c] sm:$0xff] }
 0x1f7   : > { %5183 = vmatmul.msk.f32.gmra.mxu3 %vm368_vm1, %v2405_v2 }
 0x1f8   : > { %v1107_v53 = vpop.f32.mrf.mxu2 }
 0x1f9   : > { %v1149_v31 = vadd.f32 %v1107_v53, %v834_v57  ;;  %5221 = vmatmul.msk.f32.gmra.mxu0 %vm368_vm1, %v2715_v32  ;;  %v2718_v53 = vld [vmem:[%s5457_s12 + $0xa6] sm:$0xff] }
 0x1fa   : > { %v836_v0 = vpop.f32.mrf.mxu1  ;;  %v1417_v52 = vpop.f32.mrf.mxu3 }
 0x1fb   : > { %v1459_v18 = vadd.f32 %v1417_v52, %v1149_v31  ;;  %v837_v20 = vadd.f32 %v836_v0, %v5745_v61 }
 0x1fd   : > { %v6102_v13 = vadd.f32 %v1727_v47, %v1459_v18  ;;  %5108 = vmatmul.msk.f32.gmra.mxu1 %vm368_vm1, %v2094_v19  ;;  %5146 = vmatmul.msk.f32.gmra.mxu2 %vm368_vm1, %v2096_v33  ;;  %v2407_v19 = vld [vmem:[%s5457_s12 + $0x9d] sm:$0xff] }
 0x1fe   : > { %v1730_v54 = vpop.f32.mrf.mxu0  ;;  %v2098_v47 = vld [vmem:[%s5457_s12 + $0xa4] sm:$0xff] }
 0x1ff   : > { %5184 = vmatmul.msk.f32.gmra.mxu3 %vm368_vm1, %v2406_v12 }
 0x200   : > { %v1110_v30 = vpop.f32.mrf.mxu2 }
 0x201   : > { %v1150_v38 = vadd.f32 %v1110_v30, %v837_v20  ;;  %5222 = vmatmul.msk.f32.gmra.mxu0 %vm368_vm1, %v2716_v39  ;;  %v2719_v30 = vld [vmem:[%s5457_s12 + $0xae] sm:$0xff] }
 0x202   : > { %v839_v37 = vpop.f32.mrf.mxu1  ;;  %v1420_v59 = vpop.f32.mrf.mxu3 }
 0x203   : > { %v1460_v25 = vadd.f32 %v1420_v59, %v1150_v38  ;;  %v840_v24 = vadd.f32 %v839_v37, %v5758_v3 }
 0x205   : > { %v6112_v35 = vadd.f32 %v1730_v54, %v1460_v25  ;;  %5109 = vmatmul.msk.f32.gmra.mxu1 %vm368_vm1, %v2095_v26  ;;  %5147 = vmatmul.msk.f32.gmra.mxu2 %vm368_vm1, %v2097_v40  ;;  %v2408_v26 = vld [vmem:[%s5457_s12 + $0xa5] sm:$0xff] }
 0x206   : > { %v1733_v61 = vpop.f32.mrf.mxu0  ;;  %v2099_v54 = vld [vmem:[%s5457_s12 + $0xac] sm:$0xff] }
 0x207   : > { %5185 = vmatmul.msk.f32.gmra.mxu3 %vm368_vm1, %v2407_v19 }
 0x208   : > { %v1113_v55 = vpop.f32.mrf.mxu2 }
 0x209   : > { %v1151_v45 = vadd.f32 %v1113_v55, %v840_v24  ;;  %5223 = vmatmul.msk.f32.gmra.mxu0 %vm368_vm1, %v2717_v46  ;;  %v2720_v55 = vld [vmem:[%s5457_s12 + $0xb6] sm:$0xff] }
 0x20a   : > { %v1423_v62 = vpop.f32.mrf.mxu3  ;;  %v1938_v2 = vpop.f32.mrf.mxu1 }
 0x20b   : > { %v1461_v32 = vadd.f32 %v1423_v62, %v1151_v45  ;;  %v2046_v31 = vadd.f32 %v1938_v2, %v5770_v34 }
 0x20d   : > { %v6122_v57 = vadd.f32 %v1733_v61, %v1461_v32  ;;  %5110 = vmatmul.msk.f32.gmra.mxu1 %vm368_vm1, %v2096_v33  ;;  %5148 = vmatmul.msk.f32.gmra.mxu2 %vm368_vm1, %v2098_v47  ;;  %v2409_v33 = vld [vmem:[%s5457_s12 + $0xad] sm:$0xff] }
 0x20e   : > { %v2868_v3 = vpop.f32.mrf.mxu0  ;;  %v2100_v61 = vld [vmem:[%s5457_s12 + $0xb4] sm:$0xff] }
 0x20f   : > { %5186 = vmatmul.msk.f32.gmra.mxu3 %vm368_vm1, %v2408_v26 }
 0x210   : > { %v2248_v0 = vpop.f32.mrf.mxu2 }
 0x211   : > { %v2356_v52 = vadd.f32 %v2248_v0, %v2046_v31  ;;  %5224 = vmatmul.msk.f32.gmra.mxu0 %vm368_vm1, %v2718_v53  ;;  %v2721_v0 = vld [vmem:[%s5457_s12 + $0xbe] sm:$0xff] }
 0x212   : > { %v1941_v18 = vpop.f32.mrf.mxu1  ;;  %v2558_v12 = vpop.f32.mrf.mxu3 }
 0x213   : > { %v2666_v39 = vadd.f32 %v2558_v12, %v2356_v52  ;;  %v2047_v38 = vadd.f32 %v1941_v18, %v5780_v56 }
 0x215   : > { %v6132_v20 = vadd.f32 %v2868_v3, %v2666_v39  ;;  %5111 = vmatmul.msk.f32.gmra.mxu1 %vm368_vm1, %v2097_v40  ;;  %5149 = vmatmul.msk.f32.gmra.mxu2 %vm368_vm1, %v2099_v54  ;;  %v2410_v40 = vld [vmem:[%s5457_s12 + $0xb5] sm:$0xff] }
 0x216   : > { %v2871_v34 = vpop.f32.mrf.mxu0  ;;  %v2101_v3 = vld [vmem:[%s5457_s12 + $0xbc] sm:$0xff] }
 0x217   : > { %5187 = vmatmul.msk.f32.gmra.mxu3 %vm368_vm1, %v2409_v33 }
 0x218   : > { %v2251_v37 = vpop.f32.mrf.mxu2 }
 0x219   : > { %v2357_v59 = vadd.f32 %v2251_v37, %v2047_v38  ;;  %5225 = vmatmul.msk.f32.gmra.mxu0 %vm368_vm1, %v2719_v30  ;;  %v2722_v37 = vld [vmem:[%s5457_s12 + $0xc6] sm:$0xff] }
 0x21a   : > { %v1944_v25 = vpop.f32.mrf.mxu1  ;;  %v2561_v19 = vpop.f32.mrf.mxu3 }
 0x21b   : > { %v2667_v46 = vadd.f32 %v2561_v19, %v2357_v59  ;;  %v2048_v45 = vadd.f32 %v1944_v25, %v5790_v16 }
 0x21d   : > { %v6142_v24 = vadd.f32 %v2871_v34, %v2667_v46  ;;  %5112 = vmatmul.msk.f32.gmra.mxu1 %vm368_vm1, %v2098_v47  ;;  %5150 = vmatmul.msk.f32.gmra.mxu2 %vm368_vm1, %v2100_v61  ;;  %v2411_v47 = vld [vmem:[%s5457_s12 + $0xbd] sm:$0xff] }
 0x21e   : > { %v2874_v56 = vpop.f32.mrf.mxu0  ;;  %v2102_v34 = vld [vmem:[%s5457_s12 + $0xc4] sm:$0xff] }
 0x21f   : > { %5188 = vmatmul.msk.f32.gmra.mxu3 %vm368_vm1, %v2410_v40 }
 0x220   : > { %v2254_v62 = vpop.f32.mrf.mxu2 }
 0x221   : > { %v2358_v2 = vadd.f32 %v2254_v62, %v2048_v45  ;;  %5226 = vmatmul.msk.f32.gmra.mxu0 %vm368_vm1, %v2720_v55  ;;  %v2723_v62 = vld [vmem:[%s5457_s12 + $0xce] sm:$0xff] }
 0x222   : > { %v1947_v32 = vpop.f32.mrf.mxu1  ;;  %v2564_v26 = vpop.f32.mrf.mxu3 }
 0x223   : > { %v2668_v53 = vadd.f32 %v2564_v26, %v2358_v2  ;;  %v2049_v52 = vadd.f32 %v1947_v32, %v5800_v41 }
 0x225   : > { %v6152_v31 = vadd.f32 %v2874_v56, %v2668_v53  ;;  %5113 = vmatmul.msk.f32.gmra.mxu1 %vm368_vm1, %v2099_v54  ;;  %5151 = vmatmul.msk.f32.gmra.mxu2 %vm368_vm1, %v2101_v3  ;;  %v2412_v54 = vld [vmem:[%s5457_s12 + $0xc5] sm:$0xff] }
 0x226   : > { %v2877_v16 = vpop.f32.mrf.mxu0  ;;  %v2103_v56 = vld [vmem:[%s5457_s12 + $0xcc] sm:$0xff] }
 0x227   : > { %5189 = vmatmul.msk.f32.gmra.mxu3 %vm368_vm1, %v2411_v47 }
 0x228   : > { %v2257_v18 = vpop.f32.mrf.mxu2 }
 0x229   : > { %v2359_v12 = vadd.f32 %v2257_v18, %v2049_v52  ;;  %5227 = vmatmul.msk.f32.gmra.mxu0 %vm368_vm1, %v2721_v0  ;;  %v2724_v18 = vld [vmem:[%s5457_s12 + $0xd6] sm:$0xff] }
 0x22a   : > { %v1950_v39 = vpop.f32.mrf.mxu1  ;;  %v2567_v33 = vpop.f32.mrf.mxu3 }
 0x22b   : > { %v2669_v30 = vadd.f32 %v2567_v33, %v2359_v12  ;;  %v2050_v59 = vadd.f32 %v1950_v39, %v5810_v63 }
 0x22d   : > { %v6162_v38 = vadd.f32 %v2877_v16, %v2669_v30  ;;  %5114 = vmatmul.msk.f32.gmra.mxu1 %vm368_vm1, %v2100_v61  ;;  %5152 = vmatmul.msk.f32.gmra.mxu2 %vm368_vm1, %v2102_v34  ;;  %v2413_v61 = vld [vmem:[%s5457_s12 + $0xcd] sm:$0xff] }
 0x22e   : > { %v2880_v41 = vpop.f32.mrf.mxu0  ;;  %v2104_v16 = vld [vmem:[%s5457_s12 + $0xd4] sm:$0xff] }
 0x22f   : > { %5190 = vmatmul.msk.f32.gmra.mxu3 %vm368_vm1, %v2412_v54 }
 0x230   : > { %v2260_v25 = vpop.f32.mrf.mxu2 }
 0x231   : > { %v2360_v19 = vadd.f32 %v2260_v25, %v2050_v59  ;;  %5228 = vmatmul.msk.f32.gmra.mxu0 %vm368_vm1, %v2722_v37  ;;  %v2725_v25 = vld [vmem:[%s5457_s12 + $0xde] sm:$0xff] }
 0x232   : > { %v1953_v46 = vpop.f32.mrf.mxu1  ;;  %v2570_v40 = vpop.f32.mrf.mxu3 }
 0x233   : > { %v2670_v55 = vadd.f32 %v2570_v40, %v2360_v19  ;;  %v2051_v2 = vadd.f32 %v1953_v46, %v5820_v21 }
 0x235   : > { %v6172_v45 = vadd.f32 %v2880_v41, %v2670_v55  ;;  %5115 = vmatmul.msk.f32.gmra.mxu1 %vm368_vm1, %v2101_v3  ;;  %5153 = vmatmul.msk.f32.gmra.mxu2 %vm368_vm1, %v2103_v56  ;;  %v2414_v3 = vld [vmem:[%s5457_s12 + $0xd5] sm:$0xff] }
 0x236   : > { %v2883_v63 = vpop.f32.mrf.mxu0  ;;  %v2105_v41 = vld [vmem:[%s5457_s12 + $0xdc] sm:$0xff] }
 0x237   : > { %5191 = vmatmul.msk.f32.gmra.mxu3 %vm368_vm1, %v2413_v61 }
 0x238   : > { %v2263_v32 = vpop.f32.mrf.mxu2 }
 0x239   : > { %v2361_v26 = vadd.f32 %v2263_v32, %v2051_v2  ;;  %5229 = vmatmul.msk.f32.gmra.mxu0 %vm368_vm1, %v2723_v62  ;;  %v2726_v32 = vld [vmem:[%s5457_s12 + $0xe6] sm:$0xff] }
 0x23a   : > { %v1956_v53 = vpop.f32.mrf.mxu1  ;;  %v2573_v47 = vpop.f32.mrf.mxu3 }
 0x23b   : > { %v2671_v0 = vadd.f32 %v2573_v47, %v2361_v26  ;;  %v2052_v12 = vadd.f32 %v1956_v53, %v5830_v44 }
 0x23d   : > { %v6182_v52 = vadd.f32 %v2883_v63, %v2671_v0  ;;  %5116 = vmatmul.msk.f32.gmra.mxu1 %vm368_vm1, %v2102_v34  ;;  %5154 = vmatmul.msk.f32.gmra.mxu2 %vm368_vm1, %v2104_v16  ;;  %v2415_v34 = vld [vmem:[%s5457_s12 + $0xdd] sm:$0xff] }
 0x23e   : > { %v2886_v21 = vpop.f32.mrf.mxu0  ;;  %v2106_v63 = vld [vmem:[%s5457_s12 + $0xe4] sm:$0xff] }
 0x23f   : > { %5192 = vmatmul.msk.f32.gmra.mxu3 %vm368_vm1, %v2414_v3 }
 0x240   : > { %v2266_v39 = vpop.f32.mrf.mxu2 }
 0x241   : > { %v2362_v33 = vadd.f32 %v2266_v39, %v2052_v12  ;;  %5230 = vmatmul.msk.f32.gmra.mxu0 %vm368_vm1, %v2724_v18  ;;  %v2727_v39 = vld [vmem:[%s5457_s12 + $0xee] sm:$0xff] }
 0x242   : > { %v1959_v30 = vpop.f32.mrf.mxu1  ;;  %v2576_v54 = vpop.f32.mrf.mxu3 }
 0x243   : > { %v2672_v37 = vadd.f32 %v2576_v54, %v2362_v33  ;;  %v2053_v19 = vadd.f32 %v1959_v30, %v5840_v4 }
 0x245   : > { %v6192_v59 = vadd.f32 %v2886_v21, %v2672_v37  ;;  %5117 = vmatmul.msk.f32.gmra.mxu1 %vm368_vm1, %v2103_v56  ;;  %5155 = vmatmul.msk.f32.gmra.mxu2 %vm368_vm1, %v2105_v41  ;;  %v2416_v56 = vld [vmem:[%s5457_s12 + $0xe5] sm:$0xff] }
 0x246   : > { %v2889_v44 = vpop.f32.mrf.mxu0  ;;  %v2107_v21 = vld [vmem:[%s5457_s12 + $0xec] sm:$0xff] }
 0x247   : > { %5193 = vmatmul.msk.f32.gmra.mxu3 %vm368_vm1, %v2415_v34 }
 0x248   : > { %v2269_v46 = vpop.f32.mrf.mxu2 }
 0x249   : > { %v2363_v40 = vadd.f32 %v2269_v46, %v2053_v19  ;;  %5231 = vmatmul.msk.f32.gmra.mxu0 %vm368_vm1, %v2725_v25  ;;  %v2728_v46 = vld [vmem:[%s5457_s12 + $0xf6] sm:$0xff] }
 0x24a   : > { %v1962_v55 = vpop.f32.mrf.mxu1  ;;  %v2579_v61 = vpop.f32.mrf.mxu3 }
 0x24b   : > { %v2673_v62 = vadd.f32 %v2579_v61, %v2363_v40  ;;  %v2054_v26 = vadd.f32 %v1962_v55, %v5850_v27 }
 0x24d   : > { %v6202_v2 = vadd.f32 %v2889_v44, %v2673_v62  ;;  %5118 = vmatmul.msk.f32.gmra.mxu1 %vm368_vm1, %v2104_v16  ;;  %5156 = vmatmul.msk.f32.gmra.mxu2 %vm368_vm1, %v2106_v63  ;;  %v2417_v16 = vld [vmem:[%s5457_s12 + $0xed] sm:$0xff] }
 0x24e   : > { %v2892_v4 = vpop.f32.mrf.mxu0  ;;  %v2108_v44 = vld [vmem:[%s5457_s12 + $0xf4] sm:$0xff] }
 0x24f   : > { %5194 = vmatmul.msk.f32.gmra.mxu3 %vm368_vm1, %v2416_v56 }
 0x250   : > { %v2272_v53 = vpop.f32.mrf.mxu2 }
 0x251   : > { %v2364_v47 = vadd.f32 %v2272_v53, %v2054_v26  ;;  %5232 = vmatmul.msk.f32.gmra.mxu0 %vm368_vm1, %v2726_v32  ;;  %v2419_v26 = vld [vmem:[%s5457_s12 + $0xfd] sm:$0xff] }
 0x252   : > { %v1965_v0 = vpop.f32.mrf.mxu1  ;;  %v2582_v3 = vpop.f32.mrf.mxu3  ;;  %v2729_v53 = vld [vmem:[%s5457_s12 + $0xfe] sm:$0xff] }
 0x253   : > { %v2674_v18 = vadd.f32 %v2582_v3, %v2364_v47  ;;  %v2055_v33 = vadd.f32 %v1965_v0, %v5860_v49 }
 0x255   : > { %v6212_v12 = vadd.f32 %v2892_v4, %v2674_v18  ;;  %5119 = vmatmul.msk.f32.gmra.mxu1 %vm368_vm1, %v2105_v41  ;;  %5157 = vmatmul.msk.f32.gmra.mxu2 %vm368_vm1, %v2107_v21  ;;  %v2418_v41 = vld [vmem:[%s5457_s12 + $0xf5] sm:$0xff] }
 0x256   : > { %v2895_v27 = vpop.f32.mrf.mxu0  ;;  %v2109_v4 = vld [vmem:[%s5457_s12 + $0xfc] sm:$0xff] }
 0x257   : > { %5195 = vmatmul.msk.f32.gmra.mxu3 %vm368_vm1, %v2417_v16 }
 0x258   : > { %v2275_v30 = vpop.f32.mrf.mxu2 }
 0x259   : > { %v2365_v54 = vadd.f32 %v2275_v30, %v2055_v33  ;;  %5233 = vmatmul.msk.f32.gmra.mxu0 %vm368_vm1, %v2727_v39  ;;  %v2420_v33 = vld [vmem:[%s5457_s12 + $0x105] sm:$0xff] }
 0x25a   : > { %v1968_v37 = vpop.f32.mrf.mxu1  ;;  %v2585_v34 = vpop.f32.mrf.mxu3 }
 0x25b   : > { %v2675_v25 = vadd.f32 %v2585_v34, %v2365_v54  ;;  %v2056_v40 = vadd.f32 %v1968_v37, %v5870_v9  ;;  %v2730_v54 = vld [vmem:[%s5457_s12 + $0x106] sm:$0xff] }
 0x25d   : > { %v6222_v19 = vadd.f32 %v2895_v27, %v2675_v25  ;;  %5120 = vmatmul.msk.f32.gmra.mxu1 %vm368_vm1, %v2106_v63  ;;  %5158 = vmatmul.msk.f32.gmra.mxu2 %vm368_vm1, %v2108_v44  ;;  %v2110_v27 = vld [vmem:[%s5457_s12 + $0x104] sm:$0xff] }
 0x25e   : > { %v2898_v49 = vpop.f32.mrf.mxu0 }
 0x25f   : > { %5196 = vmatmul.msk.f32.gmra.mxu3 %vm368_vm1, %v2418_v41  ;;  %v2111_v41 = vld [vmem:[%s5457_s12 + $0x10c] sm:$0xff] }
 0x260   : > { %v2278_v55 = vpop.f32.mrf.mxu2 }
 0x261   : > { %v2366_v61 = vadd.f32 %v2278_v55, %v2056_v40  ;;  %5234 = vmatmul.msk.f32.gmra.mxu0 %vm368_vm1, %v2728_v46 }
 0x262   : > { %v1971_v62 = vpop.f32.mrf.mxu1  ;;  %v2588_v56 = vpop.f32.mrf.mxu3 }
 0x263   : > { %v2676_v32 = vadd.f32 %v2588_v56, %v2366_v61  ;;  %v2057_v47 = vadd.f32 %v1971_v62, %v5880_v8  ;;  %v2731_v61 = vld [vmem:[%s5457_s12 + $0x10e] sm:$0xff] }
 0x265   : > { %v6232_v63 = vadd.f32 %v2898_v49, %v2676_v32  ;;  %5121 = vmatmul.msk.f32.gmra.mxu1 %vm368_vm1, %v2107_v21  ;;  %5159 = vmatmul.msk.f32.gmra.mxu2 %vm368_vm1, %v2109_v4 }
 0x266   : > { %v2901_v9 = vpop.f32.mrf.mxu0 }
 0x267   : > { %5197 = vmatmul.msk.f32.gmra.mxu3 %vm368_vm1, %v2419_v26  ;;  %v2112_v26 = vld [vmem:[%s5457_s12 + $0x114] sm:$0xff] }
 0x268   : > { %v2281_v0 = vpop.f32.mrf.mxu2 }
 0x269   : > { %v2367_v3 = vadd.f32 %v2281_v0, %v2057_v47  ;;  %5235 = vmatmul.msk.f32.gmra.mxu0 %vm368_vm1, %v2729_v53 }
 0x26a   : > { %v1974_v18 = vpop.f32.mrf.mxu1  ;;  %v2591_v16 = vpop.f32.mrf.mxu3 }
 0x26b   : > { %v2058_v39 = vadd.f32 %v1974_v18, %v5890_v15  ;;  %v2677_v21 = vadd.f32 %v2591_v16, %v2367_v3  ;;  %v2732_v3 = vld [vmem:[%s5457_s12 + $0x116] sm:$0xff] }
 0x26d   : > { %v6243_v30 = vadd.f32 %v2901_v9, %v2677_v21  ;;  %5122 = vmatmul.msk.f32.gmra.mxu1 %vm368_vm1, %v2108_v44  ;;  %5160 = vmatmul.msk.f32.gmra.mxu2 %vm368_vm1, %v2110_v27  ;;  %v2421_v44 = vld [vmem:[%s5457_s12 + $0x10d] sm:$0xff]  ;;  %v2113_v21 = vld [vmem:[%s5457_s12 + $0x11c] sm:$0xff] }
 0x26e   : > { %v2904_v8 = vpop.f32.mrf.mxu0 }
 0x26f   : > { %5198 = vmatmul.msk.f32.gmra.mxu3 %vm368_vm1, %v2420_v33 }
 0x270   : > { %v2284_v37 = vpop.f32.mrf.mxu2 }
 0x271   : > { %v2368_v34 = vadd.f32 %v2284_v37, %v2058_v39  ;;  %5236 = vmatmul.msk.f32.gmra.mxu0 %vm368_vm1, %v2730_v54 }
 0x272   : > { %v1977_v25 = vpop.f32.mrf.mxu1  ;;  %v2594_v15 = vpop.f32.mrf.mxu3 }
 0x273   : > { %v2059_v49 = vadd.f32 %v1977_v25, %v5900_v22  ;;  %v2678_v46 = vadd.f32 %v2594_v15, %v2368_v34  ;;  %v2733_v34 = vld [vmem:[%s5457_s12 + $0x11e] sm:$0xff] }
 0x275   : > { %v6253_v40 = vadd.f32 %v2904_v8, %v2678_v46  ;;  %5123 = vmatmul.msk.f32.gmra.mxu1 %vm368_vm1, %v2109_v4  ;;  %5161 = vmatmul.msk.f32.gmra.mxu2 %vm368_vm1, %v2111_v41  ;;  %v2422_v4 = vld [vmem:[%s5457_s12 + $0x115] sm:$0xff]  ;;  %v2114_v46 = vld [vmem:[%s5457_s12 + $0x124] sm:$0xff] }
 0x276   : > { %v2907_v55 = vpop.f32.mrf.mxu0 }
 0x277   : > { %5199 = vmatmul.msk.f32.gmra.mxu3 %vm368_vm1, %v2421_v44 }
 0x278   : > { %v2287_v62 = vpop.f32.mrf.mxu2 }
 0x279   : > { %v2369_v56 = vadd.f32 %v2287_v62, %v2059_v49  ;;  %5237 = vmatmul.msk.f32.gmra.mxu0 %vm368_vm1, %v2731_v61 }
 0x27a   : > { %v1980_v32 = vpop.f32.mrf.mxu1  ;;  %v2597_v22 = vpop.f32.mrf.mxu3 }
 0x27b   : > { %v2060_v9 = vadd.f32 %v1980_v32, %v5910_v29  ;;  %v2679_v53 = vadd.f32 %v2597_v22, %v2369_v56  ;;  %v2734_v56 = vld [vmem:[%s5457_s12 + $0x126] sm:$0xff] }
 0x27d   : > { %v6263_v47 = vadd.f32 %v2907_v55, %v2679_v53  ;;  %5124 = vmatmul.msk.f32.gmra.mxu1 %vm368_vm1, %v2110_v27  ;;  %5162 = vmatmul.msk.f32.gmra.mxu2 %vm368_vm1, %v2112_v26  ;;  %v2423_v27 = vld [vmem:[%s5457_s12 + $0x11d] sm:$0xff]  ;;  %v2115_v53 = vld [vmem:[%s5457_s12 + $0x12c] sm:$0xff] }
 0x27e   : > { %v2910_v0 = vpop.f32.mrf.mxu0 }
 0x27f   : > { %5200 = vmatmul.msk.f32.gmra.mxu3 %vm368_vm1, %v2422_v4 }
 0x280   : > { %v2290_v18 = vpop.f32.mrf.mxu2 }
 0x281   : > { %v2370_v16 = vadd.f32 %v2290_v18, %v2060_v9  ;;  %5238 = vmatmul.msk.f32.gmra.mxu0 %vm368_vm1, %v2732_v3 }
 0x282   : > { %v1983_v39 = vpop.f32.mrf.mxu1  ;;  %v2600_v29 = vpop.f32.mrf.mxu3 }
 0x283   : > { %v2061_v33 = vadd.f32 %v1983_v39, %v5920_v36  ;;  %v2680_v8 = vadd.f32 %v2600_v29, %v2370_v16  ;;  %v2735_v16 = vld [vmem:[%s5457_s12 + $0x12e] sm:$0xff] }
 0x285   : > { %v6273_v54 = vadd.f32 %v2910_v0, %v2680_v8  ;;  %5125 = vmatmul.msk.f32.gmra.mxu1 %vm368_vm1, %v2111_v41  ;;  %5163 = vmatmul.msk.f32.gmra.mxu2 %vm368_vm1, %v2113_v21  ;;  %v2424_v41 = vld [vmem:[%s5457_s12 + $0x125] sm:$0xff]  ;;  %v2116_v8 = vld [vmem:[%s5457_s12 + $0x134] sm:$0xff] }
 0x286   : > { %v2913_v37 = vpop.f32.mrf.mxu0 }
 0x287   : > { %5201 = vmatmul.msk.f32.gmra.mxu3 %vm368_vm1, %v2423_v27 }
 0x288   : > { %v2293_v25 = vpop.f32.mrf.mxu2 }
 0x289   : > { %v2371_v15 = vadd.f32 %v2293_v25, %v2061_v33  ;;  %5239 = vmatmul.msk.f32.gmra.mxu0 %vm368_vm1, %v2733_v34 }
 0x28a   : > { %v1986_v49 = vpop.f32.mrf.mxu1  ;;  %v2603_v36 = vpop.f32.mrf.mxu3 }
 0x28b   : > { %v2062_v44 = vadd.f32 %v1986_v49, %v5930_v43  ;;  %v2681_v55 = vadd.f32 %v2603_v36, %v2371_v15  ;;  %v2736_v15 = vld [vmem:[%s5457_s12 + $0x136] sm:$0xff] }
 0x28d   : > { %v6283_v61 = vadd.f32 %v2913_v37, %v2681_v55  ;;  %5126 = vmatmul.msk.f32.gmra.mxu1 %vm368_vm1, %v2112_v26  ;;  %5164 = vmatmul.msk.f32.gmra.mxu2 %vm368_vm1, %v2114_v46  ;;  %v2425_v26 = vld [vmem:[%s5457_s12 + $0x12d] sm:$0xff]  ;;  %v2117_v55 = vld [vmem:[%s5457_s12 + $0x13c] sm:$0xff] }
 0x28e   : > { %v2916_v62 = vpop.f32.mrf.mxu0 }
 0x28f   : > { %5202 = vmatmul.msk.f32.gmra.mxu3 %vm368_vm1, %v2424_v41 }
 0x290   : > { %v2296_v32 = vpop.f32.mrf.mxu2 }
 0x291   : > { %v2372_v22 = vadd.f32 %v2296_v32, %v2062_v44  ;;  %5240 = vmatmul.msk.f32.gmra.mxu0 %vm368_vm1, %v2734_v56  ;;  %v2427_v56 = vld [vmem:[%s5457_s12 + $0x13d] sm:$0xff] }
 0x292   : > { %v1989_v9 = vpop.f32.mrf.mxu1  ;;  %v2606_v43 = vpop.f32.mrf.mxu3 }
 0x293   : > { %v2063_v4 = vadd.f32 %v1989_v9, %v5940_v50  ;;  %v2682_v0 = vadd.f32 %v2606_v43, %v2372_v22  ;;  %v2737_v22 = vld [vmem:[%s5457_s12 + $0x13e] sm:$0xff] }
 0x295   : > { %v6293_v3 = vadd.f32 %v2916_v62, %v2682_v0  ;;  %5127 = vmatmul.msk.f32.gmra.mxu1 %vm368_vm1, %v2113_v21  ;;  %5165 = vmatmul.msk.f32.gmra.mxu2 %vm368_vm1, %v2115_v53  ;;  %v2426_v21 = vld [vmem:[%s5457_s12 + $0x135] sm:$0xff] }
 0x296   : > { %v2919_v18 = vpop.f32.mrf.mxu0 }
 0x297   : > { %5203 = vmatmul.msk.f32.gmra.mxu3 %vm368_vm1, %v2425_v26 }
 0x298   : > { %v2299_v39 = vpop.f32.mrf.mxu2 }
 0x299   : > { %v2373_v29 = vadd.f32 %v2299_v39, %v2063_v4  ;;  %5241 = vmatmul.msk.f32.gmra.mxu0 %vm368_vm1, %v2735_v16 }
 0x29a   : > { %v1992_v33 = vpop.f32.mrf.mxu1  ;;  %v2609_v50 = vpop.f32.mrf.mxu3 }
 0x29b   : > { %v2064_v27 = vadd.f32 %v1992_v33, %v5950_v58  ;;  %v2683_v37 = vadd.f32 %v2609_v50, %v2373_v29 }
 0x29d   : > { %v6303_v34 = vadd.f32 %v2919_v18, %v2683_v37  ;;  %5128 = vmatmul.msk.f32.gmra.mxu1 %vm368_vm1, %v2114_v46  ;;  %5166 = vmatmul.msk.f32.gmra.mxu2 %vm368_vm1, %v2116_v8 }
 0x29e   : > { %v2922_v25 = vpop.f32.mrf.mxu0 }
 0x29f   : > { %5204 = vmatmul.msk.f32.gmra.mxu3 %vm368_vm1, %v2426_v21 }
 0x2a0   : > { %v2302_v49 = vpop.f32.mrf.mxu2 }
 0x2a1   : > { %v2374_v36 = vadd.f32 %v2302_v49, %v2064_v27  ;;  %5242 = vmatmul.msk.f32.gmra.mxu0 %vm368_vm1, %v2736_v15 }
 0x2a2   : > { %v1995_v44 = vpop.f32.mrf.mxu1  ;;  %v2612_v58 = vpop.f32.mrf.mxu3 }
 0x2a3   : > { %v2065_v41 = vadd.f32 %v1995_v44, %v5961_v7  ;;  %v2684_v62 = vadd.f32 %v2612_v58, %v2374_v36 }
 0x2a5   : > { %v6313_v32 = vadd.f32 %v2922_v25, %v2684_v62  ;;  %5129 = vmatmul.msk.f32.gmra.mxu1 %vm368_vm1, %v2115_v53  ;;  %5167 = vmatmul.msk.f32.gmra.mxu2 %vm368_vm1, %v2117_v55 }
 0x2a6   : > { %v2925_v46 = vpop.f32.mrf.mxu0 }
 0x2a7   : > { %5205 = vmatmul.msk.f32.gmra.mxu3 %vm368_vm1, %v2427_v56 }
 0x2a8   : > { %v2305_v9 = vpop.f32.mrf.mxu2 }
 0x2a9   : > { %v2375_v43 = vadd.f32 %v2305_v9, %v2065_v41  ;;  %5243 = vmatmul.msk.f32.gmra.mxu0 %vm368_vm1, %v2737_v22 }
 0x2aa   : > { %v1998_v4 = vpop.f32.mrf.mxu1  ;;  %v2615_v0 = vpop.f32.mrf.mxu3 }
 0x2ab   : > { %v2066_v7 = vadd.f32 %v1998_v4, %v5972_v42  ;;  %v2685_v26 = vadd.f32 %v2615_v0, %v2375_v43 }
 0x2ad   : > { %v6321_v18 = vadd.f32 %v2925_v46, %v2685_v26 }
 0x2ae   : > { %v2928_v16 = vpop.f32.mrf.mxu0 }
 0x2b0   : > { %v2308_v39 = vpop.f32.mrf.mxu2 }
 0x2b1   : > { %v2376_v53 = vadd.f32 %v2308_v39, %v2066_v7 }
 0x2b2   : > { %v2001_v29 = vpop.f32.mrf.mxu1  ;;  %v2618_v33 = vpop.f32.mrf.mxu3 }
 0x2b3   : > { %v2067_v50 = vadd.f32 %v2001_v29, %v5982_v1  ;;  %v2686_v8 = vadd.f32 %v2618_v33, %v2376_v53 }
 0x2b5   : > { %v6324_v27 = vadd.f32 %v2928_v16, %v2686_v8 }
 0x2b6   : > { %v2931_v37 = vpop.f32.mrf.mxu0 }
 0x2b8   : > { %v2311_v21 = vpop.f32.mrf.mxu2 }
 0x2b9   : > { %v2377_v25 = vadd.f32 %v2311_v21, %v2067_v50 }
 0x2ba   : > { %v2004_v15 = vpop.f32.mrf.mxu1  ;;  %v2621_v49 = vpop.f32.mrf.mxu3 }
 0x2bb   : > { %v2068_v42 = vadd.f32 %v2004_v15, %v5992_v23  ;;  %v2687_v36 = vadd.f32 %v2621_v49, %v2377_v25 }
 0x2bd   : > { %v6327_v44 = vadd.f32 %v2931_v37, %v2687_v36 }
 0x2be   : > { %v2934_v58 = vpop.f32.mrf.mxu0 }
 0x2c0   : > { %v2314_v55 = vpop.f32.mrf.mxu2 }
 0x2c1   : > { %v2378_v41 = vadd.f32 %v2314_v55, %v2068_v42 }
 0x2c2   : > { %v2007_v62 = vpop.f32.mrf.mxu1  ;;  %v2624_v56 = vpop.f32.mrf.mxu3 }
 0x2c3   : > { %v2069_v1 = vadd.f32 %v2007_v62, %v6002_v48  ;;  %v2688_v46 = vadd.f32 %v2624_v56, %v2378_v41 }
 0x2c5   : > { %v6330_v22 = vadd.f32 %v2934_v58, %v2688_v46 }
 0x2c6   : > { %v2937_v9 = vpop.f32.mrf.mxu0 }
 0x2c8   : > { %v2317_v43 = vpop.f32.mrf.mxu2 }
 0x2c9   : > { %v2379_v4 = vadd.f32 %v2317_v43, %v2069_v1 }
 0x2ca   : > { %v2010_v0 = vpop.f32.mrf.mxu1  ;;  %v2627_v7 = vpop.f32.mrf.mxu3 }
 0x2cb   : > { %v2070_v23 = vadd.f32 %v2010_v0, %v6012_v6  ;;  %v2689_v26 = vadd.f32 %v2627_v7, %v2379_v4 }
 0x2cd   : > { %v6333_v16 = vadd.f32 %v2937_v9, %v2689_v26 }
 0x2ce   : > { %v2940_v39 = vpop.f32.mrf.mxu0 }
 0x2d0   : > { %v2320_v53 = vpop.f32.mrf.mxu2 }
 0x2d1   : > { %v2380_v29 = vadd.f32 %v2320_v53, %v2070_v23 }
 0x2d2   : > { %v2013_v33 = vpop.f32.mrf.mxu1  ;;  %v2630_v50 = vpop.f32.mrf.mxu3 }
 0x2d3   : > { %v2071_v48 = vadd.f32 %v2013_v33, %v6022_v28  ;;  %v2690_v8 = vadd.f32 %v2630_v50, %v2380_v29 }
 0x2d5   : > { %v6336_v37 = vadd.f32 %v2940_v39, %v2690_v8 }
 0x2d6   : > { %v2943_v21 = vpop.f32.mrf.mxu0 }
 0x2d8   : > { %v2323_v25 = vpop.f32.mrf.mxu2 }
 0x2d9   : > { %v2381_v15 = vadd.f32 %v2323_v25, %v2071_v48 }
 0x2da   : > { %v2016_v49 = vpop.f32.mrf.mxu1  ;;  %v2633_v42 = vpop.f32.mrf.mxu3 }
 0x2db   : > { %v2072_v6 = vadd.f32 %v2016_v49, %v6032_v51  ;;  %v2691_v36 = vadd.f32 %v2633_v42, %v2381_v15 }
 0x2dd   : > { %v6339_v58 = vadd.f32 %v2943_v21, %v2691_v36 }
 0x2de   : > { %v2946_v55 = vpop.f32.mrf.mxu0 }
 0x2e0   : > { %v2326_v41 = vpop.f32.mrf.mxu2 }
 0x2e1   : > { %v2382_v62 = vadd.f32 %v2326_v41, %v2072_v6 }
 0x2e2   : > { %v2019_v56 = vpop.f32.mrf.mxu1  ;;  %v2636_v1 = vpop.f32.mrf.mxu3 }
 0x2e3   : > { %v2073_v28 = vadd.f32 %v2019_v56, %v6042_v14  ;;  %v2692_v46 = vadd.f32 %v2636_v1, %v2382_v62 }
 0x2e5   : > { %v6342_v9 = vadd.f32 %v2946_v55, %v2692_v46 }
 0x2e6   : > { %v2949_v43 = vpop.f32.mrf.mxu0 }
 0x2e8   : > { %v2329_v4 = vpop.f32.mrf.mxu2 }
 0x2e9   : > { %v2383_v0 = vadd.f32 %v2329_v4, %v2073_v28 }
 0x2ea   : > { %v2022_v7 = vpop.f32.mrf.mxu1  ;;  %v2639_v23 = vpop.f32.mrf.mxu3 }
 0x2eb   : > { %v2693_v26 = vadd.f32 %v2639_v23, %v2383_v0  ;;  %v2074_v53 = vadd.f32 %v2022_v7, %v6052_v60 }
 0x2ed   : > { %v6344_v51 = vadd.f32 %v2949_v43, %v2693_v26 }
 0x2ee   : > { %v2952_v39 = vpop.f32.mrf.mxu0 }
 0x2f0   : > { %v2332_v29 = vpop.f32.mrf.mxu2 }
 0x2f1   : > { %v2384_v33 = vadd.f32 %v2332_v29, %v2074_v53 }
 0x2f2   : > { %v2025_v50 = vpop.f32.mrf.mxu1  ;;  %v2642_v48 = vpop.f32.mrf.mxu3 }
 0x2f3   : > { %v2694_v8 = vadd.f32 %v2642_v48, %v2384_v33  ;;  %v2075_v25 = vadd.f32 %v2025_v50, %v6062_v10 }
 0x2f5   : > { %v6347_v14 = vadd.f32 %v2952_v39, %v2694_v8 }
 0x2f6   : > { %v2955_v21 = vpop.f32.mrf.mxu0 }
 0x2f8   : > { %v2335_v15 = vpop.f32.mrf.mxu2 }
 0x2f9   : > { %v2385_v49 = vadd.f32 %v2335_v15, %v2075_v25 }
 0x2fa   : > { %v2028_v42 = vpop.f32.mrf.mxu1  ;;  %v2645_v6 = vpop.f32.mrf.mxu3 }
 0x2fb   : > { %v2695_v36 = vadd.f32 %v2645_v6, %v2385_v49  ;;  %v2076_v60 = vadd.f32 %v2028_v42, %v6072_v17 }
 0x2fd   : > { %v6350_v55 = vadd.f32 %v2955_v21, %v2695_v36 }
 0x2fe   : > { %v2958_v41 = vpop.f32.mrf.mxu0 }
 0x300   : > { %v2338_v62 = vpop.f32.mrf.mxu2 }
 0x301   : > { %v2386_v56 = vadd.f32 %v2338_v62, %v2076_v60 }
 0x302   : > { %v2031_v1 = vpop.f32.mrf.mxu1  ;;  %v2648_v28 = vpop.f32.mrf.mxu3 }
 0x303   : > { %v2696_v46 = vadd.f32 %v2648_v28, %v2386_v56  ;;  %v2077_v10 = vadd.f32 %v2031_v1, %v6082_v5 }
 0x305   : > { %v6353_v43 = vadd.f32 %v2958_v41, %v2696_v46 }
 0x306   : > { %v2961_v4 = vpop.f32.mrf.mxu0 }
 0x308   : > { %v2341_v0 = vpop.f32.mrf.mxu2 }
 0x309   : > { %v2387_v7 = vadd.f32 %v2341_v0, %v2077_v10 }
 0x30a   : > { %v2034_v23 = vpop.f32.mrf.mxu1  ;;  %v2651_v26 = vpop.f32.mrf.mxu3 }
 0x30b   : > { %v2697_v39 = vadd.f32 %v2651_v26, %v2387_v7  ;;  %v2078_v17 = vadd.f32 %v2034_v23, %v6092_v11 }
 0x30d   : > { %v6356_v53 = vadd.f32 %v2961_v4, %v2697_v39 }
 0x30e   : > { %v2964_v29 = vpop.f32.mrf.mxu0 }
 0x310   : > { %v2344_v33 = vpop.f32.mrf.mxu2 }
 0x311   : > { %v2388_v50 = vadd.f32 %v2344_v33, %v2078_v17 }
 0x312   : > { %v2037_v48 = vpop.f32.mrf.mxu1  ;;  %v2654_v8 = vpop.f32.mrf.mxu3 }
 0x313   : > { %v2698_v21 = vadd.f32 %v2654_v8, %v2388_v50  ;;  %v2079_v5 = vadd.f32 %v2037_v48, %v6102_v13 }
 0x315   : > { %v6359_v25 = vadd.f32 %v2964_v29, %v2698_v21 }
 0x316   : > { %v2967_v15 = vpop.f32.mrf.mxu0 }
 0x318   : > { %v2347_v49 = vpop.f32.mrf.mxu2 }
 0x319   : > { %v2389_v42 = vadd.f32 %v2347_v49, %v2079_v5 }
 0x31a   : > { %v2040_v6 = vpop.f32.mrf.mxu1  ;;  %v2657_v36 = vpop.f32.mrf.mxu3 }
 0x31b   : > { %v2699_v41 = vadd.f32 %v2657_v36, %v2389_v42  ;;  %v2080_v62 = vadd.f32 %v2040_v6, %v6112_v35 }
 0x31d   : > { %v6362_v60 = vadd.f32 %v2967_v15, %v2699_v41 }
 0x31e   : > { %v2970_v56 = vpop.f32.mrf.mxu0 }
 0x320   : > { %v2350_v11 = vpop.f32.mrf.mxu2 }
 0x321   : > { %v2390_v1 = vadd.f32 %v2350_v11, %v2080_v62 }
 0x322   : > { %v2660_v28 = vpop.f32.mrf.mxu3  ;;  %v2043_v4 = vpop.f32.mrf.mxu1 }
 0x323   : > { %v2700_v46 = vadd.f32 %v2660_v28, %v2390_v1  ;;  %v2081_v0 = vadd.f32 %v2043_v4, %v6122_v57 }
 0x325   : > { %v6365_v10 = vadd.f32 %v2970_v56, %v2700_v46 }
 0x326   : > { %v2973_v26 = vpop.f32.mrf.mxu0 }
 0x328   : > { %v2353_v13 = vpop.f32.mrf.mxu2 }
 0x329   : > { %v2391_v7 = vadd.f32 %v2353_v13, %v2081_v0  ;;  %3014 = sbr.rel (%p5244_p13) target bundleno = 850 (0x352), region = 36 }
 0x32a   : > { %v2663_v23 = vpop.f32.mrf.mxu3 }
 0x32b   : > { %v2701_v39 = vadd.f32 %v2663_v23, %v2391_v7 }
 0x32d   : > { %v6368_v29 = vadd.f32 %v2973_v26, %v2701_v39 }
 0x32e   : > { %3015 = vst [vmem:[%s5477_s8] sm:$0xff] %v6132_v20 }
 0x32f   : > { %3016 = vst [vmem:[%s5477_s8 + $0x8] sm:$0xff] %v6142_v24 }
 0x330   : > { %3017 = vst [vmem:[%s5477_s8 + $0x10] sm:$0xff] %v6152_v31 }
 0x331   : > { %3018 = vst [vmem:[%s5477_s8 + $0x18] sm:$0xff] %v6162_v38 }
 0x332   : > { %3019 = vst [vmem:[%s5477_s8 + $0x20] sm:$0xff] %v6172_v45 }
 0x333   : > { %3020 = vst [vmem:[%s5477_s8 + $0x28] sm:$0xff] %v6182_v52 }
 0x334   : > { %3021 = vst [vmem:[%s5477_s8 + $0x30] sm:$0xff] %v6192_v59 }
 0x335   : > { %3022 = vst [vmem:[%s5477_s8 + $0x38] sm:$0xff] %v6202_v2 }
 0x336   : > { %3023 = vst [vmem:[%s5477_s8 + $0x40] sm:$0xff] %v6212_v12 }
 0x337   : > { %3024 = vst [vmem:[%s5477_s8 + $0x48] sm:$0xff] %v6222_v19 }
 0x338   : > { %3025 = vst [vmem:[%s5477_s8 + $0x50] sm:$0xff] %v6232_v63 }
 0x339   : > { %3026 = vst [vmem:[%s5477_s8 + $0x58] sm:$0xff] %v6243_v30 }
 0x33a   : > { %3027 = vst [vmem:[%s5477_s8 + $0x60] sm:$0xff] %v6253_v40 }
 0x33b   : > { %3028 = vst [vmem:[%s5477_s8 + $0x68] sm:$0xff] %v6263_v47 }
 0x33c   : > { %3029 = vst [vmem:[%s5477_s8 + $0x70] sm:$0xff] %v6273_v54 }
 0x33d   : > { %3030 = vst [vmem:[%s5477_s8 + $0x78] sm:$0xff] %v6283_v61 }
 0x33e   : > { %3031 = vst [vmem:[%s5477_s8 + $0x80] sm:$0xff] %v6293_v3 }
 0x33f   : > { %3032 = vst [vmem:[%s5477_s8 + $0x88] sm:$0xff] %v6303_v34 }
 0x340   : > { %3033 = vst [vmem:[%s5477_s8 + $0x90] sm:$0xff] %v6313_v32 }
 0x341   : > { %3034 = vst [vmem:[%s5477_s8 + $0x98] sm:$0xff] %v6321_v18 }
 0x342   : > { %3035 = vst [vmem:[%s5477_s8 + $0xa0] sm:$0xff] %v6324_v27 }
 0x343   : > { %3036 = vst [vmem:[%s5477_s8 + $0xa8] sm:$0xff] %v6327_v44 }
 0x344   : > { %3037 = vst [vmem:[%s5477_s8 + $0xb0] sm:$0xff] %v6330_v22 }
 0x345   : > { %3038 = vst [vmem:[%s5477_s8 + $0xb8] sm:$0xff] %v6333_v16 }
 0x346   : > { %3039 = vst [vmem:[%s5477_s8 + $0xc0] sm:$0xff] %v6336_v37 }
 0x347   : > { %3040 = vst [vmem:[%s5477_s8 + $0xc8] sm:$0xff] %v6339_v58 }
 0x348   : > { %3041 = vst [vmem:[%s5477_s8 + $0xd0] sm:$0xff] %v6342_v9 }
 0x349   : > { %3042 = vst [vmem:[%s5477_s8 + $0xd8] sm:$0xff] %v6344_v51 }
 0x34a   : > { %3043 = vst [vmem:[%s5477_s8 + $0xe0] sm:$0xff] %v6347_v14 }
 0x34b   : > { %3044 = vst [vmem:[%s5477_s8 + $0xe8] sm:$0xff] %v6350_v55 }
 0x34c   : > { %3045 = vst [vmem:[%s5477_s8 + $0xf0] sm:$0xff] %v6353_v43 }
 0x34d   : > { %3046 = vst [vmem:[%s5477_s8 + $0xf8] sm:$0xff] %v6356_v53 }
 0x34e   : > { %3047 = vst [vmem:[%s5477_s8 + $0x100] sm:$0xff] %v6359_v25 }
 0x34f   : > { %3048 = vst [vmem:[%s5477_s8 + $0x108] sm:$0xff] %v6362_v60 }
 0x350   : > { %3049 = vst [vmem:[%s5477_s8 + $0x110] sm:$0xff] %v6365_v10 }
 0x351   : > { %3050 = vst [vmem:[%s5477_s8 + $0x118] sm:$0xff] %v6368_v29 }
 0x352 PF: > { %3054 = sbr.rel (%p286_p11) target bundleno = 894 (0x37e), region = 40 }
 0x357   : > { %v3056_v57 = vld [vmem:[%s5477_s8 + $0x8] sm:$0xff]  ;;  %v3057_v17 = vld [vmem:[%s5477_s8 + $0x10] sm:$0xff]  ;;  %v3058_v8 = vld [vmem:[%s5477_s8 + $0x18] sm:$0xff] }
 0x358   : > { %v3092_v50 = vadd.f32 %v3056_v57, %v6142_v24  ;;  %v3093_v48 = vadd.f32 %v3057_v17, %v6152_v31  ;;  %v3059_v21 = vld [vmem:[%s5477_s8 + $0x20] sm:$0xff]  ;;  %v3060_v15 = vld [vmem:[%s5477_s8 + $0x28] sm:$0xff]  ;;  %v3094_v5 = vadd.f32 %v3058_v8, %v6162_v38  ;;  %v3061_v49 = vld [vmem:[%s5477_s8 + $0x30] sm:$0xff] }
 0x359   : > { %v3055_v35 = vld [vmem:[%s5477_s8] sm:$0xff]  ;;  %v3095_v42 = vadd.f32 %v3059_v21, %v6172_v45  ;;  %v3096_v24 = vadd.f32 %v3060_v15, %v6182_v52  ;;  %v3097_v6 = vadd.f32 %v3061_v49, %v6192_v59  ;;  %v3064_v38 = vld [vmem:[%s5477_s8 + $0x48] sm:$0xff]  ;;  %v3065_v45 = vld [vmem:[%s5477_s8 + $0x50] sm:$0xff] }
 0x35a   : > { %v3091_v33 = vadd.f32 %v3055_v35, %v6132_v20  ;;  %v3062_v20 = vld [vmem:[%s5477_s8 + $0x38] sm:$0xff]  ;;  %3128 = vst [vmem:[%s5477_s8 + $0x8] sm:$0xff] %v3092_v50  ;;  %v3063_v31 = vld [vmem:[%s5477_s8 + $0x40] sm:$0xff]  ;;  %v3100_v62 = vadd.f32 %v3064_v38, %v6222_v19  ;;  %v3101_v11 = vadd.f32 %v3065_v45, %v6232_v63  ;;  %v3089_v49 = vld [vmem:[%s5477_s8 + $0x110] sm:$0xff] }
 0x35b   : > { %3129 = vst [vmem:[%s5477_s8 + $0x10] sm:$0xff] %v3093_v48  ;;  %v3098_v36 = vadd.f32 %v3062_v20, %v6202_v2  ;;  %v3099_v41 = vadd.f32 %v3063_v31, %v6212_v12  ;;  %v3066_v52 = vld [vmem:[%s5477_s8 + $0x58] sm:$0xff]  ;;  %v3067_v59 = vld [vmem:[%s5477_s8 + $0x60] sm:$0xff]  ;;  %v3068_v2 = vld [vmem:[%s5477_s8 + $0x68] sm:$0xff]  ;;  %v3125_v20 = vadd.f32 %v3089_v49, %v6365_v10 }
 0x35c   : > { %3127 = vst [vmem:[%s5477_s8] sm:$0xff] %v3091_v33  ;;  %v3102_v56 = vadd.f32 %v3066_v52, %v6243_v30  ;;  %v3069_v12 = vld [vmem:[%s5477_s8 + $0x70] sm:$0xff]  ;;  %v3103_v1 = vadd.f32 %v3067_v59, %v6253_v40  ;;  %v3070_v19 = vld [vmem:[%s5477_s8 + $0x78] sm:$0xff]  ;;  %v3104_v28 = vadd.f32 %v3068_v2, %v6263_v47  ;;  %v3071_v63 = vld [vmem:[%s5477_s8 + $0x80] sm:$0xff] }
 0x35d   : > { %3130 = vst [vmem:[%s5477_s8 + $0x18] sm:$0xff] %v3094_v5  ;;  %v3105_v46 = vadd.f32 %v3069_v12, %v6273_v54  ;;  %v3072_v30 = vld [vmem:[%s5477_s8 + $0x88] sm:$0xff]  ;;  %v3106_v4 = vadd.f32 %v3070_v19, %v6283_v61  ;;  %v3073_v40 = vld [vmem:[%s5477_s8 + $0x90] sm:$0xff]  ;;  %v3107_v0 = vadd.f32 %v3071_v63, %v6293_v3  ;;  %v3074_v47 = vld [vmem:[%s5477_s8 + $0x98] sm:$0xff] }
 0x35e   : > { %3131 = vst [vmem:[%s5477_s8 + $0x20] sm:$0xff] %v3095_v42  ;;  %v3108_v13 = vadd.f32 %v3072_v30, %v6303_v34  ;;  %v3075_v54 = vld [vmem:[%s5477_s8 + $0xa0] sm:$0xff]  ;;  %v3109_v7 = vadd.f32 %v3073_v40, %v6313_v32  ;;  %v3076_v61 = vld [vmem:[%s5477_s8 + $0xa8] sm:$0xff]  ;;  %v3110_v23 = vadd.f32 %v3074_v47, %v6321_v18  ;;  %v3077_v3 = vld [vmem:[%s5477_s8 + $0xb0] sm:$0xff] }
 0x35f   : > { %3132 = vst [vmem:[%s5477_s8 + $0x28] sm:$0xff] %v3096_v24  ;;  %v3111_v26 = vadd.f32 %v3075_v54, %v6324_v27  ;;  %v3078_v34 = vld [vmem:[%s5477_s8 + $0xb8] sm:$0xff]  ;;  %v3112_v39 = vadd.f32 %v3076_v61, %v6327_v44  ;;  %v3079_v32 = vld [vmem:[%s5477_s8 + $0xc0] sm:$0xff]  ;;  %v3113_v35 = vadd.f32 %v3077_v3, %v6330_v22  ;;  %v3080_v18 = vld [vmem:[%s5477_s8 + $0xc8] sm:$0xff] }
 0x360   : > { %3133 = vst [vmem:[%s5477_s8 + $0x30] sm:$0xff] %v3097_v6  ;;  %v3114_v57 = vadd.f32 %v3078_v34, %v6333_v16  ;;  %v3081_v27 = vld [vmem:[%s5477_s8 + $0xd0] sm:$0xff]  ;;  %v3115_v17 = vadd.f32 %v3079_v32, %v6336_v37  ;;  %v3082_v44 = vld [vmem:[%s5477_s8 + $0xd8] sm:$0xff]  ;;  %v3116_v33 = vadd.f32 %v3080_v18, %v6339_v58  ;;  %v3083_v22 = vld [vmem:[%s5477_s8 + $0xe0] sm:$0xff] }
 0x361   : > { %3134 = vst [vmem:[%s5477_s8 + $0x38] sm:$0xff] %v3098_v36  ;;  %v3117_v50 = vadd.f32 %v3081_v27, %v6342_v9  ;;  %v3084_v16 = vld [vmem:[%s5477_s8 + $0xe8] sm:$0xff]  ;;  %v3118_v48 = vadd.f32 %v3082_v44, %v6344_v51  ;;  %v3085_v37 = vld [vmem:[%s5477_s8 + $0xf0] sm:$0xff]  ;;  %v3119_v8 = vadd.f32 %v3083_v22, %v6347_v14  ;;  %v3086_v58 = vld [vmem:[%s5477_s8 + $0xf8] sm:$0xff] }
 0x362   : > { %3135 = vst [vmem:[%s5477_s8 + $0x40] sm:$0xff] %v3099_v41  ;;  %v3120_v21 = vadd.f32 %v3084_v16, %v6350_v55  ;;  %v3087_v15 = vld [vmem:[%s5477_s8 + $0x100] sm:$0xff]  ;;  %v3121_v9 = vadd.f32 %v3085_v37, %v6353_v43  ;;  %v3088_v51 = vld [vmem:[%s5477_s8 + $0x108] sm:$0xff]  ;;  %v3122_v5 = vadd.f32 %v3086_v58, %v6356_v53  ;;  %v3090_v42 = vld [vmem:[%s5477_s8 + $0x118] sm:$0xff] }
 0x363   : > { %3136 = vst [vmem:[%s5477_s8 + $0x48] sm:$0xff] %v3100_v62  ;;  %v3123_v14 = vadd.f32 %v3087_v15, %v6359_v25  ;;  %v3124_v55 = vadd.f32 %v3088_v51, %v6362_v60  ;;  %v3126_v43 = vadd.f32 %v3090_v42, %v6368_v29 }
 0x364   : > { %3137 = vst [vmem:[%s5477_s8 + $0x50] sm:$0xff] %v3101_v11 }
 0x365   : > { %3138 = vst [vmem:[%s5477_s8 + $0x58] sm:$0xff] %v3102_v56 }
 0x366   : > { %3139 = vst [vmem:[%s5477_s8 + $0x60] sm:$0xff] %v3103_v1 }
 0x367   : > { %3140 = vst [vmem:[%s5477_s8 + $0x68] sm:$0xff] %v3104_v28 }
 0x368   : > { %3141 = vst [vmem:[%s5477_s8 + $0x70] sm:$0xff] %v3105_v46 }
 0x369   : > { %3142 = vst [vmem:[%s5477_s8 + $0x78] sm:$0xff] %v3106_v4 }
 0x36a   : > { %3143 = vst [vmem:[%s5477_s8 + $0x80] sm:$0xff] %v3107_v0 }
 0x36b   : > { %3144 = vst [vmem:[%s5477_s8 + $0x88] sm:$0xff] %v3108_v13 }
 0x36c   : > { %3145 = vst [vmem:[%s5477_s8 + $0x90] sm:$0xff] %v3109_v7 }
 0x36d   : > { %3146 = vst [vmem:[%s5477_s8 + $0x98] sm:$0xff] %v3110_v23 }
 0x36e   : > { %3147 = vst [vmem:[%s5477_s8 + $0xa0] sm:$0xff] %v3111_v26 }
 0x36f   : > { %3148 = vst [vmem:[%s5477_s8 + $0xa8] sm:$0xff] %v3112_v39 }
 0x370   : > { %3149 = vst [vmem:[%s5477_s8 + $0xb0] sm:$0xff] %v3113_v35 }
 0x371   : > { %3150 = vst [vmem:[%s5477_s8 + $0xb8] sm:$0xff] %v3114_v57 }
 0x372   : > { %3151 = vst [vmem:[%s5477_s8 + $0xc0] sm:$0xff] %v3115_v17 }
 0x373   : > { %3152 = vst [vmem:[%s5477_s8 + $0xc8] sm:$0xff] %v3116_v33 }
 0x374   : > { %3153 = vst [vmem:[%s5477_s8 + $0xd0] sm:$0xff] %v3117_v50 }
 0x375   : > { %3154 = vst [vmem:[%s5477_s8 + $0xd8] sm:$0xff] %v3118_v48 }
 0x376   : > { %3155 = vst [vmem:[%s5477_s8 + $0xe0] sm:$0xff] %v3119_v8 }
 0x377   : > { %3156 = vst [vmem:[%s5477_s8 + $0xe8] sm:$0xff] %v3120_v21 }
 0x378   : > { %3157 = vst [vmem:[%s5477_s8 + $0xf0] sm:$0xff] %v3121_v9 }
 0x379   : > { %3158 = vst [vmem:[%s5477_s8 + $0xf8] sm:$0xff] %v3122_v5 }
 0x37a   : > { %3159 = vst [vmem:[%s5477_s8 + $0x100] sm:$0xff] %v3123_v14 }
 0x37b   : > { %3160 = vst [vmem:[%s5477_s8 + $0x108] sm:$0xff] %v3124_v55 }
 0x37c   : > { %3161 = vst [vmem:[%s5477_s8 + $0x110] sm:$0xff] %v3125_v20 }
 0x37d   : > { %3162 = vst [vmem:[%s5477_s8 + $0x118] sm:$0xff] %v3126_v43 }
 0x37e PF: > { %p5246_p0 = scmp.ne.s32.totalorder %s5345_s15, 2 }
 0x380   : > { %3166 = sbr.rel (%p5246_p0) target bundleno = 1218 (0x4c2), region = 44 }
 0x385   : > { %v3203_v53 = vlaneseq  ;;  %v8084_v4 = vmov 0  }
 0x387   : > { %v6554_v25 = vshrl.u32 %v3203_v53, 7 }
 0x389   : > { %v6557_v24 = vadd.s32 8, %v6554_v25  ;;  %v3243_v60 = vand.u32 65535, %v6554_v25  ;;  %v6562_v29 = vadd.s32 16, %v6554_v25  ;;  %v3244_v31 = vshrl.u32 %v6554_v25, 16 }
 0x38a   : > { %v6576_v28 = vadd.s32 24, %v6554_v25  ;;  %v6593_v50 = vadd.s32 32, %v6554_v25  ;;  %v6596_v16 = vadd.s32 40, %v6554_v25  ;;  %v6599_v48 = vadd.s32 48, %v6554_v25 }
 0x38b   : > { %v3272_v10 = vand.u32 65535, %v6557_v24  ;;  %v3247_v6 = vmul.u32 58254, %v3243_v60  ;;  %v3273_v38 = vshrl.u32 %v6557_v24, 16  ;;  %v3246_v45 = vmul.u32 14564, %v3243_v60 }
 0x38c   : > { %v6566_v41 = vmul.u32 14564, %v3244_v31  ;;  %v3301_v62 = vand.u32 65535, %v6562_v29  ;;  %v3302_v56 = vshrl.u32 %v6562_v29, 16  ;;  %v3249_v30 = vmul.u32 58254, %v3244_v31 }
 0x38d   : > { %v3276_v36 = vmul.u32 58254, %v3272_v10  ;;  %v3250_v52 = vshll.u32 %v3247_v6, 16  ;;  %v3275_v59 = vmul.u32 14564, %v3272_v10  ;;  %v6569_v11 = vmul.u32 14564, %v3273_v38 }
 0x38e   : > { %v3252_v12 = vshll.u32 %v6566_v41, 16  ;;  %v6573_v19 = vmul.u32 58254, %v3301_v62  ;;  %v3278_v0 = vmul.u32 58254, %v3273_v38  ;;  %v3304_v47 = vmul.u32 14564, %v3301_v62 }
 0x38f   : > { %v3279_v2 = vshll.u32 %v3276_v36, 16  ;;  %vm3254_vm2 = vc.u32 %v3246_v45, %v3250_v52  ;;  %v3256_v1 = vadd.s32 %v3250_v52, %v3246_v45  ;;  %v3281_v63 = vshll.u32 %v6569_v11, 16 }
 0x390   : > { %v3255_v40 = vsel %vm3254_vm2, 1, %v8084_v4  ;;  %v6581_v54 = vmul.u32 14564, %v3302_v56  ;;  %v3308_v7 = vshll.u32 %v6573_v19, 16  ;;  %v3330_v61 = vand.u32 65535, %v6576_v28 }
 0x391   : > { %vm3283_vm3 = vc.u32 %v3275_v59, %v3279_v2  ;;  %v3285_v46 = vadd.s32 %v3279_v2, %v3275_v59  ;;  %vm3258_vm4 = vc.u32 %v3256_v1, %v3252_v12  ;;  %v3257_v23 = vadd.s32 %v3255_v40, %v3249_v30 }
 0x392   : > { %v3284_v13 = vsel %vm3283_vm3, 1, %v8084_v4  ;;  %v3259_v3 = vsel %vm3258_vm4, 1, %v8084_v4  ;;  %v3310_v39 = vshll.u32 %v6581_v54, 16  ;;  %vm3312_vm6 = vc.u32 %v3304_v47, %v3308_v7 }
 0x393   : > { %vm3287_vm5 = vc.u32 %v3285_v46, %v3281_v63  ;;  %v3286_v26 = vadd.s32 %v3284_v13, %v3278_v0  ;;  %v3314_v32 = vadd.s32 %v3308_v7, %v3304_v47  ;;  %v3331_v35 = vshrl.u32 %v6576_v28, 16 }
 0x394   : > { %v3288_v34 = vsel %vm3287_vm5, 1, %v8084_v4  ;;  %v6589_v18 = vmul.u32 58254, %v3330_v61  ;;  %v3251_v57 = vshrl.u32 %v3247_v6, 16  ;;  %v3307_v27 = vmul.u32 58254, %v3302_v56 }
 0x395   : > { %v3261_v17 = vadd.s32 %v3259_v3, %v3257_v23  ;;  %v3280_v44 = vshrl.u32 %v3276_v36, 16  ;;  %v3290_v33 = vadd.s32 %v3288_v34, %v3286_v26  ;;  %v3313_v22 = vsel %vm3312_vm6, 1, %v8084_v4 }
 0x396   : > { %vm3316_vm7 = vc.u32 %v3314_v32, %v3310_v39  ;;  %v3333_v37 = vmul.u32 14564, %v3330_v61  ;;  %v6601_v8 = vmul.u32 14564, %v3331_v35  ;;  %v3337_v58 = vshll.u32 %v6589_v18, 16 }
 0x397   : > { %v6605_v21 = vadd.s32 56, %v6554_v25  ;;  %v6608_v15 = vadd.s32 64, %v6554_v25  ;;  %v3253_v9 = vshrl.u32 %v6566_v41, 16  ;;  %v3315_v51 = vadd.s32 %v3313_v22, %v3307_v27 }
 0x398   : > { %v3262_v5 = vadd.s32 %v3261_v17, %v3251_v57  ;;  %v3282_v49 = vshrl.u32 %v6569_v11, 16  ;;  %v3291_v14 = vadd.s32 %v3290_v33, %v3280_v44  ;;  %v3317_v42 = vsel %vm3316_vm7, 1, %v8084_v4 }
 0x399   : > { %v6614_v55 = vadd.s32 72, %v6554_v25  ;;  %v6617_v20 = vadd.s32 80, %v6554_v25  ;;  %v6620_v43 = vadd.s32 88, %v6554_v25  ;;  %v6623_v53 = vadd.s32 96, %v6554_v25 }
 0x39a   : > { %v6626_v60 = vadd.s32 104, %v6554_v25  ;;  %v3339_v10 = vshll.u32 %v6601_v8, 16  ;;  %vm3341_vm8 = vc.u32 %v3333_v37, %v3337_v58  ;;  %v3343_v31 = vadd.s32 %v3337_v58, %v3333_v37 }
 0x39b   : > { %v6630_v6 = vadd.s32 112, %v6554_v25  ;;  %v6633_v38 = vadd.s32 120, %v6554_v25  ;;  %v3309_v36 = vshrl.u32 %v6573_v19, 16  ;;  %v3319_v45 = vadd.s32 %v3317_v42, %v3315_v51 }
 0x39c   : > { %v6637_v41 = vadd.s32 128, %v6554_v25  ;;  %v3263_v52 = vadd.s32 %v3262_v5, %v3253_v9  ;;  %v3292_v62 = vadd.s32 %v3291_v14, %v3282_v49  ;;  %v3336_v59 = vmul.u32 58254, %v3331_v35 }
 0x39d   : > { %v6640_v11 = vadd.s32 136, %v6554_v25  ;;  %v6643_v2 = vadd.s32 144, %v6554_v25  ;;  %v3342_v56 = vsel %vm3341_vm8, 1, %v8084_v4  ;;  %v3359_v12 = vand.u32 65535, %v6593_v50 }
 0x39e   : > { %v6648_v1 = vadd.s32 152, %v6554_v25  ;;  %v6651_v19 = vadd.s32 160, %v6554_v25  ;;  %v6654_v63 = vadd.s32 168, %v6554_v25  ;;  %vm3345_vm9 = vc.u32 %v3343_v31, %v3339_v10 }
 0x39f   : > { %v6657_v46 = vadd.s32 176, %v6554_v25  ;;  %v6660_v30 = vadd.s32 184, %v6554_v25  ;;  %v3311_v40 = vshrl.u32 %v6581_v54, 16  ;;  %v3320_v0 = vadd.s32 %v3319_v45, %v3309_v36 }
 0x3a0   : > { %v6664_v47 = vadd.s32 192, %v6554_v25  ;;  %v3264_v13 = vshrl.u32 %v3263_v52, 4  ;;  %v3293_v7 = vshrl.u32 %v3292_v62, 4  ;;  %v3344_v61 = vadd.s32 %v3342_v56, %v3336_v59 }
 0x3a1   : > { %v6667_v23 = vadd.s32 200, %v6554_v25  ;;  %v3346_v3 = vsel %vm3345_vm9, 1, %v8084_v4  ;;  %v6670_v26 = vmul.u32 58254, %v3359_v12  ;;  %v3388_v34 = vand.u32 65535, %v6596_v16 }
 0x3a2   : > { %8123 = vst [vmem:[#allocation4_spill] sm:$0xff] %v6664_v47  ;;  %v6674_v39 = vadd.s32 208, %v6554_v25  ;;  %v6677_v54 = vadd.s32 216, %v6554_v25  ;;  %v6680_v32 = vadd.s32 224, %v6554_v25  ;;  %v6683_v35 = vadd.s32 232, %v6554_v25 }
 0x3a3   : > { %8124 = vst [vmem:[#allocation5_spill] sm:$0xff] %v6667_v23  ;;  %v6686_v57 = vadd.s32 240, %v6554_v25  ;;  %v6689_v27 = vadd.s32 248, %v6554_v25  ;;  %v3321_v17 = vadd.s32 %v3320_v0, %v3311_v40  ;;  %v3360_v44 = vshrl.u32 %v6593_v50, 16 }
 0x3a4   : > { %8125 = vst [vmem:[#allocation6_spill] sm:$0xff] %v6674_v39  ;;  %v3265_v33 = vmul.u32 18, %v3264_v13  ;;  %v3294_v22 = vmul.u32 18, %v3293_v7  ;;  %v3338_v37 = vshrl.u32 %v6589_v18, 16  ;;  %v3348_v58 = vadd.s32 %v3346_v3, %v3344_v61 }
 0x3a5   : > { %8126 = vst [vmem:[#allocation7_spill] sm:$0xff] %v6677_v54  ;;  %v3362_v9 = vmul.u32 14564, %v3359_v12  ;;  %v3366_v51 = vshll.u32 %v6670_v26, 16  ;;  %v3389_v5 = vshrl.u32 %v6596_v16, 16  ;;  %v6695_v49 = vmul.u32 58254, %v3388_v34 }
 0x3a6   : > { %8127 = vst [vmem:[#allocation8_spill] sm:$0xff] %v6680_v32  ;;  %v6698_v14 = vadd.s32 256, %v6554_v25  ;;  %v6701_v42 = vadd.s32 264, %v6554_v25  ;;  %v6704_v10 = vadd.s32 272, %v6554_v25  ;;  %v3417_v31 = vand.u32 65535, %v6599_v48 }
 0x3a7   : > { %8128 = vst [vmem:[#allocation9_spill] sm:$0xff] %v6683_v35  ;;  %v6708_v18 = vadd.s32 280, %v6554_v25  ;;  %v3322_v36 = vshrl.u32 %v3321_v17, 4  ;;  %v3340_v45 = vshrl.u32 %v6601_v8, 16  ;;  %v6711_v52 = vmul.u32 14564, %v3360_v44 }
 0x3a8   : > { %8129 = vst [vmem:[#allocation10_spill] sm:$0xff] %v6686_v57  ;;  %v6714_v62 = vsub.s32 %v6554_v25, %v3265_v33  ;;  %v6717_v59 = vsub.s32 %v6557_v24, %v3294_v22  ;;  %v3349_v56 = vadd.s32 %v3348_v58, %v3338_v37  ;;  %v3365_v12 = vmul.u32 58254, %v3360_v44 }
 0x3a9   : > { %8130 = vst [vmem:[#allocation11_spill] sm:$0xff] %v6689_v27  ;;  %vm3370_vm10 = vc.u32 %v3362_v9, %v3366_v51  ;;  %v3391_v40 = vmul.u32 14564, %v3388_v34  ;;  %v6719_v0 = vmul.u32 14564, %v3389_v5  ;;  %v3395_v13 = vshll.u32 %v6695_v49, 16 }
 0x3aa   : > { %8131 = vst [vmem:[#allocation12_spill] sm:$0xff] %v6698_v14  ;;  %v3418_v8 = vshrl.u32 %v6599_v48, 16  ;;  %v6724_v61 = vmul.u32 58254, %v3417_v31  ;;  %v3446_v25 = vand.u32 65535, %v6605_v21  ;;  %v3323_v3 = vmul.u32 18, %v3322_v36 }
 0x3ab   : > { %8132 = vst [vmem:[#allocation13_spill] sm:$0xff] %v6701_v42  ;;  %v3368_v24 = vshll.u32 %v6711_v52, 16  ;;  %v3475_v44 = vand.u32 65535, %v6608_v15  ;;  %v6730_v34 = vadd.s32 %v3349_v56, %v3340_v45  ;;  %v3371_v33 = vsel %vm3370_vm10, 1, %v8084_v4 }
 0x3ac   : > { %8133 = vst [vmem:[#allocation14_spill] sm:$0xff] %v6704_v10  ;;  %v3372_v22 = vadd.s32 %v3366_v51, %v3362_v9  ;;  %v3504_v37 = vand.u32 65535, %v6614_v55  ;;  %v3397_v58 = vshll.u32 %v6719_v0, 16  ;;  %vm6735_vm11 = vc.u32 %v3391_v40, %v3395_v13 }
 0x3ad   : > { %8134 = vst [vmem:[#allocation15_spill] sm:$0xff] %v6708_v18  ;;  %v3401_v36 = vadd.s32 %v3395_v13, %v3391_v40  ;;  %v6740_v17 = vmul.u32 14564, %v3418_v8  ;;  %v3424_v45 = vshll.u32 %v6724_v61, 16  ;;  %v6743_v56 = vmul.u32 58254, %v3446_v25 }
 0x3ae   : > { %8135 = vst [vmem:[#allocation16_spill] sm:$0xff] %v6714_v62  ;;  %v3420_v62 = vmul.u32 14564, %v3417_v31  ;;  %v6746_v9 = vsub.s32 %v6562_v29, %v3323_v3  ;;  %v3394_v51 = vmul.u32 58254, %v3389_v5  ;;  %v3476_v4 = vshrl.u32 %v6608_v15, 16 }
 0x3af   : > { %8136 = vst [vmem:[#allocation17_spill] sm:$0xff] %v6717_v59  ;;  %v3447_v59 = vshrl.u32 %v6605_v21, 16  ;;  %v6749_v18 = vmul.u32 58254, %v3475_v44  ;;  %v3373_v40 = vadd.s32 %v3371_v33, %v3365_v12  ;;  %v3505_v13 = vshrl.u32 %v6614_v55, 16 }
 0x3b0   : > { %8139 = vst [vmem:[#allocation18_spill] sm:$0xff] %v6746_v9  ;;  %v6753_v31 = vmul.u32 58254, %v3504_v37  ;;  %vm6755_vm12 = vc.u32 %v3372_v22, %v3368_v24  ;;  %v8142_v14 = vmov 0   ;;  %vm6762_vm13 = vc.u32 %v3401_v36, %v3397_v58 }
 0x3b1   : > { %v3400_v29 = vsel %vm6735_vm11, 1, %v8142_v14  ;;  %v3449_v3 = vmul.u32 14564, %v3446_v25  ;;  %v3426_v10 = vshll.u32 %v6740_v17, 16  ;;  %v3430_v12 = vadd.s32 %v3424_v45, %v3420_v62 }
 0x3b2   : > { %v6767_v33 = vmul.u32 14564, %v3447_v59  ;;  %v3453_v9 = vshll.u32 %v6743_v56, 16  ;;  %vm3428_vm14 = vc.u32 %v3420_v62, %v3424_v45  ;;  %v3478_v24 = vmul.u32 14564, %v3475_v44 }
 0x3b3   : > { %v6770_v22 = vmul.u32 14564, %v3476_v4  ;;  %v3482_v27 = vshll.u32 %v6749_v18, 16  ;;  %v3396_v7 = vshrl.u32 %v6695_v49, 16  ;;  %v3507_v58 = vmul.u32 14564, %v3504_v37 }
 0x3b4   : > { %v6774_v36 = vmul.u32 14564, %v3505_v13  ;;  %v3511_v25 = vshll.u32 %v6753_v31, 16  ;;  %v3375_v57 = vsel %vm6755_vm12, 1, %v8142_v14  ;;  %v3402_v35 = vadd.s32 %v3400_v29, %v3394_v51 }
 0x3b5   : > { %v3404_v62 = vsel %vm6762_vm13, 1, %v8142_v14  ;;  %v3423_v44 = vmul.u32 58254, %v3418_v8  ;;  %v3429_v45 = vsel %vm3428_vm14, 1, %v8142_v14  ;;  %vm3432_vm15 = vc.u32 %v3430_v12, %v3426_v10 }
 0x3b6   : > { %v3455_v49 = vshll.u32 %v6767_v33, 16  ;;  %vm3457_vm0 = vc.u32 %v3449_v3, %v3453_v9  ;;  %v3459_v37 = vadd.s32 %v3453_v9, %v3449_v3  ;;  %v3484_v32 = vshll.u32 %v6770_v22, 16 }
 0x3b7   : > { %vm3486_vm1 = vc.u32 %v3478_v24, %v3482_v27  ;;  %v3488_v54 = vadd.s32 %v3482_v27, %v3478_v24  ;;  %v3377_v39 = vadd.s32 %v3375_v57, %v3373_v40  ;;  %v3513_v42 = vshll.u32 %v6774_v36, 16 }
 0x3b8   : > { %vm3515_vm2 = vc.u32 %v3507_v58, %v3511_v25  ;;  %v3517_v51 = vadd.s32 %v3511_v25, %v3507_v58  ;;  %v3406_v29 = vadd.s32 %v3404_v62, %v3402_v35  ;;  %v3431_v5 = vadd.s32 %v3429_v45, %v3423_v44 }
 0x3b9   : > { %v3452_v23 = vmul.u32 58254, %v3447_v59  ;;  %v3481_v8 = vmul.u32 58254, %v3476_v4  ;;  %v3433_v47 = vsel %vm3432_vm15, 1, %v8142_v14  ;;  %v3458_v10 = vsel %vm3457_vm0, 1, %v8142_v14 }
 0x3ba   : > { %v3487_v12 = vsel %vm3486_vm1, 1, %v8142_v14  ;;  %v3510_v9 = vmul.u32 58254, %v3505_v13  ;;  %vm3461_vm3 = vc.u32 %v3459_v37, %v3455_v49  ;;  %vm3490_vm4 = vc.u32 %v3488_v54, %v3484_v32 }
 0x3bb   : > { %v3516_v27 = vsel %vm3515_vm2, 1, %v8142_v14  ;;  %v3533_v57 = vand.u32 65535, %v6617_v20  ;;  %v8145_v40 = vshrl.u32 %v6670_v26, 16  ;;  %v3398_v35 = vshrl.u32 %v6719_v0, 16 }
 0x3bc   : > { %vm3519_vm5 = vc.u32 %v3517_v51, %v3513_v42  ;;  %v3562_v4 = vand.u32 65535, %v6620_v43  ;;  %v3407_v59 = vadd.s32 %v3406_v29, %v3396_v7  ;;  %v3425_v24 = vshrl.u32 %v6724_v61, 16 }
 0x3bd   : > { %v3378_v3 = vadd.s32 %v3377_v39, %v8145_v40  ;;  %v3460_v58 = vadd.s32 %v3458_v10, %v3452_v23  ;;  %v3489_v25 = vadd.s32 %v3487_v12, %v3481_v8  ;;  %v3435_v13 = vadd.s32 %v3433_v47, %v3431_v5 }
 0x3be   : > { %v3462_v54 = vsel %vm3461_vm3, 1, %v8142_v14  ;;  %v3491_v32 = vsel %vm3490_vm4, 1, %v8142_v14  ;;  %v3518_v62 = vadd.s32 %v3516_v27, %v3510_v9  ;;  %v3520_v44 = vsel %vm3519_vm5, 1, %v8142_v14 }
 0x3bf   : > { %v3534_v26 = vshrl.u32 %v6617_v20, 16  ;;  %v6801_v39 = vmul.u32 58254, %v3533_v57  ;;  %v3563_v0 = vshrl.u32 %v6620_v43, 16  ;;  %v8146_v7 = vshrl.u32 %v6730_v34, 4 }
 0x3c0   : > { %v8147_v23 = vshrl.u32 %v6711_v52, 16  ;;  %v3427_v47 = vshrl.u32 %v6740_v17, 16  ;;  %v6809_v49 = vmul.u32 58254, %v3562_v4  ;;  %v3454_v37 = vshrl.u32 %v6743_v56, 16 }
 0x3c1   : > { %v3352_v45 = vmul.u32 18, %v8146_v7  ;;  %v3464_v42 = vadd.s32 %v3462_v54, %v3460_v58  ;;  %v3483_v51 = vshrl.u32 %v6749_v18, 16  ;;  %v3493_v29 = vadd.s32 %v3491_v32, %v3489_v25 }
 0x3c2   : > { %v3379_v61 = vadd.s32 %v3378_v3, %v8147_v23  ;;  %v3408_v5 = vadd.s32 %v3407_v59, %v3398_v35  ;;  %v3436_v8 = vadd.s32 %v3435_v13, %v3425_v24  ;;  %v3512_v10 = vshrl.u32 %v6753_v31, 16 }
 0x3c3   : > { %v3522_v12 = vadd.s32 %v3520_v44, %v3518_v62  ;;  %v3536_v34 = vmul.u32 14564, %v3533_v57  ;;  %v6814_v9 = vmul.u32 14564, %v3534_v26  ;;  %v3540_v52 = vshll.u32 %v6801_v39, 16 }
 0x3c4   : > { %v6817_v27 = vmul.u32 14564, %v3563_v0  ;;  %v3380_v17 = vshrl.u32 %v3379_v61, 4  ;;  %v3565_v40 = vmul.u32 14564, %v3562_v4  ;;  %v3569_v56 = vshll.u32 %v6809_v49, 16 }
 0x3c5   : > { %v3591_v3 = vand.u32 65535, %v6623_v53  ;;  %v3456_v18 = vshrl.u32 %v6767_v33, 16  ;;  %v3465_v35 = vadd.s32 %v3464_v42, %v3454_v37  ;;  %v3485_v59 = vshrl.u32 %v6770_v22, 16 }
 0x3c6   : > { %v3494_v31 = vadd.s32 %v3493_v29, %v3483_v51  ;;  %v3409_v24 = vshrl.u32 %v3408_v5, 4  ;;  %v3437_v57 = vadd.s32 %v3436_v8, %v3427_v47  ;;  %v3514_v58 = vshrl.u32 %v6774_v36, 16 }
 0x3c7   : > { %v3523_v25 = vadd.s32 %v3522_v12, %v3512_v10  ;;  %v3542_v13 = vshll.u32 %v6814_v9, 16  ;;  %vm3544_vm6 = vc.u32 %v3536_v34, %v3540_v52  ;;  %v3546_v54 = vadd.s32 %v3540_v52, %v3536_v34 }
 0x3c8   : > { %v3571_v4 = vshll.u32 %v6817_v27, 16  ;;  %vm3573_vm7 = vc.u32 %v3565_v40, %v3569_v56  ;;  %v3575_v32 = vadd.s32 %v3569_v56, %v3565_v40  ;;  %v3592_v62 = vshrl.u32 %v6623_v53, 16 }
 0x3c9   : > { %v6827_v33 = vmul.u32 58254, %v3591_v3  ;;  %v3381_v44 = vmul.u32 18, %v3380_v17  ;;  %v3466_v22 = vadd.s32 %v3465_v35, %v3456_v18  ;;  %v3495_v7 = vadd.s32 %v3494_v31, %v3485_v59 }
 0x3ca   : > { %v3539_v23 = vmul.u32 58254, %v3534_v26  ;;  %v3410_v61 = vmul.u32 18, %v3409_v24  ;;  %v3524_v47 = vadd.s32 %v3523_v25, %v3514_v58  ;;  %v3545_v36 = vsel %vm3544_vm6, 1, %v8142_v14 }
 0x3cb   : > { %v3568_v37 = vmul.u32 58254, %v3563_v0  ;;  %v3438_v42 = vshrl.u32 %v3437_v57, 4  ;;  %vm3548_vm8 = vc.u32 %v3546_v54, %v3542_v13  ;;  %v3574_v51 = vsel %vm3573_vm7, 1, %v8142_v14 }
 0x3cc   : > { %v3620_v29 = vand.u32 65535, %v6626_v60  ;;  %vm3577_vm9 = vc.u32 %v3575_v32, %v3571_v4  ;;  %v3594_v5 = vmul.u32 14564, %v3591_v3  ;;  %v6832_v8 = vmul.u32 14564, %v3592_v62 }
 0x3cd   : > { %v3598_v10 = vshll.u32 %v6827_v33, 16  ;;  %v6836_v12 = vsub.s32 %v6576_v28, %v3352_v45  ;;  %v3467_v26 = vshrl.u32 %v3466_v22, 4  ;;  %v3496_v34 = vshrl.u32 %v3495_v7, 4 }
 0x3ce   : > { %v3547_v52 = vadd.s32 %v3545_v36, %v3539_v23  ;;  %v6839_v0 = vsub.s32 %v6593_v50, %v3381_v44  ;;  %v3525_v17 = vshrl.u32 %v3524_v47, 4  ;;  %v3549_v40 = vsel %vm3548_vm8, 1, %v8142_v14 }
 0x3cf   : > { %v3576_v56 = vadd.s32 %v3574_v51, %v3568_v37  ;;  %v6843_v18 = vsub.s32 %v6596_v16, %v3410_v61  ;;  %v3578_v3 = vsel %vm3577_vm9, 1, %v8142_v14  ;;  %v3621_v35 = vshrl.u32 %v6626_v60, 16 }
 0x3d0   : > { %8148 = vst [vmem:[#allocation19_spill] sm:$0xff] %v6839_v0  ;;  %v6847_v59 = vmul.u32 58254, %v3620_v29  ;;  %v3439_v28 = vmul.u32 18, %v3438_v42  ;;  %v3600_v45 = vshll.u32 %v6832_v8, 16  ;;  %vm3602_vm10 = vc.u32 %v3594_v5, %v3598_v10 }
 0x3d1   : > { %8149 = vst [vmem:[#allocation20_spill] sm:$0xff] %v6843_v18  ;;  %v3604_v31 = vadd.s32 %v3598_v10, %v3594_v5  ;;  %v3468_v50 = vmul.u32 18, %v3467_v26  ;;  %v3497_v24 = vmul.u32 18, %v3496_v34  ;;  %v3541_v57 = vshrl.u32 %v6801_v39, 16 }
 0x3d2   : > { %v3551_v58 = vadd.s32 %v3549_v40, %v3547_v52  ;;  %v3526_v25 = vmul.u32 18, %v3525_v17  ;;  %v3570_v16 = vshrl.u32 %v6809_v49, 16  ;;  %v3580_v13 = vadd.s32 %v3578_v3, %v3576_v56 }
 0x3d3   : > { %v3597_v54 = vmul.u32 58254, %v3592_v62  ;;  %v3603_v4 = vsel %vm3602_vm10, 1, %v8142_v14  ;;  %v3623_v32 = vmul.u32 14564, %v3620_v29  ;;  %v6853_v44 = vmul.u32 14564, %v3621_v35 }
 0x3d4   : > { %v3627_v22 = vshll.u32 %v6847_v59, 16  ;;  %v6857_v7 = vsub.s32 %v6599_v48, %v3439_v28  ;;  %vm3606_vm11 = vc.u32 %v3604_v31, %v3600_v45  ;;  %v3649_v23 = vand.u32 65535, %v6630_v6 }
 0x3d5   : > { %v3678_v39 = vand.u32 65535, %v6633_v38  ;;  %v6862_v61 = vsub.s32 %v6605_v21, %v3468_v50  ;;  %v6865_v49 = vsub.s32 %v6608_v15, %v3497_v24  ;;  %v3543_v62 = vshrl.u32 %v6814_v9, 16 }
 0x3d6   : > { %8150 = vst [vmem:[#allocation21_spill] sm:$0xff] %v6857_v7  ;;  %v3552_v47 = vadd.s32 %v3551_v58, %v3541_v57  ;;  %v6869_v36 = vsub.s32 %v6614_v55, %v3526_v25  ;;  %v3572_v48 = vshrl.u32 %v6817_v27, 16  ;;  %v3581_v37 = vadd.s32 %v3580_v13, %v3570_v16  ;;  %v8197_v7 = vld [vmem:[#allocation15_spill] sm:$0xff] }
 0x3d7   : > { %8151 = vst [vmem:[#allocation22_spill] sm:$0xff] %v6862_v61  ;;  %v3605_v42 = vadd.s32 %v3603_v4, %v3597_v54  ;;  %v3607_v51 = vsel %vm3606_vm11, 1, %v8142_v14  ;;  %v3629_v29 = vshll.u32 %v6853_v44, 16  ;;  %v3633_v5 = vadd.s32 %v3627_v22, %v3623_v32 }
 0x3d8   : > { %8152 = vst [vmem:[#allocation23_spill] sm:$0xff] %v6865_v49  ;;  %v3650_v21 = vshrl.u32 %v6630_v6, 16  ;;  %vm3631_vm12 = vc.u32 %v3623_v32, %v3627_v22  ;;  %v6875_v15 = vmul.u32 58254, %v3649_v23  ;;  %v3679_v9 = vshrl.u32 %v6633_v38, 16 }
 0x3d9   : > { %8153 = vst [vmem:[#allocation24_spill] sm:$0xff] %v6869_v36  ;;  %v6878_v10 = vmul.u32 58254, %v3678_v39  ;;  %v6880_v55 = vadd.s32 %v3552_v47, %v3543_v62  ;;  %v3599_v27 = vshrl.u32 %v6827_v33, 16  ;;  %v3601_v26 = vshrl.u32 %v6832_v8, 16 }
 0x3da   : > { %v3707_v34 = vand.u32 65535, %v6637_v41  ;;  %v6885_v52 = vadd.s32 %v3581_v37, %v3572_v48  ;;  %v3609_v17 = vadd.s32 %v3607_v51, %v3605_v42  ;;  %v3626_v40 = vmul.u32 58254, %v3621_v35 }
 0x3db   : > { %v3736_v56 = vand.u32 65535, %v6640_v11  ;;  %v3632_v3 = vsel %vm3631_vm12, 1, %v8142_v14  ;;  %vm6889_vm13 = vc.u32 %v3633_v5, %v3629_v29  ;;  %v3652_v45 = vmul.u32 14564, %v3649_v23 }
 0x3dc   : > { %v6893_v31 = vmul.u32 14564, %v3650_v21  ;;  %v3656_v33 = vshll.u32 %v6875_v15, 16  ;;  %v3681_v8 = vmul.u32 14564, %v3678_v39  ;;  %v6896_v50 = vmul.u32 14564, %v3679_v9 }
 0x3dd   : > { %v3685_v24 = vshll.u32 %v6878_v10, 16  ;;  %v3554_v35 = vshrl.u32 %v6880_v55, 4  ;;  %v3628_v57 = vshrl.u32 %v6847_v59, 16  ;;  %v3708_v58 = vshrl.u32 %v6637_v41, 16 }
 0x3de   : > { %v6902_v25 = vmul.u32 58254, %v3707_v34  ;;  %v3583_v16 = vshrl.u32 %v6885_v52, 4  ;;  %v3630_v13 = vshrl.u32 %v6853_v44, 16  ;;  %v3737_v54 = vshrl.u32 %v6640_v11, 16 }
 0x3df   : > { %v6907_v4 = vmul.u32 58254, %v3736_v56  ;;  %v3610_v32 = vadd.s32 %v3609_v17, %v3599_v27  ;;  %v3634_v22 = vadd.s32 %v3632_v3, %v3626_v40  ;;  %v3636_v23 = vsel %vm6889_vm13, 1, %v8142_v14 }
 0x3e0   : > { %v3658_v59 = vshll.u32 %v6893_v31, 16  ;;  %vm6913_vm14 = vc.u32 %v3652_v45, %v3656_v33  ;;  %v3662_v62 = vadd.s32 %v3656_v33, %v3652_v45  ;;  %v3687_v47 = vshll.u32 %v6896_v50, 16 }
 0x3e1   : > { %v3691_v44 = vadd.s32 %v3685_v24, %v3681_v8  ;;  %vm3689_vm15 = vc.u32 %v3681_v8, %v3685_v24  ;;  %v3710_v48 = vmul.u32 14564, %v3707_v34  ;;  %v6918_v37 = vmul.u32 14564, %v3708_v58 }
 0x3e2   : > { %v3714_v42 = vshll.u32 %v6902_v25, 16  ;;  %v3739_v51 = vmul.u32 14564, %v3736_v56  ;;  %v6921_v29 = vmul.u32 14564, %v3737_v54  ;;  %v3743_v5 = vshll.u32 %v6907_v4, 16 }
 0x3e3   : > { %v3765_v27 = vand.u32 65535, %v6643_v2  ;;  %v3611_v17 = vadd.s32 %v3610_v32, %v3601_v26  ;;  %v3638_v40 = vadd.s32 %v3636_v23, %v3634_v22  ;;  %v3655_v3 = vmul.u32 58254, %v3650_v21 }
 0x3e4   : > { %v3684_v28 = vmul.u32 58254, %v3679_v9  ;;  %v3661_v45 = vsel %vm6913_vm14, 1, %v8142_v14  ;;  %vm3664_vm0 = vc.u32 %v3662_v62, %v3658_v59  ;;  %v3690_v34 = vsel %vm3689_vm15, 1, %v8142_v14 }
 0x3e5   : > { %vm3693_vm1 = vc.u32 %v3691_v44, %v3687_v47  ;;  %v3716_v56 = vshll.u32 %v6918_v37, 16  ;;  %vm3718_vm2 = vc.u32 %v3710_v48, %v3714_v42  ;;  %v3720_v33 = vadd.s32 %v3714_v42, %v3710_v48 }
 0x3e6   : > { %v3766_v8 = vshrl.u32 %v6643_v2, 16  ;;  %v3745_v24 = vshll.u32 %v6921_v29, 16  ;;  %vm3747_vm3 = vc.u32 %v3739_v51, %v3743_v5  ;;  %v3749_v26 = vadd.s32 %v3743_v5, %v3739_v51 }
 0x3e7   : > { %v6932_v21 = vmul.u32 58254, %v3765_v27  ;;  %v3657_v9 = vshrl.u32 %v6875_v15, 16  ;;  %v3663_v32 = vadd.s32 %v3661_v45, %v3655_v3  ;;  %v3692_v22 = vadd.s32 %v3690_v34, %v3684_v28 }
 0x3e8   : > { %v3713_v23 = vmul.u32 58254, %v3708_v58  ;;  %v3665_v59 = vsel %vm3664_vm0, 1, %v8142_v14  ;;  %v3694_v39 = vsel %vm3693_vm1, 1, %v8142_v14  ;;  %v3719_v62 = vsel %vm3718_vm2, 1, %v8142_v14 }
 0x3e9   : > { %v3742_v47 = vmul.u32 58254, %v3737_v54  ;;  %v3639_v44 = vadd.s32 %v3638_v40, %v3628_v57  ;;  %vm3722_vm4 = vc.u32 %v3720_v33, %v3716_v56  ;;  %v3748_v48 = vsel %vm3747_vm3, 1, %v8142_v14 }
 0x3ea   : > { %v6939_v42 = vmul.u32 14564, %v3766_v8  ;;  %vm3751_vm5 = vc.u32 %v3749_v26, %v3745_v24  ;;  %v3768_v51 = vmul.u32 14564, %v3765_v27  ;;  %v3772_v15 = vshll.u32 %v6932_v21, 16 }
 0x3eb   : > { %v3794_v5 = vand.u32 65535, %v6648_v1  ;;  %v3667_v58 = vadd.s32 %v3665_v59, %v3663_v32  ;;  %v3686_v3 = vshrl.u32 %v6878_v10, 16  ;;  %v3696_v28 = vadd.s32 %v3694_v39, %v3692_v22 }
 0x3ec   : > { %v3721_v45 = vadd.s32 %v3719_v62, %v3713_v23  ;;  %v3612_v34 = vshrl.u32 %v3611_v17, 4  ;;  %v3659_v54 = vshrl.u32 %v6893_v31, 16  ;;  %v3723_v57 = vsel %vm3722_vm4, 1, %v8142_v14 }
 0x3ed   : > { %v3750_v40 = vadd.s32 %v3748_v48, %v3742_v47  ;;  %v3640_v56 = vadd.s32 %v3639_v44, %v3630_v13  ;;  %v3688_v33 = vshrl.u32 %v6896_v50, 16  ;;  %v3752_v27 = vsel %vm3751_vm5, 1, %v8142_v14 }
 0x3ee   : > { %v3774_v24 = vshll.u32 %v6939_v42, 16  ;;  %vm3776_vm6 = vc.u32 %v3768_v51, %v3772_v15  ;;  %v3778_v26 = vadd.s32 %v3772_v15, %v3768_v51  ;;  %v3795_v32 = vshrl.u32 %v6648_v1, 16 }
 0x3ef   : > { %v6950_v10 = vmul.u32 58254, %v3794_v5  ;;  %v3668_v22 = vadd.s32 %v3667_v58, %v3657_v9  ;;  %v3697_v17 = vadd.s32 %v3696_v28, %v3686_v3  ;;  %v3715_v31 = vshrl.u32 %v6902_v25, 16 }
 0x3f0   : > { %v3725_v23 = vadd.s32 %v3723_v57, %v3721_v45  ;;  %v3555_v13 = vmul.u32 18, %v3554_v35  ;;  %v3744_v50 = vshrl.u32 %v6907_v4, 16  ;;  %v3754_v59 = vadd.s32 %v3752_v27, %v3750_v40 }
 0x3f1   : > { %v3771_v39 = vmul.u32 58254, %v3766_v8  ;;  %v3584_v62 = vmul.u32 18, %v3583_v16  ;;  %v3613_v47 = vmul.u32 18, %v3612_v34  ;;  %v3641_v44 = vshrl.u32 %v3640_v56, 4 }
 0x3f2   : > { %v3777_v48 = vsel %vm3776_vm6, 1, %v8142_v14  ;;  %vm3780_vm7 = vc.u32 %v3778_v26, %v3774_v24  ;;  %v3797_v9 = vmul.u32 14564, %v3794_v5  ;;  %v6959_v51 = vmul.u32 14564, %v3795_v32 }
 0x3f3   : > { %v3801_v25 = vshll.u32 %v6950_v10, 16  ;;  %v3669_v15 = vadd.s32 %v3668_v22, %v3659_v54  ;;  %v3698_v55 = vadd.s32 %v3697_v17, %v3688_v33  ;;  %v3717_v35 = vshrl.u32 %v6918_v37, 16 }
 0x3f4   : > { %v3726_v4 = vadd.s32 %v3725_v23, %v3715_v31  ;;  %v6964_v8 = vsub.s32 %v6617_v20, %v3555_v13  ;;  %v3746_v52 = vshrl.u32 %v6921_v29, 16  ;;  %v3755_v16 = vadd.s32 %v3754_v59, %v3744_v50 }
 0x3f5   : > { %v3779_v58 = vadd.s32 %v3777_v48, %v3771_v39  ;;  %v6968_v3 = vsub.s32 %v6620_v43, %v3584_v62  ;;  %v3642_v5 = vmul.u32 18, %v3641_v44  ;;  %v3781_v28 = vsel %vm3780_vm7, 1, %v8142_v14 }
 0x3f6   : > { %8158 = vst [vmem:[#allocation25_spill] sm:$0xff] %v6964_v8  ;;  %v3823_v45 = vand.u32 65535, %v6651_v19  ;;  %v3803_v34 = vshll.u32 %v6959_v51, 16  ;;  %vm3805_vm8 = vc.u32 %v3797_v9, %v3801_v25  ;;  %v3807_v37 = vadd.s32 %v3801_v25, %v3797_v9 }
 0x3f7   : > { %8159 = vst [vmem:[#allocation26_spill] sm:$0xff] %v6968_v3  ;;  %v3852_v54 = vand.u32 65535, %v6654_v63  ;;  %v6975_v20 = vsub.s32 %v6623_v53, %v3613_v47  ;;  %v3670_v29 = vshrl.u32 %v3669_v15, 4  ;;  %v3699_v57 = vshrl.u32 %v3698_v55, 4 }
 0x3f8   : > { %v3727_v40 = vadd.s32 %v3726_v4, %v3717_v35  ;;  %v3756_v56 = vadd.s32 %v3755_v16, %v3746_v52  ;;  %v3773_v43 = vshrl.u32 %v6932_v21, 16  ;;  %v3783_v33 = vadd.s32 %v3781_v28, %v3779_v58 }
 0x3f9   : > { %8160 = vst [vmem:[#allocation27_spill] sm:$0xff] %v6975_v20  ;;  %v3800_v27 = vmul.u32 58254, %v3795_v32  ;;  %v3806_v24 = vsel %vm3805_vm8, 1, %v8142_v14  ;;  %v3824_v26 = vshrl.u32 %v6651_v19, 16  ;;  %v6980_v22 = vmul.u32 58254, %v3823_v45 }
 0x3fa   : > { %v3853_v17 = vshrl.u32 %v6654_v63, 16  ;;  %v6984_v31 = vsub.s32 %v6626_v60, %v3642_v5  ;;  %vm3809_vm9 = vc.u32 %v3807_v37, %v3803_v34  ;;  %v6986_v53 = vmul.u32 58254, %v3852_v54 }
 0x3fb   : > { %v3881_v23 = vand.u32 65535, %v6657_v46  ;;  %v3671_v13 = vmul.u32 18, %v3670_v29  ;;  %v3700_v21 = vmul.u32 18, %v3699_v57  ;;  %v3728_v50 = vshrl.u32 %v3727_v40, 4 }
 0x3fc   : > { %8161 = vst [vmem:[#allocation28_spill] sm:$0xff] %v6984_v31  ;;  %v3775_v32 = vshrl.u32 %v6939_v42, 16  ;;  %v3757_v59 = vshrl.u32 %v3756_v56, 4  ;;  %v3784_v39 = vadd.s32 %v3783_v33, %v3773_v43  ;;  %v3808_v62 = vadd.s32 %v3806_v24, %v3800_v27 }
 0x3fd   : > { %v3826_v47 = vmul.u32 14564, %v3823_v45  ;;  %v3810_v44 = vsel %vm3809_vm9, 1, %v8142_v14  ;;  %v6991_v48 = vmul.u32 14564, %v3824_v26  ;;  %v3830_v60 = vshll.u32 %v6980_v22, 16 }
 0x3fe   : > { %v6994_v9 = vmul.u32 14564, %v3853_v17  ;;  %v3855_v25 = vmul.u32 14564, %v3852_v54  ;;  %v3859_v15 = vshll.u32 %v6986_v53, 16  ;;  %v3882_v55 = vshrl.u32 %v6657_v46, 16 }
 0x3ff   : > { %v6998_v35 = vmul.u32 58254, %v3881_v23  ;;  %v7001_v42 = vsub.s32 %v6630_v6, %v3671_v13  ;;  %v7004_v4 = vsub.s32 %v6633_v38, %v3700_v21  ;;  %v3729_v52 = vmul.u32 18, %v3728_v50 }
 0x400   : > { %v3910_v16 = vand.u32 65535, %v6660_v30  ;;  %v3758_v58 = vmul.u32 18, %v3757_v59  ;;  %v3785_v5 = vadd.s32 %v3784_v39, %v3775_v32  ;;  %v3802_v28 = vshrl.u32 %v6950_v10, 16 }
 0x401   : > { %8162 = vst [vmem:[#allocation29_spill] sm:$0xff] %v7001_v42  ;;  %v3812_v45 = vadd.s32 %v3810_v44, %v3808_v62  ;;  %v3832_v34 = vshll.u32 %v6991_v48, 16  ;;  %vm7009_vm10 = vc.u32 %v3826_v47, %v3830_v60  ;;  %v3836_v54 = vadd.s32 %v3830_v60, %v3826_v47  ;;  %v8174_v60 = vld [vmem:[#allocation4_spill] sm:$0xff] }
 0x402   : > { %8163 = vst [vmem:[#allocation30_spill] sm:$0xff] %v7004_v4  ;;  %v3861_v6 = vshll.u32 %v6994_v9, 16  ;;  %v3865_v29 = vadd.s32 %v3859_v15, %v3855_v25  ;;  %v3884_v38 = vmul.u32 14564, %v3881_v23  ;;  %v7014_v57 = vmul.u32 14564, %v3882_v55 }
 0x403   : > { %v3888_v40 = vshll.u32 %v6998_v35, 16  ;;  %v7018_v56 = vsub.s32 %v6637_v41, %v3729_v52  ;;  %vm3863_vm11 = vc.u32 %v3855_v25, %v3859_v15  ;;  %v3911_v10 = vshrl.u32 %v6660_v30, 16  ;;  %v8175_v15 = vld [vmem:[#allocation5_spill] sm:$0xff] }
 0x404   : > { %v7021_v43 = vmul.u32 58254, %v3910_v16  ;;  %v7024_v33 = vsub.s32 %v6640_v11, %v3758_v58  ;;  %v3786_v27 = vshrl.u32 %v3785_v5, 4  ;;  %v3804_v24 = vshrl.u32 %v6959_v51, 16 }
 0x405   : > { %8166 = vst [vmem:[#allocation31_spill] sm:$0xff] %v7018_v56  ;;  %v3829_v13 = vmul.u32 58254, %v3824_v26  ;;  %v3813_v23 = vadd.s32 %v3812_v45, %v3802_v28  ;;  %v3835_v21 = vsel %vm7009_vm10, 1, %v8142_v14  ;;  %vm7030_vm12 = vc.u32 %v3836_v54, %v3832_v34 }
 0x406   : > { %8167 = vst [vmem:[#allocation32_spill] sm:$0xff] %v7024_v33  ;;  %v3858_v50 = vmul.u32 58254, %v3853_v17  ;;  %v3864_v32 = vsel %vm3863_vm11, 1, %v8142_v14  ;;  %vm7035_vm13 = vc.u32 %v3865_v29, %v3861_v6  ;;  %v3890_v11 = vshll.u32 %v7014_v57, 16 }
 0x407   : > { %vm7040_vm14 = vc.u32 %v3884_v38, %v3888_v40  ;;  %v3894_v26 = vadd.s32 %v3888_v40, %v3884_v38  ;;  %v3913_v39 = vmul.u32 14564, %v3910_v16  ;;  %v7044_v62 = vmul.u32 14564, %v3911_v10 }
 0x408   : > { %v3917_v47 = vshll.u32 %v7021_v43, 16  ;;  %v3831_v17 = vshrl.u32 %v6980_v22, 16  ;;  %v3833_v44 = vshrl.u32 %v6991_v48, 16  ;;  %v3939_v25 = vand.u32 65535, %v8174_v60 }
 0x409   : > { %v3968_v52 = vand.u32 65535, %v8175_v15  ;;  %v7051_v58 = vmul.u32 18, %v3786_v27  ;;  %v3814_v5 = vadd.s32 %v3813_v23, %v3804_v24  ;;  %v3837_v28 = vadd.s32 %v3835_v21, %v3829_v13  ;;  %v8176_v13 = vld [vmem:[#allocation6_spill] sm:$0xff] }
 0x40a   : > { %v3839_v16 = vsel %vm7030_vm12, 1, %v8142_v14  ;;  %v3866_v45 = vadd.s32 %v3864_v32, %v3858_v50  ;;  %v3868_v34 = vsel %vm7035_vm13, 1, %v8142_v14  ;;  %v3887_v22 = vmul.u32 58254, %v3882_v55 }
 0x40b   : > { %v3893_v48 = vsel %vm7040_vm14, 1, %v8142_v14  ;;  %vm3896_vm15 = vc.u32 %v3894_v26, %v3890_v11  ;;  %v3919_v37 = vshll.u32 %v7044_v62, 16  ;;  %v3923_v54 = vadd.s32 %v3917_v47, %v3913_v39 }
 0x40c   : > { %v3940_v6 = vshrl.u32 %v8174_v60, 16  ;;  %vm3921_vm0 = vc.u32 %v3913_v39, %v3917_v47  ;;  %v7064_v29 = vmul.u32 58254, %v3939_v25  ;;  %v3969_v38 = vshrl.u32 %v8175_v15, 16 }
 0x40d   : > { %v7067_v40 = vmul.u32 58254, %v3968_v52  ;;  %v3815_v27 = vshrl.u32 %v3814_v5, 4  ;;  %v3841_v24 = vadd.s32 %v3839_v16, %v3837_v28  ;;  %v3860_v55 = vshrl.u32 %v6986_v53, 16 }
 0x40e   : > { %v3997_v23 = vand.u32 65535, %v8176_v13  ;;  %v3870_v21 = vadd.s32 %v3868_v34, %v3866_v45  ;;  %v3895_v41 = vadd.s32 %v3893_v48, %v3887_v22  ;;  %v3897_v50 = vsel %vm3896_vm15, 1, %v8142_v14  ;;  %v8179_v48 = vld [vmem:[#allocation7_spill] sm:$0xff] }
 0x40f   : > { %v3916_v32 = vmul.u32 58254, %v3911_v10  ;;  %v3922_v59 = vsel %vm3921_vm0, 1, %v8142_v14  ;;  %vm7073_vm1 = vc.u32 %v3923_v54, %v3919_v37  ;;  %v3942_v51 = vmul.u32 14564, %v3939_v25 }
 0x410   : > { %v7077_v26 = vmul.u32 14564, %v3940_v6  ;;  %v3946_v39 = vshll.u32 %v7064_v29, 16  ;;  %v3971_v47 = vmul.u32 14564, %v3968_v52  ;;  %v7080_v53 = vmul.u32 14564, %v3969_v38 }
 0x411   : > { %v3975_v5 = vshll.u32 %v7067_v40, 16  ;;  %v7083_v28 = vmul.u32 18, %v3815_v27  ;;  %v3862_v10 = vshrl.u32 %v6994_v9, 16  ;;  %v3998_v16 = vshrl.u32 %v8176_v13, 16 }
 0x412   : > { %v7087_v45 = vmul.u32 58254, %v3997_v23  ;;  %v3842_v34 = vadd.s32 %v3841_v24, %v3831_v17  ;;  %v3871_v22 = vadd.s32 %v3870_v21, %v3860_v55  ;;  %v3889_v25 = vshrl.u32 %v6998_v35, 16 }
 0x413   : > { %v4026_v37 = vand.u32 65535, %v8179_v48  ;;  %v3899_v54 = vadd.s32 %v3897_v50, %v3895_v41  ;;  %v3924_v52 = vadd.s32 %v3922_v59, %v3916_v32  ;;  %v3926_v33 = vsel %vm7073_vm1, 1, %v8142_v14 }
 0x414   : > { %v3948_v27 = vshll.u32 %v7077_v26, 16  ;;  %vm7095_vm2 = vc.u32 %v3942_v51, %v3946_v39  ;;  %v3952_v56 = vadd.s32 %v3946_v39, %v3942_v51  ;;  %v3977_v17 = vshll.u32 %v7080_v53, 16 }
 0x415   : > { %vm7100_vm3 = vc.u32 %v3971_v47, %v3975_v5  ;;  %v3981_v35 = vadd.s32 %v3975_v5, %v3971_v47  ;;  %v4000_v55 = vmul.u32 14564, %v3997_v23  ;;  %v7104_v21 = vmul.u32 14564, %v3998_v16 }
 0x416   : > { %v4004_v41 = vshll.u32 %v7087_v45, 16  ;;  %v3843_v50 = vadd.s32 %v3842_v34, %v3833_v44  ;;  %v3891_v32 = vshrl.u32 %v7014_v57, 16  ;;  %v4027_v59 = vshrl.u32 %v8179_v48, 16 }
 0x417   : > { %v7109_v11 = vmul.u32 58254, %v4026_v37  ;;  %v3872_v51 = vadd.s32 %v3871_v22, %v3862_v10  ;;  %v3918_v39 = vshrl.u32 %v7021_v43, 16  ;;  %v3945_v4 = vmul.u32 58254, %v3940_v6 }
 0x418   : > { %v3974_v42 = vmul.u32 58254, %v3969_v38  ;;  %v3900_v31 = vadd.s32 %v3899_v54, %v3889_v25  ;;  %v3928_v20 = vadd.s32 %v3926_v33, %v3924_v52  ;;  %v3951_v23 = vsel %vm7095_vm2, 1, %v8142_v14 }
 0x419   : > { %v3980_v44 = vsel %vm7100_vm3, 1, %v8142_v14  ;;  %vm3954_vm4 = vc.u32 %v3952_v56, %v3948_v27  ;;  %vm3983_vm5 = vc.u32 %v3981_v35, %v3977_v17  ;;  %v4006_v57 = vshll.u32 %v7104_v21, 16 }
 0x41a   : > { %vm4008_vm6 = vc.u32 %v4000_v55, %v4004_v41  ;;  %v4010_v47 = vadd.s32 %v4004_v41, %v4000_v55  ;;  %v4029_v5 = vmul.u32 14564, %v4026_v37  ;;  %v7119_v43 = vmul.u32 14564, %v4027_v59  ;;  %v8184_v37 = vld [vmem:[#allocation8_spill] sm:$0xff] }
 0x41b   : > { %v4033_v6 = vshll.u32 %v7109_v11, 16  ;;  %v3844_v33 = vshrl.u32 %v3843_v50, 4  ;;  %v3920_v38 = vshrl.u32 %v7044_v62, 16  ;;  %v3953_v10 = vadd.s32 %v3951_v23, %v3945_v4 }
 0x41c   : > { %v3982_v34 = vadd.s32 %v3980_v44, %v3974_v42  ;;  %v3929_v22 = vadd.s32 %v3928_v20, %v3918_v39  ;;  %v3955_v25 = vsel %vm3954_vm4, 1, %v8142_v14  ;;  %v3984_v56 = vsel %vm3983_vm5, 1, %v8142_v14 }
 0x41d   : > { %v4003_v54 = vmul.u32 58254, %v3998_v16  ;;  %v3873_v52 = vshrl.u32 %v3872_v51, 4  ;;  %v3901_v27 = vadd.s32 %v3900_v31, %v3891_v32  ;;  %v4009_v9 = vsel %vm4008_vm6, 1, %v8142_v14 }
 0x41e   : > { %v4055_v17 = vand.u32 65535, %v8184_v37  ;;  %vm4012_vm7 = vc.u32 %v4010_v47, %v4006_v57  ;;  %v4035_v24 = vshll.u32 %v7119_v43, 16  ;;  %vm4037_vm8 = vc.u32 %v4029_v5, %v4033_v6 }
 0x41f   : > { %v4039_v35 = vadd.s32 %v4033_v6, %v4029_v5  ;;  %v3947_v4 = vshrl.u32 %v7064_v29, 16  ;;  %v3957_v42 = vadd.s32 %v3955_v25, %v3953_v10  ;;  %v3976_v20 = vshrl.u32 %v7067_v40, 16  ;;  %v8185_v29 = vld [vmem:[#allocation9_spill] sm:$0xff] }
 0x420   : > { %v3986_v62 = vadd.s32 %v3984_v56, %v3982_v34  ;;  %v3845_v55 = vmul.u32 18, %v3844_v33  ;;  %v3930_v41 = vadd.s32 %v3929_v22, %v3920_v38  ;;  %v4011_v16 = vadd.s32 %v4009_v9, %v4003_v54 }
 0x421   : > { %v4032_v50 = vmul.u32 58254, %v4027_v59  ;;  %v4013_v31 = vsel %vm4012_vm7, 1, %v8142_v14  ;;  %v4038_v32 = vsel %vm4037_vm8, 1, %v8142_v14  ;;  %v4056_v51 = vshrl.u32 %v8184_v37, 16 }
 0x422   : > { %v7133_v39 = vmul.u32 58254, %v4055_v17  ;;  %v3874_v23 = vmul.u32 18, %v3873_v52  ;;  %v3902_v44 = vshrl.u32 %v3901_v27, 4  ;;  %vm4041_vm9 = vc.u32 %v4039_v35, %v4035_v24 }
 0x423   : > { %v4084_v57 = vand.u32 65535, %v8185_v29  ;;  %v3949_v40 = vshrl.u32 %v7077_v26, 16  ;;  %v3958_v47 = vadd.s32 %v3957_v42, %v3947_v4  ;;  %v3978_v5 = vshrl.u32 %v7080_v53, 16 }
 0x424   : > { %v3987_v6 = vadd.s32 %v3986_v62, %v3976_v20  ;;  %v3931_v59 = vshrl.u32 %v3930_v41, 4  ;;  %v4005_v33 = vshrl.u32 %v7087_v45, 16  ;;  %v4015_v38 = vadd.s32 %v4013_v31, %v4011_v16  ;;  %v8191_v31 = vld [vmem:[#allocation11_spill] sm:$0xff] }
 0x425   : > { %v4040_v10 = vadd.s32 %v4038_v32, %v4032_v50  ;;  %v4042_v34 = vsel %vm4041_vm9, 1, %v8142_v14  ;;  %v4058_v22 = vmul.u32 14564, %v4055_v17  ;;  %v7140_v25 = vmul.u32 14564, %v4056_v51 }
 0x426   : > { %v4062_v56 = vshll.u32 %v7133_v39, 16  ;;  %v7145_v54 = vsub.s32 %v6643_v2, %v7051_v58  ;;  %v7149_v26 = vsub.s32 %v6648_v1, %v7083_v28  ;;  %v4085_v53 = vshrl.u32 %v8185_v29, 16 }
 0x427   : > { %v7152_v45 = vmul.u32 58254, %v4084_v57  ;;  %v7155_v52 = vsub.s32 %v6651_v19, %v3845_v55  ;;  %v7158_v27 = vsub.s32 %v6654_v63, %v3874_v23  ;;  %v7160_v9 = vadd.s32 %v3958_v47, %v3949_v40  ;;  %v8190_v55 = vld [vmem:[#allocation10_spill] sm:$0xff]  ;;  %v8192_v23 = vld [vmem:[#allocation12_spill] sm:$0xff] }
 0x428   : > { %8186 = vst [vmem:[#allocation4_spill] sm:$0xff] %v7145_v54  ;;  %v7162_v17 = vadd.s32 %v3987_v6, %v3978_v5  ;;  %v4007_v2 = vshrl.u32 %v7104_v21, 16  ;;  %v4016_v58 = vadd.s32 %v4015_v38, %v4005_v33  ;;  %v4034_v1 = vshrl.u32 %v7109_v11, 16 }
 0x429   : > { %8187 = vst [vmem:[#allocation5_spill] sm:$0xff] %v7149_v26  ;;  %v4044_v28 = vadd.s32 %v4042_v34, %v4040_v10  ;;  %v7166_v24 = vmul.u32 18, %v3902_v44  ;;  %v7168_v35 = vmul.u32 18, %v3931_v59  ;;  %v4064_v19 = vshll.u32 %v7140_v25, 16 }
 0x42a   : > { %8188 = vst [vmem:[#allocation6_spill] sm:$0xff] %v7155_v52  ;;  %v4068_v4 = vadd.s32 %v4062_v56, %v4058_v22  ;;  %vm4066_vm10 = vc.u32 %v4058_v22, %v4062_v56  ;;  %v4087_v63 = vmul.u32 14564, %v4084_v57  ;;  %v7171_v42 = vmul.u32 14564, %v4085_v53 }
 0x42b   : > { %8189 = vst [vmem:[#allocation7_spill] sm:$0xff] %v7158_v27  ;;  %v4091_v20 = vshll.u32 %v7152_v45, 16  ;;  %v4036_v11 = vshrl.u32 %v7119_v43, 16  ;;  %v4113_v41 = vand.u32 65535, %v8190_v55  ;;  %v7178_v16 = vadd.s32 %v4016_v58, %v4007_v2  ;;  %v8193_v43 = vld [vmem:[#allocation13_spill] sm:$0xff]  ;;  %v8196_v27 = vld [vmem:[#allocation14_spill] sm:$0xff] }
 0x42c   : > { %v4045_v50 = vadd.s32 %v4044_v28, %v4034_v1  ;;  %v4142_v32 = vand.u32 65535, %v8191_v31  ;;  %v4171_v44 = vand.u32 65535, %v8192_v23  ;;  %v4061_v57 = vmul.u32 58254, %v4056_v51 }
 0x42d   : > { %v4067_v47 = vsel %vm4066_vm10, 1, %v8142_v14  ;;  %vm4070_vm11 = vc.u32 %v4068_v4, %v4064_v19  ;;  %v4093_v5 = vshll.u32 %v7171_v42, 16  ;;  %vm4095_vm12 = vc.u32 %v4087_v63, %v4091_v20 }
 0x42e   : > { %v4097_v6 = vadd.s32 %v4091_v20, %v4087_v63  ;;  %v4200_v59 = vand.u32 65535, %v8193_v43  ;;  %v4114_v38 = vshrl.u32 %v8190_v55, 16  ;;  %v7188_v10 = vmul.u32 58254, %v4113_v41 }
 0x42f   : > { %v4143_v34 = vshrl.u32 %v8191_v31, 16  ;;  %v7191_v51 = vadd.s32 %v4045_v50, %v4036_v11  ;;  %v7193_v22 = vmul.u32 58254, %v4142_v32  ;;  %v4172_v56 = vshrl.u32 %v8192_v23, 16 }
 0x430   : > { %v7196_v2 = vmul.u32 58254, %v4171_v44  ;;  %v4069_v58 = vadd.s32 %v4067_v47, %v4061_v57  ;;  %v4071_v1 = vsel %vm4070_vm11, 1, %v8142_v14  ;;  %v4090_v28 = vmul.u32 58254, %v4085_v53 }
 0x431   : > { %v4096_v19 = vsel %vm4095_vm12, 1, %v8142_v14  ;;  %vm7200_vm13 = vc.u32 %v4097_v6, %v4093_v5  ;;  %v4116_v63 = vmul.u32 14564, %v4113_v41  ;;  %v4201_v20 = vshrl.u32 %v8193_v43, 16 }
 0x432   : > { %v7205_v11 = vmul.u32 58254, %v4200_v59  ;;  %v7207_v50 = vmul.u32 14564, %v4114_v38  ;;  %v4120_v21 = vshll.u32 %v7188_v10, 16  ;;  %v4145_v62 = vmul.u32 14564, %v4142_v32 }
 0x433   : > { %v7210_v57 = vmul.u32 14564, %v4143_v34  ;;  %v4149_v53 = vshll.u32 %v7193_v22, 16  ;;  %v4174_v47 = vmul.u32 14564, %v4171_v44  ;;  %v7213_v33 = vmul.u32 14564, %v4172_v56 }
 0x434   : > { %v4178_v5 = vshll.u32 %v7196_v2, 16  ;;  %v4073_v6 = vadd.s32 %v4071_v1, %v4069_v58  ;;  %v4092_v41 = vshrl.u32 %v7152_v45, 16  ;;  %v4098_v40 = vadd.s32 %v4096_v19, %v4090_v28 }
 0x435   : > { %v4229_v52 = vand.u32 65535, %v8196_v27  ;;  %v4100_v26 = vsel %vm7200_vm13, 1, %v8142_v14  ;;  %v4203_v32 = vmul.u32 14564, %v4200_v59  ;;  %v7221_v54 = vmul.u32 14564, %v4201_v20 }
 0x436   : > { %v4207_v3 = vshll.u32 %v7205_v11, 16  ;;  %v4122_v44 = vshll.u32 %v7207_v50, 16  ;;  %vm4124_vm14 = vc.u32 %v4116_v63, %v4120_v21  ;;  %v4126_v8 = vadd.s32 %v4120_v21, %v4116_v63 }
 0x437   : > { %v4151_v58 = vshll.u32 %v7210_v57, 16  ;;  %vm4153_vm15 = vc.u32 %v4145_v62, %v4149_v53  ;;  %v4155_v45 = vadd.s32 %v4149_v53, %v4145_v62  ;;  %v4180_v1 = vshll.u32 %v7213_v33, 16 }
 0x438   : > { %v4184_v28 = vadd.s32 %v4178_v5, %v4174_v47  ;;  %v4119_v19 = vmul.u32 58254, %v4114_v38  ;;  %vm4182_vm0 = vc.u32 %v4174_v47, %v4178_v5  ;;  %v4230_v4 = vshrl.u32 %v8196_v27, 16 }
 0x439   : > { %v7228_v59 = vmul.u32 58254, %v4229_v52  ;;  %v4125_v36 = vsel %vm4124_vm14, 1, %v8142_v14  ;;  %v4209_v49 = vshll.u32 %v7221_v54, 16  ;;  %v4213_v61 = vadd.s32 %v4207_v3, %v4203_v32 }
 0x43a   : > { %v4258_v21 = vand.u32 65535, %v8197_v7  ;;  %vm7233_vm1 = vc.u32 %v4126_v8, %v4122_v44  ;;  %v4148_v62 = vmul.u32 58254, %v4143_v34  ;;  %v4154_v53 = vsel %vm4153_vm15, 1, %v8142_v14 }
 0x43b   : > { %vm4211_vm2 = vc.u32 %v4203_v32, %v4207_v3  ;;  %vm7238_vm3 = vc.u32 %v4155_v45, %v4151_v58  ;;  %v4177_v47 = vmul.u32 58254, %v4172_v56  ;;  %v4183_v5 = vsel %vm4182_vm0, 1, %v8142_v14 }
 0x43c   : > { %vm7243_vm4 = vc.u32 %v4184_v28, %v4180_v1  ;;  %v4206_v18 = vmul.u32 58254, %v4201_v20  ;;  %v4232_v8 = vmul.u32 14564, %v4229_v52  ;;  %v7247_v44 = vmul.u32 14564, %v4230_v4 }
 0x43d   : > { %v4236_v34 = vshll.u32 %v7228_v59, 16  ;;  %v4212_v43 = vsel %vm4211_vm2, 1, %v8142_v14  ;;  %vm4215_vm5 = vc.u32 %v4213_v61, %v4209_v49  ;;  %v4259_v3 = vshrl.u32 %v8197_v7, 16 }
 0x43e   : > { %v7252_v32 = vmul.u32 58254, %v4258_v21  ;;  %v4094_v56 = vshrl.u32 %v7171_v42, 16  ;;  %v4102_v58 = vadd.s32 %v4100_v26, %v4098_v40  ;;  %v4127_v45 = vadd.s32 %v4125_v36, %v4119_v19 }
 0x43f   : > { %v4156_v1 = vadd.s32 %v4154_v53, %v4148_v62  ;;  %v4129_v52 = vsel %vm7233_vm1, 1, %v8142_v14  ;;  %v4158_v20 = vsel %vm7238_vm3, 1, %v8142_v14  ;;  %v4185_v28 = vadd.s32 %v4183_v5, %v4177_v47 }
 0x440   : > { %v4187_v61 = vsel %vm7243_vm4, 1, %v8142_v14  ;;  %v4214_v49 = vadd.s32 %v4212_v43, %v4206_v18  ;;  %v4216_v7 = vsel %vm4215_vm5, 1, %v8142_v14  ;;  %v4238_v26 = vshll.u32 %v7247_v44, 16 }
 0x441   : > { %vm7266_vm6 = vc.u32 %v4232_v8, %v4236_v34  ;;  %v4242_v42 = vadd.s32 %v4236_v34, %v4232_v8  ;;  %v4261_v40 = vmul.u32 14564, %v4258_v21  ;;  %v7270_v19 = vmul.u32 14564, %v4259_v3 }
 0x442   : > { %v4265_v63 = vshll.u32 %v7252_v32, 16  ;;  %v4121_v62 = vshrl.u32 %v7188_v10, 16  ;;  %v4131_v53 = vadd.s32 %v4129_v52, %v4127_v45  ;;  %v4150_v27 = vshrl.u32 %v7193_v22, 16 }
 0x443   : > { %v4160_v18 = vadd.s32 %v4158_v20, %v4156_v1  ;;  %v8206_v43 = vshrl.u32 %v7133_v39, 16  ;;  %v4103_v47 = vadd.s32 %v4102_v58, %v4092_v41  ;;  %v4179_v5 = vshrl.u32 %v7196_v2, 16 }
 0x444   : > { %v4235_v23 = vmul.u32 58254, %v4230_v4  ;;  %v4189_v0 = vadd.s32 %v4187_v61, %v4185_v28  ;;  %v4208_v21 = vshrl.u32 %v7205_v11, 16  ;;  %v4218_v8 = vadd.s32 %v4216_v7, %v4214_v49 }
 0x445   : > { %v4074_v38 = vadd.s32 %v4073_v6, %v8206_v43  ;;  %v4241_v34 = vsel %vm7266_vm6, 1, %v8142_v14  ;;  %vm4244_vm7 = vc.u32 %v4242_v42, %v4238_v26  ;;  %v4267_v10 = vshll.u32 %v7270_v19, 16 }
 0x446   : > { %vm4269_vm8 = vc.u32 %v4261_v40, %v4265_v63  ;;  %v4271_v22 = vadd.s32 %v4265_v63, %v4261_v40  ;;  %v4123_v39 = vshrl.u32 %v7207_v50, 16  ;;  %v4132_v6 = vadd.s32 %v4131_v53, %v4121_v62 }
 0x447   : > { %v4152_v41 = vshrl.u32 %v7210_v57, 16  ;;  %v4161_v2 = vadd.s32 %v4160_v18, %v4150_v27  ;;  %v4018_v4 = vshrl.u32 %v7178_v16, 4  ;;  %v8207_v11 = vshrl.u32 %v7140_v25, 16 }
 0x448   : > { %v4243_v58 = vadd.s32 %v4241_v34, %v4235_v23  ;;  %v4264_v45 = vmul.u32 58254, %v4259_v3  ;;  %v4104_v1 = vadd.s32 %v4103_v47, %v4094_v56  ;;  %v4181_v52 = vshrl.u32 %v7213_v33, 16 }
 0x449   : > { %v4075_v7 = vadd.s32 %v4074_v38, %v8207_v11  ;;  %v4245_v20 = vsel %vm4244_vm7, 1, %v8142_v14  ;;  %v4270_v28 = vsel %vm4269_vm8, 1, %v8142_v14  ;;  %v4190_v61 = vadd.s32 %v4189_v0, %v4179_v5  ;;  %v8247_v11 = vld [vmem:[#allocation28_spill] sm:$0xff] }
 0x44a   : > { %v4210_v50 = vshrl.u32 %v7221_v54, 16  ;;  %v4219_v49 = vadd.s32 %v4218_v8, %v4208_v21  ;;  %vm4273_vm9 = vc.u32 %v4271_v22, %v4267_v10  ;;  %v8208_v57 = vshrl.u32 %v7160_v9, 4  ;;  %v8210_v21 = vld [vmem:[#allocation16_spill] sm:$0xff]  ;;  %v8212_v22 = vld [vmem:[#allocation18_spill] sm:$0xff] }
 0x44b   : > { %v4047_v25 = vshrl.u32 %v7191_v51, 4  ;;  %v4133_v26 = vadd.s32 %v4132_v6, %v4123_v39  ;;  %v4162_v23 = vadd.s32 %v4161_v2, %v4152_v41  ;;  %v8209_v3 = vshrl.u32 %v7162_v17, 4 }
 0x44c   : > { %v3961_v16 = vmul.u32 18, %v8208_v57  ;;  %v4237_v33 = vshrl.u32 %v7228_v59, 16  ;;  %v4247_v36 = vadd.s32 %v4245_v20, %v4243_v58  ;;  %v4272_v42 = vadd.s32 %v4270_v28, %v4264_v45  ;;  %v8220_v28 = vld [vmem:[#allocation12_spill] sm:$0xff] }
 0x44d   : > { %v3990_v56 = vmul.u32 18, %v8209_v3  ;;  %v4019_v40 = vmul.u32 18, %v4018_v4  ;;  %v4076_v0 = vshrl.u32 %v4075_v7, 4  ;;  %v4105_v63 = vshrl.u32 %v4104_v1, 4  ;;  %v8217_v1 = vld [vmem:[#allocation19_spill] sm:$0xff]  ;;  %v8222_v57 = vld [vmem:[#allocation20_spill] sm:$0xff] }
 0x44e   : > { %v4274_v54 = vsel %vm4273_vm9, 1, %v8142_v14  ;;  %v7301_v9 = vsub.s32 %v6657_v46, %v7166_v24  ;;  %v7305_v51 = vsub.s32 %v6660_v30, %v7168_v35  ;;  %v4191_v62 = vadd.s32 %v4190_v61, %v4181_v52 }
 0x44f   : > { %v4220_v17 = vadd.s32 %v4219_v49, %v4210_v50  ;;  %v7308_v53 = vsub.s32 %v8174_v60, %v3961_v16  ;;  %v4048_v59 = vmul.u32 18, %v4047_v25  ;;  %v4134_v27 = vshrl.u32 %v4133_v26, 4  ;;  %v8221_v50 = vld [vmem:[#allocation13_spill] sm:$0xff]  ;;  %v8226_v26 = vld [vmem:[#allocation22_spill] sm:$0xff] }
 0x450   : > { %v4163_v18 = vshrl.u32 %v4162_v23, 4  ;;  %v4239_v43 = vshrl.u32 %v7247_v44, 16  ;;  %v4248_v38 = vadd.s32 %v4247_v36, %v4237_v33  ;;  %v4266_v14 = vshrl.u32 %v7252_v32, 16  ;;  %v8211_v32 = vld [vmem:[#allocation17_spill] sm:$0xff] }
 0x451   : > { %v4276_v47 = vadd.s32 %v4274_v54, %v4272_v42  ;;  %v7313_v46 = vsub.s32 %v8175_v15, %v3990_v56  ;;  %v7316_v30 = vsub.s32 %v8176_v13, %v4019_v40  ;;  %v4077_v24 = vmul.u32 18, %v4076_v0  ;;  %v8223_v16 = vld [vmem:[#allocation21_spill] sm:$0xff]  ;;  %v3167_v56 = vld [vmem:[%s5477_s8] sm:$0xff]  ;;  %v8229_v0 = vld [vmem:[#allocation23_spill] sm:$0xff] }
 0x452   : > { %v4106_v35 = vmul.u32 18, %v4105_v63  ;;  %v4192_v5 = vshrl.u32 %v4191_v62, 4  ;;  %v4221_v60 = vshrl.u32 %v4220_v17, 4  ;;  %vm4284_vm10 = vcmp.ne.s32.totalorder %v8210_v21, 0  ;;  %v3168_v33 = vld [vmem:[%s5477_s8 + $0x8] sm:$0xff]  ;;  %v3169_v62 = vld [vmem:[%s5477_s8 + $0x10] sm:$0xff] }
 0x453   : > { %vm4320_vm11 = vcmp.lt.s32.totalorder %v8210_v21, 0  ;;  %v7321_v44 = vsub.s32 %v8179_v48, %v4048_v59  ;;  %v4135_v8 = vmul.u32 18, %v4134_v27  ;;  %vm4285_vm12 = vcmp.ne.s32.totalorder %v8211_v32, 0  ;;  %v8230_v17 = vld [vmem:[#allocation24_spill] sm:$0xff]  ;;  %v8231_v59 = vld [vmem:[#allocation25_spill] sm:$0xff]  ;;  %v3174_v27 = vld [vmem:[%s5477_s8 + $0x38] sm:$0xff] }
 0x454   : > { %vm4321_vm13 = vcmp.lt.s32.totalorder %v8211_v32, 0  ;;  %v4164_v15 = vmul.u32 18, %v4163_v18  ;;  %v4249_v34 = vadd.s32 %v4248_v38, %v4239_v43  ;;  %v4268_v13 = vshrl.u32 %v7270_v19, 16  ;;  %vm7328_vm0 = vmand %vm4320_vm11, %vm4284_vm10 }
 0x455   : > { %v4277_v10 = vadd.s32 %v4276_v47, %v4266_v14  ;;  %vm4286_vm14 = vcmp.ne.s32.totalorder %v8212_v22, 0  ;;  %vm4322_vm15 = vcmp.lt.s32.totalorder %v8212_v22, 0  ;;  %v4392_v48 = vadd.s32 18, %v8210_v21  ;;  %vm7342_vm1 = vmand %vm4321_vm13, %vm4285_vm12 }
 0x456   : > { %v4393_v6 = vadd.s32 18, %v8211_v32  ;;  %v7335_v41 = vsub.s32 %v8184_v37, %v4077_v24  ;;  %v7338_v2 = vsub.s32 %v8185_v29, %v4106_v35  ;;  %v4193_v19 = vmul.u32 18, %v4192_v5  ;;  %vm7360_vm5 = vmand %vm4322_vm15, %vm4286_vm14  ;;  %v3170_v24 = vld [vmem:[%s5477_s8 + $0x18] sm:$0xff]  ;;  %v8237_v35 = vld [vmem:[#allocation14_spill] sm:$0xff] }
 0x457   : > { %v4222_v4 = vmul.u32 18, %v4221_v60  ;;  %v7347_v7 = vsub.s32 %v8190_v55, %v4135_v8  ;;  %vm4287_vm2 = vcmp.ne.s32.totalorder %v6836_v12, 0  ;;  %vm4323_vm3 = vcmp.lt.s32.totalorder %v6836_v12, 0  ;;  %v8248_v55 = vld [vmem:[#allocation15_spill] sm:$0xff] }
 0x458   : > { %v4394_v37 = vadd.s32 18, %v8212_v22  ;;  %v7353_v29 = vsub.s32 %v8191_v31, %v4164_v15  ;;  %v4250_v58 = vshrl.u32 %v4249_v34, 4  ;;  %v4278_v45 = vadd.s32 %v4277_v10, %v4268_v13  ;;  %vm7384_vm9 = vmand %vm4323_vm3, %vm4287_vm2  ;;  %v8242_v15 = vld [vmem:[#allocation27_spill] sm:$0xff] }
 0x459   : > { %vm4288_vm4 = vcmp.ne.s32.totalorder %v8217_v1, 0  ;;  %vm4324_vm6 = vcmp.lt.s32.totalorder %v8217_v1, 0  ;;  %v4395_v52 = vadd.s32 18, %v6836_v12  ;;  %v4428_v31 = vsel %vm7328_vm0, %v4392_v48, %v8210_v21  ;;  %v3175_v21 = vld [vmem:[%s5477_s8 + $0x40] sm:$0xff] }
 0x45a   : > { %v4429_v20 = vsel %vm7342_vm1, %v4393_v6, %v8211_v32  ;;  %v7373_v61 = vsub.s32 %v8220_v28, %v4193_v19  ;;  %v7376_v49 = vsub.s32 %v8221_v50, %v4222_v4  ;;  %vm4289_vm7 = vcmp.ne.s32.totalorder %v8222_v57, 0  ;;  %vm7400_vm12 = vmand %vm4324_vm6, %vm4288_vm4 }
 0x45b   : > { %vm4290_vm8 = vcmp.ne.s32.totalorder %v8223_v16, 0  ;;  %vm4291_vm10 = vcmp.ne.s32.totalorder %v8226_v26, 0  ;;  %vm4325_vm11 = vcmp.lt.s32.totalorder %v8222_v57, 0  ;;  %v4396_v23 = vadd.s32 18, %v8217_v1 }
 0x45c   : > { %v4430_v3 = vsel %vm7360_vm5, %v4394_v37, %v8212_v22  ;;  %v4251_v36 = vmul.u32 18, %v4250_v58  ;;  %v4279_v42 = vshrl.u32 %v4278_v45, 4  ;;  %vm4464_vm13 = vcmp.lt.s32.totalorder %v4428_v31, 16  ;;  %vm7418_vm4 = vmand %vm4325_vm11, %vm4289_vm7  ;;  %v3171_v22 = vld [vmem:[%s5477_s8 + $0x20] sm:$0xff] }
 0x45d   : > { %vm4465_vm14 = vcmp.lt.s32.totalorder %v4429_v20, 16  ;;  %vm4292_vm15 = vcmp.ne.s32.totalorder %v8229_v0, 0  ;;  %vm4326_vm0 = vcmp.lt.s32.totalorder %v8223_v16, 0  ;;  %v4397_v63 = vadd.s32 18, %v8222_v57  ;;  %v3177_v20 = vld [vmem:[%s5477_s8 + $0x50] sm:$0xff] }
 0x45e   : > { %v4431_v54 = vsel %vm7384_vm9, %v4395_v52, %v6836_v12  ;;  %vm4293_vm1 = vcmp.ne.s32.totalorder %v8230_v17, 0  ;;  %vm4294_vm2 = vcmp.ne.s32.totalorder %v8231_v59, 0  ;;  %vm4327_vm3 = vcmp.lt.s32.totalorder %v8226_v26, 0  ;;  %v8236_v12 = vld [vmem:[#allocation26_spill] sm:$0xff]  ;;  %vm7439_vm7 = vmand %vm4326_vm0, %vm4290_vm8 }
 0x45f   : > { %vm7422_vm5 = vcmp.lt.s32.totalorder %v4430_v3, 16  ;;  %vm4295_vm6 = vcmp.ne.s32.totalorder %v8236_v12, 0  ;;  %v4398_v43 = vadd.s32 18, %v8223_v16  ;;  %v4432_v38 = vsel %vm7400_vm12, %v4396_v23, %v8217_v1  ;;  %vm7460_vm8 = vmand %vm4327_vm3, %vm4291_vm10  ;;  %v3172_v1 = vld [vmem:[%s5477_s8 + $0x28] sm:$0xff]  ;;  %v3173_v3 = vld [vmem:[%s5477_s8 + $0x30] sm:$0xff] }
 0x460   : > { %v4572_v14 = vsel %vm4464_vm13, %v3167_v56, 0.0  ;;  %v4573_v47 = vsel %vm4465_vm14, %v3168_v33, 0.0  ;;  %v7433_v5 = vsub.s32 %v8237_v35, %v4251_v36  ;;  %v4280_v60 = vmul.u32 18, %v4279_v42 }
 0x461   : > { %vm7443_vm9 = vcmp.lt.s32.totalorder %v4431_v54, 16  ;;  %v4609_v32 = vadd.f32 %v4573_v47, %v4572_v14  ;;  %vm4296_vm11 = vcmp.ne.s32.totalorder %v8242_v15, 0  ;;  %vm4328_vm12 = vcmp.lt.s32.totalorder %v8229_v0, 0 }
 0x462   : > { %v4399_v34 = vadd.s32 18, %v8226_v26  ;;  %v4433_v13 = vsel %vm7418_vm4, %v4397_v63, %v8222_v57  ;;  %v4574_v10 = vsel %vm7422_vm5, %v3169_v62, 0.0  ;;  %vm7464_vm13 = vcmp.lt.s32.totalorder %v4432_v38, 16  ;;  %vm7484_vm10 = vmand %vm4328_vm12, %vm4292_vm15  ;;  %v8253_v57 = vld [vmem:[#allocation29_spill] sm:$0xff] }
 0x463   : > { %v4610_v6 = vadd.f32 %v4609_v32, %v4574_v10  ;;  %v4653_v19 = vmul.f32 %v4572_v14, %v4572_v14  ;;  %v4654_v4 = vmul.f32 %v4573_v47, %v4573_v47  ;;  %vm4297_vm14 = vcmp.ne.s32.totalorder %v8247_v11, 0 }
 0x464   : > { %vm4329_vm0 = vcmp.lt.s32.totalorder %v8230_v17, 0  ;;  %v4400_v37 = vadd.s32 18, %v8229_v0  ;;  %v4434_v58 = vsel %vm7439_vm7, %v4398_v43, %v8223_v16  ;;  %v4575_v45 = vsel %vm7443_vm9, %v3170_v24, 0.0 }
 0x465   : > { %v7478_v52 = vsub.s32 %v8248_v55, %v4280_v60  ;;  %vm7488_vm3 = vcmp.lt.s32.totalorder %v4433_v13, 16  ;;  %v4611_v28 = vadd.f32 %v4610_v6, %v4575_v45  ;;  %v4655_v50 = vmul.f32 %v4574_v10, %v4574_v10  ;;  %vm7505_vm15 = vmand %vm4329_vm0, %vm4293_vm1  ;;  %v3176_v6 = vld [vmem:[%s5477_s8 + $0x48] sm:$0xff] }
 0x466   : > { %vm4298_vm4 = vcmp.ne.s32.totalorder %v8253_v57, 0  ;;  %vm4330_vm5 = vcmp.lt.s32.totalorder %v8231_v59, 0  ;;  %v4401_v16 = vadd.s32 18, %v8230_v17  ;;  %v4435_v25 = vsel %vm7460_vm8, %v4399_v34, %v8226_v26  ;;  %v8258_v26 = vld [vmem:[#allocation30_spill] sm:$0xff] }
 0x467   : > { %v4576_v23 = vsel %vm7464_vm13, %v3171_v22, 0.0  ;;  %vm7509_vm7 = vcmp.lt.s32.totalorder %v4434_v58, 16  ;;  %v4656_v42 = vmul.f32 %v4575_v45, %v4575_v45  ;;  %v4689_v40 = vadd.f32 %v4654_v4, %v4653_v19  ;;  %vm7526_vm1 = vmand %vm4330_vm5, %vm4294_vm2  ;;  %v3181_v4 = vld [vmem:[%s5477_s8 + $0x70] sm:$0xff] }
 0x468   : > { %v4612_v36 = vadd.f32 %v4611_v28, %v4576_v23  ;;  %vm4299_vm9 = vcmp.ne.s32.totalorder %v8258_v26, 0  ;;  %vm4331_vm12 = vcmp.lt.s32.totalorder %v8236_v12, 0  ;;  %v4402_v63 = vadd.s32 18, %v8231_v59  ;;  %v3182_v28 = vld [vmem:[%s5477_s8 + $0x78] sm:$0xff] }
 0x469   : > { %v4436_v54 = vsel %vm7484_vm10, %v4400_v37, %v8229_v0  ;;  %v4577_v62 = vsel %vm7488_vm3, %v3172_v1, 0.0  ;;  %vm7530_vm8 = vcmp.lt.s32.totalorder %v4435_v25, 16  ;;  %v4657_v14 = vmul.f32 %v4576_v23, %v4576_v23  ;;  %v8263_v0 = vld [vmem:[#allocation31_spill] sm:$0xff]  ;;  %vm7547_vm2 = vmand %vm4331_vm12, %vm4295_vm6 }
 0x46a   : > { %v4613_v38 = vadd.f32 %v4612_v36, %v4577_v62  ;;  %v4690_v47 = vadd.f32 %v4689_v40, %v4655_v50  ;;  %vm4300_vm13 = vcmp.ne.s32.totalorder %v8263_v0, 0  ;;  %vm4332_vm0 = vcmp.lt.s32.totalorder %v8242_v15, 0  ;;  %v3178_v36 = vld [vmem:[%s5477_s8 + $0x58] sm:$0xff] }
 0x46b   : > { %v4403_v24 = vadd.s32 18, %v8236_v12  ;;  %v4437_v35 = vsel %vm7505_vm15, %v4401_v16, %v8230_v17  ;;  %v4578_v60 = vsel %vm7509_vm7, %v3173_v3, 0.0  ;;  %vm7551_vm10 = vcmp.lt.s32.totalorder %v4436_v54, 16  ;;  %v8268_v17 = vld [vmem:[#allocation32_spill] sm:$0xff]  ;;  %vm7568_vm6 = vmand %vm4332_vm0, %vm4296_vm11 }
 0x46c   : > { %v4614_v34 = vadd.f32 %v4613_v38, %v4578_v60  ;;  %v4658_v13 = vmul.f32 %v4577_v62, %v4577_v62  ;;  %v4691_v10 = vadd.f32 %v4690_v47, %v4656_v42  ;;  %vm4301_vm3 = vcmp.ne.s32.totalorder %v8268_v17, 0  ;;  %v3179_v38 = vld [vmem:[%s5477_s8 + $0x60] sm:$0xff] }
 0x46d   : > { %vm4333_vm5 = vcmp.lt.s32.totalorder %v8247_v11, 0  ;;  %v4404_v22 = vadd.s32 18, %v8242_v15  ;;  %v4438_v39 = vsel %vm7526_vm1, %v4402_v63, %v8231_v59  ;;  %v4579_v48 = vsel %vm7530_vm8, %v3174_v27, 0.0  ;;  %v8273_v59 = vld [vmem:[#allocation4_spill] sm:$0xff] }
 0x46e   : > { %vm7572_vm15 = vcmp.lt.s32.totalorder %v4437_v35, 16  ;;  %v4615_v37 = vadd.f32 %v4614_v34, %v4579_v48  ;;  %v4659_v58 = vmul.f32 %v4578_v60, %v4578_v60  ;;  %v4692_v45 = vadd.f32 %v4691_v10, %v4657_v14  ;;  %vm7589_vm11 = vmand %vm4333_vm5, %vm4297_vm14  ;;  %v3180_v34 = vld [vmem:[%s5477_s8 + $0x68] sm:$0xff]  ;;  %v3190_v14 = vld [vmem:[%s5477_s8 + $0xb8] sm:$0xff] }
 0x46f   : > { %vm4302_vm7 = vcmp.ne.s32.totalorder %v8273_v59, 0  ;;  %vm4334_vm12 = vcmp.lt.s32.totalorder %v8253_v57, 0  ;;  %v4405_v1 = vadd.s32 18, %v8247_v11  ;;  %v4439_v55 = vsel %vm7547_vm2, %v4403_v24, %v8236_v12  ;;  %v8278_v12 = vld [vmem:[#allocation5_spill] sm:$0xff] }
 0x470   : > { %v4580_v31 = vsel %vm7551_vm10, %v3175_v21, 0.0  ;;  %vm7593_vm1 = vcmp.lt.s32.totalorder %v4438_v39, 16  ;;  %v4660_v25 = vmul.f32 %v4579_v48, %v4579_v48  ;;  %v4693_v23 = vadd.f32 %v4692_v45, %v4658_v13  ;;  %vm7610_vm14 = vmand %vm4334_vm12, %vm4298_vm4 }
 0x471   : > { %v4616_v16 = vadd.f32 %v4615_v37, %v4580_v31  ;;  %vm4303_vm8 = vcmp.ne.s32.totalorder %v8278_v12, 0  ;;  %vm4335_vm0 = vcmp.lt.s32.totalorder %v8258_v26, 0  ;;  %v4406_v3 = vadd.s32 18, %v8253_v57 }
 0x472   : > { %v4440_v56 = vsel %vm7568_vm6, %v4404_v22, %v8242_v15  ;;  %v4581_v33 = vsel %vm7572_vm15, %v3176_v6, 0.0  ;;  %vm7614_vm2 = vcmp.lt.s32.totalorder %v4439_v55, 16  ;;  %v4661_v54 = vmul.f32 %v4580_v31, %v4580_v31  ;;  %v8283_v15 = vld [vmem:[#allocation6_spill] sm:$0xff]  ;;  %vm7631_vm4 = vmand %vm4335_vm0, %vm4299_vm9 }
 0x473   : > { %v4617_v63 = vadd.f32 %v4616_v16, %v4581_v33  ;;  %v4694_v62 = vadd.f32 %v4693_v23, %v4659_v58  ;;  %vm4304_vm10 = vcmp.ne.s32.totalorder %v8283_v15, 0  ;;  %vm4336_vm5 = vcmp.lt.s32.totalorder %v8263_v0, 0 }
 0x474   : > { %v4407_v27 = vadd.s32 18, %v8258_v26  ;;  %v4441_v18 = vsel %vm7589_vm11, %v4405_v1, %v8247_v11  ;;  %v4582_v43 = vsel %vm7593_vm1, %v3177_v20, 0.0  ;;  %vm7635_vm6 = vcmp.lt.s32.totalorder %v4440_v56, 16  ;;  %v8288_v11 = vld [vmem:[#allocation7_spill] sm:$0xff]  ;;  %vm7652_vm9 = vmand %vm4336_vm5, %vm4300_vm13 }
 0x475   : > { %v4618_v24 = vadd.f32 %v4617_v63, %v4582_v43  ;;  %v4662_v35 = vmul.f32 %v4581_v33, %v4581_v33  ;;  %v4695_v60 = vadd.f32 %v4694_v62, %v4660_v25  ;;  %vm4305_vm15 = vcmp.ne.s32.totalorder %v8288_v11, 0 }
 0x476   : > { %vm4337_vm12 = vcmp.lt.s32.totalorder %v8268_v17, 0  ;;  %v4408_v21 = vadd.s32 18, %v8263_v0  ;;  %v4442_v8 = vsel %vm7610_vm14, %v4406_v3, %v8253_v57  ;;  %v4583_v32 = vsel %vm7614_vm2, %v3178_v36, 0.0  ;;  %v3183_v36 = vld [vmem:[%s5477_s8 + $0x80] sm:$0xff] }
 0x477   : > { %vm7656_vm11 = vcmp.lt.s32.totalorder %v4441_v18, 16  ;;  %v4619_v22 = vadd.f32 %v4618_v24, %v4583_v32  ;;  %v4663_v39 = vmul.f32 %v4582_v43, %v4582_v43  ;;  %v4696_v48 = vadd.f32 %v4695_v60, %v4661_v54  ;;  %vm7673_vm13 = vmand %vm4337_vm12, %vm4301_vm3  ;;  %v3184_v43 = vld [vmem:[%s5477_s8 + $0x88] sm:$0xff] }
 0x478   : > { %vm4306_vm1 = vcmp.ne.s32.totalorder %v7301_v9, 0  ;;  %vm4338_vm0 = vcmp.lt.s32.totalorder %v8273_v59, 0  ;;  %v4409_v57 = vadd.s32 18, %v8268_v17  ;;  %v4443_v6 = vsel %vm7631_vm4, %v4407_v27, %v8258_v26 }
 0x479   : > { %v4584_v19 = vsel %vm7635_vm6, %v3179_v38, 0.0  ;;  %vm7677_vm14 = vcmp.lt.s32.totalorder %v4442_v8, 16  ;;  %v4664_v1 = vmul.f32 %v4583_v32, %v4583_v32  ;;  %v4697_v55 = vadd.f32 %v4696_v48, %v4662_v35  ;;  %vm7694_vm3 = vmand %vm4338_vm0, %vm4302_vm7  ;;  %v3185_v8 = vld [vmem:[%s5477_s8 + $0x90] sm:$0xff]  ;;  %v3191_v32 = vld [vmem:[%s5477_s8 + $0xc0] sm:$0xff] }
 0x47a   : > { %v4620_v45 = vadd.f32 %v4619_v22, %v4584_v19  ;;  %vm4307_vm2 = vcmp.ne.s32.totalorder %v7305_v51, 0  ;;  %vm4339_vm5 = vcmp.lt.s32.totalorder %v8278_v12, 0  ;;  %v4410_v26 = vadd.s32 18, %v8273_v59 }
 0x47b   : > { %v4444_v31 = vsel %vm7652_vm9, %v4408_v21, %v8263_v0  ;;  %v4585_v20 = vsel %vm7656_vm11, %v3180_v34, 0.0  ;;  %vm7698_vm4 = vcmp.lt.s32.totalorder %v4443_v6, 16  ;;  %v4665_v23 = vmul.f32 %v4584_v19, %v4584_v19  ;;  %vm7715_vm7 = vmand %vm4339_vm5, %vm4303_vm8  ;;  %v3199_v6 = vld [vmem:[%s5477_s8 + $0x100] sm:$0xff] }
 0x47c   : > { %v4621_v25 = vadd.f32 %v4620_v45, %v4585_v20  ;;  %v4698_v3 = vadd.f32 %v4697_v55, %v4663_v39  ;;  %vm4308_vm6 = vcmp.ne.s32.totalorder %v7308_v53, 0  ;;  %vm4340_vm12 = vcmp.lt.s32.totalorder %v8283_v15, 0  ;;  %v3187_v55 = vld [vmem:[%s5477_s8 + $0xa0] sm:$0xff] }
 0x47d   : > { %v4411_v0 = vadd.s32 18, %v8278_v12  ;;  %v4445_v56 = vsel %vm7673_vm13, %v4409_v57, %v8268_v17  ;;  %v4586_v33 = vsel %vm7677_vm14, %v3181_v4, 0.0  ;;  %vm7719_vm9 = vcmp.lt.s32.totalorder %v4444_v31, 16  ;;  %vm7736_vm8 = vmand %vm4340_vm12, %vm4304_vm10  ;;  %v3186_v57 = vld [vmem:[%s5477_s8 + $0x98] sm:$0xff] }
 0x47e   : > { %v4622_v63 = vadd.f32 %v4621_v25, %v4586_v33  ;;  %v4666_v54 = vmul.f32 %v4585_v20, %v4585_v20  ;;  %v4699_v62 = vadd.f32 %v4698_v3, %v4664_v1  ;;  %vm4309_vm11 = vcmp.ne.s32.totalorder %v7313_v46, 0 }
 0x47f   : > { %vm4341_vm0 = vcmp.lt.s32.totalorder %v8288_v11, 0  ;;  %v4412_v17 = vadd.s32 18, %v8283_v15  ;;  %v4446_v27 = vsel %vm7694_vm3, %v4410_v26, %v8273_v59  ;;  %v4587_v18 = vsel %vm7698_vm4, %v3182_v28, 0.0 }
 0x480   : > { %vm7740_vm13 = vcmp.lt.s32.totalorder %v4445_v56, 16  ;;  %v4623_v47 = vadd.f32 %v4622_v63, %v4587_v18  ;;  %v4667_v24 = vmul.f32 %v4586_v33, %v4586_v33  ;;  %v4700_v35 = vadd.f32 %v4699_v62, %v4665_v23  ;;  %vm7757_vm10 = vmand %vm4341_vm0, %vm4305_vm15  ;;  %v3188_v23 = vld [vmem:[%s5477_s8 + $0xa8] sm:$0xff]  ;;  %v3189_v63 = vld [vmem:[%s5477_s8 + $0xb0] sm:$0xff] }
 0x481   : > { %vm4310_vm14 = vcmp.ne.s32.totalorder %v7316_v30, 0  ;;  %vm4342_vm5 = vcmp.lt.s32.totalorder %v7301_v9, 0  ;;  %v4413_v59 = vadd.s32 18, %v8288_v11  ;;  %v4447_v60 = vsel %vm7715_vm7, %v4411_v0, %v8278_v12 }
 0x482   : > { %v4588_v21 = vsel %vm7719_vm9, %v3183_v36, 0.0  ;;  %vm7761_vm3 = vcmp.lt.s32.totalorder %v4446_v27, 16  ;;  %v4668_v10 = vmul.f32 %v4587_v18, %v4587_v18  ;;  %v4701_v22 = vadd.f32 %v4700_v35, %v4666_v54  ;;  %vm7778_vm15 = vmand %vm4342_vm5, %vm4306_vm1 }
 0x483   : > { %v4624_v13 = vadd.f32 %v4623_v47, %v4588_v21  ;;  %vm4311_vm4 = vcmp.ne.s32.totalorder %v7321_v44, 0  ;;  %vm4343_vm12 = vcmp.lt.s32.totalorder %v7305_v51, 0  ;;  %v4414_v12 = vadd.s32 18, %v7301_v9 }
 0x484   : > { %v4448_v39 = vsel %vm7736_vm8, %v4412_v17, %v8283_v15  ;;  %v4589_v48 = vsel %vm7740_vm13, %v3184_v43, 0.0  ;;  %vm7782_vm7 = vcmp.lt.s32.totalorder %v4447_v60, 16  ;;  %v4669_v37 = vmul.f32 %v4588_v21, %v4588_v21  ;;  %vm7799_vm1 = vmand %vm4343_vm12, %vm4307_vm2 }
 0x485   : > { %v4625_v4 = vadd.f32 %v4624_v13, %v4589_v48  ;;  %v4702_v58 = vadd.f32 %v4701_v22, %v4667_v24  ;;  %vm4312_vm9 = vcmp.ne.s32.totalorder %v7335_v41, 0  ;;  %vm4344_vm0 = vcmp.lt.s32.totalorder %v7308_v53, 0 }
 0x486   : > { %v4415_v15 = vadd.s32 18, %v7305_v51  ;;  %v4449_v45 = vsel %vm7757_vm10, %v4413_v59, %v8288_v11  ;;  %v4590_v1 = vsel %vm7761_vm3, %v3185_v8, 0.0  ;;  %vm7803_vm8 = vcmp.lt.s32.totalorder %v4448_v39, 16  ;;  %vm7820_vm2 = vmand %vm4344_vm0, %vm4308_vm6 }
 0x487   : > { %v4626_v20 = vadd.f32 %v4625_v4, %v4590_v1  ;;  %v4670_v28 = vmul.f32 %v4589_v48, %v4589_v48  ;;  %v4703_v50 = vadd.f32 %v4702_v58, %v4668_v10  ;;  %vm4313_vm13 = vcmp.ne.s32.totalorder %v7338_v2, 0 }
 0x488   : > { %vm4345_vm5 = vcmp.lt.s32.totalorder %v7313_v46, 0  ;;  %v4416_v11 = vadd.s32 18, %v7308_v53  ;;  %v4450_v16 = vsel %vm7778_vm15, %v4414_v12, %v7301_v9  ;;  %v4591_v25 = vsel %vm7782_vm7, %v3186_v57, 0.0  ;;  %v3192_v57 = vld [vmem:[%s5477_s8 + $0xc8] sm:$0xff] }
 0x489   : > { %vm7824_vm10 = vcmp.lt.s32.totalorder %v4449_v45, 16  ;;  %v4627_v56 = vadd.f32 %v4626_v20, %v4591_v25  ;;  %v4671_v33 = vmul.f32 %v4590_v1, %v4590_v1  ;;  %v4704_v36 = vadd.f32 %v4703_v50, %v4669_v37  ;;  %vm7841_vm6 = vmand %vm4345_vm5, %vm4309_vm11  ;;  %v3193_v1 = vld [vmem:[%s5477_s8 + $0xd0] sm:$0xff] }
 0x48a   : > { %vm4314_vm3 = vcmp.ne.s32.totalorder %v7347_v7, 0  ;;  %vm4346_vm12 = vcmp.lt.s32.totalorder %v7316_v30, 0  ;;  %v4417_v9 = vadd.s32 18, %v7313_v46  ;;  %v4451_v42 = vsel %vm7799_vm1, %v4415_v15, %v7305_v51 }
 0x48b   : > { %v4592_v40 = vsel %vm7803_vm8, %v3187_v55, 0.0  ;;  %vm7845_vm15 = vcmp.lt.s32.totalorder %v4450_v16, 16  ;;  %v4672_v27 = vmul.f32 %v4591_v25, %v4591_v25  ;;  %v4705_v18 = vadd.f32 %v4704_v36, %v4670_v28  ;;  %vm7862_vm11 = vmand %vm4346_vm12, %vm4310_vm14  ;;  %v3194_v16 = vld [vmem:[%s5477_s8 + $0xd8] sm:$0xff] }
 0x48c   : > { %v4628_v17 = vadd.f32 %v4627_v56, %v4592_v40  ;;  %vm4315_vm7 = vcmp.ne.s32.totalorder %v7353_v29, 0  ;;  %vm4347_vm0 = vcmp.lt.s32.totalorder %v7321_v44, 0  ;;  %v4418_v51 = vadd.s32 18, %v7316_v30 }
 0x48d   : > { %v4452_v43 = vsel %vm7820_vm2, %v4416_v11, %v7308_v53  ;;  %v4593_v38 = vsel %vm7824_vm10, %v3188_v23, 0.0  ;;  %vm7866_vm1 = vcmp.lt.s32.totalorder %v4451_v42, 16  ;;  %v4673_v59 = vmul.f32 %v4592_v40, %v4592_v40  ;;  %vm7883_vm14 = vmand %vm4347_vm0, %vm4311_vm4 }
 0x48e   : > { %v4629_v35 = vadd.f32 %v4628_v17, %v4593_v38  ;;  %v4706_v60 = vadd.f32 %v4705_v18, %v4671_v33  ;;  %vm4316_vm8 = vcmp.ne.s32.totalorder %v7373_v61, 0  ;;  %vm4348_vm5 = vcmp.lt.s32.totalorder %v7335_v41, 0  ;;  %v3196_v18 = vld [vmem:[%s5477_s8 + $0xe8] sm:$0xff] }
 0x48f   : > { %v4419_v53 = vadd.s32 18, %v7321_v44  ;;  %v4453_v21 = vsel %vm7841_vm6, %v4417_v9, %v7313_v46  ;;  %v4594_v8 = vsel %vm7845_vm15, %v3189_v63, 0.0  ;;  %vm7887_vm2 = vcmp.lt.s32.totalorder %v4452_v43, 16  ;;  %vm7904_vm4 = vmand %vm4348_vm5, %vm4312_vm9  ;;  %v3195_v9 = vld [vmem:[%s5477_s8 + $0xe0] sm:$0xff] }
 0x490   : > { %v4630_v10 = vadd.f32 %v4629_v35, %v4594_v8  ;;  %v4674_v22 = vmul.f32 %v4593_v38, %v4593_v38  ;;  %v4707_v12 = vadd.f32 %v4706_v60, %v4672_v27  ;;  %vm4317_vm10 = vcmp.ne.s32.totalorder %v7376_v49, 0 }
 0x491   : > { %vm4349_vm12 = vcmp.lt.s32.totalorder %v7338_v2, 0  ;;  %v4420_v46 = vadd.s32 18, %v7335_v41  ;;  %v4454_v39 = vsel %vm7862_vm11, %v4418_v51, %v7316_v30  ;;  %v4595_v48 = vsel %vm7866_vm1, %v3190_v14, 0.0 }
 0x492   : > { %vm7908_vm6 = vcmp.lt.s32.totalorder %v4453_v21, 16  ;;  %v4631_v4 = vadd.f32 %v4630_v10, %v4595_v48  ;;  %v4675_v37 = vmul.f32 %v4594_v8, %v4594_v8  ;;  %v4708_v58 = vadd.f32 %v4707_v12, %v4673_v59  ;;  %vm7925_vm9 = vmand %vm4349_vm12, %vm4313_vm13  ;;  %v3197_v59 = vld [vmem:[%s5477_s8 + $0xf0] sm:$0xff]  ;;  %v3198_v10 = vld [vmem:[%s5477_s8 + $0xf8] sm:$0xff] }
 0x493   : > { %vm4318_vm15 = vcmp.ne.s32.totalorder %v7433_v5, 0  ;;  %vm4350_vm0 = vcmp.lt.s32.totalorder %v7347_v7, 0  ;;  %v4421_v30 = vadd.s32 18, %v7338_v2  ;;  %v4455_v15 = vsel %vm7883_vm14, %v4419_v53, %v7321_v44 }
 0x494   : > { %v4596_v45 = vsel %vm7887_vm2, %v3191_v32, 0.0  ;;  %vm7929_vm11 = vcmp.lt.s32.totalorder %v4454_v39, 16  ;;  %v4676_v20 = vmul.f32 %v4595_v48, %v4595_v48  ;;  %v4709_v28 = vadd.f32 %v4708_v58, %v4674_v22  ;;  %vm7946_vm13 = vmand %vm4350_vm0, %vm4314_vm3 }
 0x495   : > { %v4632_v31 = vadd.f32 %v4631_v4, %v4596_v45  ;;  %vm4319_vm1 = vcmp.ne.s32.totalorder %v7478_v52, 0  ;;  %vm4351_vm5 = vcmp.lt.s32.totalorder %v7353_v29, 0  ;;  %v4422_v44 = vadd.s32 18, %v7347_v7 }
 0x496   : > { %v4456_v50 = vsel %vm7904_vm4, %v4420_v46, %v7335_v41  ;;  %v4597_v11 = vsel %vm7908_vm6, %v3192_v57, 0.0  ;;  %vm7950_vm14 = vcmp.lt.s32.totalorder %v4455_v15, 16  ;;  %v4677_v0 = vmul.f32 %v4596_v45, %v4596_v45  ;;  %vm7966_vm3 = vmand %vm4351_vm5, %vm4315_vm7  ;;  %v3200_v15 = vld [vmem:[%s5477_s8 + $0x108] sm:$0xff] }
 0x497   : > { %v4633_v3 = vadd.f32 %v4632_v31, %v4597_v11  ;;  %v4710_v41 = vadd.f32 %v4709_v28, %v4675_v37  ;;  %vm4352_vm2 = vcmp.lt.s32.totalorder %v7373_v61, 0  ;;  %v4423_v56 = vadd.s32 18, %v7353_v29 }
 0x498   : > { %v4457_v33 = vsel %vm7925_vm9, %v4421_v30, %v7338_v2  ;;  %v4598_v36 = vsel %vm7929_vm11, %v3193_v1, 0.0  ;;  %vm7970_vm12 = vcmp.lt.s32.totalorder %v4456_v50, 16  ;;  %v4678_v54 = vmul.f32 %v4597_v11, %v4597_v11  ;;  %vm7986_vm7 = vmand %vm4352_vm2, %vm4316_vm8 }
 0x499   : > { %v4634_v63 = vadd.f32 %v4633_v3, %v4598_v36  ;;  %v4711_v2 = vadd.f32 %v4710_v41, %v4676_v20  ;;  %vm4353_vm4 = vcmp.lt.s32.totalorder %v7376_v49, 0  ;;  %v4424_v62 = vadd.s32 18, %v7373_v61  ;;  %v3201_v20 = vld [vmem:[%s5477_s8 + $0x110] sm:$0xff] }
 0x49a   : > { %v4458_v17 = vsel %vm7946_vm13, %v4422_v44, %v7347_v7  ;;  %v4599_v27 = vsel %vm7950_vm14, %v3194_v16, 0.0  ;;  %vm7990_vm6 = vcmp.lt.s32.totalorder %v4457_v33, 16  ;;  %v4679_v14 = vmul.f32 %v4598_v36, %v4598_v36  ;;  %vm8006_vm8 = vmand %vm4353_vm4, %vm4317_vm10  ;;  %v3202_v16 = vld [vmem:[%s5477_s8 + $0x118] sm:$0xff] }
 0x49b   : > { %v4635_v38 = vadd.f32 %v4634_v63, %v4599_v27  ;;  %v4712_v7 = vadd.f32 %v4711_v2, %v4677_v0  ;;  %vm4354_vm0 = vcmp.lt.s32.totalorder %v7433_v5, 0  ;;  %v4425_v47 = vadd.s32 18, %v7376_v49 }
 0x49c   : > { %v4459_v24 = vsel %vm7966_vm3, %v4423_v56, %v7353_v29  ;;  %v4600_v35 = vsel %vm7970_vm12, %v3195_v9, 0.0  ;;  %vm8010_vm9 = vcmp.lt.s32.totalorder %v4458_v17, 16  ;;  %v4680_v8 = vmul.f32 %v4599_v27, %v4599_v27  ;;  %vm8026_vm10 = vmand %vm4354_vm0, %vm4318_vm15 }
 0x49d   : > { %v4636_v21 = vadd.f32 %v4635_v38, %v4600_v35  ;;  %v4713_v29 = vadd.f32 %v4712_v7, %v4678_v54  ;;  %vm4355_vm11 = vcmp.lt.s32.totalorder %v7478_v52, 0  ;;  %v4426_v32 = vadd.s32 18, %v7433_v5  ;;  %v4608_v38 = vld [vmem:[%s5451_s30] sm:$0x1] }
 0x49e   : > { %v4460_v34 = vsel %vm7986_vm7, %v4424_v62, %v7373_v61  ;;  %v4601_v13 = vsel %vm7990_vm6, %v3196_v18, 0.0  ;;  %vm4495_vm5 = vcmp.lt.s32.totalorder %v4459_v24, 16  ;;  %v4681_v46 = vmul.f32 %v4600_v35, %v4600_v35  ;;  %vm8039_vm15 = vmand %vm4355_vm11, %vm4319_vm1 }
 0x49f   : > { %v4637_v12 = vadd.f32 %v4636_v21, %v4601_v13  ;;  %v4714_v39 = vadd.f32 %v4713_v29, %v4679_v14  ;;  %v4427_v48 = vadd.s32 18, %v7478_v52  ;;  %v4461_v61 = vsel %vm8006_vm8, %v4425_v47, %v7376_v49 }
 0x4a0   : > { %v4602_v57 = vsel %vm8010_vm9, %v3197_v59, 0.0  ;;  %vm4496_vm13 = vcmp.lt.s32.totalorder %v4460_v34, 16  ;;  %v4682_v37 = vmul.f32 %v4601_v13, %v4601_v13  ;;  %v4462_v49 = vsel %vm8026_vm10, %v4426_v32, %v7433_v5  ;;  %v4652_v59 = vld [vmem:[%s5462_s24] sm:$0x1] }
 0x4a1   : > { %v4638_v4 = vadd.f32 %v4637_v12, %v4602_v57  ;;  %v4715_v58 = vadd.f32 %v4714_v39, %v4680_v8  ;;  %v4603_v30 = vsel %vm4495_vm5, %v3198_v10, 0.0  ;;  %vm4497_vm14 = vcmp.lt.s32.totalorder %v4461_v61, 16 }
 0x4a2   : > { %v4683_v1 = vmul.f32 %v4602_v57, %v4602_v57  ;;  %v4463_v26 = vsel %vm8039_vm15, %v4427_v48, %v7478_v52  ;;  %v4604_v31 = vsel %vm4496_vm13, %v3199_v6, 0.0  ;;  %vm4498_vm1 = vcmp.lt.s32.totalorder %v4462_v49, 16 }
 0x4a3   : > { %v4639_v45 = vadd.f32 %v4638_v4, %v4603_v30  ;;  %v4716_v55 = vadd.f32 %v4715_v58, %v4681_v46  ;;  %v4684_v44 = vmul.f32 %v4603_v30, %v4603_v30  ;;  %v4605_v11 = vsel %vm4497_vm14, %v3200_v15, 0.0 }
 0x4a4   : > { %vm4499_vm2 = vcmp.lt.s32.totalorder %v4463_v26, 16  ;;  %v4685_v25 = vmul.f32 %v4604_v31, %v4604_v31  ;;  %v4606_v3 = vsel %vm4498_vm1, %v3201_v20, 0.0  ;;  %v4686_v41 = vmul.f32 %v4605_v11, %v4605_v11 }
 0x4a5   : > { %v4640_v28 = vadd.f32 %v4639_v45, %v4604_v31  ;;  %v4717_v50 = vadd.f32 %v4716_v55, %v4682_v37  ;;  %v4607_v33 = vsel %vm4499_vm2, %v3202_v16, 0.0  ;;  %v4687_v52 = vmul.f32 %v4606_v3, %v4606_v3 }
 0x4a6   : > { %v4688_v40 = vmul.f32 %v4607_v33, %v4607_v33 }
 0x4a7   : > { %v4641_v5 = vadd.f32 %v4640_v28, %v4605_v11  ;;  %v4718_v23 = vadd.f32 %v4717_v50, %v4683_v1 }
 0x4a9   : > { %v4642_v0 = vadd.f32 %v4641_v5, %v4606_v3  ;;  %v4719_v56 = vadd.f32 %v4718_v23, %v4684_v44 }
 0x4ab   : > { %v4643_v36 = vadd.f32 %v4642_v0, %v4607_v33  ;;  %v4720_v9 = vadd.f32 %v4719_v56, %v4685_v25 }
 0x4ad   : > { %v4644_v42 = vrot.slane %v4643_v36, 4  ;;  %v4721_v63 = vadd.f32 %v4720_v9, %v4686_v41 }
 0x4af   : > { %v4645_v54 = vadd.f32 %v4644_v42, %v4643_v36  ;;  %v4722_v2 = vadd.f32 %v4721_v63, %v4687_v52 }
 0x4b1   : > { %v4646_v62 = vrot.slane %v4645_v54, 2  ;;  %v4723_v17 = vadd.f32 %v4722_v2, %v4688_v40 }
 0x4b3   : > { %v4647_v27 = vadd.f32 %v4646_v62, %v4645_v54  ;;  %v4724_v18 = vrot.slane %v4723_v17, 4 }
 0x4b5   : > { %v4648_v51 = vrot.slane %v4647_v27, 1  ;;  %v4725_v43 = vadd.f32 %v4724_v18, %v4723_v17 }
 0x4b7   : > { %v4649_v14 = vadd.f32 %v4648_v51, %v4647_v27  ;;  %v4726_v7 = vrot.slane %v4725_v43, 2 }
 0x4b9   : > { %v4650_v47 = vadd.f32 %v4649_v14, %v4608_v38  ;;  %v4727_v24 = vadd.f32 %v4726_v7, %v4725_v43 }
 0x4bb   : > { %4651 = vst [vmem:[%s5451_s30] sm:$0x1] %v4650_v47  ;;  %v4728_v35 = vrot.slane %v4727_v24, 1 }
 0x4bd   : > { %v4729_v60 = vadd.f32 %v4728_v35, %v4727_v24 }
 0x4bf   : > { %v4730_v53 = vadd.f32 %v4729_v60, %v4652_v59 }
 0x4c1   : > { %4731 = vst [vmem:[%s5462_s24] sm:$0x1] %v4730_v53 }
 0x4c2 PF: > { %s15_s21 = sadd.s32 1, %s5369_s21   ;;  %s8365_s23 = sld [smem:[#allocation2_spill]] }
 0x4c3   : > { %p12_p1 = scmp.ge.s32.totalorder %s15_s21, 50   ;;  %s8366_s7 = sld [smem:[#allocation3_spill]] }
 0x4c4   : > { %s8367_s15 = smov %s5357_s18  ;;  %s8368_s16 = smov %s5361_s19 }
 0x4c5   : > { %s8369_s17 = smov %s5365_s20  ;;  %s8370_s18 = smov %s8374_s22 }
 0x4c6   :  { %14 = sbr.rel (!%p12_p1) target bundleno = 4 (0x4), region = 109 }
 0x4c8   : > { %s8371_s19 = smov %s8365_s23 }
 0x4c9   : > { %s8372_s20 = smov %s8366_s7 }

</bundles_post_ra>
